<compile_context>
chip_gen: v7x
topology: tpu7x:2x2x1
jax: 0.10.0
libtpu: 0.0.40
codegen_flags: <defaults>
</compile_context>

<pallas_src>
import functools

import jax
import jax.numpy as jnp
from jax.experimental import pallas as pl
from jax.experimental.pallas import tpu as pltpu

NEG_SLOPE = 0.2          # GATv2Conv default negative_slope
LANE = 128               # TPU lane width; every feature axis is padded to this
MASK_FILL = -1e30        # finite additive fill for masked attention logits

# packed-parameter slab layout (per layer, rows; all offsets multiples of 8)
ROWS_PER_LAYER = 400
ROW_W = 0        # [128,128]  shared lin_l/lin_r weight, [Fin, H*C] zero-padded
ROW_ATT = 128    # [128,128]  block-diagonal att matrix: A[h*C+c, h] = att_h[c]
ROW_EXP = 256    # [128,128]  expand matrix: E[h, h*C+c] = 1
ROW_BL = 384     # [1,128]    lin_l bias (H*C, zero-padded)
ROW_BIAS = 392   # [1,128]    output bias (H*C, zero-padded)


# ----------------------------------------------------------------------------
# Fused kernel: all GNN layers in one pallas_call
# ----------------------------------------------------------------------------
def fused_gatv2_kernel(x_ref, adj_ref, e_ref, we_ref, p_ref, out_ref,
                       e_all_ref):
    n = x_ref.shape[0]
    num_layers = p_ref.shape[0] // ROWS_PER_LAYER

    # hoisted: adjacency as 0/1 [N, N, 1] and its additive logit bias
    adj = adj_ref[...].reshape(n, n, 1)                    # 0/1 f32
    mask_add = (1.0 - adj) * MASK_FILL                     # 0 on edges, -1e30 off

    # hoisted: edge-feature projection for ALL layers in ONE wide MXU matmul,
    # parked in VMEM scratch; per-layer slices are 128-lane aligned (free).
    e_all_ref[...] = jnp.dot(e_ref[...], we_ref[...],
                             preferred_element_type=jnp.float32)

    x = x_ref[...]                                         # [N, 128] (padded)
    for l in range(num_layers):
        base = l * ROWS_PER_LAYER
        w      = p_ref[base + ROW_W:   base + ROW_W + LANE, :]    # [128,128]
        att_bd = p_ref[base + ROW_ATT: base + ROW_ATT + LANE, :]  # [128,128]
        expand = p_ref[base + ROW_EXP: base + ROW_EXP + LANE, :]  # [128,128]
        bl     = p_ref[base + ROW_BL:   base + ROW_BL + 1, :]     # [1,128]
        bias   = p_ref[base + ROW_BIAS: base + ROW_BIAS + 1, :]   # [1,128]

        # shared node projection, all heads at once (lanes h*C+c)
        xh = jnp.dot(x, w, preferred_element_type=jnp.float32) + bl  # [N,128]

        # edge projection slice for this layer (head-batched)
        eh = e_all_ref[:, l * LANE:(l + 1) * LANE].reshape(n, n, LANE)

        # m[i, j, :] = x_i + x_j + lin_edge(e_ij);  LeakyReLU(0.2)
        m = xh[:, None, :] + xh[None, :, :] + eh            # [N, N, 128]
        m = jnp.where(m > 0, m, NEG_SLOPE * m)

        # attention logits on the MXU: block-diag att -> lane h = head h score
        s = jnp.dot(m.reshape(n * n, LANE), att_bd,
                    preferred_element_type=jnp.float32)     # [N*N, 128]
        s = s.reshape(n, n, LANE) + mask_add                # masked logits

        # masked softmax over source nodes j (axis 1), per target i, per head
        smax = jnp.max(s, axis=1, keepdims=True)            # [N, 1, 128]
        p = jnp.exp(s - smax) * adj                         # zero off-edges
        denom = jnp.sum(p, axis=1, keepdims=True)           # [N, 1, 128]
        inv = jnp.where(denom > 0, pl.reciprocal(denom, approx=True), 0.0)
        alpha = (p * inv).reshape(n * n, LANE)              # [N*N, 128]

        # head-expand alpha back to H*C lanes (MXU) and aggregate neighbours
        a_exp = jnp.dot(alpha, expand,
                        preferred_element_type=jnp.float32).reshape(n, n, LANE)
        x = jnp.sum(a_exp * xh[None, :, :], axis=1) + bias  # [N, 128]

    # lane-dense [N, 128] output slab: unmasked full-width store
    out_ref[...] = x


# ----------------------------------------------------------------------------
# Wrapper-side parameter packing (done ONCE, outside the jitted forward)
# ----------------------------------------------------------------------------
def pack_gatv2_params(layer_params, edge_dim):
    """Pack per-layer head-major params into 2 kernel operands.

    Returns (we_all [Fe, L*128], params [L*400, 128], hc_out).
    """
    num_layers = len(layer_params)
    we_all = jnp.zeros((edge_dim, num_layers * LANE), jnp.float32)
    pages = []
    hc_out = 0
    for l, prm in enumerate(layer_params):
        heads, in_dim, c = prm["w"].shape
        hc = heads * c
        assert in_dim <= LANE and hc <= LANE, "packing assumes dims <= 128"
        hc_out = hc

        # head-major [H, *, C] -> interleaved concat layout, column q = h*C + c
        w_full = jnp.transpose(prm["w"], (1, 0, 2)).reshape(in_dim, hc)
        we_full = jnp.transpose(prm["we"], (1, 0, 2)).reshape(edge_dim, hc)
        bl_row = jnp.transpose(prm["bl"], (1, 0, 2)).reshape(hc)
        bias_row = jnp.transpose(prm["bias"], (1, 0, 2)).reshape(hc)

        we_all = we_all.at[:, l * LANE: l * LANE + hc].set(we_full)

        att_bd = jnp.zeros((LANE, LANE), jnp.float32)
        expand = jnp.zeros((LANE, LANE), jnp.float32)
        for h in range(heads):
            att_bd = att_bd.at[h * c:(h + 1) * c, h].set(prm["att"][h, 0, :])
            expand = expand.at[h, h * c:(h + 1) * c].set(1.0)

        page = jnp.zeros((ROWS_PER_LAYER, LANE), jnp.float32)
        page = page.at[ROW_W:ROW_W + in_dim, :hc].set(w_full)
        page = page.at[ROW_ATT:ROW_ATT + LANE, :].set(att_bd)
        page = page.at[ROW_EXP:ROW_EXP + LANE, :].set(expand)
        page = page.at[ROW_BL, :hc].set(bl_row)
        page = page.at[ROW_BIAS, :hc].set(bias_row)
        pages.append(page)

    params = jnp.concatenate(pages, axis=0)                 # [L*400, 128]
    return we_all, params, hc_out


# ----------------------------------------------------------------------------
# JAX wrapper: densify the sparse graph, run the single fused Pallas call
# ----------------------------------------------------------------------------
@functools.partial(jax.jit, static_argnames=("hc_out",))
def naive_graph_conv_forward(x, edge_index, edge_attr, we_all, params, *,
                             hc_out):
    n = x.shape[0]
    fe = edge_attr.shape[1]
    src, tgt = edge_index[0], edge_index[1]

    # dense adjacency + dense edge features (target-major):
    # adj[i, j] = 1 and e_dense[i, j] = edge_attr iff there is an edge j -> i
    adj = jnp.zeros((n, n), jnp.float32).at[tgt, src].set(1.0)
    e_dense = jnp.zeros((n, n, fe), jnp.float32).at[tgt, src].set(edge_attr)
    e_flat = e_dense.reshape(n * n, fe)
    adj_flat = adj.reshape(n * n, 1)                        # sublane-major mask

    # pad node features to the lane-dense 128 width (zeros beyond Fin)
    x_pad = jnp.zeros((n, LANE), jnp.float32).at[:, :x.shape[1]].set(x)

    num_layers = params.shape[0] // ROWS_PER_LAYER
    vmem = pl.BlockSpec(memory_space=pltpu.MemorySpace.VMEM)
    out_padded = pl.pallas_call(
        fused_gatv2_kernel,
        out_shape=jax.ShapeDtypeStruct((n, LANE), jnp.float32),
        in_specs=[vmem] * 5,
        out_specs=vmem,
        scratch_shapes=[pltpu.VMEM((n * n, num_layers * LANE), jnp.float32)],
    )(x_pad, adj_flat, e_flat, we_all, params)
    return out_padded[:, :hc_out]


# ----------------------------------------------------------------------------
# Parameter construction (deterministic, glorot-style, head-major layout)
# ----------------------------------------------------------------------------
def make_layer_params(key, in_dim, out_dim, edge_dim, heads):
    hc = heads * out_dim
    k = jax.random.split(key, 5)

    def glorot(k_, shape, fan_in, fan_out):
        lim = (6.0 / (fan_in + fan_out)) ** 0.5
        return jax.random.uniform(k_, shape, jnp.float32, -lim, lim)

    return {
        "w":    glorot(k[0], (heads, in_dim, out_dim), in_dim, hc),  # lin_l==lin_r
        "bl":   0.05 * jax.random.normal(k[1], (heads, 1, out_dim), jnp.float32),
        "we":   glorot(k[2], (heads, edge_dim, out_dim), edge_dim, hc),  # lin_edge
        "att":  glorot(k[3], (heads, 1, out_dim), 2 * out_dim, 1),   # attention vec
        "bias": 0.05 * jax.random.normal(k[4], (heads, 1, out_dim), jnp.float32),
    }


# ----------------------------------------------------------------------------
if __name__ == "__main__":
    NODE_FEAT_DIM = 32
    EDGE_FEAT_DIM = 8
    NUM_HEADS = 3
    NUM_LAYERS = 3
    N_NODES = 16

    key = jax.random.PRNGKey(0)
    k_x, k_e, k_p = jax.random.split(key, 3)

    # node features
    x = jax.random.normal(k_x, (N_NODES, NODE_FEAT_DIM), jnp.float32)

    # deterministic graph: node i receives edges from (i+1), (i+3), (i+7) mod N
    tgts, srcs = [], []
    for i in range(N_NODES):
        for d in (1, 3, 7):
            tgts.append(i)
            srcs.append((i + d) % N_NODES)
    edge_index = jnp.array([srcs, tgts], dtype=jnp.int32)            # [2, E]
    edge_attr = jax.random.normal(k_e, (edge_index.shape[1], EDGE_FEAT_DIM),
                                  jnp.float32)

    # per-layer parameters (channel_halving=True, heads concat)
    layer_params = []
    in_dim = NODE_FEAT_DIM
    pkeys = jax.random.split(k_p, NUM_LAYERS)
    for li in range(NUM_LAYERS):
        out_dim = max(in_dim // 2, 1)
        layer_params.append(
            make_layer_params(pkeys[li], in_dim, out_dim, EDGE_FEAT_DIM,
                              NUM_HEADS))
        in_dim = out_dim * NUM_HEADS

    we_all, params, hc_out = pack_gatv2_params(layer_params, EDGE_FEAT_DIM)

    out = jax.block_until_ready(
        naive_graph_conv_forward(x, edge_index, edge_attr, we_all, params,
                                 hc_out=hc_out))

    assert out.shape == (N_NODES, in_dim), out.shape                 # (16, 108)
    assert bool(jnp.all(jnp.isfinite(out)))
    print("KERNEL_OK")
</pallas_src>

<mosaic_0001>
module attributes {stable_mosaic.version = 11 : i64} {
  func.func @fused_gatv2_kernel(%arg0: memref<16x128xf32, #tpu.memory_space<vmem>>, %arg1: memref<256x1xf32, #tpu.memory_space<vmem>>, %arg2: memref<256x8xf32, #tpu.memory_space<vmem>>, %arg3: memref<8x384xf32, #tpu.memory_space<vmem>>, %arg4: memref<1200x128xf32, #tpu.memory_space<vmem>>, %arg5: memref<16x128xf32, #tpu.memory_space<vmem>>, %arg6: memref<256x384xf32, #tpu.memory_space<vmem>>) attributes {dimension_semantics = [], scalar_prefetch = 0 : i64, scratch_operands = 1 : i64, tpu.core_type = #tpu.core_type<tc>} {
    %c0 = arith.constant 0 : index
    %c0_0 = arith.constant 0 : index
    %0 = vector.load %arg1[%c0, %c0_0] : memref<256x1xf32, #tpu.memory_space<vmem>>, vector<256x1xf32>
    %1 = vector.shape_cast %0 : vector<256x1xf32> to vector<16x16x1xf32>
    %cst = arith.constant 1.000000e+00 : f32
    %2 = vector.broadcast %cst : f32 to vector<16x16x1xf32>
    %3 = arith.subf %2, %1 : vector<16x16x1xf32>
    %cst_1 = arith.constant -1.000000e+30 : f32
    %4 = vector.broadcast %cst_1 : f32 to vector<16x16x1xf32>
    %5 = arith.mulf %3, %4 : vector<16x16x1xf32>
    %c0_2 = arith.constant 0 : index
    %c0_3 = arith.constant 0 : index
    %6 = vector.load %arg2[%c0_2, %c0_3] : memref<256x8xf32, #tpu.memory_space<vmem>>, vector<256x8xf32>
    %c0_4 = arith.constant 0 : index
    %c0_5 = arith.constant 0 : index
    %7 = vector.load %arg3[%c0_4, %c0_5] : memref<8x384xf32, #tpu.memory_space<vmem>>, vector<8x384xf32>
    %cst_6 = arith.constant dense<0.000000e+00> : vector<256x384xf32>
    %8 = tpu.matmul %6, %7, %cst_6 {dimension_numbers = #tpu.dot_dimension_numbers<[1], [0], [0], [1], [0, 0, 1, 1], [], []>} : vector<256x8xf32>, vector<8x384xf32>, vector<256x384xf32> -> vector<256x384xf32>
    %c0_7 = arith.constant 0 : index
    %c0_8 = arith.constant 0 : index
    %9 = vector.load %arg6[%c0_7, %c0_8] : memref<256x384xf32, #tpu.memory_space<vmem>>, vector<256x384xf32>
    tpu.vector_store %arg6[%c0_7, %c0_8], %8 {strides = array<i32>} : memref<256x384xf32, #tpu.memory_space<vmem>>, vector<256x384xf32>,
    %c0_9 = arith.constant 0 : index
    %c0_10 = arith.constant 0 : index
    %10 = vector.load %arg0[%c0_9, %c0_10] : memref<16x128xf32, #tpu.memory_space<vmem>>, vector<16x128xf32>
    %c0_11 = arith.constant 0 : index
    %c0_12 = arith.constant 0 : index
    %11 = vector.load %arg4[%c0_11, %c0_12] : memref<1200x128xf32, #tpu.memory_space<vmem>>, vector<128x128xf32>
    %c128 = arith.constant 128 : index
    %c0_13 = arith.constant 0 : index
    %12 = vector.load %arg4[%c128, %c0_13] : memref<1200x128xf32, #tpu.memory_space<vmem>>, vector<128x128xf32>
    %c256 = arith.constant 256 : index
    %c0_14 = arith.constant 0 : index
    %13 = vector.load %arg4[%c256, %c0_14] : memref<1200x128xf32, #tpu.memory_space<vmem>>, vector<128x128xf32>
    %c384 = arith.constant 384 : index
    %c0_15 = arith.constant 0 : index
    %14 = vector.load %arg4[%c384, %c0_15] : memref<1200x128xf32, #tpu.memory_space<vmem>>, vector<1x128xf32>
    %c392 = arith.constant 392 : index
    %c0_16 = arith.constant 0 : index
    %15 = vector.load %arg4[%c392, %c0_16] : memref<1200x128xf32, #tpu.memory_space<vmem>>, vector<1x128xf32>
    %cst_17 = arith.constant dense<0.000000e+00> : vector<16x128xf32>
    %16 = tpu.matmul %10, %11, %cst_17 {dimension_numbers = #tpu.dot_dimension_numbers<[1], [0], [0], [1], [0, 0, 1, 1], [], []>} : vector<16x128xf32>, vector<128x128xf32>, vector<16x128xf32> -> vector<16x128xf32>
    %17 = vector.broadcast %14 : vector<1x128xf32> to vector<16x128xf32>
    %18 = arith.addf %16, %17 : vector<16x128xf32>
    %c0_18 = arith.constant 0 : index
    %c0_19 = arith.constant 0 : index
    %19 = vector.load %arg6[%c0_18, %c0_19] : memref<256x384xf32, #tpu.memory_space<vmem>>, vector<256x128xf32>
    %20 = vector.shape_cast %19 : vector<256x128xf32> to vector<16x16x128xf32>
    %21 = vector.shape_cast %18 : vector<16x128xf32> to vector<16x1x128xf32>
    %22 = vector.shape_cast %18 : vector<16x128xf32> to vector<1x16x128xf32>
    %23 = vector.broadcast %21 : vector<16x1x128xf32> to vector<16x16x128xf32>
    %24 = vector.broadcast %22 : vector<1x16x128xf32> to vector<16x16x128xf32>
    %25 = arith.addf %23, %24 : vector<16x16x128xf32>
    %26 = arith.addf %25, %20 : vector<16x16x128xf32>
    %cst_20 = arith.constant 0.000000e+00 : f32
    %27 = vector.broadcast %cst_20 : f32 to vector<16x16x128xf32>
    %28 = arith.cmpf ogt, %26, %27 : vector<16x16x128xf32>
    %cst_21 = arith.constant 2.000000e-01 : f32
    %29 = vector.broadcast %cst_21 : f32 to vector<16x16x128xf32>
    %30 = arith.mulf %29, %26 : vector<16x16x128xf32>
    %31 = arith.select %28, %26, %30 : vector<16x16x128xi1>, vector<16x16x128xf32>
    %32 = vector.shape_cast %31 : vector<16x16x128xf32> to vector<256x128xf32>
    %cst_22 = arith.constant dense<0.000000e+00> : vector<256x128xf32>
    %33 = tpu.matmul %32, %12, %cst_22 {dimension_numbers = #tpu.dot_dimension_numbers<[1], [0], [0], [1], [0, 0, 1, 1], [], []>} : vector<256x128xf32>, vector<128x128xf32>, vector<256x128xf32> -> vector<256x128xf32>
    %34 = vector.shape_cast %33 : vector<256x128xf32> to vector<16x16x128xf32>
    %35 = vector.broadcast %5 : vector<16x16x1xf32> to vector<16x16x128xf32>
    %36 = arith.addf %34, %35 : vector<16x16x128xf32>
    %cst_23 = arith.constant dense<0xFF800000> : vector<16x128xf32>
    %37 = vector.multi_reduction <maximumf>, %36, %cst_23 [1] : vector<16x16x128xf32> to vector<16x128xf32>
    %38 = vector.shape_cast %37 : vector<16x128xf32> to vector<16x1x128xf32>
    %39 = vector.broadcast %38 : vector<16x1x128xf32> to vector<16x16x128xf32>
    %40 = arith.subf %36, %39 : vector<16x16x128xf32>
    %41 = math.exp %40 : vector<16x16x128xf32>
    %42 = vector.broadcast %1 : vector<16x16x1xf32> to vector<16x16x128xf32>
    %43 = arith.mulf %41, %42 : vector<16x16x128xf32>
    %cst_24 = arith.constant dense<0.000000e+00> : vector<16x128xf32>
    %44 = vector.multi_reduction <add>, %43, %cst_24 [1] : vector<16x16x128xf32> to vector<16x128xf32>
    %45 = vector.shape_cast %44 : vector<16x128xf32> to vector<16x1x128xf32>
    %cst_25 = arith.constant 0.000000e+00 : f32
    %46 = vector.broadcast %cst_25 : f32 to vector<16x1x128xf32>
    %47 = arith.cmpf ogt, %45, %46 : vector<16x1x128xf32>
    %48 = tpu.reciprocal %45 {approx = true} : vector<16x1x128xf32> -> vector<16x1x128xf32>
    %cst_26 = arith.constant 0.000000e+00 : f32
    %49 = vector.broadcast %cst_26 : f32 to vector<16x1x128xf32>
    %50 = arith.select %47, %48, %49 : vector<16x1x128xi1>, vector<16x1x128xf32>
    %51 = vector.broadcast %50 : vector<16x1x128xf32> to vector<16x16x128xf32>
    %52 = arith.mulf %43, %51 : vector<16x16x128xf32>
    %53 = vector.shape_cast %52 : vector<16x16x128xf32> to vector<256x128xf32>
    %cst_27 = arith.constant dense<0.000000e+00> : vector<256x128xf32>
    %54 = tpu.matmul %53, %13, %cst_27 {dimension_numbers = #tpu.dot_dimension_numbers<[1], [0], [0], [1], [0, 0, 1, 1], [], []>} : vector<256x128xf32>, vector<128x128xf32>, vector<256x128xf32> -> vector<256x128xf32>
    %55 = vector.shape_cast %54 : vector<256x128xf32> to vector<16x16x128xf32>
    %56 = vector.shape_cast %18 : vector<16x128xf32> to vector<1x16x128xf32>
    %57 = vector.broadcast %56 : vector<1x16x128xf32> to vector<16x16x128xf32>
    %58 = arith.mulf %55, %57 : vector<16x16x128xf32>
    %cst_28 = arith.constant dense<0.000000e+00> : vector<16x128xf32>
    %59 = vector.multi_reduction <add>, %58, %cst_28 [1] : vector<16x16x128xf32> to vector<16x128xf32>
    %60 = vector.broadcast %15 : vector<1x128xf32> to vector<16x128xf32>
    %61 = arith.addf %59, %60 : vector<16x128xf32>
    %c400 = arith.constant 400 : index
    %c0_29 = arith.constant 0 : index
    %62 = vector.load %arg4[%c400, %c0_29] : memref<1200x128xf32, #tpu.memory_space<vmem>>, vector<128x128xf32>
    %c528 = arith.constant 528 : index
    %c0_30 = arith.constant 0 : index
    %63 = vector.load %arg4[%c528, %c0_30] : memref<1200x128xf32, #tpu.memory_space<vmem>>, vector<128x128xf32>
    %c656 = arith.constant 656 : index
    %c0_31 = arith.constant 0 : index
    %64 = vector.load %arg4[%c656, %c0_31] : memref<1200x128xf32, #tpu.memory_space<vmem>>, vector<128x128xf32>
    %c784 = arith.constant 784 : index
    %c0_32 = arith.constant 0 : index
    %65 = vector.load %arg4[%c784, %c0_32] : memref<1200x128xf32, #tpu.memory_space<vmem>>, vector<1x128xf32>
    %c792 = arith.constant 792 : index
    %c0_33 = arith.constant 0 : index
    %66 = vector.load %arg4[%c792, %c0_33] : memref<1200x128xf32, #tpu.memory_space<vmem>>, vector<1x128xf32>
    %cst_34 = arith.constant dense<0.000000e+00> : vector<16x128xf32>
    %67 = tpu.matmul %61, %62, %cst_34 {dimension_numbers = #tpu.dot_dimension_numbers<[1], [0], [0], [1], [0, 0, 1, 1], [], []>} : vector<16x128xf32>, vector<128x128xf32>, vector<16x128xf32> -> vector<16x128xf32>
    %68 = vector.broadcast %65 : vector<1x128xf32> to vector<16x128xf32>
    %69 = arith.addf %67, %68 : vector<16x128xf32>
    %c0_35 = arith.constant 0 : index
    %c128_36 = arith.constant 128 : index
    %70 = vector.load %arg6[%c0_35, %c128_36] : memref<256x384xf32, #tpu.memory_space<vmem>>, vector<256x128xf32>
    %71 = vector.shape_cast %70 : vector<256x128xf32> to vector<16x16x128xf32>
    %72 = vector.shape_cast %69 : vector<16x128xf32> to vector<16x1x128xf32>
    %73 = vector.shape_cast %69 : vector<16x128xf32> to vector<1x16x128xf32>
    %74 = vector.broadcast %72 : vector<16x1x128xf32> to vector<16x16x128xf32>
    %75 = vector.broadcast %73 : vector<1x16x128xf32> to vector<16x16x128xf32>
    %76 = arith.addf %74, %75 : vector<16x16x128xf32>
    %77 = arith.addf %76, %71 : vector<16x16x128xf32>
    %cst_37 = arith.constant 0.000000e+00 : f32
    %78 = vector.broadcast %cst_37 : f32 to vector<16x16x128xf32>
    %79 = arith.cmpf ogt, %77, %78 : vector<16x16x128xf32>
    %cst_38 = arith.constant 2.000000e-01 : f32
    %80 = vector.broadcast %cst_38 : f32 to vector<16x16x128xf32>
    %81 = arith.mulf %80, %77 : vector<16x16x128xf32>
    %82 = arith.select %79, %77, %81 : vector<16x16x128xi1>, vector<16x16x128xf32>
    %83 = vector.shape_cast %82 : vector<16x16x128xf32> to vector<256x128xf32>
    %cst_39 = arith.constant dense<0.000000e+00> : vector<256x128xf32>
    %84 = tpu.matmul %83, %63, %cst_39 {dimension_numbers = #tpu.dot_dimension_numbers<[1], [0], [0], [1], [0, 0, 1, 1], [], []>} : vector<256x128xf32>, vector<128x128xf32>, vector<256x128xf32> -> vector<256x128xf32>
    %85 = vector.shape_cast %84 : vector<256x128xf32> to vector<16x16x128xf32>
    %86 = vector.broadcast %5 : vector<16x16x1xf32> to vector<16x16x128xf32>
    %87 = arith.addf %85, %86 : vector<16x16x128xf32>
    %cst_40 = arith.constant dense<0xFF800000> : vector<16x128xf32>
    %88 = vector.multi_reduction <maximumf>, %87, %cst_40 [1] : vector<16x16x128xf32> to vector<16x128xf32>
    %89 = vector.shape_cast %88 : vector<16x128xf32> to vector<16x1x128xf32>
    %90 = vector.broadcast %89 : vector<16x1x128xf32> to vector<16x16x128xf32>
    %91 = arith.subf %87, %90 : vector<16x16x128xf32>
    %92 = math.exp %91 : vector<16x16x128xf32>
    %93 = vector.broadcast %1 : vector<16x16x1xf32> to vector<16x16x128xf32>
    %94 = arith.mulf %92, %93 : vector<16x16x128xf32>
    %cst_41 = arith.constant dense<0.000000e+00> : vector<16x128xf32>
    %95 = vector.multi_reduction <add>, %94, %cst_41 [1] : vector<16x16x128xf32> to vector<16x128xf32>
    %96 = vector.shape_cast %95 : vector<16x128xf32> to vector<16x1x128xf32>
    %cst_42 = arith.constant 0.000000e+00 : f32
    %97 = vector.broadcast %cst_42 : f32 to vector<16x1x128xf32>
    %98 = arith.cmpf ogt, %96, %97 : vector<16x1x128xf32>
    %99 = tpu.reciprocal %96 {approx = true} : vector<16x1x128xf32> -> vector<16x1x128xf32>
    %cst_43 = arith.constant 0.000000e+00 : f32
    %100 = vector.broadcast %cst_43 : f32 to vector<16x1x128xf32>
    %101 = arith.select %98, %99, %100 : vector<16x1x128xi1>, vector<16x1x128xf32>
    %102 = vector.broadcast %101 : vector<16x1x128xf32> to vector<16x16x128xf32>
    %103 = arith.mulf %94, %102 : vector<16x16x128xf32>
    %104 = vector.shape_cast %103 : vector<16x16x128xf32> to vector<256x128xf32>
    %cst_44 = arith.constant dense<0.000000e+00> : vector<256x128xf32>
    %105 = tpu.matmul %104, %64, %cst_44 {dimension_numbers = #tpu.dot_dimension_numbers<[1], [0], [0], [1], [0, 0, 1, 1], [], []>} : vector<256x128xf32>, vector<128x128xf32>, vector<256x128xf32> -> vector<256x128xf32>
    %106 = vector.shape_cast %105 : vector<256x128xf32> to vector<16x16x128xf32>
    %107 = vector.shape_cast %69 : vector<16x128xf32> to vector<1x16x128xf32>
    %108 = vector.broadcast %107 : vector<1x16x128xf32> to vector<16x16x128xf32>
    %109 = arith.mulf %106, %108 : vector<16x16x128xf32>
    %cst_45 = arith.constant dense<0.000000e+00> : vector<16x128xf32>
    %110 = vector.multi_reduction <add>, %109, %cst_45 [1] : vector<16x16x128xf32> to vector<16x128xf32>
    %111 = vector.broadcast %66 : vector<1x128xf32> to vector<16x128xf32>
    %112 = arith.addf %110, %111 : vector<16x128xf32>
    %c800 = arith.constant 800 : index
    %c0_46 = arith.constant 0 : index
    %113 = vector.load %arg4[%c800, %c0_46] : memref<1200x128xf32, #tpu.memory_space<vmem>>, vector<128x128xf32>
    %c928 = arith.constant 928 : index
    %c0_47 = arith.constant 0 : index
    %114 = vector.load %arg4[%c928, %c0_47] : memref<1200x128xf32, #tpu.memory_space<vmem>>, vector<128x128xf32>
    %c1056 = arith.constant 1056 : index
    %c0_48 = arith.constant 0 : index
    %115 = vector.load %arg4[%c1056, %c0_48] : memref<1200x128xf32, #tpu.memory_space<vmem>>, vector<128x128xf32>
    %c1184 = arith.constant 1184 : index
    %c0_49 = arith.constant 0 : index
    %116 = vector.load %arg4[%c1184, %c0_49] : memref<1200x128xf32, #tpu.memory_space<vmem>>, vector<1x128xf32>
    %c1192 = arith.constant 1192 : index
    %c0_50 = arith.constant 0 : index
    %117 = vector.load %arg4[%c1192, %c0_50] : memref<1200x128xf32, #tpu.memory_space<vmem>>, vector<1x128xf32>
    %cst_51 = arith.constant dense<0.000000e+00> : vector<16x128xf32>
    %118 = tpu.matmul %112, %113, %cst_51 {dimension_numbers = #tpu.dot_dimension_numbers<[1], [0], [0], [1], [0, 0, 1, 1], [], []>} : vector<16x128xf32>, vector<128x128xf32>, vector<16x128xf32> -> vector<16x128xf32>
    %119 = vector.broadcast %116 : vector<1x128xf32> to vector<16x128xf32>
    %120 = arith.addf %118, %119 : vector<16x128xf32>
    %c0_52 = arith.constant 0 : index
    %c256_53 = arith.constant 256 : index
    %121 = vector.load %arg6[%c0_52, %c256_53] : memref<256x384xf32, #tpu.memory_space<vmem>>, vector<256x128xf32>
    %122 = vector.shape_cast %121 : vector<256x128xf32> to vector<16x16x128xf32>
    %123 = vector.shape_cast %120 : vector<16x128xf32> to vector<16x1x128xf32>
    %124 = vector.shape_cast %120 : vector<16x128xf32> to vector<1x16x128xf32>
    %125 = vector.broadcast %123 : vector<16x1x128xf32> to vector<16x16x128xf32>
    %126 = vector.broadcast %124 : vector<1x16x128xf32> to vector<16x16x128xf32>
    %127 = arith.addf %125, %126 : vector<16x16x128xf32>
    %128 = arith.addf %127, %122 : vector<16x16x128xf32>
    %cst_54 = arith.constant 0.000000e+00 : f32
    %129 = vector.broadcast %cst_54 : f32 to vector<16x16x128xf32>
    %130 = arith.cmpf ogt, %128, %129 : vector<16x16x128xf32>
    %cst_55 = arith.constant 2.000000e-01 : f32
    %131 = vector.broadcast %cst_55 : f32 to vector<16x16x128xf32>
    %132 = arith.mulf %131, %128 : vector<16x16x128xf32>
    %133 = arith.select %130, %128, %132 : vector<16x16x128xi1>, vector<16x16x128xf32>
    %134 = vector.shape_cast %133 : vector<16x16x128xf32> to vector<256x128xf32>
    %cst_56 = arith.constant dense<0.000000e+00> : vector<256x128xf32>
    %135 = tpu.matmul %134, %114, %cst_56 {dimension_numbers = #tpu.dot_dimension_numbers<[1], [0], [0], [1], [0, 0, 1, 1], [], []>} : vector<256x128xf32>, vector<128x128xf32>, vector<256x128xf32> -> vector<256x128xf32>
    %136 = vector.shape_cast %135 : vector<256x128xf32> to vector<16x16x128xf32>
    %137 = vector.broadcast %5 : vector<16x16x1xf32> to vector<16x16x128xf32>
    %138 = arith.addf %136, %137 : vector<16x16x128xf32>
    %cst_57 = arith.constant dense<0xFF800000> : vector<16x128xf32>
    %139 = vector.multi_reduction <maximumf>, %138, %cst_57 [1] : vector<16x16x128xf32> to vector<16x128xf32>
    %140 = vector.shape_cast %139 : vector<16x128xf32> to vector<16x1x128xf32>
    %141 = vector.broadcast %140 : vector<16x1x128xf32> to vector<16x16x128xf32>
    %142 = arith.subf %138, %141 : vector<16x16x128xf32>
    %143 = math.exp %142 : vector<16x16x128xf32>
    %144 = vector.broadcast %1 : vector<16x16x1xf32> to vector<16x16x128xf32>
    %145 = arith.mulf %143, %144 : vector<16x16x128xf32>
    %cst_58 = arith.constant dense<0.000000e+00> : vector<16x128xf32>
    %146 = vector.multi_reduction <add>, %145, %cst_58 [1] : vector<16x16x128xf32> to vector<16x128xf32>
    %147 = vector.shape_cast %146 : vector<16x128xf32> to vector<16x1x128xf32>
    %cst_59 = arith.constant 0.000000e+00 : f32
    %148 = vector.broadcast %cst_59 : f32 to vector<16x1x128xf32>
    %149 = arith.cmpf ogt, %147, %148 : vector<16x1x128xf32>
    %150 = tpu.reciprocal %147 {approx = true} : vector<16x1x128xf32> -> vector<16x1x128xf32>
    %cst_60 = arith.constant 0.000000e+00 : f32
    %151 = vector.broadcast %cst_60 : f32 to vector<16x1x128xf32>
    %152 = arith.select %149, %150, %151 : vector<16x1x128xi1>, vector<16x1x128xf32>
    %153 = vector.broadcast %152 : vector<16x1x128xf32> to vector<16x16x128xf32>
    %154 = arith.mulf %145, %153 : vector<16x16x128xf32>
    %155 = vector.shape_cast %154 : vector<16x16x128xf32> to vector<256x128xf32>
    %cst_61 = arith.constant dense<0.000000e+00> : vector<256x128xf32>
    %156 = tpu.matmul %155, %115, %cst_61 {dimension_numbers = #tpu.dot_dimension_numbers<[1], [0], [0], [1], [0, 0, 1, 1], [], []>} : vector<256x128xf32>, vector<128x128xf32>, vector<256x128xf32> -> vector<256x128xf32>
    %157 = vector.shape_cast %156 : vector<256x128xf32> to vector<16x16x128xf32>
    %158 = vector.shape_cast %120 : vector<16x128xf32> to vector<1x16x128xf32>
    %159 = vector.broadcast %158 : vector<1x16x128xf32> to vector<16x16x128xf32>
    %160 = arith.mulf %157, %159 : vector<16x16x128xf32>
    %cst_62 = arith.constant dense<0.000000e+00> : vector<16x128xf32>
    %161 = vector.multi_reduction <add>, %160, %cst_62 [1] : vector<16x16x128xf32> to vector<16x128xf32>
    %162 = vector.broadcast %117 : vector<1x128xf32> to vector<16x128xf32>
    %163 = arith.addf %161, %162 : vector<16x128xf32>
    %c0_63 = arith.constant 0 : index
    %c0_64 = arith.constant 0 : index
    %164 = vector.load %arg5[%c0_63, %c0_64] : memref<16x128xf32, #tpu.memory_space<vmem>>, vector<16x128xf32>
    tpu.vector_store %arg5[%c0_63, %c0_64], %163 {strides = array<i32>} : memref<16x128xf32, #tpu.memory_space<vmem>>, vector<16x128xf32>,
    return
  }
}

</mosaic_0001>

<bundles_post_ra>
// kernel: naive_graph_conv_forward.1
= control target key start
LH: loop header
LB: loop body
LE: loop exit
PB: predicated region body
PF: predicated region fallthrough
CT: control target
= control target key end

     0   :  { %vm152_vm0 = vcmask 64512   ;;  %v7739_v5 = vmov 0.0   ;;  %s10786_s0 = inlined_call_operand.vmem [shape: f32[16,128], index: 0, kind: input, shape index: {}]   ;;  %s10787_s1 = inlined_call_operand.vmem [shape: f32[256,1], index: 1, kind: input, shape index: {}]   ;;  %s10788_s2 = inlined_call_operand.vmem [shape: f32[256,8], index: 2, kind: input, shape index: {}]   ;;  %s10789_s3 = inlined_call_operand.vmem [shape: f32[8,384], index: 3, kind: input, shape index: {}]   ;;  %s10790_s4 = inlined_call_operand.vmem [shape: f32[1200,128], index: 4, kind: input, shape index: {}]   ;;  %s10791_s5 = inlined_call_operand.hbm [shape: f32[16,128], index: 5, kind: output, shape index: {}]  }
   0x1   :  { %v150_v0 = vld [vmem:[%s10789_s3 + $0x8] sm:$0xff]  ;;  %v149_v1 = vld [vmem:[%s10789_s3] sm:$0xff]  ;;  %v151_v4 = vld [vmem:[%s10789_s3 + $0x10] sm:$0xff]  ;;  %313 = vmatprep.mubr.f32.mxu0 %v7739_v5  ;;  %481 = vmatprep.mubr.f32.mxu1 %v7739_v5 }
   0x2   :  { %249 = vmatprep.subr.mxu0 %v150_v0  ;;  %7417 = vmatprep.subr.mxu1 %v150_v0  ;;  %v117_v2 = vld [vmem:[%s10788_s2] sm:$0xff]  ;;  %v830_v7 = vld [vmem:[%s10790_s4 + $0x8] sm:$0xff]  ;;  %v119_v11 = vld [vmem:[%s10788_s2 + $0x10] sm:$0xff] }
   0x3   :  { %v7787_v3 = vld [vmem:[%s10788_s2 + $0xe0] sm:$0xff]  ;;  %250 = vmatpush1.msra.mxu0 %v149_v1  ;;  %7418 = vmatpush1.msra.mxu1 %v149_v1  ;;  %v118_v8 = vld [vmem:[%s10788_s2 + $0x8] sm:$0xff]  ;;  %v7824_v12 = vld [vmem:[%s10788_s2 + $0xf0] sm:$0xff] }
   0x4   :  { %6049 = vmatmul.mubr.msk.f32.vlgmr.msra.gmra.mrb[0].mxu0 %vm152_vm0, %v117_v2  ;;  %6077 = vmatmul.mubr.msk.f32.vlgmr.msra.gmra.mrb[0].mxu1 %vm152_vm0, %v7787_v3  ;;  %v829_v6 = vld [vmem:[%s10790_s4] sm:$0xff]  ;;  %v7810_v9 = vld [vmem:[%s10788_s2 + $0xe8] sm:$0xff]  ;;  %v120_v13 = vld [vmem:[%s10788_s2 + $0x18] sm:$0xff] }
   0x5   :  { %6494 = vmatprep.subr.mxu1 %v151_v4  ;;  %319 = vmatprep.mubr.f32.mxu0 %v7739_v5  ;;  %v7129_v10 = vpack.c.bf16 %v830_v7, %v829_v6  ;;  %v7837_v14 = vld [vmem:[%s10788_s2 + $0xf8] sm:$0xff]  ;;  %v831_v15 = vld [vmem:[%s10790_s4 + $0x10] sm:$0xff]  ;;  %v121_v17 = vld [vmem:[%s10788_s2 + $0x20] sm:$0xff] }
   0x6   :  { %6495 = vmatpush3.msra.mxu1 %v151_v4  ;;  %487 = vmatprep.mubr.f32.mxu1 %v7739_v5  ;;  %v832_v16 = vld [vmem:[%s10790_s4 + $0x18] sm:$0xff] }
   0x7   :  { %7130 = vmatprep.subr.bf16.mxu1 %v7129_v10 }
   0x8   :  { %6050 = vmatmul.mubr.msk.f32.gmra.mrb[2].mxu0 %vm152_vm0, %v118_v8  ;;  %6078 = vmatmul.mubr.msk.f32.gmra.mrb[2].mxu1 %vm152_vm0, %v7810_v9 }
   0x9   :  { %325 = vmatprep.mubr.f32.mxu0 %v7739_v5  ;;  %493 = vmatprep.mubr.f32.mxu1 %v7739_v5 }
   0xc   :  { %6051 = vmatmul.mubr.msk.f32.gmra.mrb[4].mxu0 %vm152_vm0, %v119_v11  ;;  %6079 = vmatmul.mubr.msk.f32.gmra.mrb[4].mxu1 %vm152_vm0, %v7824_v12 }
   0xd   :  { %331 = vmatprep.mubr.f32.mxu0 %v7739_v5  ;;  %499 = vmatprep.mubr.f32.mxu1 %v7739_v5 }
  0x10   :  { %6052 = vmatmul.mubr.msk.f32.gmra.mrb[6].mxu0 %vm152_vm0, %v120_v13  ;;  %6080 = vmatmul.mubr.msk.f32.gmra.mrb[6].mxu1 %vm152_vm0, %v7837_v14 }
  0x11   :  { %337 = vmatprep.mubr.f32.mxu0 %v7739_v5  ;;  %6496 = vmatprep.mubr.msk.f32.mxu1 %vm152_vm0, %v117_v2 }
  0x12   :  { %10 = vsyncpa [#allocation4], 0  ;;  %v7133_v18 = vpack.c.bf16 %v832_v16, %v831_v15  ;;  %v833_v19 = vld [vmem:[%s10790_s4 + $0x20] sm:$0xff]  ;;  %v834_v20 = vld [vmem:[%s10790_s4 + $0x28] sm:$0xff]  ;;  %v7740_v4 = vmov 0  }
  0x13   :  { %v122_v21 = vld [vmem:[%s10788_s2 + $0x28] sm:$0xff]  ;;  %v7137_v22 = vpack.c.bf16 %v834_v20, %v833_v19  ;;  %v835_v23 = vld [vmem:[%s10790_s4 + $0x30] sm:$0xff]  ;;  %v836_v24 = vld [vmem:[%s10790_s4 + $0x38] sm:$0xff]  ;;  %7426 = vset.pattern.permute.xlu1 %v7740_v4  ;;  %7425 = vset.pattern.permute.xlu0 %v7740_v4 }
  0x14   :  { %6053 = vmatmul.mubr.msk.f32.gmra.mrb[8].mxu0 %vm152_vm0, %v121_v17  ;;  %6497 = vmatmul.mubr.msk.f32.vlgmr.msra.gmra.mrb[8].mxu1 %vm152_vm0, %v118_v8  ;;  %v123_v25 = vld [vmem:[%s10788_s2 + $0x30] sm:$0xff]  ;;  %v7141_v26 = vpack.c.bf16 %v836_v24, %v835_v23  ;;  %v837_v27 = vld [vmem:[%s10790_s4 + $0x40] sm:$0xff]  ;;  %v838_v28 = vld [vmem:[%s10790_s4 + $0x48] sm:$0xff] }
  0x15   :  { %7132 = vmatpush3.bf16.msra.mxu1 %v7129_v10  ;;  %343 = vmatprep.mubr.f32.mxu0 %v7739_v5  ;;  %v124_v29 = vld [vmem:[%s10788_s2 + $0x38] sm:$0xff]  ;;  %v125_v30 = vld [vmem:[%s10788_s2 + $0x40] sm:$0xff]  ;;  %v7145_v31 = vpack.c.bf16 %v838_v28, %v837_v27  ;;  %v839_v32 = vld [vmem:[%s10790_s4 + $0x50] sm:$0xff] }
  0x16   :  { %6499 = vmatprep.mubr.msk.f32.mxu1 %vm152_vm0, %v119_v11  ;;  %7134 = vmatprep.subr.bf16.mxu1 %v7133_v18  ;;  %v840_v33 = vld [vmem:[%s10790_s4 + $0x58] sm:$0xff]  ;;  %v126_v34 = vld [vmem:[%s10788_s2 + $0x48] sm:$0xff]  ;;  %v127_v35 = vld [vmem:[%s10788_s2 + $0x50] sm:$0xff] }
  0x17   :  { %v7149_v36 = vpack.c.bf16 %v840_v33, %v839_v32  ;;  %v841_v37 = vld [vmem:[%s10790_s4 + $0x60] sm:$0xff]  ;;  %v842_v38 = vld [vmem:[%s10790_s4 + $0x68] sm:$0xff]  ;;  %v128_v39 = vld [vmem:[%s10788_s2 + $0x58] sm:$0xff] }
  0x18   :  { %6054 = vmatmul.mubr.msk.f32.gmra.mrb[10].mxu0 %vm152_vm0, %v122_v21  ;;  %6500 = vmatmul.mubr.msk.f32.gmra.mrb[10].mxu1 %vm152_vm0, %v120_v13  ;;  %v129_v40 = vld [vmem:[%s10788_s2 + $0x60] sm:$0xff]  ;;  %v7153_v41 = vpack.c.bf16 %v842_v38, %v841_v37  ;;  %v843_v42 = vld [vmem:[%s10790_s4 + $0x70] sm:$0xff]  ;;  %v844_v43 = vld [vmem:[%s10790_s4 + $0x78] sm:$0xff] }
  0x19   :  { %349 = vmatprep.mubr.f32.mxu0 %v7739_v5  ;;  %6502 = vmatprep.mubr.msk.f32.mxu1 %vm152_vm0, %v121_v17  ;;  %v130_v44 = vld [vmem:[%s10788_s2 + $0x68] sm:$0xff]  ;;  %v131_v45 = vld [vmem:[%s10788_s2 + $0x70] sm:$0xff]  ;;  %v7157_v46 = vpack.c.bf16 %v844_v43, %v843_v42  ;;  %v132_v47 = vld [vmem:[%s10788_s2 + $0x78] sm:$0xff] }
  0x1a   :  { %7136 = vmatpush3.bf16.msra.mxu1 %v7133_v18  ;;  %v133_v48 = vld [vmem:[%s10788_s2 + $0x80] sm:$0xff]  ;;  %v134_v49 = vld [vmem:[%s10788_s2 + $0x88] sm:$0xff]  ;;  %v135_v50 = vld [vmem:[%s10788_s2 + $0x90] sm:$0xff] }
  0x1b   :  { %7138 = vmatprep.subr.bf16.mxu1 %v7137_v22  ;;  %v136_v51 = vld [vmem:[%s10788_s2 + $0x98] sm:$0xff]  ;;  %v137_v52 = vld [vmem:[%s10788_s2 + $0xa0] sm:$0xff]  ;;  %v138_v53 = vld [vmem:[%s10788_s2 + $0xa8] sm:$0xff] }
  0x1c   :  { %6055 = vmatmul.mubr.msk.f32.gmra.mrb[12].mxu0 %vm152_vm0, %v123_v25  ;;  %6503 = vmatmul.mubr.msk.f32.gmra.mrb[12].mxu1 %vm152_vm0, %v122_v21  ;;  %v139_v54 = vld [vmem:[%s10788_s2 + $0xb0] sm:$0xff]  ;;  %v140_v55 = vld [vmem:[%s10788_s2 + $0xb8] sm:$0xff]  ;;  %v141_v56 = vld [vmem:[%s10788_s2 + $0xc0] sm:$0xff] }
  0x1d   :  { %355 = vmatprep.mubr.f32.mxu0 %v7739_v5  ;;  %6505 = vmatprep.mubr.msk.f32.mxu1 %vm152_vm0, %v123_v25  ;;  %v142_v57 = vld [vmem:[%s10788_s2 + $0xc8] sm:$0xff]  ;;  %v143_v58 = vld [vmem:[%s10788_s2 + $0xd0] sm:$0xff]  ;;  %v144_v59 = vld [vmem:[%s10788_s2 + $0xd8] sm:$0xff] }
  0x1e   :  { %7140 = vmatpush3.bf16.msra.mxu1 %v7137_v22  ;;  %v827_v60 = vld [vmem:[%s10786_s0] sm:$0xff]  ;;  %v828_v61 = vld [vmem:[%s10786_s0 + $0x8] sm:$0xff]  ;;  %v8047_v62 = vld [vmem:[%s10787_s1 + $0x10] sm:$0xff] }
  0x1f   :  { %7142 = vmatprep.subr.bf16.mxu1 %v7141_v26  ;;  %v8052_v63 = vld [vmem:[%s10787_s1] sm:$0xff]  ;;  %v55_v0 = vsub.f32 1.0, %v8047_v62  ;;  %v8061_v6 = vld [vmem:[%s10787_s1 + $0x18] sm:$0xff]  ;;  %v22_v7 = vld [vmem:[%s10787_s1 + $0x8] sm:$0xff] }
  0x20   :  { %6056 = vmatmul.mubr.msk.f32.gmra.mrb[14].mxu0 %vm152_vm0, %v124_v29  ;;  %6506 = vmatmul.mubr.msk.f32.gmra.mrb[14].mxu1 %vm152_vm0, %v124_v29  ;;  %v53_v1 = vsub.f32 1.0, %v8052_v63  ;;  %v54_v8 = vsub.f32 1.0, %v22_v7  ;;  %v8070_v11 = vld [vmem:[%s10787_s1 + $0x28] sm:$0xff]  ;;  %v8082_v17 = vld [vmem:[%s10787_s1 + $0x38] sm:$0xff]  ;;  %v8087_v18 = vld [vmem:[%s10787_s1 + $0x30] sm:$0xff] }
  0x21   :  { %361 = vmatprep.mubr.f32.mxu0 %v7739_v5  ;;  %6508 = vmatprep.mubr.msk.f32.mxu1 %vm152_vm0, %v125_v30  ;;  %v87_v2 = vmul.f32 -1e+30, %v55_v0  ;;  %v58_v13 = vsub.f32 1.0, %v8070_v11  ;;  %v60_v19 = vsub.f32 1.0, %v8082_v17  ;;  %v59_v20 = vsub.f32 1.0, %v8087_v18  ;;  %v8094_v23 = vld [vmem:[%s10787_s1 + $0x48] sm:$0xff] }
  0x22   :  { %7144 = vmatpush3.bf16.msra.mxu1 %v7141_v26  ;;  %v86_v10 = vmul.f32 -1e+30, %v54_v8  ;;  %v8099_v24 = vld [vmem:[%s10787_s1 + $0x40] sm:$0xff]  ;;  %v62_v25 = vsub.f32 1.0, %v8094_v23  ;;  %v8106_v29 = vld [vmem:[%s10787_s1 + $0x58] sm:$0xff]  ;;  %v8135_v42 = vld [vmem:[%s10787_s1 + $0x70] sm:$0xff] }
  0x23   :  { %7146 = vmatprep.subr.bf16.mxu1 %v7145_v31  ;;  %1567 = vperm.xlu1 %7426, %v87_v2   ;;  %v90_v15 = vmul.f32 -1e+30, %v58_v13  ;;  %v92_v21 = vmul.f32 -1e+30, %v60_v19  ;;  %v91_v22 = vmul.f32 -1e+30, %v59_v20 }
  0x24   :  { %6057 = vmatmul.mubr.msk.f32.gmra.mrb[16].mxu0 %vm152_vm0, %v125_v30  ;;  %6509 = vmatmul.mubr.msk.f32.gmra.mrb[16].mxu1 %vm152_vm0, %v126_v34  ;;  %v61_v26 = vsub.f32 1.0, %v8099_v24  ;;  %v94_v27 = vmul.f32 -1e+30, %v62_v25  ;;  %v8111_v30 = vld [vmem:[%s10787_s1 + $0x50] sm:$0xff]  ;;  %v849_v2 = vld [vmem:[%s10790_s4 + $0xa0] sm:$0xff]  ;;  %v8187_v4 = vld [vmem:[%s10787_s1 + $0xa8] sm:$0xff] }
  0x25   :  { %367 = vmatprep.mubr.f32.mxu0 %v7739_v5  ;;  %6511 = vmatprep.mubr.msk.f32.mxu1 %vm152_vm0, %v127_v35  ;;  %v63_v32 = vsub.f32 1.0, %v8111_v30  ;;  %v851_v8 = vld [vmem:[%s10790_s4 + $0xb0] sm:$0xff] }
  0x26   :  { %7148 = vmatpush3.bf16.msra.mxu1 %v7145_v31  ;;  %v93_v28 = vmul.f32 -1e+30, %v61_v26  ;;  %v64_v31 = vsub.f32 1.0, %v8106_v29  ;;  %v855_v20 = vld [vmem:[%s10790_s4 + $0xd0] sm:$0xff] }
  0x27   :  { %7150 = vmatprep.subr.bf16.mxu1 %v7149_v36 }
  0x28   :  { %6058 = vmatmul.mubr.msk.f32.gmra.mrb[18].mxu0 %vm152_vm0, %v126_v34  ;;  %6512 = vmatmul.mubr.msk.f32.gmra.mrb[18].mxu1 %vm152_vm0, %v128_v39  ;;  %v96_v33 = vmul.f32 -1e+30, %v64_v31  ;;  %v95_v34 = vmul.f32 -1e+30, %v63_v32  ;;  %v8241_v32 = vld [vmem:[%s10787_s1 + $0xc8] sm:$0xff] }
  0x29   :  { %373 = vmatprep.mubr.f32.mxu0 %v7739_v5  ;;  %6514 = vmatprep.mubr.msk.f32.mxu1 %vm152_vm0, %v129_v40 }
  0x2a   :  { %7152 = vmatpush3.bf16.msra.mxu1 %v7149_v36  ;;  %v8123_v36 = vld [vmem:[%s10787_s1 + $0x60] sm:$0xff] }
  0x2b   :  { %7154 = vmatprep.subr.bf16.mxu1 %v7153_v41  ;;  %v65_v38 = vsub.f32 1.0, %v8123_v36 }
  0x2c   :  { %6059 = vmatmul.mubr.msk.f32.gmra.mrb[20].mxu0 %vm152_vm0, %v127_v35  ;;  %6515 = vmatmul.mubr.msk.f32.gmra.mrb[20].mxu1 %vm152_vm0, %v130_v44  ;;  %v8118_v35 = vld [vmem:[%s10787_s1 + $0x68] sm:$0xff] }
  0x2d   :  { %379 = vmatprep.mubr.f32.mxu0 %v7739_v5  ;;  %6517 = vmatprep.mubr.msk.f32.mxu1 %vm152_vm0, %v131_v45  ;;  %v66_v37 = vsub.f32 1.0, %v8118_v35 }
  0x2e   :  { %7156 = vmatpush3.bf16.msra.mxu1 %v7153_v41  ;;  %v8130_v41 = vld [vmem:[%s10787_s1 + $0x78] sm:$0xff] }
  0x2f   :  { %7158 = vmatprep.subr.bf16.mxu1 %v7157_v46  ;;  %v68_v43 = vsub.f32 1.0, %v8130_v41 }
  0x30   :  { %6060 = vmatmul.mubr.msk.f32.gmra.mrb[22].mxu0 %vm152_vm0, %v128_v39  ;;  %6518 = vmatmul.mubr.msk.f32.gmra.mrb[22].mxu1 %vm152_vm0, %v132_v47  ;;  %v98_v39 = vmul.f32 -1e+30, %v66_v37  ;;  %v860_v37 = vld [vmem:[%s10790_s4 + $0xf8] sm:$0xff] }
  0x31   :  { %385 = vmatprep.mubr.f32.mxu0 %v7739_v5  ;;  %6520 = vmatprep.mubr.msk.f32.mxu1 %vm152_vm0, %v133_v48 }
  0x32   :  { %7160 = vmatpush3.bf16.msra.mxu1 %v7157_v46 }
  0x34   :  { %6061 = vmatmul.mubr.msk.f32.gmra.mrb[24].mxu0 %vm152_vm0, %v129_v40  ;;  %6521 = vmatmul.mubr.msk.f32.gmra.mrb[24].mxu1 %vm152_vm0, %v134_v49  ;;  %v97_v40 = vmul.f32 -1e+30, %v65_v38 }
  0x35   :  { %391 = vmatprep.mubr.f32.mxu0 %v7739_v5  ;;  %6523 = vmatprep.mubr.msk.f32.mxu1 %vm152_vm0, %v135_v50 }
  0x38   :  { %6062 = vmatmul.mubr.msk.f32.gmra.mrb[26].mxu0 %vm152_vm0, %v130_v44  ;;  %6524 = vmatmul.mubr.msk.f32.gmra.mrb[26].mxu1 %vm152_vm0, %v136_v51  ;;  %v67_v44 = vsub.f32 1.0, %v8135_v42 }
  0x39   :  { %397 = vmatprep.mubr.f32.mxu0 %v7739_v5  ;;  %6526 = vmatprep.mubr.msk.f32.mxu1 %vm152_vm0, %v137_v52 }
  0x3a   :  { %v99_v46 = vmul.f32 -1e+30, %v67_v44  ;;  %v8264_v44 = vld [vmem:[%s10787_s1 + $0xd0] sm:$0xff] }
  0x3c   :  { %6063 = vmatmul.mubr.msk.f32.gmra.mrb[28].mxu0 %vm152_vm0, %v131_v45  ;;  %6527 = vmatmul.mubr.msk.f32.gmra.mrb[28].mxu1 %vm152_vm0, %v138_v53  ;;  %v100_v45 = vmul.f32 -1e+30, %v68_v43  ;;  %v8259_v43 = vld [vmem:[%s10787_s1 + $0xd8] sm:$0xff] }
  0x3d   :  { %403 = vmatprep.mubr.f32.mxu0 %v7739_v5  ;;  %6529 = vmatprep.mubr.msk.f32.mxu1 %vm152_vm0, %v139_v54 }
  0x40   :  { %6064 = vmatmul.mubr.msk.f32.gmra.mrb[30].mxu0 %vm152_vm0, %v132_v47  ;;  %6530 = vmatmul.mubr.msk.f32.gmra.mrb[30].mxu1 %vm152_vm0, %v140_v55  ;;  %v8142_v47 = vld [vmem:[%s10787_s1 + $0x88] sm:$0xff] }
  0x41   :  { %409 = vmatprep.mubr.f32.mxu0 %v7739_v5  ;;  %6532 = vmatprep.mubr.msk.f32.mxu1 %vm152_vm0, %v141_v56 }
  0x44   :  { %6065 = vmatmul.mubr.msk.f32.gmra.mrb[32].mxu0 %vm152_vm0, %v133_v48  ;;  %6533 = vmatmul.mubr.msk.f32.gmra.mrb[32].mxu1 %vm152_vm0, %v142_v57  ;;  %v8147_v48 = vld [vmem:[%s10787_s1 + $0x80] sm:$0xff] }
  0x45   :  { %415 = vmatprep.mubr.f32.mxu0 %v7739_v5  ;;  %6535 = vmatprep.mubr.msk.f32.mxu1 %vm152_vm0, %v143_v58 }
  0x48   :  { %6066 = vmatmul.mubr.msk.f32.gmra.mrb[34].mxu0 %vm152_vm0, %v134_v49  ;;  %6536 = vmatmul.mubr.msk.f32.gmra.mrb[34].mxu1 %vm152_vm0, %v144_v59  ;;  %v70_v49 = vsub.f32 1.0, %v8142_v47 }
  0x49   :  { %421 = vmatprep.mubr.f32.mxu0 %v7739_v5  ;;  %6538 = vmatprep.mubr.msk.f32.mxu1 %vm152_vm0, %v7787_v3  ;;  %v85_v3 = vmul.f32 -1e+30, %v53_v1 }
  0x4b   :  { %1557 = vperm.xlu0 %7425, %v85_v3  }
  0x4c   :  { %6067 = vmatmul.mubr.msk.f32.gmra.mrb[36].mxu0 %vm152_vm0, %v135_v50  ;;  %6539 = vmatmul.mubr.msk.f32.gmra.mrb[36].mxu1 %vm152_vm0, %v7810_v9  ;;  %v69_v50 = vsub.f32 1.0, %v8147_v48 }
  0x4d   :  { %427 = vmatprep.mubr.f32.mxu0 %v7739_v5  ;;  %6541 = vmatprep.mubr.msk.f32.mxu1 %vm152_vm0, %v7824_v12  ;;  %v8075_v12 = vld [vmem:[%s10787_s1 + $0x20] sm:$0xff] }
  0x4f   :  { %1562 = vperm.xlu0 %7425, %v86_v10  }
  0x50   :  { %6068 = vmatmul.mubr.msk.f32.gmra.mrb[38].mxu0 %vm152_vm0, %v136_v51  ;;  %6542 = vmatmul.mubr.msk.f32.gmra.mrb[38].mxu1 %vm152_vm0, %v7837_v14  ;;  %v57_v14 = vsub.f32 1.0, %v8075_v12  ;;  %v102_v51 = vmul.f32 -1e+30, %v70_v49 }
  0x51   :  { %433 = vmatprep.mubr.f32.mxu0 %v7739_v5  ;;  %6576 = vmatprep.mubr.f32.mxu1 %v827_v60  ;;  %v847_v60 = vld [vmem:[%s10790_s4 + $0x90] sm:$0xff] }
  0x52   :  { %v89_v16 = vmul.f32 -1e+30, %v57_v14 }
  0x54   :  { %6069 = vmatmul.mubr.msk.f32.gmra.mrb[40].mxu0 %vm152_vm0, %v137_v52  ;;  %6577 = vmatmul.mubr.f32.vlgmr.msra.gmra.mrb[40].mxu1 %v828_v61  ;;  %v101_v52 = vmul.f32 -1e+30, %v69_v50  ;;  %v848_v61 = vld [vmem:[%s10790_s4 + $0x98] sm:$0xff] }
  0x55   :  { %439 = vmatprep.mubr.f32.mxu0 %v7739_v5  ;;  %1577 = vperm.xlu0 %7425, %v89_v16   ;;  %v8215_v16 = vld [vmem:[%s10787_s1 + $0xb8] sm:$0xff] }
  0x58   :  { %6070 = vmatmul.mubr.msk.f32.gmra.mrb[42].mxu0 %vm152_vm0, %v138_v53  ;;  %v845_v53 = vld [vmem:[%s10790_s4 + $0x80] sm:$0xff] }
  0x59   :  { %445 = vmatprep.mubr.f32.mxu0 %v7739_v5  ;;  %1587 = vperm.xlu0 %7425, %v91_v22  }
  0x5c   :  { %6071 = vmatmul.mubr.msk.f32.gmra.mrb[44].mxu0 %vm152_vm0, %v139_v54  ;;  %v846_v54 = vld [vmem:[%s10790_s4 + $0x88] sm:$0xff] }
  0x5d   :  { %451 = vmatprep.mubr.f32.mxu0 %v7739_v5  ;;  %1597 = vperm.xlu0 %7425, %v93_v28   ;;  %v858_v28 = vld [vmem:[%s10790_s4 + $0xe8] sm:$0xff] }
  0x60   :  { %6072 = vmatmul.mubr.msk.f32.gmra.mrb[46].mxu0 %vm152_vm0, %v140_v55  ;;  %v7161_v55 = vpack.c.bf16 %v846_v54, %v845_v53  ;;  %v8277_v53 = vld [vmem:[%s10787_s1 + $0xe8] sm:$0xff] }
  0x61   :  { %457 = vmatprep.mubr.f32.mxu0 %v7739_v5  ;;  %1607 = vperm.xlu0 %7425, %v95_v34   ;;  %v859_v34 = vld [vmem:[%s10790_s4 + $0xf0] sm:$0xff] }
  0x62   :  { %7162 = vmatprep.subr.bf16.mxu1 %v7161_v55  ;;  %v7189_v38 = vpack.c.bf16 %v860_v37, %v859_v34 }
  0x63   :  { %7164 = vmatpush3.bf16.msra.mxu1 %v7161_v55  ;;  %v82_v55 = vsub.f32 1.0, %v8277_v53 }
  0x64   :  { %6073 = vmatmul.mubr.msk.f32.gmra.mrb[48].mxu0 %vm152_vm0, %v141_v56  ;;  %v8161_v56 = vld [vmem:[%s10787_s1 + $0x98] sm:$0xff] }
  0x65   :  { %463 = vmatprep.mubr.f32.mxu0 %v7739_v5  ;;  %1617 = vperm.xlu0 %7425, %v97_v40  }
  0x68   :  { %6074 = vmatmul.mubr.msk.f32.gmra.mrb[50].mxu0 %vm152_vm0, %v142_v57  ;;  %v8166_v57 = vld [vmem:[%s10787_s1 + $0x90] sm:$0xff] }
  0x69   :  { %469 = vmatprep.mubr.f32.mxu0 %v7739_v5  ;;  %1627 = vperm.xlu0 %7425, %v99_v46   ;;  %v79_v46 = vsub.f32 1.0, %v8264_v44 }
  0x6b   :  { %v111_v50 = vmul.f32 -1e+30, %v79_v46  ;;  %v862_v46 = vld [vmem:[%s10790_s4 + $0x108] sm:$0xff] }
  0x6c   :  { %6075 = vmatmul.mubr.msk.f32.gmra.mrb[52].mxu0 %vm152_vm0, %v143_v58  ;;  %v72_v58 = vsub.f32 1.0, %v8161_v56 }
  0x6d   :  { %475 = vmatprep.mubr.f32.mxu0 %v7739_v5  ;;  %v56_v5 = vsub.f32 1.0, %v8061_v6  ;;  %1957 = vperm.xlu0 %7425, %v8052_v63   ;;  %v7165_v63 = vpack.c.bf16 %v848_v61, %v847_v60 }
  0x6e   :  { %v104_v0 = vmul.f32 -1e+30, %v72_v58 }
  0x6f   :  { %v88_v9 = vmul.f32 -1e+30, %v56_v5  ;;  %7166 = vmatprep.subr.bf16.mxu1 %v7165_v63 }
  0x70   :  { %6076 = vmatmul.mubr.msk.f32.gmra.mrb[54].mxu0 %vm152_vm0, %v144_v59  ;;  %v71_v59 = vsub.f32 1.0, %v8166_v57  ;;  %7168 = vmatpush3.bf16.msra.mxu1 %v7165_v63 }
  0x71   :  { %1572 = vperm.xlu1 %7426, %v88_v9   ;;  %1637 = vperm.xlu0 %7425, %v101_v52   ;;  %v852_v9 = vld [vmem:[%s10790_s4 + $0xb8] sm:$0xff] }
  0x72   :  { %v103_v1 = vmul.f32 -1e+30, %v71_v59  ;;  %v7173_v10 = vpack.c.bf16 %v852_v9, %v851_v8  ;;  %v114_v59 = vmul.f32 -1e+30, %v82_v55  ;;  %v864_v55 = vld [vmem:[%s10790_s4 + $0x118] sm:$0xff] }
  0x75   :  { %1582 = vperm.xlu1 %7426, %v90_v15   ;;  %1967 = vperm.xlu0 %7425, %v8047_v62   ;;  %v850_v62 = vld [vmem:[%s10790_s4 + $0xa8] sm:$0xff] }
  0x76   :  { %v7169_v3 = vpack.c.bf16 %v850_v62, %v849_v2  ;;  %v51_v62 = vld [vmem:[%s10787_s1 + $0xf0] sm:$0xff] }
  0x77   :  { %v83_v8 = vsub.f32 1.0, %v51_v62 }
  0x78   :  { %7170 = vmatprep.subr.bf16.mxu1 %v7169_v3 }
  0x79   :  { %1592 = vperm.xlu1 %7426, %v92_v21   ;;  %1647 = vperm.xlu0 %7425, %v103_v1   ;;  %v856_v21 = vld [vmem:[%s10790_s4 + $0xd8] sm:$0xff] }
  0x7a   :  { %7172 = vmatpush3.bf16.msra.mxu1 %v7169_v3  ;;  %v7181_v22 = vpack.c.bf16 %v856_v21, %v855_v20 }
  0x7b   :  { %7174 = vmatprep.subr.bf16.mxu1 %v7173_v10 }
  0x7d   :  { %1602 = vperm.xlu1 %7426, %v94_v27   ;;  %1977 = vperm.xlu0 %7425, %v8075_v12   ;;  %v854_v12 = vld [vmem:[%s10790_s4 + $0xc8] sm:$0xff]  ;;  %v857_v27 = vld [vmem:[%s10790_s4 + $0xe0] sm:$0xff] }
  0x7e   :  { %7176 = vmatpush3.bf16.msra.mxu1 %v7173_v10  ;;  %v7185_v31 = vpack.c.bf16 %v858_v28, %v857_v27  ;;  %v115_v10 = vmul.f32 -1e+30, %v83_v8 }
  0x81   :  { %1612 = vperm.xlu1 %7426, %v96_v33  }
  0x85   :  { %1622 = vperm.xlu1 %7426, %v98_v39  }
  0x89   :  { %1632 = vperm.xlu1 %7426, %v100_v45   ;;  %v80_v45 = vsub.f32 1.0, %v8259_v43 }
  0x8b   :  { %v112_v49 = vmul.f32 -1e+30, %v80_v45 }
  0x8d   :  { %1962 = vperm.xlu1 %7426, %v22_v7   ;;  %v74_v7 = vsub.f32 1.0, %v8187_v4 }
  0x8f   :  { %v106_v13 = vmul.f32 -1e+30, %v74_v7 }
  0x91   :  { %1642 = vperm.xlu1 %7426, %v102_v51  }
  0x95   :  { %1972 = vperm.xlu1 %7426, %v8061_v6   ;;  %v8192_v6 = vld [vmem:[%s10787_s1 + $0xa0] sm:$0xff] }
  0x96   :  { %v73_v5 = vsub.f32 1.0, %v8192_v6 }
  0x98   :  { %v105_v14 = vmul.f32 -1e+30, %v73_v5 }
  0x99   :  { %1652 = vperm.xlu1 %7426, %v104_v0  }
  0x9a   :  { %1657 = vperm.xlu0 %7425, %v105_v14  }
  0x9d   :  { %1982 = vperm.xlu1 %7426, %v8070_v11   ;;  %v853_v11 = vld [vmem:[%s10790_s4 + $0xc0] sm:$0xff] }
  0x9e   :  { %1987 = vperm.xlu0 %7425, %v8087_v18   ;;  %v7177_v15 = vpack.c.bf16 %v854_v12, %v853_v11  ;;  %v76_v18 = vsub.f32 1.0, %v8215_v16 }
  0xa0   :  { %7178 = vmatprep.subr.bf16.mxu1 %v7177_v15  ;;  %v108_v25 = vmul.f32 -1e+30, %v76_v18 }
  0xa1   :  { %1662 = vperm.xlu1 %7426, %v106_v13   ;;  %7180 = vmatpush3.bf16.msra.mxu1 %v7177_v15 }
  0xa2   :  { %7182 = vmatprep.subr.bf16.mxu1 %v7181_v22 }
  0xa5   :  { %1992 = vperm.xlu1 %7426, %v8082_v17   ;;  %v8220_v17 = vld [vmem:[%s10787_s1 + $0xb0] sm:$0xff]  ;;  %7184 = vmatpush3.bf16.msra.mxu1 %v7181_v22 }
  0xa6   :  { %v75_v19 = vsub.f32 1.0, %v8220_v17  ;;  %7186 = vmatprep.subr.bf16.mxu1 %v7185_v31 }
  0xa8   :  { %v107_v26 = vmul.f32 -1e+30, %v75_v19 }
  0xa9   :  { %1672 = vperm.xlu1 %7426, %v108_v25   ;;  %7188 = vmatpush3.bf16.msra.mxu1 %v7185_v31 }
  0xaa   :  { %1667 = vperm.xlu0 %7425, %v107_v26   ;;  %7190 = vmatprep.subr.bf16.mxu1 %v7189_v38 }
  0xad   :  { %2002 = vperm.xlu1 %7426, %v8094_v23   ;;  %v8246_v23 = vld [vmem:[%s10787_s1 + $0xc0] sm:$0xff]  ;;  %7192 = vmatpush3.bf16.msra.mxu1 %v7189_v38 }
  0xae   :  { %1997 = vperm.xlu0 %7425, %v8099_v24   ;;  %v78_v24 = vsub.f32 1.0, %v8241_v32  ;;  %v77_v33 = vsub.f32 1.0, %v8246_v23 }
  0xb0   :  { %v110_v39 = vmul.f32 -1e+30, %v78_v24  ;;  %v109_v40 = vmul.f32 -1e+30, %v77_v33 }
  0xb2   :  { %1682 = vperm.xlu1 %7426, %v110_v39   ;;  %1677 = vperm.xlu0 %7425, %v109_v40  }
  0xb6   :  { %2012 = vperm.xlu1 %7426, %v8106_v29   ;;  %2007 = vperm.xlu0 %7425, %v8111_v30   ;;  %v8282_v29 = vld [vmem:[%s10787_s1 + $0xe0] sm:$0xff] }
  0xb7   :  { %v81_v58 = vsub.f32 1.0, %v8282_v29 }
  0xb9   :  { %v113_v60 = vmul.f32 -1e+30, %v81_v58 }
  0xba   :  { %1692 = vperm.xlu1 %7426, %v112_v49   ;;  %1687 = vperm.xlu0 %7425, %v111_v50   ;;  %v863_v49 = vld [vmem:[%s10790_s4 + $0x110] sm:$0xff] }
  0xbe   :  { %2022 = vperm.xlu1 %7426, %v8118_v35   ;;  %2017 = vperm.xlu0 %7425, %v8123_v36   ;;  %v52_v36 = vld [vmem:[%s10787_s1 + $0xf8] sm:$0xff] }
  0xbf   :  { %v84_v5 = vsub.f32 1.0, %v52_v36 }
  0xc1   :  { %v116_v9 = vmul.f32 -1e+30, %v84_v5 }
  0xc2   :  { %1702 = vperm.xlu1 %7426, %v114_v59   ;;  %1697 = vperm.xlu0 %7425, %v113_v60   ;;  %v7197_v60 = vpack.c.bf16 %v864_v55, %v863_v49  ;;  %v868_v49 = vld [vmem:[%s10790_s4 + $0x138] sm:$0xff] }
  0xc6   :  { %2032 = vperm.xlu1 %7426, %v8130_v41   ;;  %2027 = vperm.xlu0 %7425, %v8135_v42  }
  0xca   :  { %1712 = vperm.xlu1 %7426, %v116_v9   ;;  %1707 = vperm.xlu0 %7425, %v115_v10  }
  0xce   :  { %2042 = vperm.xlu1 %7426, %v8142_v47   ;;  %2037 = vperm.xlu0 %7425, %v8147_v48  }
  0xd2   :  { %2052 = vperm.xlu1 %7426, %v8161_v56   ;;  %2047 = vperm.xlu0 %7425, %v8166_v57  }
  0xd6   :  { %2062 = vperm.xlu1 %7426, %v8187_v4   ;;  %2057 = vperm.xlu0 %7425, %v8192_v6  }
  0xd7   :  { %v8270_v51 = vpop.f32.mrb[0].mxu1  ;;  %v8272_v52 = vpop.f32.mrb[0].mxu0 }
  0xd8   :  { %v8284_v54 = vpop.f32.mrb[1].mxu1  ;;  %v8286_v30 = vpop.f32.mrb[1].mxu0 }
  0xd9   :  { %10916 = vst [vmem:[#allocation6_spill] sm:$0xff] %v8284_v54  ;;  %10917 = vst [vmem:[#allocation7_spill] sm:$0xff] %v8286_v30 }
  0xda   :  { %2072 = vperm.xlu1 %7426, %v8215_v16   ;;  %2067 = vperm.xlu0 %7425, %v8220_v17  }
  0xdb   :  { %v8292_v61 = vpop.f32.mrb[2].mxu1  ;;  %v8294_v63 = vpop.f32.mrb[2].mxu0 }
  0xdc   :  { %v8296_v0 = vpop.f32.mrb[3].mxu1  ;;  %v8298_v1 = vpop.f32.mrb[3].mxu0 }
  0xdd   :  { %10918 = vst [vmem:[#allocation8_spill] sm:$0xff] %v8296_v0  ;;  %10919 = vst [vmem:[#allocation9_spill] sm:$0xff] %v8298_v1 }
  0xde   :  { %2082 = vperm.xlu1 %7426, %v8241_v32   ;;  %2077 = vperm.xlu0 %7425, %v8246_v23  }
  0xdf   :  { %v8300_v2 = vpop.f32.mrb[4].mxu1  ;;  %v8302_v35 = vpop.f32.mrb[4].mxu0 }
  0xe0   :  { %v8310_v3 = vpop.f32.mrb[5].mxu1  ;;  %v8312_v7 = vpop.f32.mrb[5].mxu0 }
  0xe1   :  { %10920 = vst [vmem:[#allocation10_spill] sm:$0xff] %v8310_v3  ;;  %10921 = vst [vmem:[#allocation11_spill] sm:$0xff] %v8312_v7 }
  0xe2   :  { %2092 = vperm.xlu1 %7426, %v8259_v43   ;;  %2087 = vperm.xlu0 %7425, %v8264_v44   ;;  %v861_v44 = vld [vmem:[%s10790_s4 + $0x100] sm:$0xff] }
  0xe3   :  { %v8316_v13 = vpop.f32.mrb[6].mxu1  ;;  %v8318_v14 = vpop.f32.mrb[6].mxu0 }
  0xe4   :  { %v8320_v11 = vpop.f32.mrb[7].mxu1  ;;  %v8322_v12 = vpop.f32.mrb[7].mxu0 }
  0xe5   :  { %10922 = vst [vmem:[#allocation12_spill] sm:$0xff] %v8320_v11  ;;  %10923 = vst [vmem:[#allocation13_spill] sm:$0xff] %v8322_v12 }
  0xe6   :  { %2102 = vperm.xlu1 %7426, %v8277_v53   ;;  %2097 = vperm.xlu0 %7425, %v8282_v29   ;;  %v7193_v29 = vpack.c.bf16 %v862_v46, %v861_v44  ;;  %v867_v46 = vld [vmem:[%s10790_s4 + $0x130] sm:$0xff] }
  0xe7   :  { %v8324_v15 = vpop.f32.mrb[8].mxu1  ;;  %v8326_v18 = vpop.f32.mrb[8].mxu0 }
  0xe8   :  { %10924 = vst [vmem:[#allocation14_spill] sm:$0xff] %v8324_v15  ;;  %v8328_v41 = vpop.f32.mrb[9].mxu1  ;;  %v8330_v19 = vpop.f32.mrb[9].mxu0  ;;  %7194 = vmatprep.subr.bf16.mxu0 %v7193_v29 }
  0xe9   :  { %10925 = vst [vmem:[#allocation15_spill] sm:$0xff] %v8328_v41  ;;  %10926 = vst [vmem:[#allocation16_spill] sm:$0xff] %v8330_v19  ;;  %7196 = vmatpush3.bf16.msra.mxu0 %v7193_v29 }
  0xea   :  { %2112 = vperm.xlu1 %7426, %v52_v36   ;;  %2107 = vperm.xlu0 %7425, %v51_v62   ;;  %v865_v36 = vld [vmem:[%s10790_s4 + $0x120] sm:$0xff]  ;;  %v866_v62 = vld [vmem:[%s10790_s4 + $0x128] sm:$0xff] }
  0xeb   :  { %v8334_v42 = vpop.f32.mrb[10].mxu1  ;;  %v8336_v20 = vpop.f32.mrb[10].mxu0  ;;  %7198 = vmatprep.subr.bf16.mxu0 %v7197_v60  ;;  %v7201_v9 = vpack.c.bf16 %v866_v62, %v865_v36 }
  0xec   :  { %10927 = vst [vmem:[#allocation17_spill] sm:$0xff] %v8334_v42  ;;  %v8338_v21 = vpop.f32.mrb[11].mxu1  ;;  %v8340_v22 = vpop.f32.mrb[11].mxu0 }
  0xed   :  { %10928 = vst [vmem:[#allocation18_spill] sm:$0xff] %v8338_v21  ;;  %10929 = vst [vmem:[#allocation19_spill] sm:$0xff] %v8340_v22  ;;  %7200 = vmatpush3.bf16.msra.mxu0 %v7197_v60 }
  0xee   :  { %7202 = vmatprep.subr.bf16.mxu0 %v7201_v9 }
  0xef   :  { %v8344_v25 = vpop.f32.mrb[12].mxu1  ;;  %v8346_v26 = vpop.f32.mrb[12].mxu0 }
  0xf0   :  { %10930 = vst [vmem:[#allocation20_spill] sm:$0xff] %v8344_v25  ;;  %v8348_v27 = vpop.f32.mrb[13].mxu1  ;;  %v8350_v47 = vpop.f32.mrb[13].mxu0 }
  0xf1   :  { %10931 = vst [vmem:[#allocation21_spill] sm:$0xff] %v8348_v27  ;;  %10932 = vst [vmem:[#allocation22_spill] sm:$0xff] %v8350_v47  ;;  %7204 = vmatpush3.bf16.msra.mxu0 %v7201_v9 }
  0xf3   :  { %v8354_v48 = vpop.f32.mrb[14].mxu1  ;;  %v8356_v28 = vpop.f32.mrb[14].mxu0 }
  0xf4   :  { %10933 = vst [vmem:[#allocation23_spill] sm:$0xff] %v8354_v48  ;;  %v8358_v31 = vpop.f32.mrb[15].mxu1  ;;  %v8360_v56 = vpop.f32.mrb[15].mxu0 }
  0xf5   :  { %10934 = vst [vmem:[#allocation24_spill] sm:$0xff] %v8358_v31  ;;  %10935 = vst [vmem:[#allocation25_spill] sm:$0xff] %v8360_v56 }
  0xf7   :  { %v8364_v57 = vpop.f32.mrb[16].mxu1  ;;  %v8366_v24 = vpop.f32.mrb[16].mxu0 }
  0xf8   :  { %10936 = vst [vmem:[#allocation26_spill] sm:$0xff] %v8364_v57  ;;  %v8368_v33 = vpop.f32.mrb[17].mxu1  ;;  %v8370_v4 = vpop.f32.mrb[17].mxu0 }
  0xf9   :  { %10937 = vst [vmem:[#allocation27_spill] sm:$0xff] %v8368_v33  ;;  %10938 = vst [vmem:[#allocation28_spill] sm:$0xff] %v8370_v4 }
  0xfb   :  { %v8374_v6 = vpop.f32.mrb[18].mxu1  ;;  %v8376_v34 = vpop.f32.mrb[18].mxu0 }
  0xfc   :  { %10939 = vst [vmem:[#allocation29_spill] sm:$0xff] %v8374_v6  ;;  %v8378_v37 = vpop.f32.mrb[19].mxu1  ;;  %v8380_v16 = vpop.f32.mrb[19].mxu0  ;;  %v996_v6 = vlaneseq }
  0xfd   :  { %10940 = vst [vmem:[#allocation30_spill] sm:$0xff] %v8378_v37  ;;  %10941 = vst [vmem:[#allocation31_spill] sm:$0xff] %v8380_v16 }
  0xfe   :  { %v997_v48 = vshrl.u32 %v996_v6, 7 }
  0xff   :  { %v8384_v17 = vpop.f32.mrb[20].mxu1  ;;  %v8386_v38 = vpop.f32.mrb[20].mxu0 }
 0x100   :  { %10942 = vst [vmem:[#allocation32_spill] sm:$0xff] %v8384_v17  ;;  %v8388_v39 = vpop.f32.mrb[21].mxu1  ;;  %v8390_v32 = vpop.f32.mrb[21].mxu0  ;;  %v8513_v11 = vsub.s32 0, %v997_v48 }
 0x101   :  { %10943 = vst [vmem:[#allocation33_spill] sm:$0xff] %v8388_v39  ;;  %10944 = vst [vmem:[#allocation34_spill] sm:$0xff] %v8390_v32  ;;  %v7741_v39 = vmov 1966171168  }
 0x102   :  { %10976 = vst [vmem:[#allocation66_spill] sm:$0xff] %v8513_v11 }
 0x103   :  { %v8394_v23 = vpop.f32.mrb[22].mxu1  ;;  %v8396_v40 = vpop.f32.mrb[22].mxu0 }
 0x104   :  { %10945 = vst [vmem:[#allocation35_spill] sm:$0xff] %v8394_v23  ;;  %v8398_v45 = vpop.f32.mrb[23].mxu1  ;;  %v8400_v43 = vpop.f32.mrb[23].mxu0 }
 0x105   :  { %10946 = vst [vmem:[#allocation36_spill] sm:$0xff] %v8398_v45  ;;  %10947 = vst [vmem:[#allocation37_spill] sm:$0xff] %v8400_v43 }
 0x107   :  { %v8411_v50 = vpop.f32.mrb[24].mxu1  ;;  %v8413_v53 = vpop.f32.mrb[24].mxu0 }
 0x108   :  { %10948 = vst [vmem:[#allocation38_spill] sm:$0xff] %v8411_v50  ;;  %v8418_v58 = vpop.f32.mrb[25].mxu1  ;;  %v8420_v59 = vpop.f32.mrb[25].mxu0 }
 0x109   :  { %10949 = vst [vmem:[#allocation39_spill] sm:$0xff] %v8418_v58  ;;  %10950 = vst [vmem:[#allocation40_spill] sm:$0xff] %v8420_v59 }
 0x10b   :  { %v8428_v5 = vpop.f32.mrb[26].mxu1  ;;  %v8430_v8 = vpop.f32.mrb[26].mxu0 }
 0x10c   :  { %10951 = vst [vmem:[#allocation41_spill] sm:$0xff] %v8428_v5  ;;  %v8432_v10 = vpop.f32.mrb[27].mxu1  ;;  %v8434_v44 = vpop.f32.mrb[27].mxu0  ;;  %v7205_v5 = vpack.c.bf16 %v868_v49, %v867_v46 }
 0x10d   :  { %10952 = vst [vmem:[#allocation42_spill] sm:$0xff] %v8432_v10  ;;  %10953 = vst [vmem:[#allocation43_spill] sm:$0xff] %v8434_v44 }
 0x10e   :  { %7206 = vmatprep.subr.bf16.mxu0 %v7205_v5 }
 0x10f   :  { %v8442_v29 = vpop.f32.mrb[28].mxu1  ;;  %v8444_v55 = vpop.f32.mrb[28].mxu0  ;;  %7208 = vmatpush3.bf16.msra.mxu0 %v7205_v5 }
 0x110   :  { %10954 = vst [vmem:[#allocation44_spill] sm:$0xff] %v8442_v29  ;;  %v8446_v36 = vpop.f32.mrb[29].mxu1  ;;  %v8448_v62 = vpop.f32.mrb[29].mxu0 }
 0x111   :  { %10955 = vst [vmem:[#allocation45_spill] sm:$0xff] %v8446_v36  ;;  %10956 = vst [vmem:[#allocation46_spill] sm:$0xff] %v8448_v62 }
 0x113   :  { %v8450_v10 = vpop.f32.mrb[30].mxu1  ;;  %v8452_v50 = vpop.f32.mrb[30].mxu0 }
 0x114   :  { %10957 = vst [vmem:[#allocation47_spill] sm:$0xff] %v8450_v10  ;;  %v8454_v58 = vpop.f32.mrb[31].mxu1  ;;  %v8456_v23 = vpop.f32.mrb[31].mxu0 }
 0x115   :  { %10958 = vst [vmem:[#allocation48_spill] sm:$0xff] %v8454_v58  ;;  %10959 = vst [vmem:[#allocation49_spill] sm:$0xff] %v8456_v23 }
 0x117   :  { %v8458_v60 = vpop.f32.mrb[32].mxu1  ;;  %v8460_v29 = vpop.f32.mrb[32].mxu0 }
 0x118   :  { %10960 = vst [vmem:[#allocation50_spill] sm:$0xff] %v8458_v60  ;;  %v8462_v46 = vpop.f32.mrb[33].mxu1  ;;  %v8464_v49 = vpop.f32.mrb[33].mxu0 }
 0x119   :  { %10961 = vst [vmem:[#allocation51_spill] sm:$0xff] %v8462_v46  ;;  %10962 = vst [vmem:[#allocation52_spill] sm:$0xff] %v8464_v49  ;;  %v994_v46 = vunpack.c.l.s4 %v7741_v39 }
 0x11b   :  { %v8466_v36 = vpop.f32.mrb[34].mxu1  ;;  %v8468_v9 = vpop.f32.mrb[34].mxu0  ;;  %v995_v33 = vunpack.c.0.s8 %v994_v46 }
 0x11c   :  { %10963 = vst [vmem:[#allocation53_spill] sm:$0xff] %v8466_v36  ;;  %v8470_v10 = vpop.f32.mrb[35].mxu1  ;;  %v8472_v45 = vpop.f32.mrb[35].mxu0 }
 0x11d   :  { %10964 = vst [vmem:[#allocation54_spill] sm:$0xff] %v8470_v10  ;;  %10965 = vst [vmem:[#allocation55_spill] sm:$0xff] %v8472_v45  ;;  %v8497_v27 = vsub.s32 %v995_v33, %v997_v48 }
 0x11f   :  { %v8474_v58 = vpop.f32.mrb[36].mxu1  ;;  %v8476_v17 = vpop.f32.mrb[36].mxu0  ;;  %10973 = vst [vmem:[#allocation63_spill] sm:$0xff] %v8497_v27 }
 0x120   :  { %10966 = vst [vmem:[#allocation56_spill] sm:$0xff] %v8474_v58  ;;  %v8478_v5 = vpop.f32.mrb[37].mxu1  ;;  %v8480_v60 = vpop.f32.mrb[37].mxu0 }
 0x121   :  { %10967 = vst [vmem:[#allocation57_spill] sm:$0xff] %v8478_v5  ;;  %10968 = vst [vmem:[#allocation58_spill] sm:$0xff] %v8480_v60  ;;  %v6113_v5 = vld [vmem:[%s10790_s4 + $0x180] ss:$0 sm:$0xff] }
 0x123   :  { %v8482_v37 = vpop.f32.mrb[38].mxu1  ;;  %v8484_v36 = vpop.f32.mrb[38].mxu0 }
 0x124   :  { %10969 = vst [vmem:[#allocation59_spill] sm:$0xff] %v8482_v37  ;;  %v8486_v57 = vpop.f32.mrb[39].mxu1  ;;  %v8488_v10 = vpop.f32.mrb[39].mxu0 }
 0x125   :  { %10970 = vst [vmem:[#allocation60_spill] sm:$0xff] %v8486_v57  ;;  %10971 = vst [vmem:[#allocation61_spill] sm:$0xff] %v8488_v10 }
 0x127   :  { %v6578_v58 = vpop.f32.mrb[40].mxu1  ;;  %v8493_v31 = vpop.f32.mrb[40].mxu0 }
 0x128   :  { %v949_v25 = vpop.f32.mrb[41].mxu1  ;;  %v8495_v39 = vpop.f32.mrb[41].mxu0 }
 0x129   :  { %10972 = vst [vmem:[#allocation62_spill] sm:$0xff] %v8495_v39  ;;  %v8499_v37 = vadd.f32 %v6113_v5, %v949_v25 }
 0x12b   :  { %v8501_v42 = vpop.f32.mrb[42].mxu0  ;;  %v999_v6 = vrot.slane %v8499_v37, %v8497_v27  ;;  %v992_v54 = vcombine.high %v8499_v37, %v8499_v37 }
 0x12c   :  { %v8503_v57 = vpop.f32.mrb[43].mxu0 }
 0x12d   :  { %10974 = vst [vmem:[#allocation64_spill] sm:$0xff] %v8503_v57  ;;  %v1007_v15 = vcombine.high %v999_v6, %v999_v6  ;;  %v1015_v33 = vrot.slane %v999_v6, %v8497_v27  ;;  %v1006_v6 = vrot.slane %v992_v54, %v8497_v27 }
 0x12f   :  { %v8507_v46 = vpop.f32.mrb[44].mxu0  ;;  %v1029_v3 = vrot.slane %v1007_v15, %v8497_v27  ;;  %v1093_v57 = vrot.slane %v1015_v33, %v8513_v11  ;;  %v1037_v10 = vcombine.high %v1015_v33, %v1015_v33  ;;  %v1022_v54 = vrot.slane %v1006_v6, %v8497_v27 }
 0x130   :  { %v8509_v21 = vpop.f32.mrb[45].mxu0 }
 0x131   :  { %10975 = vst [vmem:[#allocation65_spill] sm:$0xff] %v8509_v21  ;;  %v8526_v21 = vadd.f32 %v6578_v58, %v6113_v5  ;;  %v1097_v48 = vrot.slane %v1029_v3, %v8513_v11  ;;  %v1170_v15 = vadd.f32 %v1093_v57, %v8499_v37  ;;  %v1039_v49 = vcombine.high %v1029_v3, %v1029_v3 }
 0x132   :  { %v1101_v23 = vrot.slane %v1037_v10, %v8513_v11  ;;  %v1008_v5 = vcombine.high %v1006_v6, %v1006_v6  ;;  %v1109_v32 = vrot.slane %v1022_v54, %v8513_v11  ;;  %v1038_v6 = vcombine.high %v1022_v54, %v1022_v54 }
 0x133   :  { %v8511_v41 = vpop.f32.mrb[46].mxu0  ;;  %v1202_v33 = vadd.f32 %v1170_v15, %v8272_v52  ;;  %v1173_v44 = vadd.f32 %v1097_v48, %v8526_v21 }
 0x134   :  { %v8516_v25 = vpop.f32.mrb[47].mxu0  ;;  %v1036_v10 = vrot.slane %v1008_v5, %v8497_v27  ;;  %v1175_v52 = vadd.f32 %v1101_v23, %v8526_v21 }
 0x135   :  { %10977 = vst [vmem:[#allocation67_spill] sm:$0xff] %v8516_v25  ;;  %v1171_v25 = vadd.f32 %v1093_v57, %v8526_v21  ;;  %v1105_v57 = vrot.slane %v1039_v49, %v8513_v11  ;;  %v1266_v59 = vmul.f32 0.2, %v1202_v33  ;;  %vm1234_vm2 = vcmp.gt.f32.partialorder %v1202_v33, 0.0 }
 0x137   :  { %v8519_v0 = vpop.f32.mrb[48].mxu0  ;;  %v1203_v62 = vadd.f32 %v1171_v25, %v8294_v63  ;;  %v1205_v63 = vadd.f32 %v1173_v44, %v8318_v14  ;;  %v1176_v25 = vadd.f32 %v1105_v57, %v8499_v37  ;;  %v1298_v5 = vsel %vm1234_vm2, %v1202_v33, %v1266_v59 }
 0x138   :  { %v8524_v39 = vpop.f32.mrb[49].mxu0  ;;  %v1178_v14 = vadd.f32 %v1109_v32, %v8499_v37  ;;  %6611 = vmatprep.mubr.f32.mxu1 %v1298_v5  ;;  %v1040_v59 = vcombine.high %v1036_v10, %v1036_v10 }
 0x139   :  { %10978 = vst [vmem:[#allocation68_spill] sm:$0xff] %v8524_v39  ;;  %v1172_v39 = vadd.f32 %v1097_v48, %v8499_v37  ;;  %v1267_v43 = vmul.f32 0.2, %v1203_v62  ;;  %vm1235_vm1 = vcmp.gt.f32.partialorder %v1203_v62, 0.0  ;;  %v1269_v44 = vmul.f32 0.2, %v1205_v63 }
 0x13a   :  { %vm1237_vm4 = vcmp.gt.f32.partialorder %v1205_v63, 0.0 }
 0x13b   :  { %v8529_v60 = vpop.f32.mrb[50].mxu0  ;;  %v1204_v3 = vadd.f32 %v1172_v39, %v8302_v35  ;;  %v1113_v35 = vrot.slane %v1036_v10, %v8513_v11  ;;  %v1177_v39 = vadd.f32 %v1105_v57, %v8526_v21  ;;  %v1299_v16 = vsel %vm1235_vm1, %v1203_v62, %v1267_v43 }
 0x13c   :  { %v8534_v45 = vpop.f32.mrb[51].mxu0  ;;  %6612 = vmatmul.mubr.f32.vlgmr.msra.gmra.mrb[42].mxu1 %v1299_v16  ;;  %v1048_v43 = vrot.slane %v8526_v21, %v8497_v27  ;;  %v1117_v62 = vrot.slane %v1038_v6, %v8513_v11  ;;  %v1210_v16 = vadd.f32 %v1178_v14, %v8366_v24 }
 0x13d   :  { %10979 = vst [vmem:[#allocation69_spill] sm:$0xff] %v8534_v45  ;;  %v1174_v45 = vadd.f32 %v1101_v23, %v8499_v37  ;;  %v1268_v49 = vmul.f32 0.2, %v1204_v3  ;;  %v1207_v23 = vadd.f32 %v1175_v52, %v8336_v20  ;;  %vm1236_vm3 = vcmp.gt.f32.partialorder %v1204_v3, 0.0 }
 0x13e   :  { %v1179_v20 = vadd.f32 %v1109_v32, %v8526_v21  ;;  %v1180_v33 = vadd.f32 %v1113_v35, %v8499_v37  ;;  %v1209_v57 = vadd.f32 %v1177_v39, %v8356_v28  ;;  %v1064_v10 = vrot.slane %v1048_v43, %v8497_v27 }
 0x13f   :  { %v8538_v58 = vpop.f32.mrb[52].mxu0  ;;  %v1206_v48 = vadd.f32 %v1174_v45, %v8326_v18  ;;  %v1208_v45 = vadd.f32 %v1176_v25, %v8346_v26  ;;  %v1271_v52 = vmul.f32 0.2, %v1207_v23  ;;  %v1301_v26 = vsel %vm1237_vm4, %v1205_v63, %v1269_v44 }
 0x140   :  { %v8553_v15 = vpop.f32.mrb[53].mxu0  ;;  %vm1239_vm6 = vcmp.gt.f32.partialorder %v1207_v23, 0.0  ;;  %v1181_v32 = vadd.f32 %v1113_v35, %v8526_v21  ;;  %v1056_v6 = vcombine.high %v1048_v43, %v1048_v43  ;;  %v1211_v28 = vadd.f32 %v1179_v20, %v8376_v34 }
 0x141   :  { %10980 = vst [vmem:[#allocation70_spill] sm:$0xff] %v8553_v15  ;;  %v1270_v54 = vmul.f32 0.2, %v1206_v48  ;;  %v1300_v15 = vsel %vm1236_vm3, %v1204_v3, %v1268_v49  ;;  %vm1238_vm5 = vcmp.gt.f32.partialorder %v1206_v48, 0.0  ;;  %v1272_v3 = vmul.f32 0.2, %v1208_v45 }
 0x142   :  { %6614 = vmatprep.mubr.f32.mxu1 %v1300_v15  ;;  %vm1240_vm7 = vcmp.gt.f32.partialorder %v1208_v45, 0.0  ;;  %v1121_v49 = vrot.slane %v1040_v59, %v8513_v11  ;;  %v1182_v15 = vadd.f32 %v1117_v62, %v8499_v37  ;;  %v1273_v63 = vmul.f32 0.2, %v1209_v57 }
 0x143   :  { %v8557_v4 = vpop.f32.mrb[54].mxu0  ;;  %6615 = vmatmul.mubr.f32.gmra.mrb[44].mxu1 %v1301_v26  ;;  %v1302_v25 = vsel %vm1238_vm5, %v1206_v48, %v1270_v54  ;;  %v1303_v39 = vsel %vm1239_vm6, %v1207_v23, %v1271_v52  ;;  %v1212_v24 = vadd.f32 %v1180_v33, %v8386_v38  ;;  %v1274_v5 = vmul.f32 0.2, %v1210_v16 }
 0x144   :  { %v8561_v18 = vpop.f32.mrb[55].mxu0  ;;  %6617 = vmatprep.mubr.f32.mxu1 %v1302_v25  ;;  %v1304_v48 = vsel %vm1240_vm7, %v1208_v45, %v1272_v3  ;;  %vm1241_vm8 = vcmp.gt.f32.partialorder %v1209_v57, 0.0  ;;  %vm1242_vm9 = vcmp.gt.f32.partialorder %v1210_v16, 0.0  ;;  %v1125_v14 = vrot.slane %v1064_v10, %v8513_v11 }
 0x145   :  { %10981 = vst [vmem:[#allocation71_spill] sm:$0xff] %v8561_v18  ;;  %v1183_v44 = vadd.f32 %v1117_v62, %v8526_v21  ;;  %v1078_v35 = vrot.slane %v1056_v6, %v8497_v27  ;;  %v1184_v54 = vadd.f32 %v1121_v49, %v8499_v37  ;;  %v1213_v34 = vadd.f32 %v1181_v32, %v8396_v40 }
 0x146   :  { %v1275_v43 = vmul.f32 0.2, %v1211_v28  ;;  %v1305_v23 = vsel %vm1241_vm8, %v1209_v57, %v1273_v63  ;;  %v1214_v38 = vadd.f32 %v1182_v15, %v8413_v53  ;;  %v1276_v59 = vmul.f32 0.2, %v1212_v24 }
 0x147   :  { %6618 = vmatmul.mubr.f32.gmra.mrb[46].mxu1 %v1303_v39  ;;  %v1306_v45 = vsel %vm1242_vm9, %v1210_v16, %v1274_v5  ;;  %vm1243_vm10 = vcmp.gt.f32.partialorder %v1211_v28, 0.0  ;;  %vm1244_vm11 = vcmp.gt.f32.partialorder %v1212_v24, 0.0  ;;  %v1186_v20 = vadd.f32 %v1125_v14, %v8499_v37 }
 0x148   :  { %6620 = vmatprep.mubr.f32.mxu1 %v1304_v48  ;;  %v1185_v62 = vadd.f32 %v1121_v49, %v8526_v21  ;;  %v1215_v33 = vadd.f32 %v1183_v44, %v8430_v8  ;;  %v1216_v52 = vadd.f32 %v1184_v54, %v8444_v55  ;;  %v1277_v26 = vmul.f32 0.2, %v1213_v34 }
 0x149   :  { %v1129_v40 = vrot.slane %v1078_v35, %v8513_v11  ;;  %v1307_v57 = vsel %vm1243_vm10, %v1211_v28, %v1275_v43  ;;  %v1278_v3 = vmul.f32 0.2, %v1214_v38  ;;  %v1086_v53 = vcombine.high %v1064_v10, %v1064_v10 }
 0x14a   :  { %v1308_v25 = vsel %vm1244_vm11, %v1212_v24, %v1276_v59  ;;  %vm1245_vm12 = vcmp.gt.f32.partialorder %v1213_v34, 0.0  ;;  %vm1246_vm13 = vcmp.gt.f32.partialorder %v1214_v38, 0.0  ;;  %v1041_v16 = vcombine.high %v8526_v21, %v8526_v21 }
 0x14b   :  { %6621 = vmatmul.mubr.f32.gmra.mrb[48].mxu1 %v1305_v23  ;;  %v1187_v49 = vadd.f32 %v1125_v14, %v8526_v21  ;;  %v1217_v8 = vadd.f32 %v1185_v62, %v8452_v50  ;;  %v1218_v55 = vadd.f32 %v1186_v20, %v8460_v29  ;;  %v1279_v32 = vmul.f32 0.2, %v1215_v33 }
 0x14c   :  { %6623 = vmatprep.mubr.f32.mxu1 %v1306_v45  ;;  %v1280_v6 = vmul.f32 0.2, %v1216_v52  ;;  %v1188_v15 = vadd.f32 %v1129_v40, %v8499_v37  ;;  %v1309_v28 = vsel %vm1245_vm12, %v1213_v34, %v1277_v26  ;;  %v1133_v10 = vrot.slane %v1086_v53, %v8513_v11 }
 0x14d   :  { %v1088_v63 = vcombine.high %v1078_v35, %v1078_v35  ;;  %v1310_v39 = vsel %vm1246_vm13, %v1214_v38, %v1278_v3  ;;  %vm1247_vm14 = vcmp.gt.f32.partialorder %v1215_v33, 0.0  ;;  %vm1248_vm15 = vcmp.gt.f32.partialorder %v1216_v52, 0.0 }
 0x14e   :  { %v1055_v24 = vrot.slane %v1041_v16, %v8497_v27  ;;  %v1219_v5 = vadd.f32 %v1187_v49, %v8468_v9  ;;  %v1189_v50 = vadd.f32 %v1129_v40, %v8526_v21  ;;  %v1281_v29 = vmul.f32 0.2, %v1217_v8 }
 0x14f   :  { %6624 = vmatmul.mubr.f32.gmra.mrb[50].mxu1 %v1307_v57  ;;  %v1282_v48 = vmul.f32 0.2, %v1218_v55  ;;  %v1220_v14 = vadd.f32 %v1188_v15, %v8476_v17  ;;  %v1311_v44 = vsel %vm1247_vm14, %v1215_v33, %v1279_v32  ;;  %v1190_v54 = vadd.f32 %v1133_v10, %v8499_v37 }
 0x150   :  { %6626 = vmatprep.mubr.f32.mxu1 %v1308_v25  ;;  %v1137_v35 = vrot.slane %v1088_v63, %v8513_v11  ;;  %v1312_v34 = vsel %vm1248_vm15, %v1216_v52, %v1280_v6  ;;  %vm1249_vm0 = vcmp.gt.f32.partialorder %v1217_v8, 0.0  ;;  %vm1250_vm1 = vcmp.gt.f32.partialorder %v1218_v55, 0.0 }
 0x151   :  { %v1057_v43 = vcombine.high %v1055_v24, %v1055_v24  ;;  %v1071_v23 = vrot.slane %v1055_v24, %v8497_v27  ;;  %v1283_v9 = vmul.f32 0.2, %v1219_v5  ;;  %v1284_v38 = vmul.f32 0.2, %v1220_v14 }
 0x152   :  { %v1221_v59 = vadd.f32 %v1189_v50, %v8484_v36  ;;  %v1191_v45 = vadd.f32 %v1133_v10, %v8526_v21  ;;  %v1313_v17 = vsel %vm1249_vm0, %v1217_v8, %v1281_v29  ;;  %v1222_v20 = vadd.f32 %v1190_v54, %v8493_v31 }
 0x153   :  { %6627 = vmatmul.mubr.f32.gmra.mrb[52].mxu1 %v1309_v28  ;;  %v1192_v62 = vadd.f32 %v1137_v35, %v8499_v37  ;;  %v1314_v33 = vsel %vm1250_vm1, %v1218_v55, %v1282_v48  ;;  %vm1251_vm2 = vcmp.gt.f32.partialorder %v1219_v5, 0.0  ;;  %vm1252_vm3 = vcmp.gt.f32.partialorder %v1220_v14, 0.0 }
 0x154   :  { %6629 = vmatprep.mubr.f32.mxu1 %v1310_v39  ;;  %v1085_v52 = vrot.slane %v1057_v43, %v8497_v27  ;;  %v1087_v26 = vcombine.high %v1071_v23, %v1071_v23  ;;  %v1141_v40 = vrot.slane %v1071_v23, %v8513_v11  ;;  %v1285_v57 = vmul.f32 0.2, %v1221_v59 }
 0x155   :  { %v1223_v36 = vadd.f32 %v1191_v45, %v8501_v42  ;;  %v1193_v3 = vadd.f32 %v1137_v35, %v8526_v21  ;;  %v1315_v53 = vsel %vm1251_vm2, %v1219_v5, %v1283_v9  ;;  %v1286_v25 = vmul.f32 0.2, %v1222_v20 }
 0x156   :  { %v1224_v31 = vadd.f32 %v1192_v62, %v8507_v46  ;;  %v1316_v16 = vsel %vm1252_vm3, %v1220_v14, %v1284_v38  ;;  %vm1253_vm4 = vcmp.gt.f32.partialorder %v1221_v59, 0.0  ;;  %vm1254_vm5 = vcmp.gt.f32.partialorder %v1222_v20, 0.0 }
 0x157   :  { %6630 = vmatmul.mubr.f32.gmra.mrb[54].mxu1 %v1311_v44  ;;  %v1089_v49 = vcombine.high %v1085_v52, %v1085_v52  ;;  %v1194_v8 = vadd.f32 %v1141_v40, %v8499_v37  ;;  %v1145_v55 = vrot.slane %v1085_v52, %v8513_v11  ;;  %v1149_v32 = vrot.slane %v1087_v26, %v8513_v11 }
 0x158   :  { %6632 = vmatprep.mubr.f32.mxu1 %v1312_v34  ;;  %v1287_v6 = vmul.f32 0.2, %v1223_v36  ;;  %v1225_v42 = vadd.f32 %v1193_v3, %v8511_v41  ;;  %v1317_v15 = vsel %vm1253_vm4, %v1221_v59, %v1285_v57  ;;  %v1288_v28 = vmul.f32 0.2, %v1224_v31  ;;  %v870_v3 = vld [vmem:[%s10790_s4 + $0x148] sm:$0xff] }
 0x159   :  { %v1226_v10 = vadd.f32 %v1194_v8, %v8519_v0  ;;  %v1318_v46 = vsel %vm1254_vm5, %v1222_v20, %v1286_v25  ;;  %vm1255_vm6 = vcmp.gt.f32.partialorder %v1223_v36, 0.0  ;;  %v1195_v63 = vadd.f32 %v1141_v40, %v8526_v21  ;;  %v871_v25 = vld [vmem:[%s10790_s4 + $0x150] sm:$0xff]  ;;  %v8645_v8 = vpop.permute.xlu0 %1557 }
 0x15a   :  { %vm1256_vm7 = vcmp.gt.f32.partialorder %v1224_v31, 0.0  ;;  %v1153_v39 = vrot.slane %v1089_v49, %v8513_v11  ;;  %v1196_v24 = vadd.f32 %v1145_v55, %v8499_v37  ;;  %v1198_v5 = vadd.f32 %v1149_v32, %v8499_v37  ;;  %v8643_v49 = vpop.permute.xlu1 %1567  ;;  %10983 = vst [vmem:[#allocation73_spill] sm:$0xff] %v8645_v8 }
 0x15b   :  { %6633 = vmatmul.mubr.f32.gmra.mrb[56].mxu1 %v1313_v17  ;;  %v1289_v50 = vmul.f32 0.2, %v1225_v42  ;;  %v1227_v41 = vadd.f32 %v1195_v63, %v8529_v60  ;;  %v1319_v29 = vsel %vm1255_vm6, %v1223_v36, %v1287_v6  ;;  %v1290_v48 = vmul.f32 0.2, %v1226_v10  ;;  %10982 = vst [vmem:[#allocation72_spill] sm:$0xff] %v8643_v49 }
 0x15c   :  { %6635 = vmatprep.mubr.f32.mxu1 %v1314_v33  ;;  %v1228_v0 = vadd.f32 %v1196_v24, %v8538_v58  ;;  %v1320_v14 = vsel %vm1256_vm7, %v1224_v31, %v1288_v28  ;;  %vm1257_vm8 = vcmp.gt.f32.partialorder %v1225_v42, 0.0  ;;  %v1197_v44 = vadd.f32 %v1145_v55, %v8526_v21  ;;  %v872_v31 = vld [vmem:[%s10790_s4 + $0x158] sm:$0xff]  ;;  %v873_v55 = vld [vmem:[%s10790_s4 + $0x160] sm:$0xff] }
 0x15d   :  { %vm1258_vm9 = vcmp.gt.f32.partialorder %v1226_v10, 0.0  ;;  %v1199_v54 = vadd.f32 %v1149_v32, %v8526_v21  ;;  %v1200_v35 = vadd.f32 %v1153_v39, %v8499_v37  ;;  %v1291_v34 = vmul.f32 0.2, %v1227_v41  ;;  %v874_v32 = vld [vmem:[%s10790_s4 + $0x168] sm:$0xff]  ;;  %v876_v24 = vld [vmem:[%s10790_s4 + $0x178] sm:$0xff] }
 0x15e   :  { %v1229_v43 = vadd.f32 %v1197_v44, %v8557_v4  ;;  %v1321_v23 = vsel %vm1257_vm8, %v1225_v42, %v1289_v50  ;;  %v1230_v60 = vadd.f32 %v1198_v5, %v8270_v51  ;;  %v1292_v9 = vmul.f32 0.2, %v1228_v0  ;;  %v8653_v6 = vpop.permute.xlu1 %1572 }
 0x15f   :  { %6636 = vmatmul.mubr.f32.gmra.mrb[58].mxu1 %v1315_v53  ;;  %v1322_v58 = vsel %vm1258_vm9, %v1226_v10, %v1290_v48  ;;  %vm1259_vm10 = vcmp.gt.f32.partialorder %v1227_v41, 0.0  ;;  %vm1260_vm11 = vcmp.gt.f32.partialorder %v1228_v0, 0.0  ;;  %v1201_v38 = vadd.f32 %v1153_v39, %v8526_v21  ;;  %10984 = vst [vmem:[#allocation74_spill] sm:$0xff] %v8653_v6  ;;  %v875_v39 = vld [vmem:[%s10790_s4 + $0x170] sm:$0xff] }
 0x160   :  { %6638 = vmatprep.mubr.f32.mxu1 %v1316_v16  ;;  %v1231_v59 = vadd.f32 %v1199_v54, %v8292_v61  ;;  %v1293_v45 = vmul.f32 0.2, %v1229_v43  ;;  %v1323_v17 = vsel %vm1259_vm10, %v1227_v41, %v1291_v34  ;;  %v1232_v20 = vadd.f32 %v1200_v35, %v8300_v2 }
 0x161   :  { %v1294_v62 = vmul.f32 0.2, %v1230_v60  ;;  %v1324_v4 = vsel %vm1260_vm11, %v1228_v0, %v1292_v9  ;;  %vm1261_vm12 = vcmp.gt.f32.partialorder %v1229_v43, 0.0  ;;  %vm1262_vm13 = vcmp.gt.f32.partialorder %v1230_v60, 0.0 }
 0x162   :  { %v1233_v51 = vadd.f32 %v1201_v38, %v8316_v13  ;;  %v1295_v33 = vmul.f32 0.2, %v1231_v59  ;;  %v1325_v52 = vsel %vm1261_vm12, %v1229_v43, %v1293_v45  ;;  %v1296_v26 = vmul.f32 0.2, %v1232_v20  ;;  %v869_v13 = vld [vmem:[%s10790_s4 + $0x140] sm:$0xff]  ;;  %v8657_v28 = vpop.permute.xlu1 %1582 }
 0x163   :  { %6639 = vmatmul.mubr.f32.gmra.mrb[60].mxu1 %v1317_v15  ;;  %v1326_v40 = vsel %vm1262_vm13, %v1230_v60, %v1294_v62  ;;  %vm1263_vm14 = vcmp.gt.f32.partialorder %v1231_v59, 0.0  ;;  %vm1264_vm15 = vcmp.gt.f32.partialorder %v1232_v20, 0.0  ;;  %v7209_v53 = vpack.c.bf16 %v870_v3, %v869_v13  ;;  %v8655_v15 = vpop.permute.xlu0 %1562  ;;  %10986 = vst [vmem:[#allocation76_spill] sm:$0xff] %v8657_v28 }
 0x164   :  { %6641 = vmatprep.mubr.f32.mxu1 %v1318_v46  ;;  %v1297_v61 = vmul.f32 0.2, %v1233_v51  ;;  %v1327_v57 = vsel %vm1263_vm14, %v1231_v59, %v1295_v33  ;;  %v1328_v2 = vsel %vm1264_vm15, %v1232_v20, %v1296_v26  ;;  %vm1265_vm0 = vcmp.gt.f32.partialorder %v1233_v51, 0.0  ;;  %10985 = vst [vmem:[#allocation75_spill] sm:$0xff] %v8655_v15 }
 0x165   :  { %7210 = vmatprep.subr.bf16.mxu0 %v7209_v53  ;;  %v7213_v16 = vpack.c.bf16 %v872_v31, %v871_v25  ;;  %v7217_v42 = vpack.c.bf16 %v874_v32, %v873_v55  ;;  %v7221_v5 = vpack.c.bf16 %v876_v24, %v875_v39 }
 0x166   :  { %v1329_v36 = vsel %vm1265_vm0, %v1233_v51, %v1297_v61  ;;  %7212 = vmatpush3.bf16.msra.mxu0 %v7209_v53  ;;  %v8661_v46 = vpop.permute.xlu1 %1592 }
 0x167   :  { %6642 = vmatmul.mubr.f32.gmra.mrb[62].mxu1 %v1319_v29  ;;  %7214 = vmatprep.subr.bf16.mxu0 %v7213_v16  ;;  %v8659_v10 = vpop.permute.xlu0 %1577  ;;  %10988 = vst [vmem:[#allocation78_spill] sm:$0xff] %v8661_v46 }
 0x168   :  { %6644 = vmatprep.mubr.f32.mxu1 %v1320_v14  ;;  %10987 = vst [vmem:[#allocation77_spill] sm:$0xff] %v8659_v10 }
 0x16a   :  { %7216 = vmatpush3.bf16.msra.mxu0 %v7213_v16  ;;  %v8671_v50 = vpop.permute.xlu1 %1602 }
 0x16b   :  { %6645 = vmatmul.mubr.f32.gmra.mrb[64].mxu1 %v1321_v23  ;;  %7218 = vmatprep.subr.bf16.mxu0 %v7217_v42  ;;  %v8663_v63 = vpop.permute.xlu0 %1587  ;;  %10990 = vst [vmem:[#allocation80_spill] sm:$0xff] %v8671_v50 }
 0x16c   :  { %6647 = vmatprep.mubr.f32.mxu1 %v1322_v58  ;;  %10989 = vst [vmem:[#allocation79_spill] sm:$0xff] %v8663_v63 }
 0x16e   :  { %7220 = vmatpush3.bf16.msra.mxu0 %v7217_v42  ;;  %v8675_v29 = vpop.permute.xlu1 %1612 }
 0x16f   :  { %6648 = vmatmul.mubr.f32.gmra.mrb[66].mxu1 %v1323_v17  ;;  %7222 = vmatprep.subr.bf16.mxu0 %v7221_v5  ;;  %v8673_v41 = vpop.permute.xlu0 %1597  ;;  %10992 = vst [vmem:[#allocation82_spill] sm:$0xff] %v8675_v29 }
 0x170   :  { %6650 = vmatprep.mubr.f32.mxu1 %v1324_v4  ;;  %10991 = vst [vmem:[#allocation81_spill] sm:$0xff] %v8673_v41 }
 0x172   :  { %7224 = vmatpush3.bf16.msra.mxu0 %v7221_v5  ;;  %v8679_v0 = vpop.permute.xlu1 %1622 }
 0x173   :  { %6651 = vmatmul.mubr.f32.gmra.mrb[68].mxu1 %v1325_v52  ;;  %v8677_v48 = vpop.permute.xlu0 %1607  ;;  %10994 = vst [vmem:[#allocation84_spill] sm:$0xff] %v8679_v0 }
 0x174   :  { %6653 = vmatprep.mubr.f32.mxu1 %v1326_v40  ;;  %10993 = vst [vmem:[#allocation83_spill] sm:$0xff] %v8677_v48 }
 0x176   :  { %v8683_v44 = vpop.permute.xlu1 %1632 }
 0x177   :  { %6654 = vmatmul.mubr.f32.gmra.mrb[70].mxu1 %v1327_v57  ;;  %v8681_v14 = vpop.permute.xlu0 %1617  ;;  %10996 = vst [vmem:[#allocation86_spill] sm:$0xff] %v8683_v44 }
 0x178   :  { %6656 = vmatprep.mubr.f32.mxu1 %v1328_v2  ;;  %10995 = vst [vmem:[#allocation85_spill] sm:$0xff] %v8681_v14 }
 0x17a   :  { %v8687_v35 = vpop.permute.xlu1 %1962 }
 0x17b   :  { %6657 = vmatmul.mubr.f32.gmra.mrb[72].mxu1 %v1329_v36  ;;  %v8685_v54 = vpop.permute.xlu0 %1627  ;;  %10998 = vst [vmem:[#allocation88_spill] sm:$0xff] %v8687_v35 }
 0x17c   :  { %10997 = vst [vmem:[#allocation87_spill] sm:$0xff] %v8685_v54 }
 0x17e   :  { %v8691_v43 = vpop.permute.xlu1 %1642 }
 0x17f   :  { %v8689_v34 = vpop.permute.xlu0 %1957  ;;  %11000 = vst [vmem:[#allocation90_spill] sm:$0xff] %v8691_v43 }
 0x180   :  { %10999 = vst [vmem:[#allocation89_spill] sm:$0xff] %v8689_v34 }
 0x182   :  { %v8695_v60 = vpop.permute.xlu1 %1972 }
 0x183   :  { %v8693_v23 = vpop.permute.xlu0 %1637  ;;  %11002 = vst [vmem:[#allocation92_spill] sm:$0xff] %v8695_v60 }
 0x184   :  { %11001 = vst [vmem:[#allocation91_spill] sm:$0xff] %v8693_v23 }
 0x186   :  { %v8699_v58 = vpop.permute.xlu1 %1652 }
 0x187   :  { %v8697_v9 = vpop.permute.xlu0 %1967  ;;  %11004 = vst [vmem:[#allocation94_spill] sm:$0xff] %v8699_v58 }
 0x188   :  { %11003 = vst [vmem:[#allocation93_spill] sm:$0xff] %v8697_v9 }
 0x18a   :  { %v8703_v59 = vpop.permute.xlu1 %1982 }
 0x18b   :  { %v8701_v38 = vpop.permute.xlu0 %1647  ;;  %11006 = vst [vmem:[#allocation96_spill] sm:$0xff] %v8703_v59 }
 0x18c   :  { %11005 = vst [vmem:[#allocation95_spill] sm:$0xff] %v8701_v38 }
 0x18e   :  { %v8707_v20 = vpop.permute.xlu1 %1662 }
 0x18f   :  { %v8705_v45 = vpop.permute.xlu0 %1977  ;;  %11008 = vst [vmem:[#allocation98_spill] sm:$0xff] %v8707_v20 }
 0x190   :  { %11007 = vst [vmem:[#allocation97_spill] sm:$0xff] %v8705_v45 }
 0x192   :  { %v8715_v36 = vpop.permute.xlu1 %1992 }
 0x193   :  { %v8711_v33 = vpop.permute.xlu0 %1657  ;;  %11010 = vst [vmem:[#allocation100_spill] sm:$0xff] %v8715_v36 }
 0x194   :  { %11009 = vst [vmem:[#allocation99_spill] sm:$0xff] %v8711_v33 }
 0x197   :  { %v8717_v25 = vpop.permute.xlu0 %1987 }
 0x198   :  { %11011 = vst [vmem:[#allocation101_spill] sm:$0xff] %v8717_v25 }
 0x20f   :  { %v6613_v17 = vpop.f32.mrb[42].mxu1 }
 0x210   :  { %v1716_v62 = vadd.f32 %v6613_v17, %v8655_v15  ;;  %v1396_v4 = vpop.f32.mrb[43].mxu1 }
 0x211   :  { %v1715_v51 = vadd.f32 %v8645_v8, %v1396_v4  ;;  %v8727_v4 = vpop.permute.xlu1 %1672 }
 0x212   :  { %11012 = vst [vmem:[#allocation102_spill] sm:$0xff] %v8727_v4 }
 0x213   :  { %v1747_v52 = vmax.f32 %v1715_v51, %v1716_v62 }
 0x215   :  { %v1748_v57 = vrot.slane %v1747_v52, 4  ;;  %v8742_v18 = vpop.permute.xlu1 %2002 }
 0x216   :  { %v6616_v26 = vpop.f32.mrb[44].mxu1  ;;  %11014 = vst [vmem:[#allocation104_spill] sm:$0xff] %v8742_v18 }
 0x217   :  { %v1718_v40 = vadd.f32 %v6616_v26, %v8653_v6  ;;  %v1406_v61 = vpop.f32.mrb[45].mxu1  ;;  %v1749_v13 = vmax.f32 %v1747_v52, %v1748_v57 }
 0x218   :  { %v1717_v2 = vadd.f32 %v8643_v49, %v1406_v61 }
 0x219   :  { %v1750_v55 = vrot.slane %v1749_v13, 2 }
 0x21a   :  { %v1754_v3 = vmax.f32 %v1717_v2, %v1718_v40  ;;  %v6619_v53 = vpop.f32.mrb[46].mxu1 }
 0x21b   :  { %v8720_v31 = vadd.f32 %v6619_v53, %v8657_v28  ;;  %v1416_v16 = vpop.f32.mrb[47].mxu1  ;;  %v1751_v39 = vmax.f32 %v1749_v13, %v1750_v55 }
 0x21c   :  { %v1755_v32 = vrot.slane %v1754_v3, 4  ;;  %v8723_v42 = vadd.f32 %v8659_v10, %v1416_v16  ;;  %v8735_v16 = vpop.permute.xlu0 %1667 }
 0x21d   :  { %v1752_v61 = vrot.slane %v1751_v39, 1  ;;  %11013 = vst [vmem:[#allocation103_spill] sm:$0xff] %v8735_v16 }
 0x21e   :  { %v1756_v24 = vmax.f32 %v1754_v3, %v1755_v32  ;;  %v1761_v5 = vmax.f32 %v8723_v42, %v8720_v31  ;;  %v6622_v17 = vpop.f32.mrb[48].mxu1 }
 0x21f   :  { %v8730_v52 = vadd.f32 %v6622_v17, %v8661_v46  ;;  %v1426_v26 = vpop.f32.mrb[49].mxu1  ;;  %v1753_v13 = vmax.f32 %v1751_v39, %v1752_v61 }
 0x220   :  { %v1757_v57 = vrot.slane %v1756_v24, 2  ;;  %v1762_v53 = vrot.slane %v1761_v5, 4  ;;  %v8733_v28 = vadd.f32 %v8663_v63, %v1426_v26 }
 0x221   :  { %v1859_v46 = vsub.f32 %v1715_v51, %v1753_v13  ;;  %v1860_v6 = vsub.f32 %v1716_v62, %v1753_v13 }
 0x222   :  { %v1758_v3 = vmax.f32 %v1756_v24, %v1757_v57  ;;  %v1763_v55 = vmax.f32 %v1761_v5, %v1762_v53  ;;  %v1768_v32 = vmax.f32 %v8733_v28, %v8730_v52  ;;  %v6625_v10 = vpop.f32.mrb[50].mxu1  ;;  %v8747_v53 = vpop.permute.xlu0 %1997 }
 0x223   :  { %v8740_v49 = vadd.f32 %v6625_v10, %v8671_v50  ;;  %v1436_v17 = vpop.f32.mrb[51].mxu1  ;;  %v1891_v39 = vmul.f32 1.442695, %v1859_v46  ;;  %v1893_v24 = vmul.f32 1.442695, %v1860_v6  ;;  %11015 = vst [vmem:[#allocation105_spill] sm:$0xff] %v8747_v53 }
 0x224   :  { %v1759_v8 = vrot.slane %v1758_v3, 1  ;;  %v1764_v15 = vrot.slane %v1763_v55, 2  ;;  %v1769_v26 = vrot.slane %v1768_v32, 4  ;;  %v8745_v63 = vadd.f32 %v8673_v41, %v1436_v17 }
 0x225   :  { %7427 = vpow2.f32 %v1891_v39 }
 0x226   :  { %v1760_v5 = vmax.f32 %v1758_v3, %v1759_v8  ;;  %v1765_v61 = vmax.f32 %v1763_v55, %v1764_v15  ;;  %v6628_v57 = vpop.f32.mrb[52].mxu1  ;;  %v1770_v10 = vmax.f32 %v1768_v32, %v1769_v26  ;;  %v1775_v51 = vmax.f32 %v8745_v63, %v8740_v49  ;;  %v8757_v32 = vpop.permute.xlu1 %1682 }
 0x227   :  { %v8752_v62 = vadd.f32 %v6628_v57, %v8675_v29  ;;  %v1446_v13 = vpop.f32.mrb[53].mxu1  ;;  %7429 = vpow2.f32 %v1893_v24  ;;  %11016 = vst [vmem:[#allocation106_spill] sm:$0xff] %v8757_v32 }
 0x228   :  { %v1861_v50 = vsub.f32 %v1717_v2, %v1760_v5  ;;  %v1862_v56 = vsub.f32 %v1718_v40, %v1760_v5  ;;  %v1766_v17 = vrot.slane %v1765_v61, 1  ;;  %v1771_v41 = vrot.slane %v1770_v10, 2 }
 0x229   :  { %v1776_v46 = vrot.slane %v1775_v51, 4  ;;  %v8755_v8 = vadd.f32 %v8677_v48, %v1446_v13 }
 0x22a   :  { %v1895_v6 = vmul.f32 1.442695, %v1861_v50  ;;  %v1897_v15 = vmul.f32 1.442695, %v1862_v56  ;;  %v1767_v3 = vmax.f32 %v1765_v61, %v1766_v17  ;;  %v6631_v55 = vpop.f32.mrb[54].mxu1  ;;  %v1772_v26 = vmax.f32 %v1770_v10, %v1771_v41  ;;  %v8769_v50 = vpop.permute.xlu0 %1677 }
 0x22b   :  { %v1777_v57 = vmax.f32 %v1775_v51, %v1776_v46  ;;  %v1782_v39 = vmax.f32 %v8755_v8, %v8752_v62  ;;  %v8762_v40 = vadd.f32 %v6631_v55, %v8679_v0  ;;  %v1456_v2 = vpop.f32.mrb[55].mxu1  ;;  %11017 = vst [vmem:[#allocation107_spill] sm:$0xff] %v8769_v50 }
 0x22c   :  { %7431 = vpow2.f32 %v1895_v6  ;;  %v1863_v5 = vsub.f32 %v8723_v42, %v1767_v3  ;;  %v1864_v24 = vsub.f32 %v8720_v31, %v1767_v3  ;;  %v8767_v56 = vadd.f32 %v8681_v14, %v1456_v2  ;;  %v8779_v14 = vpop.permute.xlu1 %2012 }
 0x22d   :  { %v1773_v61 = vrot.slane %v1772_v26, 1  ;;  %v1778_v41 = vrot.slane %v1777_v57, 2  ;;  %v1783_v10 = vrot.slane %v1782_v39, 4  ;;  %7433 = vpow2.f32 %v1897_v15  ;;  %11018 = vst [vmem:[#allocation108_spill] sm:$0xff] %v8779_v14 }
 0x22e   :  { %v1899_v51 = vmul.f32 1.442695, %v1863_v5  ;;  %v1901_v13 = vmul.f32 1.442695, %v1864_v24  ;;  %v1789_v17 = vmax.f32 %v8767_v56, %v8762_v40  ;;  %v6634_v46 = vpop.f32.mrb[56].mxu1 }
 0x22f   :  { %v1774_v55 = vmax.f32 %v1772_v26, %v1773_v61  ;;  %v1779_v6 = vmax.f32 %v1777_v57, %v1778_v41  ;;  %v1784_v0 = vmax.f32 %v1782_v39, %v1783_v10  ;;  %v8774_v42 = vadd.f32 %v6634_v46, %v8683_v44  ;;  %v1466_v31 = vpop.f32.mrb[57].mxu1  ;;  %v7428_v26 = vpop.eup %7427 }
 0x230   :  { %v1790_v3 = vrot.slane %v1789_v17, 4  ;;  %v8777_v2 = vadd.f32 %v8685_v54, %v1466_v31  ;;  %7435 = vpow2.f32 %v1899_v51  ;;  %v8785_v41 = vpop.permute.xlu0 %2007 }
 0x231   :  { %v1865_v5 = vsub.f32 %v8733_v28, %v1774_v55  ;;  %v1866_v24 = vsub.f32 %v8730_v52, %v1774_v55  ;;  %v1780_v48 = vrot.slane %v1779_v6, 1  ;;  %7437 = vpow2.f32 %v1901_v13  ;;  %11019 = vst [vmem:[#allocation109_spill] sm:$0xff] %v8785_v41  ;;  %v7430_v54 = vpop.eup %7429 }
 0x232   :  { %v1785_v57 = vrot.slane %v1784_v0, 2  ;;  %v1791_v39 = vmax.f32 %v1789_v17, %v1790_v3  ;;  %v1796_v61 = vmax.f32 %v8777_v2, %v8774_v42  ;;  %v6637_v15 = vpop.f32.mrb[58].mxu1 }
 0x233   :  { %v1903_v10 = vmul.f32 1.442695, %v1865_v5  ;;  %v1905_v46 = vmul.f32 1.442695, %v1866_v24  ;;  %v1781_v31 = vmax.f32 %v1779_v6, %v1780_v48  ;;  %v8788_v51 = vadd.f32 %v6637_v15, %v8691_v43  ;;  %v1476_v28 = vpop.f32.mrb[59].mxu1 }
 0x234   :  { %v1786_v52 = vmax.f32 %v1784_v0, %v1785_v57  ;;  %v1792_v55 = vrot.slane %v1791_v39, 2  ;;  %v1797_v44 = vrot.slane %v1796_v61, 4  ;;  %v8791_v13 = vadd.f32 %v8693_v23, %v1476_v28  ;;  %v8798_v0 = vpop.permute.xlu1 %1692 }
 0x235   :  { %7439 = vpow2.f32 %v1903_v10  ;;  %v1867_v17 = vsub.f32 %v8745_v63, %v1781_v31  ;;  %v1868_v3 = vsub.f32 %v8740_v49, %v1781_v31  ;;  %v8796_v5 = vmul.f32 %v7428_v26, %v8689_v34  ;;  %11020 = vst [vmem:[#allocation110_spill] sm:$0xff] %v8798_v0 }
 0x236   :  { %v7432_v48 = vpop.eup %7431  ;;  %7441 = vpow2.f32 %v1905_v46  ;;  %v1787_v6 = vrot.slane %v1786_v52, 1  ;;  %v1793_v24 = vmax.f32 %v1791_v39, %v1792_v55  ;;  %v1798_v15 = vmax.f32 %v1796_v61, %v1797_v44  ;;  %v6640_v43 = vpop.f32.mrb[60].mxu1 }
 0x237   :  { %v1907_v57 = vmul.f32 1.442695, %v1867_v17  ;;  %v1909_v29 = vmul.f32 1.442695, %v1868_v3  ;;  %v1803_v10 = vmax.f32 %v8791_v13, %v8788_v51  ;;  %v8803_v63 = vadd.f32 %v6640_v43, %v8699_v58  ;;  %v1486_v49 = vpop.f32.mrb[61].mxu1  ;;  %v8808_v39 = vpop.permute.xlu0 %1687 }
 0x238   :  { %v1788_v31 = vmax.f32 %v1786_v52, %v1787_v6  ;;  %v1794_v26 = vrot.slane %v1793_v24, 1  ;;  %v1799_v28 = vrot.slane %v1798_v15, 2  ;;  %v8806_v46 = vadd.f32 %v8701_v38, %v1486_v49  ;;  %11021 = vst [vmem:[#allocation111_spill] sm:$0xff] %v8808_v39  ;;  %v8816_v17 = vpop.eup %7433 }
 0x239   :  { %7443 = vpow2.f32 %v1907_v57  ;;  %v1804_v44 = vrot.slane %v1803_v10, 4  ;;  %v8811_v61 = vmul.f32 %v7430_v54, %v8687_v35  ;;  %v8814_v55 = vmul.f32 %v7432_v48, %v8697_v9 }
 0x23a   :  { %7445 = vpow2.f32 %v1909_v29  ;;  %v1869_v43 = vsub.f32 %v8755_v8, %v1788_v31  ;;  %v1870_v52 = vsub.f32 %v8752_v62, %v1788_v31  ;;  %v1795_v3 = vmax.f32 %v1793_v24, %v1794_v26  ;;  %v6643_v6 = vpop.f32.mrb[62].mxu1  ;;  %v8820_v49 = vpop.eup %7435 }
 0x23b   :  { %v1800_v38 = vmax.f32 %v1798_v15, %v1799_v28  ;;  %v1805_v57 = vmax.f32 %v1803_v10, %v1804_v44  ;;  %v1810_v54 = vmax.f32 %v8806_v46, %v8803_v63  ;;  %v8825_v58 = vadd.f32 %v6643_v6, %v8707_v20  ;;  %v1496_v48 = vpop.f32.mrb[63].mxu1  ;;  %v8827_v9 = vpop.eup %7437 }
 0x23c   :  { %v1911_v29 = vmul.f32 1.442695, %v1869_v43  ;;  %v1913_v23 = vmul.f32 1.442695, %v1870_v52  ;;  %v1871_v8 = vsub.f32 %v8767_v56, %v1795_v3  ;;  %v1872_v62 = vsub.f32 %v8762_v40, %v1795_v3  ;;  %v8831_v24 = vpop.permute.xlu1 %2022  ;;  %v8840_v56 = vpop.permute.xlu0 %2017 }
 0x23d   :  { %11022 = vst [vmem:[#allocation112_spill] sm:$0xff] %v8831_v24  ;;  %v1801_v31 = vrot.slane %v1800_v38, 1  ;;  %v1806_v15 = vrot.slane %v1805_v57, 2  ;;  %v1811_v10 = vrot.slane %v1810_v54, 4  ;;  %v8834_v26 = vadd.f32 %v8711_v33, %v1496_v48  ;;  %11023 = vst [vmem:[#allocation113_spill] sm:$0xff] %v8840_v56 }
 0x23e   :  { %7447 = vpow2.f32 %v1911_v29  ;;  %v1915_v28 = vmul.f32 1.442695, %v1871_v8  ;;  %v1917_v44 = vmul.f32 1.442695, %v1872_v62  ;;  %v6646_v6 = vpop.f32.mrb[64].mxu1  ;;  %v2147_v43 = vadd.f32 %v8811_v61, %v8796_v5 }
 0x23f   :  { %v8838_v52 = vpop.eup %7439  ;;  %7449 = vpow2.f32 %v1913_v23  ;;  %v1802_v40 = vmax.f32 %v1800_v38, %v1801_v31  ;;  %v1807_v3 = vmax.f32 %v1805_v57, %v1806_v15  ;;  %v1812_v20 = vmax.f32 %v1810_v54, %v1811_v10  ;;  %v1506_v35 = vpop.f32.mrb[65].mxu1 }
 0x240   :  { %v8842_v34 = vpop.eup %7441  ;;  %7451 = vpow2.f32 %v1915_v28  ;;  %v1817_v48 = vmax.f32 %v8834_v26, %v8825_v58  ;;  %v8847_v29 = vadd.f32 %v6646_v6, %v8727_v4  ;;  %v8850_v8 = vadd.f32 %v8735_v16, %v1506_v35  ;;  %v8858_v6 = vpop.permute.xlu1 %1702 }
 0x241   :  { %7453 = vpow2.f32 %v1917_v44  ;;  %v1873_v62 = vsub.f32 %v8777_v2, %v1802_v40  ;;  %v1874_v23 = vsub.f32 %v8774_v42, %v1802_v40  ;;  %v1808_v38 = vrot.slane %v1807_v3, 1  ;;  %11024 = vst [vmem:[#allocation114_spill] sm:$0xff] %v8858_v6  ;;  %v8868_v19 = vpop.permute.xlu0 %1697 }
 0x242   :  { %v1813_v57 = vrot.slane %v1812_v20, 2  ;;  %v1818_v54 = vrot.slane %v1817_v48, 4  ;;  %v1824_v31 = vmax.f32 %v8850_v8, %v8847_v29  ;;  %v6649_v15 = vpop.f32.mrb[66].mxu1  ;;  %v2148_v10 = vrot.slane %v2147_v43, 4  ;;  %11025 = vst [vmem:[#allocation115_spill] sm:$0xff] %v8868_v19 }
 0x243   :  { %v8856_v28 = vpop.eup %7443  ;;  %v1919_v4 = vmul.f32 1.442695, %v1873_v62  ;;  %v1921_v35 = vmul.f32 1.442695, %v1874_v23  ;;  %v1809_v16 = vmax.f32 %v1807_v3, %v1808_v38  ;;  %v8861_v44 = vadd.f32 %v6649_v15, %v8757_v32  ;;  %v1516_v2 = vpop.f32.mrb[67].mxu1 }
 0x244   :  { %v8863_v42 = vpop.eup %7445  ;;  %v1814_v40 = vmax.f32 %v1812_v20, %v1813_v57  ;;  %v1819_v33 = vmax.f32 %v1817_v48, %v1818_v54  ;;  %v1825_v47 = vrot.slane %v1824_v31, 4  ;;  %v8866_v22 = vadd.f32 %v8769_v50, %v1516_v2 }
 0x245   :  { %7455 = vpow2.f32 %v1919_v4  ;;  %v1875_v12 = vsub.f32 %v8791_v13, %v1809_v16  ;;  %v1876_v62 = vsub.f32 %v8788_v51, %v1809_v16  ;;  %v2149_v3 = vadd.f32 %v2148_v10, %v2147_v43 }
 0x246   :  { %7457 = vpow2.f32 %v1921_v35  ;;  %v1815_v23 = vrot.slane %v1814_v40, 1  ;;  %v1820_v38 = vrot.slane %v1819_v33, 2  ;;  %v1826_v15 = vmax.f32 %v1824_v31, %v1825_v47  ;;  %v6652_v32 = vpop.f32.mrb[68].mxu1  ;;  %v8884_v47 = vpop.permute.xlu1 %2032 }
 0x247   :  { %v1923_v7 = vmul.f32 1.442695, %v1875_v12  ;;  %v1925_v20 = vmul.f32 1.442695, %v1876_v62  ;;  %v1831_v48 = vmax.f32 %v8866_v22, %v8861_v44  ;;  %v8875_v57 = vadd.f32 %v6652_v32, %v8798_v0  ;;  %v1526_v54 = vpop.f32.mrb[69].mxu1  ;;  %11026 = vst [vmem:[#allocation116_spill] sm:$0xff] %v8884_v47 }
 0x248   :  { %v8877_v4 = vpop.eup %7447  ;;  %v1816_v13 = vmax.f32 %v1814_v40, %v1815_v23  ;;  %v1821_v2 = vmax.f32 %v1819_v33, %v1820_v38  ;;  %v1827_v16 = vrot.slane %v1826_v15, 2  ;;  %v8880_v51 = vadd.f32 %v8808_v39, %v1526_v54  ;;  %v8896_v38 = vpop.permute.xlu0 %2027 }
 0x249   :  { %v8882_v43 = vpop.eup %7449  ;;  %7459 = vpow2.f32 %v1923_v7  ;;  %v1832_v12 = vrot.slane %v1831_v48, 4  ;;  %v2150_v31 = vrot.slane %v2149_v3, 2  ;;  %v8888_v32 = vmul.f32 %v8816_v17, %v8695_v60  ;;  %11027 = vst [vmem:[#allocation117_spill] sm:$0xff] %v8896_v38 }
 0x24a   :  { %v8890_v10 = vpop.eup %7451  ;;  %7461 = vpow2.f32 %v1925_v20  ;;  %v1877_v33 = vsub.f32 %v8806_v46, %v1816_v13  ;;  %v1878_v35 = vsub.f32 %v8803_v63, %v1816_v13  ;;  %v1822_v40 = vrot.slane %v1821_v2, 1  ;;  %v6655_v62 = vpop.f32.mrb[70].mxu1 }
 0x24b   :  { %v8894_v23 = vpop.eup %7453  ;;  %v1828_v7 = vmax.f32 %v1826_v15, %v1827_v16  ;;  %v1833_v54 = vmax.f32 %v1831_v48, %v1832_v12  ;;  %v1838_v39 = vmax.f32 %v8880_v51, %v8875_v57  ;;  %v8901_v17 = vadd.f32 %v6655_v62, %v8858_v6  ;;  %v1536_v60 = vpop.f32.mrb[71].mxu1 }
 0x24c   :  { %v1927_v20 = vmul.f32 1.442695, %v1877_v33  ;;  %v1929_v0 = vmul.f32 1.442695, %v1878_v35  ;;  %v1823_v46 = vmax.f32 %v1821_v2, %v1822_v40  ;;  %v8904_v63 = vadd.f32 %v8868_v19, %v1536_v60  ;;  %v8912_v33 = vpop.permute.xlu1 %1712 }
 0x24d   :  { %v1829_v13 = vrot.slane %v1828_v7, 1  ;;  %v1834_v50 = vrot.slane %v1833_v54, 2  ;;  %v1839_v1 = vrot.slane %v1838_v39, 4  ;;  %v2151_v30 = vadd.f32 %v2150_v31, %v2149_v3  ;;  %11028 = vst [vmem:[#allocation118_spill] sm:$0xff] %v8912_v33 }
 0x24e   :  { %7463 = vpow2.f32 %v1927_v20  ;;  %v1879_v15 = vsub.f32 %v8834_v26, %v1823_v46  ;;  %v1880_v48 = vsub.f32 %v8825_v58, %v1823_v46  ;;  %v1845_v16 = vmax.f32 %v8904_v63, %v8901_v17  ;;  %v6658_v12 = vpop.f32.mrb[72].mxu1  ;;  %v8919_v20 = vpop.permute.xlu0 %1707 }
 0x24f   :  { %v8910_v62 = vpop.eup %7455  ;;  %7465 = vpow2.f32 %v1929_v0  ;;  %v1830_v60 = vmax.f32 %v1828_v7, %v1829_v13  ;;  %v1835_v2 = vmax.f32 %v1833_v54, %v1834_v50  ;;  %v1840_v35 = vmax.f32 %v1838_v39, %v1839_v1  ;;  %v1546_v40 = vpop.f32.mrb[73].mxu1  ;;  %11029 = vst [vmem:[#allocation119_spill] sm:$0xff] %v8919_v20 }
 0x250   :  { %v8914_v19 = vpop.eup %7457  ;;  %v1931_v3 = vmul.f32 1.442695, %v1879_v15  ;;  %v1933_v31 = vmul.f32 1.442695, %v1880_v48  ;;  %v1846_v26 = vrot.slane %v1845_v16, 4  ;;  %v8917_v58 = vadd.f32 %v6658_v12, %v8912_v33 }
 0x251   :  { %v1881_v46 = vsub.f32 %v8850_v8, %v1830_v60  ;;  %v1882_v6 = vsub.f32 %v8847_v29, %v1830_v60  ;;  %v1836_v11 = vrot.slane %v1835_v2, 1  ;;  %v1841_v0 = vrot.slane %v1840_v35, 2 }
 0x252   :  { %7467 = vpow2.f32 %v1931_v3  ;;  %v1847_v50 = vmax.f32 %v1845_v16, %v1846_v26  ;;  %v8924_v1 = vadd.f32 %v8919_v20, %v1546_v40  ;;  %v2152_v39 = vrot.slane %v2151_v30, 1 }
 0x253   :  { %v8926_v7 = vpop.eup %7459  ;;  %7469 = vpow2.f32 %v1933_v31  ;;  %v1935_v54 = vmul.f32 1.442695, %v1881_v46  ;;  %v1937_v13 = vmul.f32 1.442695, %v1882_v6  ;;  %v1837_v15 = vmax.f32 %v1835_v2, %v1836_v11  ;;  %v8938_v31 = vpop.permute.xlu0 %2037 }
 0x254   :  { %v8928_v48 = vpop.eup %7461  ;;  %v1842_v12 = vmax.f32 %v1840_v35, %v1841_v0  ;;  %v1848_v8 = vrot.slane %v1847_v50, 2  ;;  %v1852_v29 = vmax.f32 %v8924_v1, %v8917_v58  ;;  %v8932_v60 = vadd.f32 %v2152_v39, %v2151_v30  ;;  %11030 = vst [vmem:[#allocation120_spill] sm:$0xff] %v8938_v31 }
 0x255   :  { %7471 = vpow2.f32 %v1935_v54  ;;  %v1883_v16 = vsub.f32 %v8866_v22, %v1837_v15  ;;  %v1884_v40 = vsub.f32 %v8861_v44, %v1837_v15  ;;  %v2154_v3 = vadd.f32 %v8888_v32, %v8814_v55  ;;  %v8945_v54 = vpop.permute.xlu1 %2042 }
 0x256   :  { %7473 = vpow2.f32 %v1937_v13  ;;  %v1843_v6 = vrot.slane %v1842_v12, 1  ;;  %v1849_v11 = vmax.f32 %v1847_v50, %v1848_v8  ;;  %v1853_v2 = vrot.slane %v1852_v29, 4  ;;  %11031 = vst [vmem:[#allocation121_spill] sm:$0xff] %v8945_v54 }
 0x257   :  { %v1939_v35 = vmul.f32 1.442695, %v1883_v16  ;;  %v1941_v26 = vmul.f32 1.442695, %v1884_v40  ;;  %7475 = vrcp.f32 %v8932_v60  ;;  %v2155_v39 = vrot.slane %v2154_v3, 4 }
 0x258   :  { %v8941_v30 = vpop.eup %7463  ;;  %v1844_v46 = vmax.f32 %v1842_v12, %v1843_v6  ;;  %v1850_v0 = vrot.slane %v1849_v11, 1  ;;  %v1854_v22 = vmax.f32 %v1852_v29, %v1853_v2  ;;  %v8949_v50 = vmul.f32 %v8820_v49, %v8705_v45 }
 0x259   :  { %v8943_v44 = vpop.eup %7465  ;;  %7477 = vpow2.f32 %v1939_v35  ;;  %v8953_v13 = vmul.f32 %v8827_v9, %v8703_v59  ;;  %v8957_v15 = vmul.f32 %v8838_v52, %v8717_v25  ;;  %v2156_v40 = vadd.f32 %v2155_v39, %v2154_v3 }
 0x25a   :  { %7479 = vpow2.f32 %v1941_v26  ;;  %v1885_v12 = vsub.f32 %v8880_v51, %v1844_v46  ;;  %v1886_v8 = vsub.f32 %v8875_v57, %v1844_v46  ;;  %v1851_v29 = vmax.f32 %v1849_v11, %v1850_v0  ;;  %v8973_v57 = vpop.permute.xlu0 %2047 }
 0x25b   :  { %v1855_v16 = vrot.slane %v1854_v22, 2  ;;  %v2161_v49 = vadd.f32 %v8953_v13, %v8949_v50  ;;  %v8965_v6 = vmul.f32 %v8842_v34, %v8715_v36  ;;  %11032 = vst [vmem:[#allocation122_spill] sm:$0xff] %v8973_v57  ;;  %v2157_v11 = vrot.slane %v2156_v40, 2 }
 0x25c   :  { %v8967_v9 = vpop.eup %7467  ;;  %v1943_v2 = vmul.f32 1.442695, %v1885_v12  ;;  %v1945_v52 = vmul.f32 1.442695, %v1886_v8  ;;  %v1887_v35 = vsub.f32 %v8904_v63, %v1851_v29  ;;  %v1888_v51 = vsub.f32 %v8901_v17, %v1851_v29  ;;  %v8984_v17 = vpop.permute.xlu1 %2052 }
 0x25d   :  { %v8971_v26 = vpop.eup %7469  ;;  %v1856_v3 = vmax.f32 %v1854_v22, %v1855_v16  ;;  %v2162_v46 = vrot.slane %v2161_v49, 4  ;;  %v2168_v0 = vadd.f32 %v8965_v6, %v8957_v15  ;;  %vm2259_vm1 = vcmp.gt.f32.partialorder %v8932_v60, 0.0  ;;  %11033 = vst [vmem:[#allocation123_spill] sm:$0xff] %v8984_v17 }
 0x25e   :  { %7481 = vpow2.f32 %v1943_v2  ;;  %v8980_v34 = vmul.f32 %v8856_v28, %v8747_v53  ;;  %v1947_v39 = vmul.f32 1.442695, %v1887_v35  ;;  %v2158_v8 = vadd.f32 %v2157_v11, %v2156_v40 }
 0x25f   :  { %v8982_v63 = vpop.eup %7471  ;;  %v1857_v12 = vrot.slane %v1856_v3, 1  ;;  %v2163_v22 = vadd.f32 %v2162_v46, %v2161_v49  ;;  %7483 = vpow2.f32 %v1945_v52  ;;  %v1949_v16 = vmul.f32 1.442695, %v1888_v51  ;;  %v9006_v51 = vpop.permute.xlu0 %2057 }
 0x260   :  { %v8986_v29 = vpop.eup %7473  ;;  %v2169_v36 = vrot.slane %v2168_v0, 4  ;;  %v8990_v2 = vmul.f32 %v8863_v42, %v8742_v18  ;;  %v2159_v53 = vrot.slane %v2158_v8, 1  ;;  %v8994_v45 = vmul.f32 %v8877_v4, %v8785_v41  ;;  %11034 = vst [vmem:[#allocation124_spill] sm:$0xff] %v9006_v51 }
 0x261   :  { %v7476_v25 = vpop.eup %7475  ;;  %v1858_v28 = vmax.f32 %v1856_v3, %v1857_v12  ;;  %v2164_v59 = vrot.slane %v2163_v22, 2  ;;  %v9002_v35 = vmul.f32 %v8882_v43, %v8779_v14  ;;  %v9016_v12 = vpop.permute.xlu1 %2062  ;;  %7485 = vpow2.f32 %v1947_v39 }
 0x262   :  { %v2291_v40 = vsel %vm2259_vm1, %v7476_v25, 0.0  ;;  %v2170_v49 = vadd.f32 %v2169_v36, %v2168_v0  ;;  %v2175_v52 = vadd.f32 %v8990_v2, %v8980_v34  ;;  %v9014_v60 = vadd.f32 %v2159_v53, %v2158_v8  ;;  %11035 = vst [vmem:[#allocation125_spill] sm:$0xff] %v9016_v12 }
 0x263   :  { %v9004_v42 = vpop.eup %7477  ;;  %v1889_v3 = vsub.f32 %v8924_v1, %v1858_v28  ;;  %v1890_v4 = vsub.f32 %v8917_v58, %v1858_v28  ;;  %v2307_v11 = vmul.f32 %v2291_v40, %v8796_v5  ;;  %v2308_v25 = vmul.f32 %v2291_v40, %v8811_v61  ;;  %v9037_v40 = vpop.permute.xlu0 %2067 }
 0x264   :  { %v9012_v36 = vpop.eup %7479  ;;  %v2165_v46 = vadd.f32 %v2164_v59, %v2163_v22  ;;  %v2171_v0 = vrot.slane %v2170_v49, 2  ;;  %v2176_v43 = vrot.slane %v2175_v52, 4  ;;  %v2182_v1 = vadd.f32 %v9002_v35, %v8994_v45 }
 0x265   :  { %v1951_v14 = vmul.f32 1.442695, %v1889_v3  ;;  %6691 = vmatprep.mubr.f32.mxu0 %v2307_v11  ;;  %v9022_v5 = vmul.f32 %v8890_v10, %v8840_v56  ;;  %7487 = vrcp.f32 %v9014_v60  ;;  %v9027_v39 = vmul.f32 %v8894_v23, %v8831_v24 }
 0x266   :  { %6692 = vmatmul.mubr.f32.vlgmr.msra.gmra.mrb[56].mxu0 %v2308_v25  ;;  %v2166_v53 = vrot.slane %v2165_v46, 1  ;;  %v2172_v61 = vadd.f32 %v2171_v0, %v2170_v49  ;;  %7489 = vpow2.f32 %v1949_v16  ;;  %v2177_v59 = vadd.f32 %v2176_v43, %v2175_v52  ;;  %v9054_v25 = vpop.permute.xlu1 %2072 }
 0x267   :  { %v2183_v58 = vrot.slane %v2182_v1, 4  ;;  %7491 = vpow2.f32 %v1951_v14  ;;  %v9035_v10 = vmul.f32 %v8910_v62, %v8896_v38  ;;  %v2189_v52 = vadd.f32 %v9027_v39, %v9022_v5 }
 0x268   :  { %v9029_v8 = vpop.eup %7481  ;;  %v9031_v22 = vadd.f32 %v2166_v53, %v2165_v46  ;;  %v2173_v28 = vrot.slane %v2172_v61, 1  ;;  %v2178_v49 = vrot.slane %v2177_v59, 2  ;;  %v9043_v23 = vmul.f32 %v8914_v19, %v8884_v47 }
 0x269   :  { %v2184_v16 = vadd.f32 %v2183_v58, %v2182_v1  ;;  %v9045_v3 = vpop.eup %7483  ;;  %v1953_v14 = vmul.f32 1.442695, %v1890_v4  ;;  %v9052_v62 = vmul.f32 %v8926_v7, %v8938_v31  ;;  %v2190_v43 = vrot.slane %v2189_v52, 4 }
 0x26a   :  { %7493 = vrcp.f32 %v9031_v22  ;;  %v9048_v11 = vadd.f32 %v2173_v28, %v2172_v61  ;;  %v2179_v46 = vadd.f32 %v2178_v49, %v2177_v59  ;;  %v2196_v19 = vadd.f32 %v9043_v23, %v9035_v10 }
 0x26b   :  { %v2185_v0 = vrot.slane %v2184_v16, 2  ;;  %vm2260_vm2 = vcmp.gt.f32.partialorder %v9014_v60, 0.0  ;;  %v9062_v4 = vmul.f32 %v8928_v48, %v8945_v54  ;;  %v9066_v7 = vmul.f32 %v8941_v30, %v8973_v57  ;;  %v9082_v30 = vpop.eup %7485 }
 0x26c   :  { %7495 = vrcp.f32 %v9048_v11  ;;  %v2180_v1 = vrot.slane %v2179_v46, 1  ;;  %v2191_v61 = vadd.f32 %v2190_v43, %v2189_v52  ;;  %v2197_v59 = vrot.slane %v2196_v19, 4 }
 0x26d   :  { %v2186_v53 = vadd.f32 %v2185_v0, %v2184_v16  ;;  %v2203_v58 = vadd.f32 %v9062_v4, %v9052_v62  ;;  %v9072_v28 = vmul.f32 %v8943_v44, %v8984_v17  ;;  %v9076_v49 = vmul.f32 %v8967_v9, %v9006_v51  ;;  %v9084_v16 = vpop.permute.xlu0 %2077 }
 0x26e   :  { %v9080_v48 = vmul.f32 %v8971_v26, %v9016_v12  ;;  %v9086_v52 = vadd.f32 %v2180_v1, %v2179_v46  ;;  %v2192_v43 = vrot.slane %v2191_v61, 2  ;;  %v2198_v57 = vadd.f32 %v2197_v59, %v2196_v19  ;;  %v9094_v12 = vpop.permute.xlu1 %2082 }
 0x26f   :  { %v2187_v0 = vrot.slane %v2186_v53, 1  ;;  %v7488_v54 = vpop.eup %7487  ;;  %7497 = vpow2.f32 %v1953_v14  ;;  %v2204_v44 = vrot.slane %v2203_v58, 4  ;;  %v2210_v9 = vadd.f32 %v9072_v28, %v9066_v7 }
 0x270   :  { %v2217_v51 = vadd.f32 %v9080_v48, %v9076_v49  ;;  %v9092_v26 = vpop.eup %7489  ;;  %v2292_v46 = vsel %vm2260_vm2, %v7488_v54, 0.0  ;;  %vm2261_vm3 = vcmp.gt.f32.partialorder %v9031_v22, 0.0  ;;  %7499 = vrcp.f32 %v9086_v52 }
 0x271   :  { %v9100_v19 = vadd.f32 %v2187_v0, %v2186_v53  ;;  %v9102_v14 = vpop.eup %7491  ;;  %v2309_v1 = vmul.f32 %v2292_v46, %v8814_v55  ;;  %v2310_v59 = vmul.f32 %v2292_v46, %v8888_v32  ;;  %v2193_v17 = vadd.f32 %v2192_v43, %v2191_v61  ;;  %v9112_v55 = vpop.permute.xlu0 %2087 }
 0x272   :  { %v2199_v31 = vrot.slane %v2198_v57, 2  ;;  %vm2262_vm4 = vcmp.gt.f32.partialorder %v9048_v11, 0.0  ;;  %v2205_v60 = vadd.f32 %v2204_v44, %v2203_v58  ;;  %v2211_v54 = vrot.slane %v2210_v9, 4 }
 0x273   :  { %7501 = vrcp.f32 %v9100_v19  ;;  %6694 = vmatprep.mubr.f32.mxu0 %v2309_v1  ;;  %v2194_v38 = vrot.slane %v2193_v17, 1  ;;  %v2218_v53 = vrot.slane %v2217_v51, 4  ;;  %v9110_v0 = vmul.f32 %v8982_v63, %v9037_v40  ;;  %v9124_v1 = vpop.permute.xlu1 %2092 }
 0x274   :  { %v7494_v47 = vpop.eup %7493  ;;  %v2200_v24 = vadd.f32 %v2199_v31, %v2198_v57  ;;  %6695 = vmatmul.mubr.f32.gmra.mrb[58].mxu0 %v2310_v59  ;;  %v2206_v61 = vrot.slane %v2205_v60, 2  ;;  %v2212_v43 = vadd.f32 %v2211_v54, %v2210_v9  ;;  %v9118_v58 = vmul.f32 %v8986_v29, %v9054_v25 }
 0x275   :  { %v2293_v32 = vsel %vm2261_vm3, %v7494_v47, 0.0  ;;  %v9122_v46 = vadd.f32 %v2194_v38, %v2193_v17  ;;  %v2219_v9 = vadd.f32 %v2218_v53, %v2217_v51  ;;  %v9133_v38 = vmul.f32 %v9004_v42, %v9084_v16  ;;  %v9148_v51 = vpop.permute.xlu0 %2097 }
 0x276   :  { %v7496_v44 = vpop.eup %7495  ;;  %v2311_v31 = vmul.f32 %v2293_v32, %v8949_v50  ;;  %v2312_v57 = vmul.f32 %v2293_v32, %v8953_v13  ;;  %v2201_v63 = vrot.slane %v2200_v24, 1  ;;  %v2207_v47 = vadd.f32 %v2206_v61, %v2205_v60 }
 0x277   :  { %v2294_v22 = vsel %vm2262_vm4, %v7496_v44, 0.0  ;;  %v2213_v59 = vrot.slane %v2212_v43, 2  ;;  %7503 = vrcp.f32 %v9122_v46  ;;  %v2220_v11 = vrot.slane %v2219_v9, 2 }
 0x278   :  { %6697 = vmatprep.mubr.f32.mxu0 %v2311_v31  ;;  %v2313_v29 = vmul.f32 %v2294_v22, %v8957_v15  ;;  %v2314_v54 = vmul.f32 %v2294_v22, %v8965_v6  ;;  %v9135_v50 = vadd.f32 %v2201_v63, %v2200_v24  ;;  %v2208_v13 = vrot.slane %v2207_v47, 1  ;;  %v9159_v31 = vpop.permute.xlu1 %2102 }
 0x279   :  { %6698 = vmatmul.mubr.f32.gmra.mrb[60].mxu0 %v2312_v57  ;;  %v2214_v17 = vadd.f32 %v2213_v59, %v2212_v43  ;;  %v7498_v60 = vpop.eup %7497  ;;  %vm2263_vm5 = vcmp.gt.f32.partialorder %v9086_v52, 0.0  ;;  %v2224_v15 = vadd.f32 %v9118_v58, %v9110_v0  ;;  %v9142_v6 = vmul.f32 %v9012_v36, %v9094_v12 }
 0x27a   :  { %6700 = vmatprep.mubr.f32.mxu0 %v2313_v29  ;;  %v9146_v42 = vmul.f32 %v9029_v8, %v9112_v55  ;;  %v7500_v24 = vpop.eup %7499  ;;  %7505 = vrcp.f32 %v9135_v50  ;;  %v9151_v53 = vadd.f32 %v2208_v13, %v2207_v47  ;;  %v9155_v52 = vmul.f32 %v9045_v3, %v9124_v1 }
 0x27b   :  { %v2215_v32 = vrot.slane %v2214_v17, 1  ;;  %v2295_v61 = vsel %vm2263_vm5, %v7500_v24, 0.0  ;;  %v2221_v43 = vadd.f32 %v2220_v11, %v2219_v9  ;;  %v2225_v36 = vrot.slane %v2224_v15, 4 }
 0x27c   :  { %v2231_v44 = vadd.f32 %v9142_v6, %v9133_v38  ;;  %v2315_v57 = vmul.f32 %v2295_v61, %v8980_v34  ;;  %v2316_v63 = vmul.f32 %v2295_v61, %v8990_v2  ;;  %vm2264_vm6 = vcmp.gt.f32.partialorder %v9100_v19, 0.0  ;;  %v9171_v19 = vpop.permute.xlu0 %2107  ;;  %v9187_v61 = vpop.permute.xlu1 %2112 }
 0x27d   :  { %v7502_v8 = vpop.eup %7501  ;;  %6701 = vmatmul.mubr.f32.gmra.mrb[62].mxu0 %v2314_v54  ;;  %7507 = vrcp.f32 %v9151_v53  ;;  %v2216_v22 = vadd.f32 %v2215_v32, %v2214_v17  ;;  %v2222_v47 = vrot.slane %v2221_v43, 1  ;;  %v2226_v59 = vadd.f32 %v2225_v36, %v2224_v15 }
 0x27e   :  { %v2296_v3 = vsel %vm2264_vm6, %v7502_v8, 0.0  ;;  %6703 = vmatprep.mubr.f32.mxu0 %v2315_v57  ;;  %v2232_v13 = vrot.slane %v2231_v44, 4  ;;  %v2238_v54 = vadd.f32 %v9155_v52, %v9146_v42  ;;  %v9175_v15 = vmul.f32 %v9082_v30, %v9148_v51 }
 0x27f   :  { %v2317_v9 = vmul.f32 %v2296_v3, %v8994_v45  ;;  %v2318_v29 = vmul.f32 %v2296_v3, %v9002_v35  ;;  %7509 = vrcp.f32 %v2216_v22  ;;  %v9169_v34 = vadd.f32 %v2222_v47, %v2221_v43 }
 0x280   :  { %v2227_v2 = vrot.slane %v2226_v59, 2  ;;  %v2233_v11 = vadd.f32 %v2232_v13, %v2231_v44  ;;  %v2239_v17 = vrot.slane %v2238_v54, 4  ;;  %v9179_v45 = vmul.f32 %v9092_v26, %v9159_v31 }
 0x281   :  { %6704 = vmatmul.mubr.f32.gmra.mrb[64].mxu0 %v2316_v63  ;;  %v7504_v35 = vpop.eup %7503  ;;  %vm2265_vm7 = vcmp.gt.f32.partialorder %v9122_v46, 0.0  ;;  %7511 = vrcp.f32 %v9169_v34  ;;  %v9185_v32 = vmul.f32 %v9102_v14, %v9171_v19  ;;  %v9194_v57 = vmul.f32 %v7498_v60, %v9187_v61 }
 0x282   :  { %6706 = vmatprep.mubr.f32.mxu0 %v2317_v9  ;;  %v2228_v24 = vadd.f32 %v2227_v2, %v2226_v59  ;;  %v2297_v43 = vsel %vm2265_vm7, %v7504_v35, 0.0  ;;  %v2234_v30 = vrot.slane %v2233_v11, 2  ;;  %v2240_v36 = vadd.f32 %v2239_v17, %v2238_v54 }
 0x283   :  { %v2245_v26 = vadd.f32 %v9179_v45, %v9175_v15  ;;  %v2319_v44 = vmul.f32 %v2297_v43, %v9022_v5  ;;  %v2320_v8 = vmul.f32 %v2297_v43, %v9027_v39  ;;  %vm2266_vm8 = vcmp.gt.f32.partialorder %v9135_v50, 0.0 }
 0x284   :  { %v2229_v46 = vrot.slane %v2228_v24, 1  ;;  %v7506_v63 = vpop.eup %7505  ;;  %v2235_v14 = vadd.f32 %v2234_v30, %v2233_v11  ;;  %v2241_v3 = vrot.slane %v2240_v36, 2  ;;  %vm2267_vm9 = vcmp.gt.f32.partialorder %v9151_v53, 0.0 }
 0x285   :  { %6707 = vmatmul.mubr.f32.gmra.mrb[66].mxu0 %v2318_v29  ;;  %v2246_v47 = vrot.slane %v2245_v26, 4  ;;  %v2298_v59 = vsel %vm2266_vm8, %v7506_v63, 0.0  ;;  %v2252_v5 = vadd.f32 %v9194_v57, %v9185_v32  ;;  %vm2268_vm10 = vcmp.gt.f32.partialorder %v2216_v22, 0.0 }
 0x286   :  { %6709 = vmatprep.mubr.f32.mxu0 %v2319_v44  ;;  %v2230_v9 = vadd.f32 %v2229_v46, %v2228_v24  ;;  %v2321_v13 = vmul.f32 %v2298_v59, %v9035_v10  ;;  %v2322_v60 = vmul.f32 %v2298_v59, %v9043_v23  ;;  %v2236_v54 = vrot.slane %v2235_v14, 1 }
 0x287   :  { %v7508_v39 = vpop.eup %7507  ;;  %v2242_v29 = vadd.f32 %v2241_v3, %v2240_v36  ;;  %v2247_v50 = vadd.f32 %v2246_v47, %v2245_v26  ;;  %v2253_v30 = vrot.slane %v2252_v5, 4  ;;  %vm2269_vm11 = vcmp.gt.f32.partialorder %v9169_v34, 0.0 }
 0x288   :  { %v2299_v2 = vsel %vm2267_vm9, %v7508_v39, 0.0  ;;  %7513 = vrcp.f32 %v2230_v9  ;;  %v2237_v53 = vadd.f32 %v2236_v54, %v2235_v14  ;;  %vm2270_vm12 = vcmp.gt.f32.partialorder %v2230_v9, 0.0 }
 0x289   :  { %6710 = vmatmul.mubr.f32.gmra.mrb[68].mxu0 %v2320_v8  ;;  %v2323_v11 = vmul.f32 %v2299_v2, %v9052_v62  ;;  %v2324_v17 = vmul.f32 %v2299_v2, %v9062_v4  ;;  %v2243_v35 = vrot.slane %v2242_v29, 1  ;;  %v7510_v24 = vpop.eup %7509  ;;  %v2248_v43 = vrot.slane %v2247_v50, 2 }
 0x28a   :  { %6712 = vmatprep.mubr.f32.mxu0 %v2321_v13  ;;  %v2300_v10 = vsel %vm2268_vm10, %v7510_v24, 0.0  ;;  %7515 = vrcp.f32 %v2237_v53  ;;  %v2254_v8 = vadd.f32 %v2253_v30, %v2252_v5  ;;  %vm2271_vm13 = vcmp.gt.f32.partialorder %v2237_v53, 0.0  ;;  %v2733_v24 = vld [vmem:[%s10790_s4 + $0x1b8] sm:$0xff]  ;;  %v2734_v30 = vld [vmem:[%s10790_s4 + $0x1c0] sm:$0xff] }
 0x28b   :  { %v2244_v23 = vadd.f32 %v2243_v35, %v2242_v29  ;;  %v7512_v36 = vpop.eup %7511  ;;  %v2325_v26 = vmul.f32 %v2300_v10, %v9066_v7  ;;  %v2326_v44 = vmul.f32 %v2300_v10, %v9072_v28  ;;  %v2249_v62 = vadd.f32 %v2248_v43, %v2247_v50  ;;  %v2732_v35 = vld [vmem:[%s10790_s4 + $0x1b0] sm:$0xff]  ;;  %v2735_v10 = vld [vmem:[%s10790_s4 + $0x1c8] sm:$0xff] }
 0x28c   :  { %v2301_v4 = vsel %vm2269_vm11, %v7512_v36, 0.0  ;;  %v2255_v14 = vrot.slane %v2254_v8, 2  ;;  %v7233_v43 = vpack.c.bf16 %v2733_v24, %v2732_v35  ;;  %v2736_v36 = vld [vmem:[%s10790_s4 + $0x1d0] sm:$0xff]  ;;  %vm2799_vm1 = vcmask 1041409  }
 0x28d   :  { %6713 = vmatmul.mubr.f32.gmra.mrb[70].mxu0 %v2322_v60  ;;  %7517 = vrcp.f32 %v2244_v23  ;;  %v2327_v22 = vmul.f32 %v2301_v4, %v9076_v49  ;;  %v2328_v46 = vmul.f32 %v2301_v4, %v9080_v48  ;;  %v2250_v63 = vrot.slane %v2249_v62, 1 }
 0x28e   :  { %6715 = vmatprep.mubr.f32.mxu0 %v2323_v11  ;;  %v2256_v3 = vadd.f32 %v2255_v14, %v2254_v8  ;;  %vm2272_vm14 = vcmp.gt.f32.partialorder %v2244_v23, 0.0  ;;  %v7237_v23 = vpack.c.bf16 %v2735_v10, %v2734_v30  ;;  %v2739_v8 = vld [vmem:[%s10790_s4 + $0x1e8] sm:$0xff]  ;;  %v2742_v14 = vld [vmem:[%s10790_s4 + $0x200] sm:$0xff]  ;;  %vm2802_vm2 = vcmask 1042434  }
 0x28f   :  { %v2251_v34 = vadd.f32 %v2250_v63, %v2249_v62  ;;  %v2738_v62 = vld [vmem:[%s10790_s4 + $0x1e0] sm:$0xff]  ;;  %vm2805_vm3 = vcmask 1043459   ;;  %vm2808_vm4 = vcmask 1044484   ;;  %vm2811_vm5 = vcmask 1045509  }
 0x290   :  { %v2257_v7 = vrot.slane %v2256_v3, 1  ;;  %v7245_v4 = vpack.c.bf16 %v2739_v8, %v2738_v62  ;;  %vm2814_vm6 = vcmask 1046534   ;;  %vm2817_vm7 = vcmask 1047559  }
 0x291   :  { %6716 = vmatmul.mubr.f32.gmra.mrb[72].mxu0 %v2324_v17  ;;  %7519 = vrcp.f32 %v2251_v34  ;;  %vm2273_vm15 = vcmp.gt.f32.partialorder %v2251_v34, 0.0  ;;  %v2743_v34 = vld [vmem:[%s10790_s4 + $0x208] sm:$0xff] }
 0x292   :  { %v7514_v47 = vpop.eup %7513  ;;  %6718 = vmatprep.mubr.f32.mxu0 %v2325_v26  ;;  %v2258_v39 = vadd.f32 %v2257_v7, %v2256_v3  ;;  %v2737_v26 = vld [vmem:[%s10790_s4 + $0x1d8] sm:$0xff]  ;;  %v7253_v3 = vpack.c.bf16 %v2743_v34, %v2742_v14 }
 0x293   :  { %v2302_v28 = vsel %vm2270_vm12, %v7514_v47, 0.0  ;;  %v2744_v47 = vld [vmem:[%s10790_s4 + $0x210] sm:$0xff]  ;;  %v2745_v7 = vld [vmem:[%s10790_s4 + $0x218] sm:$0xff] }
 0x294   :  { %v2329_v59 = vmul.f32 %v2302_v28, %v9110_v0  ;;  %v2330_v5 = vmul.f32 %v2302_v28, %v9118_v58  ;;  %v7516_v13 = vpop.eup %7515  ;;  %7521 = vrcp.f32 %v2258_v39  ;;  %vm2274_vm0 = vcmp.gt.f32.partialorder %v2258_v39, 0.0  ;;  %v2746_v28 = vld [vmem:[%s10790_s4 + $0x220] sm:$0xff] }
 0x295   :  { %6719 = vmatmul.mubr.f32.gmra.mrb[74].mxu0 %v2326_v44  ;;  %v2303_v49 = vsel %vm2271_vm13, %v7516_v13, 0.0  ;;  %v7241_v44 = vpack.c.bf16 %v2737_v26, %v2736_v36  ;;  %v2748_v13 = vld [vmem:[%s10790_s4 + $0x230] sm:$0xff] }
 0x296   :  { %6721 = vmatprep.mubr.f32.mxu0 %v2327_v22  ;;  %v2331_v60 = vmul.f32 %v2303_v49, %v9133_v38  ;;  %v2332_v54 = vmul.f32 %v2303_v49, %v9142_v6  ;;  %v2740_v22 = vld [vmem:[%s10790_s4 + $0x1f0] sm:$0xff]  ;;  %v2749_v49 = vld [vmem:[%s10790_s4 + $0x238] sm:$0xff] }
 0x297   :  { %v7518_v48 = vpop.eup %7517 }
 0x298   :  { %v2304_v9 = vsel %vm2272_vm14, %v7518_v48, 0.0  ;;  %v7265_v48 = vpack.c.bf16 %v2749_v49, %v2748_v13 }
 0x299   :  { %6722 = vmatmul.mubr.f32.gmra.mrb[76].mxu0 %v2328_v46  ;;  %v2333_v29 = vmul.f32 %v2304_v9, %v9146_v42  ;;  %v2334_v0 = vmul.f32 %v2304_v9, %v9155_v52  ;;  %v2728_v52 = vld [vmem:[%s10790_s4 + $0x190] sm:$0xff]  ;;  %v2741_v46 = vld [vmem:[%s10790_s4 + $0x1f8] sm:$0xff] }
 0x29a   :  { %6724 = vmatprep.mubr.f32.mxu0 %v2329_v59  ;;  %v7249_v63 = vpack.c.bf16 %v2741_v46, %v2740_v22  ;;  %v7257_v59 = vpack.c.bf16 %v2745_v7, %v2744_v47 }
 0x29b   :  { %v7520_v58 = vpop.eup %7519 }
 0x29c   :  { %v2305_v2 = vsel %vm2273_vm15, %v7520_v58, 0.0  ;;  %7258 = vmatprep.subr.bf16.mxu0 %v7257_v59 }
 0x29d   :  { %6725 = vmatmul.mubr.f32.gmra.mrb[78].mxu0 %v2330_v5  ;;  %v2335_v50 = vmul.f32 %v2305_v2, %v9175_v15  ;;  %v2336_v11 = vmul.f32 %v2305_v2, %v9179_v45  ;;  %v2729_v15 = vld [vmem:[%s10790_s4 + $0x198] sm:$0xff]  ;;  %v2747_v5 = vld [vmem:[%s10790_s4 + $0x228] sm:$0xff]  ;;  %v2754_v2 = vld [vmem:[%s10790_s4 + $0x260] sm:$0xff] }
 0x29e   :  { %6727 = vmatprep.mubr.f32.mxu0 %v2331_v60  ;;  %v7522_v38 = vpop.eup %7521  ;;  %v7225_v45 = vpack.c.bf16 %v2729_v15, %v2728_v52  ;;  %v7261_v39 = vpack.c.bf16 %v2747_v5, %v2746_v28  ;;  %7260 = vmatpush3.bf16.msra.mxu0 %v7257_v59  ;;  %v2750_v60 = vld [vmem:[%s10790_s4 + $0x240] sm:$0xff] }
 0x29f   :  { %v2306_v6 = vsel %vm2274_vm0, %v7522_v38, 0.0 }
 0x2a0   :  { %v2337_v17 = vmul.f32 %v2306_v6, %v9185_v32  ;;  %v2338_v42 = vmul.f32 %v2306_v6, %v9194_v57  ;;  %7226 = vmatprep.subr.bf16.mxu1 %v7225_v45  ;;  %v2730_v32 = vld [vmem:[%s10790_s4 + $0x1a0] sm:$0xff]  ;;  %v2731_v57 = vld [vmem:[%s10790_s4 + $0x1a8] sm:$0xff]  ;;  %7262 = vmatprep.subr.bf16.mxu0 %v7261_v39 }
 0x2a1   :  { %6728 = vmatmul.mubr.f32.gmra.mrb[80].mxu0 %v2332_v54  ;;  %7228 = vmatpush3.bf16.msra.mxu1 %v7225_v45  ;;  %v7229_v53 = vpack.c.bf16 %v2731_v57, %v2730_v32  ;;  %v2751_v54 = vld [vmem:[%s10790_s4 + $0x248] sm:$0xff] }
 0x2a2   :  { %6730 = vmatprep.mubr.f32.mxu0 %v2333_v29  ;;  %7264 = vmatpush3.bf16.msra.mxu0 %v7261_v39  ;;  %v7269_v9 = vpack.c.bf16 %v2751_v54, %v2750_v60  ;;  %v2752_v29 = vld [vmem:[%s10790_s4 + $0x250] sm:$0xff] }
 0x2a3   :  { %7230 = vmatprep.subr.bf16.mxu1 %v7229_v53  ;;  %7266 = vmatprep.subr.bf16.mxu0 %v7265_v48 }
 0x2a5   :  { %6731 = vmatmul.mubr.f32.gmra.mrb[82].mxu0 %v2334_v0  ;;  %7232 = vmatpush3.bf16.msra.mxu1 %v7229_v53  ;;  %v2753_v0 = vld [vmem:[%s10790_s4 + $0x258] sm:$0xff] }
 0x2a6   :  { %6733 = vmatprep.mubr.f32.mxu0 %v2335_v50  ;;  %7234 = vmatprep.subr.bf16.mxu1 %v7233_v43  ;;  %v7273_v58 = vpack.c.bf16 %v2753_v0, %v2752_v29  ;;  %v2755_v50 = vld [vmem:[%s10790_s4 + $0x268] sm:$0xff] }
 0x2a7   :  { %7268 = vmatpush3.bf16.msra.mxu0 %v7265_v48 }
 0x2a8   :  { %7270 = vmatprep.subr.bf16.mxu0 %v7269_v9 }
 0x2a9   :  { %6734 = vmatmul.mubr.f32.gmra.mrb[84].mxu0 %v2336_v11  ;;  %7236 = vmatpush3.bf16.msra.mxu1 %v7233_v43  ;;  %v7277_v11 = vpack.c.bf16 %v2755_v50, %v2754_v2  ;;  %v9316_v2 = vld [vmem:[%s10790_s4 + $0x188] ss:$0 sm:$0xff] }
 0x2aa   :  { %6736 = vmatprep.mubr.f32.mxu0 %v2337_v17  ;;  %7238 = vmatprep.subr.bf16.mxu1 %v7237_v23 }
 0x2ab   :  { %7272 = vmatpush3.bf16.msra.mxu0 %v7269_v9 }
 0x2ac   :  { %7274 = vmatprep.subr.bf16.mxu0 %v7273_v58 }
 0x2ad   :  { %6737 = vmatmul.mubr.f32.gmra.mrb[86].mxu0 %v2338_v42  ;;  %7240 = vmatpush3.bf16.msra.mxu1 %v7237_v23 }
 0x2ae   :  { %7242 = vmatprep.subr.bf16.mxu1 %v7241_v44 }
 0x2af   :  { %7276 = vmatpush3.bf16.msra.mxu0 %v7273_v58 }
 0x2b0   :  { %7278 = vmatprep.subr.bf16.mxu0 %v7277_v11 }
 0x2b1   :  { %7244 = vmatpush3.bf16.msra.mxu1 %v7241_v44 }
 0x2b2   :  { %7246 = vmatprep.subr.bf16.mxu1 %v7245_v4 }
 0x2b3   :  { %7280 = vmatpush3.bf16.msra.mxu0 %v7277_v11 }
 0x2b5   :  { %7248 = vmatpush3.bf16.msra.mxu1 %v7245_v4 }
 0x2b6   :  { %7250 = vmatprep.subr.bf16.mxu1 %v7249_v63 }
 0x2b9   :  { %7252 = vmatpush3.bf16.msra.mxu1 %v7249_v63 }
 0x2ba   :  { %7254 = vmatprep.subr.bf16.mxu1 %v7253_v3 }
 0x2bd   :  { %7256 = vmatpush3.bf16.msra.mxu1 %v7253_v3 }
 0x339   :  { %v6693_v38 = vpop.f32.mrb[56].mxu0 }
 0x33a   :  { %v2565_v6 = vmul.f32 %v6693_v38, %v8526_v21  ;;  %v2405_v17 = vpop.f32.mrb[57].mxu0 }
 0x33b   :  { %v2564_v42 = vmul.f32 %v2405_v17, %v8499_v37 }
 0x33d   :  { %v2596_v52 = vadd.f32 %v2565_v6, %v2564_v42 }
 0x33f   :  { %v2597_v15 = vrot.slane %v2596_v52, 4 }
 0x341   :  { %v2598_v32 = vadd.f32 %v2597_v15, %v2596_v52 }
 0x343   :  { %v2599_v30 = vrot.slane %v2598_v32, 2 }
 0x345   :  { %v2600_v4 = vadd.f32 %v2599_v30, %v2598_v32 }
 0x347   :  { %v6696_v45 = vpop.f32.mrb[58].mxu0  ;;  %v2601_v59 = vrot.slane %v2600_v4, 1 }
 0x348   :  { %v2567_v57 = vmul.f32 %v6696_v45, %v8526_v21  ;;  %v2415_v53 = vpop.f32.mrb[59].mxu0 }
 0x349   :  { %v2566_v35 = vmul.f32 %v2415_v53, %v8499_v37  ;;  %v2602_v50 = vadd.f32 %v2601_v59, %v2600_v4 }
 0x34b   :  { %v2603_v24 = vadd.f32 %v2567_v57, %v2566_v35 }
 0x34c   :  { %v6699_v43 = vpop.f32.mrb[60].mxu0 }
 0x34d   :  { %v2569_v10 = vmul.f32 %v6699_v43, %v8526_v21  ;;  %v2425_v23 = vpop.f32.mrb[61].mxu0  ;;  %v2604_v36 = vrot.slane %v2603_v24, 4 }
 0x34e   :  { %v2568_v26 = vmul.f32 %v2425_v23, %v8499_v37 }
 0x34f   :  { %v2605_v44 = vadd.f32 %v2604_v36, %v2603_v24  ;;  %v2712_v24 = vadd.f32 %v9316_v2, %v2602_v50 }
 0x350   :  { %v2610_v62 = vadd.f32 %v2569_v10, %v2568_v26  ;;  %v6702_v8 = vpop.f32.mrb[62].mxu0 }
 0x351   :  { %v2571_v22 = vmul.f32 %v6702_v8, %v8526_v21  ;;  %v2435_v46 = vpop.f32.mrb[63].mxu0  ;;  %v2606_v63 = vrot.slane %v2605_v44, 2 }
 0x352   :  { %v2611_v14 = vrot.slane %v2610_v62, 4  ;;  %v2570_v34 = vmul.f32 %v2435_v46, %v8499_v37 }
 0x353   :  { %v2607_v3 = vadd.f32 %v2606_v63, %v2605_v44 }
 0x354   :  { %v2612_v47 = vadd.f32 %v2611_v14, %v2610_v62  ;;  %v2617_v7 = vadd.f32 %v2571_v22, %v2570_v34  ;;  %v6705_v28 = vpop.f32.mrb[64].mxu0 }
 0x355   :  { %v2573_v5 = vmul.f32 %v6705_v28, %v8526_v21  ;;  %v2445_v39 = vpop.f32.mrb[65].mxu0  ;;  %v2608_v13 = vrot.slane %v2607_v3, 1 }
 0x356   :  { %v2613_v49 = vrot.slane %v2612_v47, 2  ;;  %v2618_v48 = vrot.slane %v2617_v7, 4  ;;  %v2572_v60 = vmul.f32 %v2445_v39, %v8499_v37 }
 0x357   :  { %v2609_v54 = vadd.f32 %v2608_v13, %v2607_v3 }
 0x358   :  { %v2614_v9 = vadd.f32 %v2613_v49, %v2612_v47  ;;  %v2619_v29 = vadd.f32 %v2618_v48, %v2617_v7  ;;  %v2624_v0 = vadd.f32 %v2573_v5, %v2572_v60  ;;  %v6708_v58 = vpop.f32.mrb[66].mxu0 }
 0x359   :  { %v2575_v11 = vmul.f32 %v6708_v58, %v8526_v21  ;;  %v2455_v38 = vpop.f32.mrb[67].mxu0  ;;  %v2713_v6 = vadd.f32 %v9316_v2, %v2609_v54 }
 0x35a   :  { %v2615_v17 = vrot.slane %v2614_v9, 1  ;;  %v2620_v42 = vrot.slane %v2619_v29, 2  ;;  %v2625_v52 = vrot.slane %v2624_v0, 4  ;;  %v2574_v15 = vmul.f32 %v2455_v38, %v8499_v37 }
 0x35b   :  { %v2798_v45 = vrot.slane %v2713_v6, 7 }
 0x35c   :  { %v2616_v32 = vadd.f32 %v2615_v17, %v2614_v9  ;;  %v2621_v57 = vadd.f32 %v2620_v42, %v2619_v29  ;;  %v2626_v53 = vadd.f32 %v2625_v52, %v2624_v0  ;;  %v6711_v35 = vpop.f32.mrb[68].mxu0  ;;  %v2631_v43 = vadd.f32 %v2575_v11, %v2574_v15 }
 0x35d   :  { %v2577_v30 = vmul.f32 %v6711_v35, %v8526_v21  ;;  %v2465_v10 = vpop.f32.mrb[69].mxu0  ;;  %v2800_v8 = vsel %vm2799_vm1, %v2798_v45, %v2712_v24 }
 0x35e   :  { %v2714_v23 = vadd.f32 %v9316_v2, %v2616_v32  ;;  %v2622_v36 = vrot.slane %v2621_v57, 1  ;;  %v2627_v26 = vrot.slane %v2626_v53, 2  ;;  %v2576_v44 = vmul.f32 %v2465_v10, %v8499_v37 }
 0x35f   :  { %v2632_v62 = vrot.slane %v2631_v43, 4 }
 0x360   :  { %v2801_v4 = vrot.slane %v2714_v23, 6  ;;  %v2623_v22 = vadd.f32 %v2622_v36, %v2621_v57  ;;  %v2628_v46 = vadd.f32 %v2627_v26, %v2626_v53  ;;  %v2638_v63 = vadd.f32 %v2577_v30, %v2576_v44  ;;  %v6714_v14 = vpop.f32.mrb[70].mxu0 }
 0x361   :  { %v2633_v34 = vadd.f32 %v2632_v62, %v2631_v43  ;;  %v2579_v3 = vmul.f32 %v6714_v14, %v8526_v21  ;;  %v2475_v47 = vpop.f32.mrb[71].mxu0 }
 0x362   :  { %v2715_v7 = vadd.f32 %v9316_v2, %v2623_v22  ;;  %v2629_v28 = vrot.slane %v2628_v46, 1  ;;  %v2639_v59 = vrot.slane %v2638_v63, 4  ;;  %v2578_v5 = vmul.f32 %v2475_v47, %v8499_v37 }
 0x363   :  { %v2634_v39 = vrot.slane %v2633_v34, 2  ;;  %v2803_v13 = vsel %vm2802_vm2, %v2801_v4, %v2800_v8 }
 0x364   :  { %v2804_v49 = vrot.slane %v2715_v7, 5  ;;  %v2630_v48 = vadd.f32 %v2629_v28, %v2628_v46  ;;  %v2640_v60 = vadd.f32 %v2639_v59, %v2638_v63  ;;  %v2645_v54 = vadd.f32 %v2579_v3, %v2578_v5  ;;  %v6717_v9 = vpop.f32.mrb[72].mxu0 }
 0x365   :  { %v2635_v29 = vadd.f32 %v2634_v39, %v2633_v34  ;;  %v2581_v0 = vmul.f32 %v6717_v9, %v8526_v21  ;;  %v2485_v58 = vpop.f32.mrb[73].mxu0 }
 0x366   :  { %v2716_v50 = vadd.f32 %v9316_v2, %v2630_v48  ;;  %v2641_v11 = vrot.slane %v2640_v60, 2  ;;  %v2646_v38 = vrot.slane %v2645_v54, 4  ;;  %v2580_v6 = vmul.f32 %v2485_v58, %v8499_v37 }
 0x367   :  { %v2636_v17 = vrot.slane %v2635_v29, 1  ;;  %v2806_v42 = vsel %vm2805_vm3, %v2804_v49, %v2803_v13 }
 0x368   :  { %v2807_v52 = vrot.slane %v2716_v50, 4  ;;  %v2642_v15 = vadd.f32 %v2641_v11, %v2640_v60  ;;  %v2647_v45 = vadd.f32 %v2646_v38, %v2645_v54  ;;  %v2652_v32 = vadd.f32 %v2581_v0, %v2580_v6  ;;  %v6720_v57 = vpop.f32.mrb[74].mxu0 }
 0x369   :  { %v2637_v53 = vadd.f32 %v2636_v17, %v2635_v29  ;;  %v2583_v35 = vmul.f32 %v6720_v57, %v8526_v21  ;;  %v2495_v24 = vpop.f32.mrb[75].mxu0 }
 0x36a   :  { %v2643_v43 = vrot.slane %v2642_v15, 1  ;;  %v2648_v30 = vrot.slane %v2647_v45, 2  ;;  %v2653_v10 = vrot.slane %v2652_v32, 4  ;;  %v2582_v23 = vmul.f32 %v2495_v24, %v8499_v37 }
 0x36b   :  { %v2717_v36 = vadd.f32 %v9316_v2, %v2637_v53  ;;  %v2809_v26 = vsel %vm2808_vm4, %v2807_v52, %v2806_v42 }
 0x36c   :  { %v2644_v44 = vadd.f32 %v2643_v43, %v2642_v15  ;;  %v2649_v62 = vadd.f32 %v2648_v30, %v2647_v45  ;;  %v2654_v8 = vadd.f32 %v2653_v10, %v2652_v32  ;;  %v2659_v4 = vadd.f32 %v2583_v35, %v2582_v23  ;;  %v6723_v22 = vpop.f32.mrb[76].mxu0 }
 0x36d   :  { %v2585_v46 = vmul.f32 %v6723_v22, %v8526_v21  ;;  %v2505_v63 = vpop.f32.mrb[77].mxu0  ;;  %v2810_v14 = vrot.slane %v2717_v36, 3 }
 0x36e   :  { %v2650_v34 = vrot.slane %v2649_v62, 1  ;;  %v2655_v3 = vrot.slane %v2654_v8, 2  ;;  %v2660_v47 = vrot.slane %v2659_v4, 4  ;;  %v2584_v7 = vmul.f32 %v2505_v63, %v8499_v37 }
 0x36f   :  { %v2718_v28 = vadd.f32 %v9316_v2, %v2644_v44  ;;  %v2812_v59 = vsel %vm2811_vm5, %v2810_v14, %v2809_v26 }
 0x370   :  { %v2651_v5 = vadd.f32 %v2650_v34, %v2649_v62  ;;  %v2656_v39 = vadd.f32 %v2655_v3, %v2654_v8  ;;  %v2661_v13 = vadd.f32 %v2660_v47, %v2659_v4  ;;  %v2666_v49 = vadd.f32 %v2585_v46, %v2584_v7  ;;  %v6726_v48 = vpop.f32.mrb[78].mxu0 }
 0x371   :  { %v2587_v60 = vmul.f32 %v6726_v48, %v8526_v21  ;;  %v2515_v54 = vpop.f32.mrb[79].mxu0  ;;  %v2813_v9 = vrot.slane %v2718_v28, 2 }
 0x372   :  { %v2662_v29 = vrot.slane %v2661_v13, 2  ;;  %v2667_v0 = vrot.slane %v2666_v49, 4  ;;  %v2586_v58 = vmul.f32 %v2515_v54, %v8499_v37  ;;  %v2657_v50 = vrot.slane %v2656_v39, 1 }
 0x373   :  { %v2719_v11 = vadd.f32 %v9316_v2, %v2651_v5  ;;  %v2815_v38 = vsel %vm2814_vm6, %v2813_v9, %v2812_v59 }
 0x374   :  { %v2663_v6 = vadd.f32 %v2662_v29, %v2661_v13  ;;  %v2668_v17 = vadd.f32 %v2667_v0, %v2666_v49  ;;  %v2673_v42 = vadd.f32 %v2587_v60, %v2586_v58  ;;  %v6729_v52 = vpop.f32.mrb[80].mxu0  ;;  %v2658_v24 = vadd.f32 %v2657_v50, %v2656_v39 }
 0x375   :  { %v2589_v15 = vmul.f32 %v6729_v52, %v8526_v21  ;;  %v2525_v45 = vpop.f32.mrb[81].mxu0  ;;  %v2816_v32 = vrot.slane %v2719_v11, 1 }
 0x376   :  { %v2664_v57 = vrot.slane %v2663_v6, 1  ;;  %v2669_v53 = vrot.slane %v2668_v17, 2  ;;  %v2674_v35 = vrot.slane %v2673_v42, 4  ;;  %v2588_v43 = vmul.f32 %v2525_v45, %v8499_v37 }
 0x377   :  { %v2818_v30 = vsel %vm2817_vm7, %v2816_v32, %v2815_v38  ;;  %v2720_v14 = vadd.f32 %v9316_v2, %v2658_v24 }
 0x378   :  { %v2665_v10 = vadd.f32 %v2664_v57, %v2663_v6  ;;  %v2670_v23 = vadd.f32 %v2669_v53, %v2668_v17  ;;  %v2675_v36 = vadd.f32 %v2674_v35, %v2673_v42  ;;  %6771 = vmatprep.mubr.f32.mxu1 %v2818_v30  ;;  %v6732_v26 = vpop.f32.mrb[82].mxu0  ;;  %v2680_v44 = vadd.f32 %v2589_v15, %v2588_v43 }
 0x379   :  { %v2591_v62 = vmul.f32 %v6732_v26, %v8526_v21  ;;  %v2535_v8 = vpop.f32.mrb[83].mxu0 }
 0x37a   :  { %v2721_v4 = vadd.f32 %v9316_v2, %v2665_v10  ;;  %v2671_v22 = vrot.slane %v2670_v23, 1  ;;  %v2676_v46 = vrot.slane %v2675_v36, 2  ;;  %v2590_v63 = vmul.f32 %v2535_v8, %v8499_v37 }
 0x37b   :  { %v2681_v34 = vrot.slane %v2680_v44, 4 }
 0x37c   :  { %v2819_v3 = vrot.slane %v2721_v4, 7  ;;  %v2672_v47 = vadd.f32 %v2671_v22, %v2670_v23  ;;  %v2677_v7 = vadd.f32 %v2676_v46, %v2675_v36  ;;  %v2687_v28 = vadd.f32 %v2591_v62, %v2590_v63  ;;  %v6735_v59 = vpop.f32.mrb[84].mxu0 }
 0x37d   :  { %v2682_v5 = vadd.f32 %v2681_v34, %v2680_v44  ;;  %v2593_v39 = vmul.f32 %v6735_v59, %v8526_v21  ;;  %v2545_v13 = vpop.f32.mrb[85].mxu0 }
 0x37e   :  { %v2820_v49 = vsel %vm2799_vm1, %v2819_v3, %v2720_v14  ;;  %v2722_v48 = vadd.f32 %v9316_v2, %v2672_v47  ;;  %v2678_v60 = vrot.slane %v2677_v7, 1  ;;  %v2688_v54 = vrot.slane %v2687_v28, 4 }
 0x37f   :  { %v2683_v9 = vrot.slane %v2682_v5, 2  ;;  %v2592_v29 = vmul.f32 %v2545_v13, %v8499_v37 }
 0x380   :  { %v2821_v0 = vrot.slane %v2722_v48, 6  ;;  %v2679_v58 = vadd.f32 %v2678_v60, %v2677_v7  ;;  %v2689_v50 = vadd.f32 %v2688_v54, %v2687_v28  ;;  %v6738_v11 = vpop.f32.mrb[86].mxu0  ;;  %v2756_v54 = vld [vmem:[%s10790_s4 + $0x270] sm:$0xff] }
 0x381   :  { %v2684_v38 = vadd.f32 %v2683_v9, %v2682_v5  ;;  %v2694_v6 = vadd.f32 %v2593_v39, %v2592_v29  ;;  %v2595_v17 = vmul.f32 %v6738_v11, %v8526_v21  ;;  %v2555_v42 = vpop.f32.mrb[87].mxu0  ;;  %v2757_v9 = vld [vmem:[%s10790_s4 + $0x278] sm:$0xff] }
 0x382   :  { %v2822_v52 = vsel %vm2802_vm2, %v2821_v0, %v2820_v49  ;;  %v2723_v15 = vadd.f32 %v9316_v2, %v2679_v58  ;;  %v2690_v45 = vrot.slane %v2689_v50, 2  ;;  %v2594_v32 = vmul.f32 %v2555_v42, %v8499_v37  ;;  %v2759_v0 = vld [vmem:[%s10790_s4 + $0x288] sm:$0xff] }
 0x383   :  { %v2685_v57 = vrot.slane %v2684_v38, 1  ;;  %v2695_v53 = vrot.slane %v2694_v6, 4  ;;  %v7281_v29 = vpack.c.bf16 %v2757_v9, %v2756_v54 }
 0x384   :  { %v2823_v35 = vrot.slane %v2723_v15, 5  ;;  %v2691_v24 = vadd.f32 %v2690_v45, %v2689_v50  ;;  %v2701_v43 = vadd.f32 %v2595_v17, %v2594_v32  ;;  %v11037_v15 = vld [vmem:[#allocation66_spill] sm:$0xff] }
 0x385   :  { %v2686_v30 = vadd.f32 %v2685_v57, %v2684_v38  ;;  %v2696_v10 = vadd.f32 %v2695_v53, %v2694_v6  ;;  %7282 = vmatprep.subr.bf16.mxu0 %v7281_v29  ;;  %v6115_v38 = vld [vmem:[%s10790_s4 + $0x310] ss:$0 sm:$0xff] }
 0x386   :  { %v2692_v23 = vrot.slane %v2691_v24, 1  ;;  %v2702_v36 = vrot.slane %v2701_v43, 4  ;;  %v2824_v26 = vsel %vm2805_vm3, %v2823_v35, %v2822_v52  ;;  %7284 = vmatpush3.bf16.msra.mxu0 %v7281_v29 }
 0x387   :  { %v2724_v21 = vadd.f32 %v9316_v2, %v2686_v30  ;;  %v2697_v44 = vrot.slane %v2696_v10, 2 }
 0x388   :  { %v2693_v62 = vadd.f32 %v2692_v23, %v2691_v24  ;;  %v2703_v8 = vadd.f32 %v2702_v36, %v2701_v43  ;;  %v11040_v36 = vld [vmem:[#allocation9_spill] sm:$0xff] }
 0x389   :  { %v2825_v4 = vrot.slane %v2724_v21, 4  ;;  %v2698_v22 = vadd.f32 %v2697_v44, %v2696_v10  ;;  %v11039_v10 = vld [vmem:[#allocation7_spill] sm:$0xff] }
 0x38a   :  { %v2725_v37 = vadd.f32 %v9316_v2, %v2693_v62  ;;  %v2704_v46 = vrot.slane %v2703_v8, 2 }
 0x38b   :  { %v2699_v63 = vrot.slane %v2698_v22, 1  ;;  %v2826_v14 = vsel %vm2808_vm4, %v2825_v4, %v2824_v26 }
 0x38c   :  { %v2827_v34 = vrot.slane %v2725_v37, 3  ;;  %v2705_v3 = vadd.f32 %v2704_v46, %v2703_v8 }
 0x38d   :  { %v2700_v47 = vadd.f32 %v2699_v63, %v2698_v22 }
 0x38e   :  { %v2706_v7 = vrot.slane %v2705_v3, 1  ;;  %v2828_v28 = vsel %vm2811_vm5, %v2827_v34, %v2826_v14 }
 0x38f   :  { %v2726_v59 = vadd.f32 %v9316_v2, %v2700_v47 }
 0x390   :  { %v2707_v5 = vadd.f32 %v2706_v7, %v2705_v3  ;;  %v11041_v7 = vld [vmem:[#allocation11_spill] sm:$0xff] }
 0x391   :  { %v2829_v39 = vrot.slane %v2726_v59, 2 }
 0x392   :  { %v2727_v13 = vadd.f32 %v9316_v2, %v2707_v5  ;;  %v2758_v2 = vld [vmem:[%s10790_s4 + $0x280] sm:$0xff] }
 0x393   :  { %v2830_v49 = vsel %vm2814_vm6, %v2829_v39, %v2828_v28  ;;  %v7285_v58 = vpack.c.bf16 %v2759_v0, %v2758_v2  ;;  %v11042_v39 = vld [vmem:[#allocation13_spill] sm:$0xff] }
 0x394   :  { %v2831_v48 = vrot.slane %v2727_v13, 1 }
 0x395   :  { %7286 = vmatprep.subr.bf16.mxu0 %v7285_v58 }
 0x396   :  { %v2832_v60 = vsel %vm2817_vm7, %v2831_v48, %v2830_v49  ;;  %7288 = vmatpush3.bf16.msra.mxu0 %v7285_v58  ;;  %v11044_v58 = vld [vmem:[#allocation19_spill] sm:$0xff] }
 0x397   :  { %6772 = vmatmul.mubr.f32.vlgmr.msra.gmra.mrb[74].mxu1 %v2832_v60  ;;  %v11043_v60 = vld [vmem:[#allocation16_spill] sm:$0xff] }
 0x46a   :  { %v6773_v50 = vpop.f32.mrb[74].mxu1 }
 0x46b   :  { %v2901_v11 = vpop.f32.mrb[75].mxu1  ;;  %v9391_v32 = vadd.f32 %v6773_v50, %v6115_v38 }
 0x46c   :  { %v9385_v6 = vadd.f32 %v6115_v38, %v2901_v11 }
 0x46d   :  { %11038 = vst [vmem:[#allocation127_spill] sm:$0xff] %v9391_v32 }
 0x46e   :  { %11036 = vst [vmem:[#allocation126_spill] sm:$0xff] %v9385_v6  ;;  %v2951_v17 = vrot.slane %v9385_v6, %v8497_v27  ;;  %v2944_v24 = vcombine.high %v9385_v6, %v9385_v6 }
 0x470   :  { %v2967_v42 = vrot.slane %v2951_v17, %v8497_v27  ;;  %v2959_v52 = vcombine.high %v2951_v17, %v2951_v17  ;;  %v2958_v21 = vrot.slane %v2944_v24, %v8497_v27  ;;  %v11045_v17 = vld [vmem:[#allocation22_spill] sm:$0xff] }
 0x472   :  { %v3045_v45 = vrot.slane %v2967_v42, %v11037_v15  ;;  %v2981_v57 = vrot.slane %v2959_v52, %v8497_v27  ;;  %v2989_v43 = vcombine.high %v2967_v42, %v2967_v42  ;;  %v2960_v37 = vcombine.high %v2958_v21, %v2958_v21 }
 0x473   :  { %v2974_v63 = vrot.slane %v2958_v21, %v8497_v27 }
 0x474   :  { %v3122_v53 = vadd.f32 %v3045_v45, %v9385_v6  ;;  %v3123_v35 = vadd.f32 %v3045_v45, %v9391_v32  ;;  %v3049_v30 = vrot.slane %v2981_v57, %v11037_v15  ;;  %v2991_v44 = vcombine.high %v2981_v57, %v2981_v57 }
 0x475   :  { %v3053_v62 = vrot.slane %v2989_v43, %v11037_v15  ;;  %v2988_v59 = vrot.slane %v2960_v37, %v8497_v27  ;;  %v3061_v49 = vrot.slane %v2974_v63, %v11037_v15  ;;  %v2990_v9 = vcombine.high %v2974_v63, %v2974_v63  ;;  %v11048_v63 = vld [vmem:[#allocation31_spill] sm:$0xff] }
 0x476   :  { %v3154_v23 = vadd.f32 %v3122_v53, %v11039_v10  ;;  %v3155_v26 = vadd.f32 %v3123_v35, %v11040_v36  ;;  %v3124_v8 = vadd.f32 %v3049_v30, %v9385_v6  ;;  %v3125_v46 = vadd.f32 %v3049_v30, %v9391_v32  ;;  %v11046_v30 = vld [vmem:[#allocation25_spill] sm:$0xff] }
 0x477   :  { %v3057_v14 = vrot.slane %v2991_v44, %v11037_v15  ;;  %v3126_v34 = vadd.f32 %v3053_v62, %v9385_v6  ;;  %v3127_v5 = vadd.f32 %v3053_v62, %v9391_v32  ;;  %v3065_v2 = vrot.slane %v2988_v59, %v11037_v15 }
 0x478   :  { %vm3187_vm8 = vcmp.gt.f32.partialorder %v3155_v26, 0.0  ;;  %v3218_v4 = vmul.f32 0.2, %v3154_v23  ;;  %v3219_v22 = vmul.f32 0.2, %v3155_v26  ;;  %vm3186_vm9 = vcmp.gt.f32.partialorder %v3154_v23, 0.0 }
 0x479   :  { %v3156_v28 = vadd.f32 %v3124_v8, %v11041_v7  ;;  %v3157_v13 = vadd.f32 %v3125_v46, %v11042_v39  ;;  %v3128_v48 = vadd.f32 %v3057_v14, %v9385_v6  ;;  %v3158_v54 = vadd.f32 %v3126_v34, %v11043_v60 }
 0x47a   :  { %v3251_v3 = vsel %vm3187_vm8, %v3155_v26, %v3219_v22  ;;  %v3250_v47 = vsel %vm3186_vm9, %v3154_v23, %v3218_v4  ;;  %v3129_v0 = vadd.f32 %v3057_v14, %v9391_v32  ;;  %v3159_v50 = vadd.f32 %v3127_v5, %v11044_v58  ;;  %v11047_v26 = vld [vmem:[#allocation28_spill] sm:$0xff] }
 0x47b   :  { %6806 = vmatprep.mubr.f32.mxu0 %v3250_v47  ;;  %v3220_v29 = vmul.f32 0.2, %v3156_v28  ;;  %v3221_v11 = vmul.f32 0.2, %v3157_v13  ;;  %v3130_v38 = vadd.f32 %v3061_v49, %v9385_v6  ;;  %v3160_v42 = vadd.f32 %v3128_v48, %v11045_v17  ;;  %v11049_v47 = vld [vmem:[#allocation34_spill] sm:$0xff]  ;;  %v11050_v48 = vld [vmem:[#allocation37_spill] sm:$0xff] }
 0x47c   :  { %6807 = vmatmul.mubr.f32.vlgmr.msra.gmra.mrb[88].mxu0 %v3251_v3  ;;  %v3222_v52 = vmul.f32 0.2, %v3158_v54  ;;  %v3000_v45 = vrot.slane %v9391_v32, %v8497_v27  ;;  %vm3188_vm10 = vcmp.gt.f32.partialorder %v3156_v28, 0.0  ;;  %vm3189_vm11 = vcmp.gt.f32.partialorder %v3157_v13, 0.0 }
 0x47d   :  { %vm3190_vm12 = vcmp.gt.f32.partialorder %v3158_v54, 0.0  ;;  %v2992_v57 = vcombine.high %v2988_v59, %v2988_v59  ;;  %v3069_v53 = vrot.slane %v2990_v9, %v11037_v15  ;;  %v3131_v35 = vadd.f32 %v3061_v49, %v9391_v32 }
 0x47e   :  { %v3252_v24 = vsel %vm3188_vm10, %v3156_v28, %v3220_v29  ;;  %v3132_v43 = vadd.f32 %v3065_v2, %v9385_v6  ;;  %v3161_v10 = vadd.f32 %v3129_v0, %v11046_v30  ;;  %v3223_v23 = vmul.f32 0.2, %v3159_v50  ;;  %v11051_v29 = vld [vmem:[#allocation40_spill] sm:$0xff] }
 0x47f   :  { %6809 = vmatprep.mubr.f32.mxu0 %v3252_v24  ;;  %v3253_v36 = vsel %vm3189_vm11, %v3157_v13, %v3221_v11  ;;  %v3162_v21 = vadd.f32 %v3130_v38, %v11047_v26  ;;  %v3224_v44 = vmul.f32 0.2, %v3160_v42  ;;  %v3254_v62 = vsel %vm3190_vm12, %v3158_v54, %v3222_v52  ;;  %v11052_v52 = vld [vmem:[#allocation43_spill] sm:$0xff] }
 0x480   :  { %6810 = vmatmul.mubr.f32.gmra.mrb[90].mxu0 %v3253_v36  ;;  %vm3191_vm13 = vcmp.gt.f32.partialorder %v3159_v50, 0.0  ;;  %vm3192_vm14 = vcmp.gt.f32.partialorder %v3160_v42, 0.0  ;;  %v3008_v8 = vcombine.high %v3000_v45, %v3000_v45  ;;  %v3016_v4 = vrot.slane %v3000_v45, %v8497_v27 }
 0x481   :  { %6812 = vmatprep.mubr.f32.mxu0 %v3254_v62  ;;  %v3073_v22 = vrot.slane %v2992_v57, %v11037_v15  ;;  %v3133_v37 = vadd.f32 %v3065_v2, %v9391_v32  ;;  %v3134_v46 = vadd.f32 %v3069_v53, %v9385_v6  ;;  %v3163_v14 = vadd.f32 %v3131_v35, %v11048_v63  ;;  %v11053_v35 = vld [vmem:[#allocation46_spill] sm:$0xff] }
 0x482   :  { %v3225_v34 = vmul.f32 0.2, %v3161_v10  ;;  %v3255_v3 = vsel %vm3191_vm13, %v3159_v50, %v3223_v23  ;;  %v3164_v7 = vadd.f32 %v3132_v43, %v11049_v47  ;;  %v3226_v28 = vmul.f32 0.2, %v3162_v21 }
 0x483   :  { %v3256_v59 = vsel %vm3192_vm14, %v3160_v42, %v3224_v44  ;;  %vm3193_vm15 = vcmp.gt.f32.partialorder %v3161_v10, 0.0  ;;  %vm3194_vm0 = vcmp.gt.f32.partialorder %v3162_v21, 0.0  ;;  %v3030_v5 = vrot.slane %v3008_v8, %v8497_v27  ;;  %v11054_v44 = vld [vmem:[#allocation49_spill] sm:$0xff] }
 0x484   :  { %6813 = vmatmul.mubr.f32.gmra.mrb[92].mxu0 %v3255_v3  ;;  %v3077_v39 = vrot.slane %v3016_v4, %v11037_v15  ;;  %v3135_v13 = vadd.f32 %v3069_v53, %v9391_v32  ;;  %v3136_v49 = vadd.f32 %v3073_v22, %v9385_v6  ;;  %v3165_v60 = vadd.f32 %v3133_v37, %v11050_v48 }
 0x485   :  { %6815 = vmatprep.mubr.f32.mxu0 %v3256_v59  ;;  %v3227_v54 = vmul.f32 0.2, %v3163_v14  ;;  %v3257_v9 = vsel %vm3193_vm15, %v3161_v10, %v3225_v34  ;;  %v3166_v2 = vadd.f32 %v3134_v46, %v11051_v29  ;;  %v3228_v0 = vmul.f32 0.2, %v3164_v7 }
 0x486   :  { %v3258_v58 = vsel %vm3194_vm0, %v3162_v21, %v3226_v28  ;;  %vm3195_vm8 = vcmp.gt.f32.partialorder %v3163_v14, 0.0  ;;  %vm3196_vm9 = vcmp.gt.f32.partialorder %v3164_v7, 0.0  ;;  %v2993_v50 = vcombine.high %v9391_v32, %v9391_v32  ;;  %v11056_v28 = vld [vmem:[#allocation55_spill] sm:$0xff] }
 0x487   :  { %v3038_v11 = vcombine.high %v3016_v4, %v3016_v4  ;;  %v3081_v38 = vrot.slane %v3030_v5, %v11037_v15  ;;  %v3137_v17 = vadd.f32 %v3073_v22, %v9391_v32  ;;  %v3138_v42 = vadd.f32 %v3077_v39, %v9385_v6  ;;  %v11055_v22 = vld [vmem:[#allocation52_spill] sm:$0xff] }
 0x488   :  { %6816 = vmatmul.mubr.f32.gmra.mrb[94].mxu0 %v3257_v9  ;;  %v3167_v45 = vadd.f32 %v3135_v13, %v11052_v52  ;;  %v3229_v57 = vmul.f32 0.2, %v3165_v60  ;;  %v3259_v53 = vsel %vm3195_vm8, %v3163_v14, %v3227_v54  ;;  %v3168_v24 = vadd.f32 %v3136_v49, %v11053_v35  ;;  %v11057_v13 = vld [vmem:[#allocation58_spill] sm:$0xff] }
 0x489   :  { %6818 = vmatprep.mubr.f32.mxu0 %v3258_v58  ;;  %v3230_v43 = vmul.f32 0.2, %v3166_v2  ;;  %v3260_v30 = vsel %vm3196_vm9, %v3164_v7, %v3228_v0  ;;  %vm3197_vm10 = vcmp.gt.f32.partialorder %v3165_v60, 0.0  ;;  %vm3198_vm11 = vcmp.gt.f32.partialorder %v3166_v2, 0.0  ;;  %v11058_v0 = vld [vmem:[#allocation61_spill] sm:$0xff] }
 0x48a   :  { %v3007_v10 = vrot.slane %v2993_v50, %v8497_v27  ;;  %v3040_v23 = vcombine.high %v3030_v5, %v3030_v5  ;;  %v3085_v36 = vrot.slane %v3038_v11, %v11037_v15  ;;  %v3139_v26 = vadd.f32 %v3077_v39, %v9391_v32 }
 0x48b   :  { %v3140_v21 = vadd.f32 %v3081_v38, %v9385_v6  ;;  %v3169_v62 = vadd.f32 %v3137_v17, %v11054_v44  ;;  %v3231_v8 = vmul.f32 0.2, %v3167_v45  ;;  %v3261_v4 = vsel %vm3197_vm10, %v3165_v60, %v3229_v57 }
 0x48c   :  { %6819 = vmatmul.mubr.f32.gmra.mrb[96].mxu0 %v3259_v53  ;;  %v3170_v37 = vadd.f32 %v3138_v42, %v11055_v22  ;;  %v3232_v46 = vmul.f32 0.2, %v3168_v24  ;;  %v3262_v63 = vsel %vm3198_vm11, %v3166_v2, %v3230_v43  ;;  %vm3199_vm12 = vcmp.gt.f32.partialorder %v3167_v45, 0.0  ;;  %v11062_v22 = vld [vmem:[#allocation67_spill] sm:$0xff] }
 0x48d   :  { %6821 = vmatprep.mubr.f32.mxu0 %v3260_v30  ;;  %vm3200_vm13 = vcmp.gt.f32.partialorder %v3168_v24, 0.0  ;;  %v3009_v14 = vcombine.high %v3007_v10, %v3007_v10  ;;  %v3023_v34 = vrot.slane %v3007_v10, %v8497_v27  ;;  %v3089_v3 = vrot.slane %v3040_v23, %v11037_v15  ;;  %v11061_v23 = vld [vmem:[#allocation65_spill] sm:$0xff] }
 0x48e   :  { %v3141_v47 = vadd.f32 %v3081_v38, %v9391_v32  ;;  %v3142_v7 = vadd.f32 %v3085_v36, %v9385_v6  ;;  %v3171_v59 = vadd.f32 %v3139_v26, %v11056_v28  ;;  %v3233_v5 = vmul.f32 0.2, %v3169_v62  ;;  %v11059_v38 = vld [vmem:[#allocation62_spill] sm:$0xff] }
 0x48f   :  { %v3263_v39 = vsel %vm3199_vm12, %v3167_v45, %v3231_v8  ;;  %v3172_v49 = vadd.f32 %v3140_v21, %v11057_v13  ;;  %v3234_v48 = vmul.f32 0.2, %v3170_v37  ;;  %v3264_v60 = vsel %vm3200_vm13, %v3168_v24, %v3232_v46  ;;  %v11060_v24 = vld [vmem:[#allocation64_spill] sm:$0xff] }
 0x490   :  { %6822 = vmatmul.mubr.f32.gmra.mrb[98].mxu0 %v3261_v4  ;;  %vm3201_vm14 = vcmp.gt.f32.partialorder %v3169_v62, 0.0  ;;  %vm3202_vm15 = vcmp.gt.f32.partialorder %v3170_v37, 0.0  ;;  %v3037_v54 = vrot.slane %v3009_v14, %v8497_v27  ;;  %v3093_v9 = vrot.slane %v3023_v34, %v11037_v15  ;;  %v11063_v14 = vld [vmem:[#allocation68_spill] sm:$0xff] }
 0x491   :  { %6824 = vmatprep.mubr.f32.mxu0 %v3262_v63  ;;  %v3143_v29 = vadd.f32 %v3085_v36, %v9391_v32  ;;  %v3144_v2 = vadd.f32 %v3089_v3, %v9385_v6  ;;  %v3173_v58 = vadd.f32 %v3141_v47, %v11058_v0  ;;  %v3235_v50 = vmul.f32 0.2, %v3171_v59  ;;  %v11066_v0 = vld [vmem:[#allocation71_spill] sm:$0xff] }
 0x492   :  { %v3265_v11 = vsel %vm3201_vm14, %v3169_v62, %v3233_v5  ;;  %v3174_v17 = vadd.f32 %v3142_v7, %v11059_v38  ;;  %v3236_v42 = vmul.f32 0.2, %v3172_v49  ;;  %v3266_v52 = vsel %vm3202_vm15, %v3170_v37, %v3234_v48  ;;  %v11064_v5 = vld [vmem:[#allocation69_spill] sm:$0xff]  ;;  %v11065_v48 = vld [vmem:[#allocation70_spill] sm:$0xff] }
 0x493   :  { %vm3203_vm0 = vcmp.gt.f32.partialorder %v3171_v59, 0.0  ;;  %vm3204_vm8 = vcmp.gt.f32.partialorder %v3172_v49, 0.0  ;;  %v3039_v45 = vcombine.high %v3023_v34, %v3023_v34  ;;  %v3097_v57 = vrot.slane %v3037_v54, %v11037_v15  ;;  %v11067_v38 = vld [vmem:[#allocation6_spill] sm:$0xff] }
 0x494   :  { %6825 = vmatmul.mubr.f32.gmra.mrb[100].mxu0 %v3263_v39  ;;  %v3145_v53 = vadd.f32 %v3089_v3, %v9391_v32  ;;  %v3146_v35 = vadd.f32 %v3093_v9, %v9385_v6  ;;  %v3175_v43 = vadd.f32 %v3143_v29, %v11060_v24  ;;  %v3237_v30 = vmul.f32 0.2, %v3173_v58 }
 0x495   :  { %6827 = vmatprep.mubr.f32.mxu0 %v3264_v60  ;;  %v3267_v10 = vsel %vm3203_vm0, %v3171_v59, %v3235_v50  ;;  %v3176_v36 = vadd.f32 %v3144_v2, %v11061_v23  ;;  %v3238_v26 = vmul.f32 0.2, %v3174_v17  ;;  %v3268_v21 = vsel %vm3204_vm8, %v3172_v49, %v3236_v42 }
 0x496   :  { %vm3205_vm9 = vcmp.gt.f32.partialorder %v3173_v58, 0.0  ;;  %vm3206_vm10 = vcmp.gt.f32.partialorder %v3174_v17, 0.0  ;;  %v3041_v44 = vcombine.high %v3037_v54, %v3037_v54  ;;  %v3101_v62 = vrot.slane %v3039_v45, %v11037_v15 }
 0x497   :  { %v3147_v8 = vadd.f32 %v3093_v9, %v9391_v32  ;;  %v3148_v4 = vadd.f32 %v3097_v57, %v9385_v6  ;;  %v3177_v37 = vadd.f32 %v3145_v53, %v11062_v22  ;;  %v3239_v46 = vmul.f32 0.2, %v3175_v43 }
 0x498   :  { %6828 = vmatmul.mubr.f32.gmra.mrb[102].mxu0 %v3265_v11  ;;  %v3269_v63 = vsel %vm3205_vm9, %v3173_v58, %v3237_v30  ;;  %v3178_v34 = vadd.f32 %v3146_v35, %v11063_v14  ;;  %v3240_v3 = vmul.f32 0.2, %v3176_v36  ;;  %v3270_v47 = vsel %vm3206_vm10, %v3174_v17, %v3238_v26  ;;  %v2761_v14 = vld [vmem:[%s10790_s4 + $0x298] sm:$0xff] }
 0x499   :  { %6830 = vmatprep.mubr.f32.mxu0 %v3266_v52  ;;  %vm3207_vm11 = vcmp.gt.f32.partialorder %v3175_v43, 0.0  ;;  %vm3208_vm12 = vcmp.gt.f32.partialorder %v3176_v36, 0.0  ;;  %v3105_v7 = vrot.slane %v3041_v44, %v11037_v15  ;;  %v3149_v28 = vadd.f32 %v3097_v57, %v9391_v32  ;;  %v11068_v57 = vld [vmem:[#allocation8_spill] sm:$0xff] }
 0x49a   :  { %v3150_v59 = vadd.f32 %v3101_v62, %v9385_v6  ;;  %v3179_v39 = vadd.f32 %v3147_v8, %v11064_v5  ;;  %v3241_v13 = vmul.f32 0.2, %v3177_v37  ;;  %v3271_v49 = vsel %vm3207_vm11, %v3175_v43, %v3239_v46  ;;  %v11069_v43 = vld [vmem:[#allocation10_spill] sm:$0xff] }
 0x49b   :  { %v3180_v60 = vadd.f32 %v3148_v4, %v11065_v48  ;;  %v3242_v54 = vmul.f32 0.2, %v3178_v34  ;;  %v3272_v9 = vsel %vm3208_vm12, %v3176_v36, %v3240_v3  ;;  %vm3209_vm13 = vcmp.gt.f32.partialorder %v3177_v37, 0.0  ;;  %v11070_v36 = vld [vmem:[#allocation12_spill] sm:$0xff]  ;;  %v2768_v48 = vld [vmem:[%s10790_s4 + $0x2d0] sm:$0xff] }
 0x49c   :  { %6831 = vmatmul.mubr.f32.gmra.mrb[104].mxu0 %v3267_v10  ;;  %vm3210_vm14 = vcmp.gt.f32.partialorder %v3178_v34, 0.0  ;;  %v3151_v29 = vadd.f32 %v3101_v62, %v9391_v32  ;;  %v3152_v2 = vadd.f32 %v3105_v7, %v9385_v6  ;;  %v3181_v58 = vadd.f32 %v3149_v28, %v11066_v0  ;;  %v2762_v3 = vld [vmem:[%s10790_s4 + $0x2a0] sm:$0xff]  ;;  %v2764_v28 = vld [vmem:[%s10790_s4 + $0x2b0] sm:$0xff] }
 0x49d   :  { %6833 = vmatprep.mubr.f32.mxu0 %v3268_v21  ;;  %v3243_v50 = vmul.f32 0.2, %v3179_v39  ;;  %v3273_v11 = vsel %vm3209_vm13, %v3177_v37, %v3241_v13  ;;  %v3182_v17 = vadd.f32 %v3150_v59, %v11067_v38  ;;  %v3244_v42 = vmul.f32 0.2, %v3180_v60  ;;  %v2765_v59 = vld [vmem:[%s10790_s4 + $0x2b8] sm:$0xff]  ;;  %v2767_v13 = vld [vmem:[%s10790_s4 + $0x2c8] sm:$0xff] }
 0x49e   :  { %v3274_v52 = vsel %vm3210_vm14, %v3178_v34, %v3242_v54  ;;  %vm3211_vm15 = vcmp.gt.f32.partialorder %v3179_v39, 0.0  ;;  %vm3212_vm0 = vcmp.gt.f32.partialorder %v3180_v60, 0.0  ;;  %v3153_v45 = vadd.f32 %v3105_v7, %v9391_v32  ;;  %v2772_v0 = vld [vmem:[%s10790_s4 + $0x2f0] sm:$0xff]  ;;  %v2775_v38 = vld [vmem:[%s10790_s4 + $0x308] sm:$0xff] }
 0x49f   :  { %v3183_v53 = vadd.f32 %v3151_v29, %v11068_v57  ;;  %v3245_v35 = vmul.f32 0.2, %v3181_v58  ;;  %v3275_v24 = vsel %vm3211_vm15, %v3179_v39, %v3243_v50  ;;  %v3184_v30 = vadd.f32 %v3152_v2, %v11069_v43  ;;  %v2766_v39 = vld [vmem:[%s10790_s4 + $0x2c0] sm:$0xff]  ;;  %v2771_v29 = vld [vmem:[%s10790_s4 + $0x2e8] sm:$0xff] }
 0x4a0   :  { %6834 = vmatmul.mubr.f32.gmra.mrb[106].mxu0 %v3269_v63  ;;  %v3246_v10 = vmul.f32 0.2, %v3182_v17  ;;  %v3276_v23 = vsel %vm3212_vm0, %v3180_v60, %v3244_v42  ;;  %vm3213_vm8 = vcmp.gt.f32.partialorder %v3181_v58, 0.0  ;;  %vm3214_vm9 = vcmp.gt.f32.partialorder %v3182_v17, 0.0  ;;  %v2760_v63 = vld [vmem:[%s10790_s4 + $0x290] sm:$0xff]  ;;  %v2769_v60 = vld [vmem:[%s10790_s4 + $0x2d8] sm:$0xff] }
 0x4a1   :  { %6836 = vmatprep.mubr.f32.mxu0 %v3270_v47  ;;  %v3185_v26 = vadd.f32 %v3153_v45, %v11070_v36  ;;  %v3247_v21 = vmul.f32 0.2, %v3183_v53  ;;  %v3277_v44 = vsel %vm3213_vm8, %v3181_v58, %v3245_v35  ;;  %v3248_v62 = vmul.f32 0.2, %v3184_v30  ;;  %v2763_v47 = vld [vmem:[%s10790_s4 + $0x2a8] sm:$0xff]  ;;  %v2773_v58 = vld [vmem:[%s10790_s4 + $0x2f8] sm:$0xff] }
 0x4a2   :  { %v3278_v8 = vsel %vm3214_vm9, %v3182_v17, %v3246_v10  ;;  %vm3215_vm10 = vcmp.gt.f32.partialorder %v3183_v53, 0.0  ;;  %vm3216_vm11 = vcmp.gt.f32.partialorder %v3184_v30, 0.0  ;;  %v7289_v34 = vpack.c.bf16 %v2761_v14, %v2760_v63  ;;  %v11073_v36 = vld [vmem:[#allocation74_spill] sm:$0xff] }
 0x4a3   :  { %v3249_v4 = vmul.f32 0.2, %v3185_v26  ;;  %v3279_v22 = vsel %vm3215_vm10, %v3183_v53, %v3247_v21  ;;  %v3280_v37 = vsel %vm3216_vm11, %v3184_v30, %v3248_v62  ;;  %vm3217_vm12 = vcmp.gt.f32.partialorder %v3185_v26, 0.0  ;;  %v11072_v53 = vld [vmem:[#allocation73_spill] sm:$0xff] }
 0x4a4   :  { %6837 = vmatmul.mubr.f32.gmra.mrb[108].mxu0 %v3271_v49  ;;  %7290 = vmatprep.subr.bf16.mxu1 %v7289_v34  ;;  %v7293_v7 = vpack.c.bf16 %v2763_v47, %v2762_v3  ;;  %v7297_v5 = vpack.c.bf16 %v2765_v59, %v2764_v28  ;;  %v7301_v49 = vpack.c.bf16 %v2767_v13, %v2766_v39  ;;  %v11076_v3 = vld [vmem:[#allocation77_spill] sm:$0xff] }
 0x4a5   :  { %6839 = vmatprep.mubr.f32.mxu0 %v3272_v9  ;;  %v3281_v46 = vsel %vm3217_vm12, %v3185_v26, %v3249_v4  ;;  %7292 = vmatpush3.bf16.msra.mxu1 %v7289_v34  ;;  %v7305_v54 = vpack.c.bf16 %v2769_v60, %v2768_v48  ;;  %v2770_v9 = vld [vmem:[%s10790_s4 + $0x2e0] sm:$0xff]  ;;  %v7313_v50 = vpack.c.bf16 %v2773_v58, %v2772_v0 }
 0x4a6   :  { %7294 = vmatprep.subr.bf16.mxu1 %v7293_v7  ;;  %v7309_v2 = vpack.c.bf16 %v2771_v29, %v2770_v9  ;;  %v11078_v29 = vld [vmem:[#allocation79_spill] sm:$0xff] }
 0x4a8   :  { %6840 = vmatmul.mubr.f32.gmra.mrb[110].mxu0 %v3273_v11  ;;  %v2774_v11 = vld [vmem:[%s10790_s4 + $0x300] sm:$0xff] }
 0x4a9   :  { %6842 = vmatprep.mubr.f32.mxu0 %v3274_v52  ;;  %7296 = vmatpush3.bf16.msra.mxu1 %v7293_v7  ;;  %v7317_v17 = vpack.c.bf16 %v2775_v38, %v2774_v11  ;;  %v11071_v52 = vld [vmem:[#allocation75_spill] sm:$0xff] }
 0x4aa   :  { %7298 = vmatprep.subr.bf16.mxu1 %v7297_v5 }
 0x4ac   :  { %6843 = vmatmul.mubr.f32.gmra.mrb[112].mxu0 %v3275_v24 }
 0x4ad   :  { %6845 = vmatprep.mubr.f32.mxu0 %v3276_v23  ;;  %7300 = vmatpush3.bf16.msra.mxu1 %v7297_v5 }
 0x4ae   :  { %7302 = vmatprep.subr.bf16.mxu1 %v7301_v49 }
 0x4b0   :  { %6846 = vmatmul.mubr.f32.gmra.mrb[114].mxu0 %v3277_v44  ;;  %v11074_v44 = vld [vmem:[#allocation72_spill] sm:$0xff] }
 0x4b1   :  { %6848 = vmatprep.mubr.f32.mxu0 %v3278_v8  ;;  %7304 = vmatpush3.bf16.msra.mxu1 %v7301_v49  ;;  %v11077_v49 = vld [vmem:[#allocation78_spill] sm:$0xff] }
 0x4b2   :  { %7306 = vmatprep.subr.bf16.mxu1 %v7305_v54 }
 0x4b4   :  { %6849 = vmatmul.mubr.f32.gmra.mrb[116].mxu0 %v3279_v22 }
 0x4b5   :  { %6851 = vmatprep.mubr.f32.mxu0 %v3280_v37  ;;  %7308 = vmatpush3.bf16.msra.mxu1 %v7305_v54 }
 0x4b6   :  { %7310 = vmatprep.subr.bf16.mxu1 %v7309_v2 }
 0x4b8   :  { %6852 = vmatmul.mubr.f32.gmra.mrb[118].mxu0 %v3281_v46  ;;  %v11075_v46 = vld [vmem:[#allocation76_spill] sm:$0xff] }
 0x4b9   :  { %7312 = vmatpush3.bf16.msra.mxu1 %v7309_v2 }
 0x4ba   :  { %7314 = vmatprep.subr.bf16.mxu1 %v7313_v50 }
 0x4bd   :  { %7316 = vmatpush3.bf16.msra.mxu1 %v7313_v50 }
 0x4be   :  { %7318 = vmatprep.subr.bf16.mxu1 %v7317_v17 }
 0x4c1   :  { %7320 = vmatpush3.bf16.msra.mxu1 %v7317_v17 }
 0x54f   :  { %v6808_v42 = vpop.f32.mrb[88].mxu0 }
 0x550   :  { %v3508_v45 = vadd.f32 %v6808_v42, %v11071_v52  ;;  %v3348_v57 = vpop.f32.mrb[89].mxu0  ;;  %v11079_v42 = vld [vmem:[#allocation80_spill] sm:$0xff] }
 0x551   :  { %v3507_v35 = vadd.f32 %v3348_v57, %v11072_v53 }
 0x553   :  { %v3539_v24 = vmax.f32 %v3507_v35, %v3508_v45  ;;  %v6811_v10 = vpop.f32.mrb[90].mxu0 }
 0x554   :  { %v3510_v26 = vadd.f32 %v6811_v10, %v11073_v36  ;;  %v3358_v21 = vpop.f32.mrb[91].mxu0 }
 0x555   :  { %v3540_v43 = vrot.slane %v3539_v24, 4  ;;  %v3509_v62 = vadd.f32 %v3358_v21, %v11074_v44 }
 0x557   :  { %v3541_v30 = vmax.f32 %v3539_v24, %v3540_v43  ;;  %v3546_v4 = vmax.f32 %v3509_v62, %v3510_v26  ;;  %v6814_v22 = vpop.f32.mrb[92].mxu0 }
 0x558   :  { %v3512_v63 = vadd.f32 %v6814_v22, %v11075_v46  ;;  %v3368_v14 = vpop.f32.mrb[93].mxu0 }
 0x559   :  { %v3542_v23 = vrot.slane %v3541_v30, 2  ;;  %v3547_v34 = vrot.slane %v3546_v4, 4  ;;  %v3511_v47 = vadd.f32 %v3368_v14, %v11076_v3 }
 0x55b   :  { %v3543_v8 = vmax.f32 %v3541_v30, %v3542_v23  ;;  %v3548_v28 = vmax.f32 %v3546_v4, %v3547_v34  ;;  %v3553_v59 = vmax.f32 %v3511_v47, %v3512_v63  ;;  %v6817_v5 = vpop.f32.mrb[94].mxu0  ;;  %v11080_v30 = vld [vmem:[#allocation81_spill] sm:$0xff] }
 0x55c   :  { %v9542_v48 = vadd.f32 %v6817_v5, %v11077_v49  ;;  %v3378_v60 = vpop.f32.mrb[95].mxu0 }
 0x55d   :  { %v3544_v37 = vrot.slane %v3543_v8, 1  ;;  %v3549_v54 = vrot.slane %v3548_v28, 2  ;;  %v3554_v9 = vrot.slane %v3553_v59, 4  ;;  %v9545_v2 = vadd.f32 %v3378_v60, %v11078_v29 }
 0x55f   :  { %v3545_v7 = vmax.f32 %v3543_v8, %v3544_v37  ;;  %v3550_v50 = vmax.f32 %v3548_v28, %v3549_v54  ;;  %v3555_v11 = vmax.f32 %v3553_v59, %v3554_v9  ;;  %v3560_v38 = vmax.f32 %v9545_v2, %v9542_v48  ;;  %v6820_v17 = vpop.f32.mrb[96].mxu0  ;;  %v11081_v37 = vld [vmem:[#allocation82_spill] sm:$0xff] }
 0x560   :  { %v3388_v57 = vpop.f32.mrb[97].mxu0 }
 0x561   :  { %v3651_v39 = vsub.f32 %v3507_v35, %v3545_v7  ;;  %v3652_v13 = vsub.f32 %v3508_v45, %v3545_v7  ;;  %v9550_v45 = vadd.f32 %v6820_v17, %v11079_v42  ;;  %v3551_v35 = vrot.slane %v3550_v50, 1  ;;  %v11083_v17 = vld [vmem:[#allocation84_spill] sm:$0xff] }
 0x562   :  { %v3556_v24 = vrot.slane %v3555_v11, 2  ;;  %v3561_v43 = vrot.slane %v3560_v38, 4  ;;  %v9553_v10 = vadd.f32 %v3388_v57, %v11080_v30 }
 0x563   :  { %v3683_v0 = vmul.f32 1.442695, %v3651_v39  ;;  %v3685_v58 = vmul.f32 1.442695, %v3652_v13  ;;  %v3552_v23 = vmax.f32 %v3550_v50, %v3551_v35  ;;  %v6823_v4 = vpop.f32.mrb[98].mxu0  ;;  %v11082_v13 = vld [vmem:[#allocation83_spill] sm:$0xff] }
 0x564   :  { %v3557_v21 = vmax.f32 %v3555_v11, %v3556_v24  ;;  %v3562_v8 = vmax.f32 %v3560_v38, %v3561_v43  ;;  %v3567_v22 = vmax.f32 %v9553_v10, %v9550_v45  ;;  %v9558_v14 = vadd.f32 %v6823_v4, %v11081_v37  ;;  %v3398_v34 = vpop.f32.mrb[99].mxu0  ;;  %v11092_v37 = vld [vmem:[#allocation95_spill] sm:$0xff] }
 0x565   :  { %7523 = vpow2.f32 %v3683_v0  ;;  %v3653_v7 = vsub.f32 %v3509_v62, %v3552_v23  ;;  %v3654_v28 = vsub.f32 %v3510_v26, %v3552_v23  ;;  %v9561_v60 = vadd.f32 %v3398_v34, %v11082_v13  ;;  %v11084_v34 = vld [vmem:[#allocation85_spill] sm:$0xff] }
 0x566   :  { %7525 = vpow2.f32 %v3685_v58  ;;  %v3558_v59 = vrot.slane %v3557_v21, 1  ;;  %v3563_v5 = vrot.slane %v3562_v8, 2  ;;  %v3568_v39 = vrot.slane %v3567_v22, 4 }
 0x567   :  { %v3687_v54 = vmul.f32 1.442695, %v3653_v7  ;;  %v3689_v9 = vmul.f32 1.442695, %v3654_v28  ;;  %v6826_v50 = vpop.f32.mrb[100].mxu0  ;;  %v3574_v38 = vmax.f32 %v9561_v60, %v9558_v14 }
 0x568   :  { %v3559_v0 = vmax.f32 %v3557_v21, %v3558_v59  ;;  %v3564_v58 = vmax.f32 %v3562_v8, %v3563_v5  ;;  %v3569_v11 = vmax.f32 %v3567_v22, %v3568_v39  ;;  %v9566_v57 = vadd.f32 %v6826_v50, %v11083_v17  ;;  %v3408_v62 = vpop.f32.mrb[101].mxu0  ;;  %v11085_v59 = vld [vmem:[#allocation89_spill] sm:$0xff] }
 0x569   :  { %7527 = vpow2.f32 %v3687_v54  ;;  %v3575_v4 = vrot.slane %v3574_v38, 4  ;;  %v9569_v21 = vadd.f32 %v3408_v62, %v11084_v34 }
 0x56a   :  { %v3655_v26 = vsub.f32 %v3511_v47, %v3559_v0  ;;  %v3656_v35 = vsub.f32 %v3512_v63, %v3559_v0  ;;  %v3565_v24 = vrot.slane %v3564_v58, 1  ;;  %7529 = vpow2.f32 %v3689_v9  ;;  %v11086_v47 = vld [vmem:[#allocation86_spill] sm:$0xff] }
 0x56b   :  { %v3570_v23 = vrot.slane %v3569_v11, 2  ;;  %v6829_v28 = vpop.f32.mrb[102].mxu0  ;;  %v3576_v54 = vmax.f32 %v3574_v38, %v3575_v4  ;;  %v3581_v63 = vmax.f32 %v9569_v21, %v9566_v57 }
 0x56c   :  { %v3691_v8 = vmul.f32 1.442695, %v3655_v26  ;;  %v3693_v22 = vmul.f32 1.442695, %v3656_v35  ;;  %v3566_v7 = vmax.f32 %v3564_v58, %v3565_v24  ;;  %v9577_v9 = vadd.f32 %v6829_v28, %v11086_v47  ;;  %v3418_v0 = vpop.f32.mrb[103].mxu0  ;;  %v11087_v58 = vld [vmem:[#allocation87_spill] sm:$0xff] }
 0x56d   :  { %v3571_v50 = vmax.f32 %v3569_v11, %v3570_v23  ;;  %v9582_v35 = vadd.f32 %v3418_v0, %v11087_v58  ;;  %v3582_v11 = vrot.slane %v3581_v63, 4  ;;  %v11088_v47 = vld [vmem:[#allocation88_spill] sm:$0xff]  ;;  %v11090_v58 = vld [vmem:[#allocation91_spill] sm:$0xff] }
 0x56e   :  { %7531 = vpow2.f32 %v3691_v8  ;;  %v3657_v62 = vsub.f32 %v9545_v2, %v3566_v7  ;;  %v3658_v26 = vsub.f32 %v9542_v48, %v3566_v7  ;;  %v11089_v48 = vld [vmem:[#allocation90_spill] sm:$0xff] }
 0x56f   :  { %v7524_v43 = vpop.eup %7523  ;;  %7533 = vpow2.f32 %v3693_v22  ;;  %v3572_v24 = vrot.slane %v3571_v50, 1  ;;  %v3588_v4 = vmax.f32 %v9582_v35, %v9577_v9  ;;  %v6832_v28 = vpop.f32.mrb[104].mxu0  ;;  %v3583_v34 = vmax.f32 %v3581_v63, %v3582_v11 }
 0x570   :  { %v9572_v5 = vmul.f32 %v7524_v43, %v11085_v59  ;;  %v7526_v39 = vpop.eup %7525  ;;  %v3577_v43 = vrot.slane %v3576_v54, 2  ;;  %v3695_v38 = vmul.f32 1.442695, %v3657_v62  ;;  %v3697_v23 = vmul.f32 1.442695, %v3658_v26  ;;  %v3428_v0 = vpop.f32.mrb[105].mxu0 }
 0x571   :  { %v9587_v59 = vmul.f32 %v7526_v39, %v11088_v47  ;;  %v3573_v8 = vmax.f32 %v3571_v50, %v3572_v24  ;;  %v9590_v7 = vadd.f32 %v6832_v28, %v11089_v48  ;;  %v3589_v22 = vrot.slane %v3588_v4, 4 }
 0x572   :  { %v3578_v2 = vmax.f32 %v3576_v54, %v3577_v43  ;;  %7535 = vpow2.f32 %v3695_v38  ;;  %v9593_v17 = vadd.f32 %v3428_v0, %v11090_v58  ;;  %v3584_v63 = vrot.slane %v3583_v34, 2 }
 0x573   :  { %v3779_v62 = vadd.f32 %v9587_v59, %v9572_v5  ;;  %7537 = vpow2.f32 %v3697_v23  ;;  %v3659_v26 = vsub.f32 %v9553_v10, %v3573_v8  ;;  %v3660_v39 = vsub.f32 %v9550_v45, %v3573_v8  ;;  %v9599_v54 = vpop.eup %7527  ;;  %v6835_v11 = vpop.f32.mrb[106].mxu0  ;;  %v11091_v23 = vld [vmem:[#allocation94_spill] sm:$0xff] }
 0x574   :  { %v3579_v50 = vrot.slane %v3578_v2, 1  ;;  %v3590_v24 = vmax.f32 %v3588_v4, %v3589_v22  ;;  %v3595_v43 = vmax.f32 %v9593_v17, %v9590_v7  ;;  %v9603_v28 = vpop.eup %7529  ;;  %v9606_v47 = vadd.f32 %v6835_v11, %v11091_v23  ;;  %v3438_v10 = vpop.f32.mrb[107].mxu0 }
 0x575   :  { %v3780_v38 = vrot.slane %v3779_v62, 4  ;;  %v3699_v0 = vmul.f32 1.442695, %v3659_v26  ;;  %v3701_v58 = vmul.f32 1.442695, %v3660_v39  ;;  %v3585_v45 = vmax.f32 %v3583_v34, %v3584_v63 }
 0x576   :  { %v3580_v48 = vmax.f32 %v3578_v2, %v3579_v50  ;;  %v3591_v8 = vrot.slane %v3590_v24, 2  ;;  %v3596_v13 = vrot.slane %v3595_v43, 4  ;;  %v9609_v30 = vadd.f32 %v3438_v10, %v11092_v37 }
 0x577   :  { %7539 = vpow2.f32 %v3699_v0  ;;  %v3781_v42 = vadd.f32 %v3780_v38, %v3779_v62  ;;  %v3586_v2 = vrot.slane %v3585_v45, 1  ;;  %v6838_v50 = vpop.f32.mrb[108].mxu0  ;;  %v11093_v0 = vld [vmem:[#allocation98_spill] sm:$0xff]  ;;  %v11094_v38 = vld [vmem:[#allocation99_spill] sm:$0xff] }
 0x578   :  { %v3661_v4 = vsub.f32 %v9561_v60, %v3580_v48  ;;  %v3662_v22 = vsub.f32 %v9558_v14, %v3580_v48  ;;  %v9613_v29 = vpop.eup %7531  ;;  %7541 = vpow2.f32 %v3701_v58  ;;  %v3592_v26 = vmax.f32 %v3590_v24, %v3591_v8  ;;  %v3448_v60 = vpop.f32.mrb[109].mxu0 }
 0x579   :  { %v3597_v39 = vmax.f32 %v3595_v43, %v3596_v13  ;;  %v9615_v11 = vpop.eup %7533  ;;  %v3602_v10 = vmax.f32 %v9609_v30, %v9606_v47  ;;  %v9620_v37 = vadd.f32 %v6838_v50, %v11093_v0  ;;  %v3587_v14 = vmax.f32 %v3585_v45, %v3586_v2 }
 0x57a   :  { %v3703_v34 = vmul.f32 1.442695, %v3661_v4  ;;  %v3705_v63 = vmul.f32 1.442695, %v3662_v22  ;;  %v3593_v48 = vrot.slane %v3592_v26, 1  ;;  %v9623_v58 = vadd.f32 %v3448_v60, %v11094_v38  ;;  %v11095_v38 = vld [vmem:[#allocation102_spill] sm:$0xff] }
 0x57b   :  { %v3598_v62 = vrot.slane %v3597_v39, 2  ;;  %v3603_v13 = vrot.slane %v3602_v10, 4  ;;  %v3782_v24 = vrot.slane %v3781_v42, 2  ;;  %v3663_v8 = vsub.f32 %v9569_v21, %v3587_v14  ;;  %v6841_v50 = vpop.f32.mrb[110].mxu0 }
 0x57c   :  { %7543 = vpow2.f32 %v3703_v34  ;;  %v9625_v43 = vpop.eup %7535  ;;  %v3664_v4 = vsub.f32 %v9566_v57, %v3587_v14  ;;  %v3594_v22 = vmax.f32 %v3592_v26, %v3593_v48  ;;  %v3609_v60 = vmax.f32 %v9623_v58, %v9620_v37  ;;  %v3458_v23 = vpop.f32.mrb[111].mxu0  ;;  %v11096_v48 = vld [vmem:[#allocation103_spill] sm:$0xff] }
 0x57d   :  { %7545 = vpow2.f32 %v3705_v63  ;;  %v9629_v0 = vpop.eup %7537  ;;  %v3599_v45 = vmax.f32 %v3597_v39, %v3598_v62  ;;  %v3604_v2 = vmax.f32 %v3602_v10, %v3603_v13  ;;  %v9634_v34 = vadd.f32 %v6841_v50, %v11095_v38  ;;  %v11097_v13 = vld [vmem:[#allocation93_spill] sm:$0xff] }
 0x57e   :  { %v3707_v49 = vmul.f32 1.442695, %v3663_v8  ;;  %v3709_v3 = vmul.f32 1.442695, %v3664_v4  ;;  %v3665_v63 = vsub.f32 %v9582_v35, %v3594_v22  ;;  %v3666_v21 = vsub.f32 %v9577_v9, %v3594_v22 }
 0x57f   :  { %v3600_v57 = vrot.slane %v3599_v45, 1  ;;  %v3605_v26 = vrot.slane %v3604_v2, 2  ;;  %v3610_v14 = vrot.slane %v3609_v60, 4  ;;  %v9639_v46 = vadd.f32 %v3458_v23, %v11096_v48  ;;  %v6844_v62 = vpop.f32.mrb[112].mxu0  ;;  %v11098_v23 = vld [vmem:[#allocation106_spill] sm:$0xff] }
 0x580   :  { %7547 = vpow2.f32 %v3707_v49  ;;  %v3711_v39 = vmul.f32 1.442695, %v3665_v63  ;;  %v3713_v10 = vmul.f32 1.442695, %v3666_v21  ;;  %v9643_v50 = vmul.f32 %v9599_v54, %v11097_v13  ;;  %v3468_v9 = vpop.f32.mrb[113].mxu0  ;;  %v11099_v21 = vld [vmem:[#allocation107_spill] sm:$0xff] }
 0x581   :  { %v9645_v8 = vpop.eup %7539  ;;  %v3601_v4 = vmax.f32 %v3599_v45, %v3600_v57  ;;  %v3606_v35 = vmax.f32 %v3604_v2, %v3605_v26  ;;  %v3611_v38 = vmax.f32 %v3609_v60, %v3610_v14  ;;  %v3783_v22 = vadd.f32 %v3782_v24, %v3781_v42 }
 0x582   :  { %v9647_v44 = vpop.eup %7541  ;;  %7549 = vpow2.f32 %v3709_v3  ;;  %v3616_v49 = vmax.f32 %v9639_v46, %v9634_v34  ;;  %v9652_v63 = vadd.f32 %v6844_v62, %v11098_v23  ;;  %v9655_v48 = vadd.f32 %v3468_v9, %v11099_v21  ;;  %v11100_v9 = vld [vmem:[#allocation110_spill] sm:$0xff]  ;;  %v11101_v23 = vld [vmem:[#allocation111_spill] sm:$0xff] }
 0x583   :  { %7551 = vpow2.f32 %v3711_v39  ;;  %v3667_v54 = vsub.f32 %v9593_v17, %v3601_v4  ;;  %v3668_v45 = vsub.f32 %v9590_v7, %v3601_v4  ;;  %v3607_v2 = vrot.slane %v3606_v35, 1  ;;  %v6847_v60 = vpop.f32.mrb[114].mxu0 }
 0x584   :  { %7553 = vpow2.f32 %v3713_v10  ;;  %v3612_v42 = vrot.slane %v3611_v38, 2  ;;  %v3617_v24 = vrot.slane %v3616_v49, 4  ;;  %v3623_v3 = vmax.f32 %v9655_v48, %v9652_v63  ;;  %v3478_v39 = vpop.f32.mrb[115].mxu0 }
 0x585   :  { %v3715_v26 = vmul.f32 1.442695, %v3667_v54  ;;  %v3717_v14 = vmul.f32 1.442695, %v3668_v45  ;;  %v3608_v62 = vmax.f32 %v3606_v35, %v3607_v2  ;;  %v9664_v21 = vadd.f32 %v6847_v60, %v11100_v9 }
 0x586   :  { %v9661_v57 = vpop.eup %7543  ;;  %v3613_v7 = vmax.f32 %v3611_v38, %v3612_v42  ;;  %v3618_v4 = vmax.f32 %v3616_v49, %v3617_v24  ;;  %v3624_v10 = vrot.slane %v3623_v3, 4  ;;  %v9669_v13 = vadd.f32 %v3478_v39, %v11101_v23  ;;  %v11102_v49 = vld [vmem:[#allocation114_spill] sm:$0xff] }
 0x587   :  { %v9666_v17 = vpop.eup %7545  ;;  %7555 = vpow2.f32 %v3715_v26  ;;  %v3669_v36 = vsub.f32 %v9609_v30, %v3608_v62  ;;  %v3670_v53 = vsub.f32 %v9606_v47, %v3608_v62  ;;  %v3784_v54 = vrot.slane %v3783_v22, 1  ;;  %v6850_v60 = vpop.f32.mrb[116].mxu0  ;;  %v11103_v62 = vld [vmem:[#allocation115_spill] sm:$0xff] }
 0x588   :  { %7557 = vpow2.f32 %v3717_v14  ;;  %v3614_v35 = vrot.slane %v3613_v7, 1  ;;  %v3619_v45 = vrot.slane %v3618_v4, 2  ;;  %v3625_v2 = vmax.f32 %v3623_v3, %v3624_v10  ;;  %v3488_v24 = vpop.f32.mrb[117].mxu0 }
 0x589   :  { %v3719_v9 = vmul.f32 1.442695, %v3669_v36  ;;  %v3721_v52 = vmul.f32 1.442695, %v3670_v53  ;;  %v3630_v38 = vmax.f32 %v9669_v13, %v9664_v21  ;;  %v9676_v42 = vadd.f32 %v6850_v60, %v11102_v49  ;;  %v11104_v53 = vld [vmem:[#allocation92_spill] sm:$0xff] }
 0x58a   :  { %v9678_v26 = vpop.eup %7547  ;;  %v3615_v30 = vmax.f32 %v3613_v7, %v3614_v35  ;;  %v3620_v39 = vmax.f32 %v3618_v4, %v3619_v45  ;;  %v3626_v47 = vrot.slane %v3625_v2, 2  ;;  %v9681_v14 = vadd.f32 %v3488_v24, %v11103_v62 }
 0x58b   :  { %7559 = vpow2.f32 %v3719_v9  ;;  %v3631_v3 = vrot.slane %v3630_v38, 4  ;;  %v9683_v10 = vadd.f32 %v3784_v54, %v3783_v22  ;;  %v9687_v36 = vmul.f32 %v9603_v28, %v11104_v53  ;;  %v6853_v35 = vpop.f32.mrb[118].mxu0 }
 0x58c   :  { %v9689_v23 = vpop.eup %7549  ;;  %7561 = vpow2.f32 %v3721_v52  ;;  %v3671_v60 = vsub.f32 %v9623_v58, %v3615_v30  ;;  %v3672_v7 = vsub.f32 %v9620_v37, %v3615_v30  ;;  %v3621_v4 = vrot.slane %v3620_v39, 1  ;;  %v3498_v28 = vpop.f32.mrb[119].mxu0 }
 0x58d   :  { %v9693_v45 = vpop.eup %7551  ;;  %v3627_v24 = vmax.f32 %v3625_v2, %v3626_v47  ;;  %v3632_v9 = vmax.f32 %v3630_v38, %v3631_v3  ;;  %v3637_v22 = vmax.f32 %v9681_v14, %v9676_v42  ;;  %v9698_v54 = vadd.f32 %v6853_v35, %v8912_v33 }
 0x58e   :  { %v9700_v53 = vpop.eup %7553  ;;  %v3723_v52 = vmul.f32 1.442695, %v3671_v60  ;;  %v3725_v62 = vmul.f32 1.442695, %v3672_v7  ;;  %v3622_v58 = vmax.f32 %v3620_v39, %v3621_v4  ;;  %v9703_v37 = vadd.f32 %v3498_v28, %v8919_v20 }
 0x58f   :  { %v3628_v30 = vrot.slane %v3627_v24, 1  ;;  %v3633_v49 = vrot.slane %v3632_v9, 2  ;;  %v3638_v15 = vrot.slane %v3637_v22, 4  ;;  %7563 = vrcp.f32 %v9683_v10 }
 0x590   :  { %7565 = vpow2.f32 %v3723_v52  ;;  %v3673_v2 = vsub.f32 %v9639_v46, %v3622_v58  ;;  %v3674_v38 = vsub.f32 %v9634_v34, %v3622_v58  ;;  %v3644_v47 = vmax.f32 %v9703_v37, %v9698_v54 }
 0x591   :  { %v9710_v3 = vpop.eup %7555  ;;  %7567 = vpow2.f32 %v3725_v62  ;;  %v3629_v39 = vmax.f32 %v3627_v24, %v3628_v30  ;;  %v3634_v60 = vmax.f32 %v3632_v9, %v3633_v49  ;;  %v3639_v7 = vmax.f32 %v3637_v22, %v3638_v15  ;;  %v11105_v15 = vld [vmem:[#allocation97_spill] sm:$0xff] }
 0x592   :  { %vm3891_vm13 = vcmp.gt.f32.partialorder %v9683_v10, 0.0  ;;  %v9713_v4 = vpop.eup %7557  ;;  %v3727_v35 = vmul.f32 1.442695, %v3673_v2  ;;  %v3729_v28 = vmul.f32 1.442695, %v3674_v38  ;;  %v3645_v52 = vrot.slane %v3644_v47, 4 }
 0x593   :  { %v3786_v46 = vadd.f32 %v9687_v36, %v9643_v50  ;;  %v3675_v34 = vsub.f32 %v9655_v48, %v3629_v39  ;;  %v3676_v58 = vsub.f32 %v9652_v63, %v3629_v39  ;;  %v3635_v20 = vrot.slane %v3634_v60, 1  ;;  %v11106_v39 = vld [vmem:[#allocation96_spill] sm:$0xff] }
 0x594   :  { %v3640_v33 = vrot.slane %v3639_v7, 2  ;;  %7569 = vpow2.f32 %v3727_v35  ;;  %v3646_v62 = vmax.f32 %v3644_v47, %v3645_v52  ;;  %v9721_v24 = vmul.f32 %v9613_v29, %v11105_v15  ;;  %v11107_v52 = vld [vmem:[#allocation101_spill] sm:$0xff] }
 0x595   :  { %v3787_v49 = vrot.slane %v3786_v46, 4  ;;  %v9723_v9 = vpop.eup %7559  ;;  %7571 = vpow2.f32 %v3729_v28  ;;  %v3731_v22 = vmul.f32 1.442695, %v3675_v34  ;;  %v3733_v30 = vmul.f32 1.442695, %v3676_v58  ;;  %v11108_v58 = vld [vmem:[#allocation100_spill] sm:$0xff] }
 0x596   :  { %v3636_v2 = vmax.f32 %v3634_v60, %v3635_v20  ;;  %v9725_v38 = vpop.eup %7561  ;;  %v3641_v48 = vmax.f32 %v3639_v7, %v3640_v33  ;;  %v3647_v27 = vrot.slane %v3646_v62, 2  ;;  %v9729_v35 = vmul.f32 %v9615_v11, %v11106_v39  ;;  %v11123_v15 = vld [vmem:[#allocation125_spill] sm:$0xff] }
 0x597   :  { %v3788_v63 = vadd.f32 %v3787_v49, %v3786_v46  ;;  %7573 = vpow2.f32 %v3731_v22  ;;  %v9735_v28 = vmul.f32 %v9625_v43, %v11107_v52  ;;  %v9741_v49 = vmul.f32 %v9629_v0, %v11108_v58  ;;  %v11122_v52 = vld [vmem:[#allocation124_spill] sm:$0xff] }
 0x598   :  { %v3677_v47 = vsub.f32 %v9669_v13, %v3636_v2  ;;  %v3678_v29 = vsub.f32 %v9664_v21, %v3636_v2  ;;  %7575 = vpow2.f32 %v3733_v30  ;;  %v3642_v20 = vrot.slane %v3641_v48, 1 }
 0x599   :  { %v3648_v60 = vmax.f32 %v3646_v62, %v3647_v27  ;;  %v3789_v34 = vrot.slane %v3788_v63, 2  ;;  %v7564_v33 = vpop.eup %7563  ;;  %v3793_v11 = vadd.f32 %v9729_v35, %v9721_v24  ;;  %v3800_v10 = vadd.f32 %v9741_v49, %v9735_v28 }
 0x59a   :  { %v3735_v7 = vmul.f32 1.442695, %v3677_v47  ;;  %v3737_v46 = vmul.f32 1.442695, %v3678_v29  ;;  %v9743_v13 = vpop.eup %7565  ;;  %v3643_v21 = vmax.f32 %v3641_v48, %v3642_v20  ;;  %v3923_v43 = vsel %vm3891_vm13, %v7564_v33, 0.0 }
 0x59b   :  { %v3649_v22 = vrot.slane %v3648_v60, 1  ;;  %v3790_v30 = vadd.f32 %v3789_v34, %v3788_v63  ;;  %v9747_v27 = vpop.eup %7567  ;;  %v3939_v62 = vmul.f32 %v3923_v43, %v9572_v5  ;;  %v3940_v2 = vmul.f32 %v3923_v43, %v9587_v59  ;;  %v11109_v63 = vld [vmem:[#allocation105_spill] sm:$0xff] }
 0x59c   :  { %7577 = vpow2.f32 %v3735_v7  ;;  %v3794_v47 = vrot.slane %v3793_v11, 4  ;;  %v3679_v0 = vsub.f32 %v9681_v14, %v3643_v21  ;;  %v3680_v29 = vsub.f32 %v9676_v42, %v3643_v21 }
 0x59d   :  { %7579 = vpow2.f32 %v3737_v46  ;;  %v3650_v58 = vmax.f32 %v3648_v60, %v3649_v22  ;;  %6886 = vmatprep.mubr.f32.mxu1 %v3939_v62  ;;  %v3791_v48 = vrot.slane %v3790_v30, 1  ;;  %v9757_v34 = vmul.f32 %v9645_v8, %v11109_v63 }
 0x59e   :  { %v3795_v20 = vadd.f32 %v3794_v47, %v3793_v11  ;;  %v9759_v5 = vpop.eup %7569  ;;  %v3739_v59 = vmul.f32 1.442695, %v3679_v0  ;;  %v3741_v33 = vmul.f32 1.442695, %v3680_v29  ;;  %6887 = vmatmul.mubr.f32.vlgmr.msra.gmra.mrb[76].mxu1 %v3940_v2  ;;  %v3801_v11 = vrot.slane %v3800_v10, 4  ;;  %v11111_v29 = vld [vmem:[#allocation112_spill] sm:$0xff] }
 0x59f   :  { %v3681_v7 = vsub.f32 %v9703_v37, %v3650_v58  ;;  %v3682_v14 = vsub.f32 %v9698_v54, %v3650_v58  ;;  %v9763_v42 = vpop.eup %7571  ;;  %v9765_v60 = vadd.f32 %v3791_v48, %v3790_v30  ;;  %v9769_v21 = vmul.f32 %v9647_v44, %v8742_v18  ;;  %v11110_v44 = vld [vmem:[#allocation108_spill] sm:$0xff] }
 0x5a0   :  { %v3796_v46 = vrot.slane %v3795_v20, 2  ;;  %7581 = vpow2.f32 %v3739_v59  ;;  %v9773_v43 = vmul.f32 %v9661_v57, %v8785_v41  ;;  %v3802_v58 = vadd.f32 %v3801_v11, %v3800_v10  ;;  %v11112_v59 = vld [vmem:[#allocation117_spill] sm:$0xff] }
 0x5a1   :  { %v3743_v8 = vmul.f32 1.442695, %v3681_v7  ;;  %v3745_v22 = vmul.f32 1.442695, %v3682_v14  ;;  %v9775_v37 = vpop.eup %7573  ;;  %7583 = vpow2.f32 %v3741_v33  ;;  %v3807_v62 = vadd.f32 %v9769_v21, %v9757_v34 }
 0x5a2   :  { %v3797_v54 = vadd.f32 %v3796_v46, %v3795_v20  ;;  %v9777_v30 = vpop.eup %7575  ;;  %v9783_v2 = vmul.f32 %v9666_v17, %v11110_v44  ;;  %v9787_v47 = vmul.f32 %v9678_v26, %v8840_v56  ;;  %v3803_v0 = vrot.slane %v3802_v58, 2  ;;  %v11113_v46 = vld [vmem:[#allocation116_spill] sm:$0xff]  ;;  %v11118_v44 = vld [vmem:[#allocation122_spill] sm:$0xff] }
 0x5a3   :  { %7585 = vpow2.f32 %v3743_v8  ;;  %v9791_v48 = vmul.f32 %v9689_v23, %v11111_v29  ;;  %v3808_v20 = vrot.slane %v3807_v62, 4  ;;  %v9798_v17 = vmul.f32 %v9693_v45, %v11112_v59  ;;  %v11114_v29 = vld [vmem:[#allocation120_spill] sm:$0xff]  ;;  %v11116_v45 = vld [vmem:[#allocation121_spill] sm:$0xff] }
 0x5a4   :  { %7587 = vpow2.f32 %v3745_v22  ;;  %v3798_v57 = vrot.slane %v3797_v54, 1  ;;  %v3814_v10 = vadd.f32 %v9783_v2, %v9773_v43  ;;  %v3804_v7 = vadd.f32 %v3803_v0, %v3802_v58 }
 0x5a5   :  { %7589 = vrcp.f32 %v9765_v60  ;;  %v3821_v14 = vadd.f32 %v9791_v48, %v9787_v47  ;;  %v9806_v23 = vmul.f32 %v9700_v53, %v11113_v46  ;;  %v3809_v8 = vadd.f32 %v3808_v20, %v3807_v62 }
 0x5a6   :  { %v9800_v33 = vpop.eup %7577  ;;  %v3799_v26 = vadd.f32 %v3798_v57, %v3797_v54  ;;  %v3815_v22 = vrot.slane %v3814_v10, 4  ;;  %v9812_v56 = vmul.f32 %v9710_v3, %v11114_v29  ;;  %v9816_v59 = vmul.f32 %v9713_v4, %v11116_v45  ;;  %v11120_v29 = vld [vmem:[#allocation123_spill] sm:$0xff] }
 0x5a7   :  { %v9808_v11 = vpop.eup %7579  ;;  %v3805_v54 = vrot.slane %v3804_v7, 1  ;;  %v3822_v58 = vrot.slane %v3821_v14, 4  ;;  %v3810_v57 = vrot.slane %v3809_v8, 2  ;;  %v3828_v53 = vadd.f32 %v9806_v23, %v9798_v17 }
 0x5a8   :  { %11115 = vst [vmem:[#allocation7_spill] sm:$0xff] %v9812_v56  ;;  %11117 = vst [vmem:[#allocation9_spill] sm:$0xff] %v9816_v59  ;;  %7591 = vrcp.f32 %v3799_v26  ;;  %v3816_v0 = vadd.f32 %v3815_v22, %v3814_v10  ;;  %v3835_v62 = vadd.f32 %v9816_v59, %v9812_v56  ;;  %v9824_v3 = vmul.f32 %v9723_v9, %v11118_v44 }
 0x5a9   :  { %v3806_v20 = vadd.f32 %v3805_v54, %v3804_v7  ;;  %v3823_v46 = vadd.f32 %v3822_v58, %v3821_v14  ;;  %v9828_v4 = vmul.f32 %v9725_v38, %v11120_v29  ;;  %v3811_v41 = vadd.f32 %v3810_v57, %v3809_v8 }
 0x5aa   :  { %11119 = vst [vmem:[#allocation11_spill] sm:$0xff] %v9824_v3  ;;  %v9830_v45 = vpop.eup %7581  ;;  %v3817_v10 = vrot.slane %v3816_v0, 2  ;;  %v3829_v22 = vrot.slane %v3828_v53, 4  ;;  %v3836_v18 = vrot.slane %v3835_v62, 4  ;;  %vm3892_vm14 = vcmp.gt.f32.partialorder %v9765_v60, 0.0 }
 0x5ab   :  { %11121 = vst [vmem:[#allocation13_spill] sm:$0xff] %v9828_v4  ;;  %v9832_v63 = vpop.eup %7583  ;;  %7593 = vrcp.f32 %v3806_v20  ;;  %v3824_v7 = vrot.slane %v3823_v46, 2  ;;  %v3842_v9 = vadd.f32 %v9828_v4, %v9824_v3  ;;  %v3812_v54 = vrot.slane %v3811_v41, 1 }
 0x5ac   :  { %v3818_v38 = vadd.f32 %v3817_v10, %v3816_v0  ;;  %v3830_v58 = vadd.f32 %v3829_v22, %v3828_v53  ;;  %v3837_v29 = vadd.f32 %v3836_v18, %v3835_v62  ;;  %v9843_v39 = vmul.f32 %v9743_v13, %v11122_v52 }
 0x5ad   :  { %v9837_v14 = vpop.eup %7585  ;;  %v3825_v8 = vadd.f32 %v3824_v7, %v3823_v46  ;;  %v3843_v57 = vrot.slane %v3842_v9, 4  ;;  %v9847_v6 = vmul.f32 %v9747_v27, %v11123_v15  ;;  %v3813_v4 = vadd.f32 %v3812_v54, %v3811_v41 }
 0x5ae   :  { %v9839_v44 = vpop.eup %7587  ;;  %v3819_v3 = vrot.slane %v3818_v38, 1  ;;  %v3831_v59 = vrot.slane %v3830_v58, 2  ;;  %v3838_v56 = vrot.slane %v3837_v29, 2  ;;  %vm3893_vm15 = vcmp.gt.f32.partialorder %v3799_v26, 0.0 }
 0x5af   :  { %v7590_v32 = vpop.eup %7589  ;;  %v3826_v0 = vrot.slane %v3825_v8, 1  ;;  %v3844_v53 = vadd.f32 %v3843_v57, %v3842_v9  ;;  %v3849_v46 = vadd.f32 %v9847_v6, %v9843_v39  ;;  %7595 = vrcp.f32 %v3813_v4 }
 0x5b0   :  { %v3924_v18 = vsel %vm3892_vm14, %v7590_v32, 0.0  ;;  %v9855_v10 = vadd.f32 %v3819_v3, %v3818_v38  ;;  %v3832_v22 = vadd.f32 %v3831_v59, %v3830_v58  ;;  %v3839_v7 = vadd.f32 %v3838_v56, %v3837_v29 }
 0x5b1   :  { %v3941_v13 = vmul.f32 %v3924_v18, %v9643_v50  ;;  %v3942_v62 = vmul.f32 %v3924_v18, %v9687_v36  ;;  %v9857_v41 = vadd.f32 %v3826_v0, %v3825_v8  ;;  %v3845_v60 = vrot.slane %v3844_v53, 2 }
 0x5b2   :  { %v7592_v27 = vpop.eup %7591  ;;  %v3850_v9 = vrot.slane %v3849_v46, 4  ;;  %vm3894_vm0 = vcmp.gt.f32.partialorder %v3806_v20, 0.0  ;;  %7597 = vrcp.f32 %v9855_v10  ;;  %v3833_v36 = vrot.slane %v3832_v22, 1 }
 0x5b3   :  { %6889 = vmatprep.mubr.f32.mxu1 %v3941_v13  ;;  %v3925_v32 = vsel %vm3893_vm15, %v7592_v27, 0.0  ;;  %7599 = vrcp.f32 %v9857_v41  ;;  %v3840_v26 = vrot.slane %v3839_v7, 1  ;;  %v9865_v59 = vmul.f32 %v9759_v5, %v9037_v40 }
 0x5b4   :  { %6890 = vmatmul.mubr.f32.gmra.mrb[78].mxu1 %v3942_v62  ;;  %v3943_v54 = vmul.f32 %v3925_v32, %v9721_v24  ;;  %v3944_v50 = vmul.f32 %v3925_v32, %v9729_v35  ;;  %v3846_v29 = vadd.f32 %v3845_v60, %v3844_v53  ;;  %v3851_v3 = vadd.f32 %v3850_v9, %v3849_v46 }
 0x5b5   :  { %v7594_v56 = vpop.eup %7593  ;;  %v9869_v24 = vmul.f32 %v9763_v42, %v9054_v25  ;;  %v9873_v35 = vmul.f32 %v9775_v37, %v9084_v16  ;;  %v9875_v38 = vadd.f32 %v3833_v36, %v3832_v22  ;;  %v9877_v58 = vadd.f32 %v3840_v26, %v3839_v7 }
 0x5b6   :  { %6892 = vmatprep.mubr.f32.mxu1 %v3943_v54  ;;  %v3926_v20 = vsel %vm3894_vm0, %v7594_v56, 0.0  ;;  %v9881_v5 = vmul.f32 %v9777_v30, %v9094_v12  ;;  %v3847_v42 = vrot.slane %v3846_v29, 1  ;;  %v3852_v18 = vrot.slane %v3851_v3, 2 }
 0x5b7   :  { %v3945_v8 = vmul.f32 %v3926_v20, %v9735_v28  ;;  %v3946_v57 = vmul.f32 %v3926_v20, %v9741_v49  ;;  %vm3895_vm8 = vcmp.gt.f32.partialorder %v3813_v4, 0.0  ;;  %vm3896_vm9 = vcmp.gt.f32.partialorder %v9855_v10, 0.0 }
 0x5b8   :  { %6893 = vmatmul.mubr.f32.gmra.mrb[80].mxu1 %v3944_v50  ;;  %7601 = vrcp.f32 %v9875_v38  ;;  %v3856_v37 = vadd.f32 %v9869_v24, %v9865_v59  ;;  %v9890_v30 = vadd.f32 %v3847_v42, %v3846_v29  ;;  %v3853_v0 = vadd.f32 %v3852_v18, %v3851_v3 }
 0x5b9   :  { %6895 = vmatprep.mubr.f32.mxu1 %v3945_v8  ;;  %7603 = vrcp.f32 %v9877_v58  ;;  %v3863_v28 = vadd.f32 %v9881_v5, %v9873_v35  ;;  %v7596_v49 = vpop.eup %7595  ;;  %vm3897_vm10 = vcmp.gt.f32.partialorder %v9857_v41, 0.0  ;;  %v9897_v53 = vmul.f32 %v9800_v33, %v9112_v55 }
 0x5ba   :  { %v3857_v4 = vrot.slane %v3856_v37, 4  ;;  %v9901_v46 = vmul.f32 %v9808_v11, %v9124_v1  ;;  %v3927_v13 = vsel %vm3895_vm8, %v7596_v49, 0.0  ;;  %7605 = vrcp.f32 %v9890_v30 }
 0x5bb   :  { %v3854_v62 = vrot.slane %v3853_v0, 1  ;;  %v9906_v27 = vmul.f32 %v9830_v45, %v9148_v51  ;;  %v3947_v22 = vmul.f32 %v3927_v13, %v9757_v34  ;;  %v3948_v7 = vmul.f32 %v3927_v13, %v9769_v21 }
 0x5bc   :  { %6896 = vmatmul.mubr.f32.gmra.mrb[82].mxu1 %v3946_v57  ;;  %v3858_v32 = vadd.f32 %v3857_v4, %v3856_v37  ;;  %v3864_v33 = vrot.slane %v3863_v28, 4  ;;  %v7598_v60 = vpop.eup %7597  ;;  %v3870_v11 = vadd.f32 %v9901_v46, %v9897_v53  ;;  %v9916_v54 = vmul.f32 %v9832_v63, %v9159_v31 }
 0x5bd   :  { %v9910_v9 = vadd.f32 %v3854_v62, %v3853_v0  ;;  %v9920_v45 = vmul.f32 %v9837_v14, %v9171_v19  ;;  %v7600_v50 = vpop.eup %7599  ;;  %6898 = vmatprep.mubr.f32.mxu1 %v3947_v22  ;;  %v3928_v34 = vsel %vm3896_vm9, %v7598_v60, 0.0  ;;  %v9926_v26 = vmul.f32 %v9839_v44, %v9187_v61  ;;  %v11126_v60 = vld [vmem:[#allocation11_spill] sm:$0xff] }
 0x5be   :  { %v3859_v21 = vrot.slane %v3858_v32, 2  ;;  %v3865_v36 = vadd.f32 %v3864_v33, %v3863_v28  ;;  %v3949_v56 = vmul.f32 %v3928_v34, %v9773_v43  ;;  %v3950_v63 = vmul.f32 %v3928_v34, %v9783_v2 }
 0x5bf   :  { %v3929_v14 = vsel %vm3897_vm10, %v7600_v50, 0.0  ;;  %7607 = vrcp.f32 %v9910_v9  ;;  %v3871_v8 = vrot.slane %v3870_v11, 4  ;;  %v3877_v44 = vadd.f32 %v9916_v54, %v9906_v27 }
 0x5c0   :  { %6899 = vmatmul.mubr.f32.gmra.mrb[84].mxu1 %v3948_v7  ;;  %v3951_v29 = vmul.f32 %v3929_v14, %v9787_v47  ;;  %v3952_v3 = vmul.f32 %v3929_v14, %v9791_v48  ;;  %v3860_v10 = vadd.f32 %v3859_v21, %v3858_v32  ;;  %v3866_v20 = vrot.slane %v3865_v36, 2 }
 0x5c1   :  { %6901 = vmatprep.mubr.f32.mxu1 %v3949_v56  ;;  %v3884_v43 = vadd.f32 %v9926_v26, %v9920_v45  ;;  %vm3898_vm11 = vcmp.gt.f32.partialorder %v9875_v38, 0.0  ;;  %vm3899_vm12 = vcmp.gt.f32.partialorder %v9877_v58, 0.0  ;;  %vm3900_vm13 = vcmp.gt.f32.partialorder %v9890_v30, 0.0  ;;  %v11124_v38 = vld [vmem:[#allocation7_spill] sm:$0xff]  ;;  %v11125_v58 = vld [vmem:[#allocation9_spill] sm:$0xff] }
 0x5c2   :  { %v7602_v2 = vpop.eup %7601  ;;  %v3861_v47 = vrot.slane %v3860_v10, 1  ;;  %v3867_v57 = vadd.f32 %v3866_v20, %v3865_v36  ;;  %v3872_v42 = vadd.f32 %v3871_v8, %v3870_v11  ;;  %v3878_v18 = vrot.slane %v3877_v44, 4 }
 0x5c3   :  { %v7604_v48 = vpop.eup %7603  ;;  %v3930_v41 = vsel %vm3898_vm11, %v7602_v2, 0.0  ;;  %v3885_v36 = vrot.slane %v3884_v43, 4  ;;  %vm3901_vm14 = vcmp.gt.f32.partialorder %v9910_v9, 0.0 }
 0x5c4   :  { %6902 = vmatmul.mubr.f32.gmra.mrb[86].mxu1 %v3950_v63  ;;  %v3953_v37 = vmul.f32 %v3930_v41, %v9798_v17  ;;  %v3954_v0 = vmul.f32 %v3930_v41, %v9806_v23  ;;  %v3931_v28 = vsel %vm3899_vm12, %v7604_v48, 0.0  ;;  %v3862_v49 = vadd.f32 %v3861_v47, %v3860_v10  ;;  %v7606_v4 = vpop.eup %7605  ;;  %v11127_v17 = vld [vmem:[#allocation13_spill] sm:$0xff] }
 0x5c5   :  { %6904 = vmatprep.mubr.f32.mxu1 %v3951_v29  ;;  %v3955_v13 = vmul.f32 %v3931_v28, %v11124_v38  ;;  %v3956_v62 = vmul.f32 %v3931_v28, %v11125_v58  ;;  %v3868_v22 = vrot.slane %v3867_v57, 1  ;;  %v3873_v7 = vrot.slane %v3872_v42, 2 }
 0x5c6   :  { %v3932_v32 = vsel %vm3900_vm13, %v7606_v4, 0.0  ;;  %7609 = vrcp.f32 %v3862_v49  ;;  %v3879_v33 = vadd.f32 %v3878_v18, %v3877_v44  ;;  %v3886_v30 = vadd.f32 %v3885_v36, %v3884_v43 }
 0x5c7   :  { %v3957_v11 = vmul.f32 %v3932_v32, %v11126_v60  ;;  %v3958_v50 = vmul.f32 %v3932_v32, %v11127_v17  ;;  %v3869_v23 = vadd.f32 %v3868_v22, %v3867_v57  ;;  %v3874_v34 = vadd.f32 %v3873_v7, %v3872_v42  ;;  %v4364_v22 = vld [vmem:[%s10790_s4 + $0x340] sm:$0xff]  ;;  %v4365_v7 = vld [vmem:[%s10790_s4 + $0x348] sm:$0xff]  ;;  %v4367_v60 = vld [vmem:[%s10790_s4 + $0x358] sm:$0xff] }
 0x5c8   :  { %6905 = vmatmul.mubr.f32.gmra.mrb[88].mxu1 %v3952_v3  ;;  %v3880_v21 = vrot.slane %v3879_v33, 2  ;;  %v3887_v44 = vrot.slane %v3886_v30, 2  ;;  %vm3902_vm15 = vcmp.gt.f32.partialorder %v3862_v49, 0.0  ;;  %v7329_v32 = vpack.c.bf16 %v4365_v7, %v4364_v22  ;;  %v4368_v17 = vld [vmem:[%s10790_s4 + $0x360] sm:$0xff] }
 0x5c9   :  { %6907 = vmatprep.mubr.f32.mxu1 %v3953_v37  ;;  %7611 = vrcp.f32 %v3869_v23  ;;  %v3875_v56 = vrot.slane %v3874_v34, 1  ;;  %v7608_v63 = vpop.eup %7607  ;;  %vm3903_vm0 = vcmp.gt.f32.partialorder %v3869_v23, 0.0 }
 0x5ca   :  { %v3881_v14 = vadd.f32 %v3880_v21, %v3879_v33  ;;  %v3933_v29 = vsel %vm3901_vm14, %v7608_v63, 0.0  ;;  %v3888_v47 = vadd.f32 %v3887_v44, %v3886_v30  ;;  %v4366_v33 = vld [vmem:[%s10790_s4 + $0x350] sm:$0xff]  ;;  %v4371_v21 = vld [vmem:[%s10790_s4 + $0x378] sm:$0xff]  ;;  %v4373_v63 = vld [vmem:[%s10790_s4 + $0x388] sm:$0xff] }
 0x5cb   :  { %v3876_v10 = vadd.f32 %v3875_v56, %v3874_v34  ;;  %v3959_v3 = vmul.f32 %v3933_v29, %v9843_v39  ;;  %v3960_v20 = vmul.f32 %v3933_v29, %v9847_v6  ;;  %v4370_v34 = vld [vmem:[%s10790_s4 + $0x370] sm:$0xff]  ;;  %v4372_v56 = vld [vmem:[%s10790_s4 + $0x380] sm:$0xff]  ;;  %v4375_v29 = vld [vmem:[%s10790_s4 + $0x398] sm:$0xff] }
 0x5cc   :  { %6908 = vmatmul.mubr.f32.gmra.mrb[90].mxu1 %v3954_v0  ;;  %v3882_v8 = vrot.slane %v3881_v14, 1  ;;  %v3889_v9 = vrot.slane %v3888_v47, 1  ;;  %v7341_v36 = vpack.c.bf16 %v4371_v21, %v4370_v34  ;;  %v4374_v30 = vld [vmem:[%s10790_s4 + $0x390] sm:$0xff] }
 0x5cd   :  { %6910 = vmatprep.mubr.f32.mxu1 %v3955_v13  ;;  %7613 = vrcp.f32 %v3876_v10  ;;  %vm3904_vm8 = vcmp.gt.f32.partialorder %v3876_v10, 0.0  ;;  %v7349_v10 = vpack.c.bf16 %v4375_v29, %v4374_v30 }
 0x5ce   :  { %v3883_v2 = vadd.f32 %v3882_v8, %v3881_v14  ;;  %v3890_v42 = vadd.f32 %v3889_v9, %v3888_v47  ;;  %v7345_v14 = vpack.c.bf16 %v4373_v63, %v4372_v56  ;;  %v4378_v8 = vld [vmem:[%s10790_s4 + $0x3b0] sm:$0xff]  ;;  %v4381_v9 = vld [vmem:[%s10790_s4 + $0x3c8] sm:$0xff] }
 0x5d0   :  { %6911 = vmatmul.mubr.f32.gmra.mrb[92].mxu1 %v3956_v62  ;;  %v7610_v48 = vpop.eup %7609  ;;  %7615 = vrcp.f32 %v3883_v2  ;;  %vm3905_vm9 = vcmp.gt.f32.partialorder %v3883_v2, 0.0  ;;  %vm3906_vm10 = vcmp.gt.f32.partialorder %v3890_v42, 0.0  ;;  %v4379_v2 = vld [vmem:[%s10790_s4 + $0x3b8] sm:$0xff] }
 0x5d1   :  { %6913 = vmatprep.mubr.f32.mxu1 %v3957_v11  ;;  %v3934_v43 = vsel %vm3902_vm15, %v7610_v48, 0.0  ;;  %7617 = vrcp.f32 %v3890_v42  ;;  %v7333_v11 = vpack.c.bf16 %v4367_v60, %v4366_v33  ;;  %v7357_v47 = vpack.c.bf16 %v4379_v2, %v4378_v8  ;;  %v4380_v48 = vld [vmem:[%s10790_s4 + $0x3c0] sm:$0xff] }
 0x5d2   :  { %v3961_v41 = vmul.f32 %v3934_v43, %v9865_v59  ;;  %v3962_v57 = vmul.f32 %v3934_v43, %v9869_v24  ;;  %v7361_v43 = vpack.c.bf16 %v4381_v9, %v4380_v48 }
 0x5d3   :  { %v7612_v39 = vpop.eup %7611 }
 0x5d4   :  { %6914 = vmatmul.mubr.f32.gmra.mrb[94].mxu1 %v3958_v50  ;;  %v3935_v6 = vsel %vm3903_vm0, %v7612_v39, 0.0  ;;  %v4369_v50 = vld [vmem:[%s10790_s4 + $0x368] sm:$0xff]  ;;  %v4384_v39 = vld [vmem:[%s10790_s4 + $0x3e0] sm:$0xff] }
 0x5d5   :  { %6916 = vmatprep.mubr.f32.mxu1 %v3959_v3  ;;  %v3963_v18 = vmul.f32 %v3935_v6, %v9873_v35  ;;  %v3964_v37 = vmul.f32 %v3935_v6, %v9881_v5  ;;  %v7337_v23 = vpack.c.bf16 %v4369_v50, %v4368_v17  ;;  %v4376_v3 = vld [vmem:[%s10790_s4 + $0x3a0] sm:$0xff]  ;;  %v4385_v6 = vld [vmem:[%s10790_s4 + $0x3e8] sm:$0xff] }
 0x5d7   :  { %v7614_v0 = vpop.eup %7613 }
 0x5d8   :  { %6917 = vmatmul.mubr.f32.gmra.mrb[96].mxu1 %v3960_v20  ;;  %v3936_v28 = vsel %vm3904_vm8, %v7614_v0, 0.0  ;;  %v4377_v20 = vld [vmem:[%s10790_s4 + $0x3a8] sm:$0xff]  ;;  %v4387_v0 = vld [vmem:[%s10790_s4 + $0x3f8] sm:$0xff] }
 0x5d9   :  { %6919 = vmatprep.mubr.f32.mxu1 %v3961_v41  ;;  %v3965_v59 = vmul.f32 %v3936_v28, %v9897_v53  ;;  %v3966_v24 = vmul.f32 %v3936_v28, %v9901_v46  ;;  %v4360_v46 = vld [vmem:[%s10790_s4 + $0x320] sm:$0xff]  ;;  %v7353_v44 = vpack.c.bf16 %v4377_v20, %v4376_v3  ;;  %v4382_v41 = vld [vmem:[%s10790_s4 + $0x3d0] sm:$0xff] }
 0x5da   :  { %v7616_v49 = vpop.eup %7615 }
 0x5db   :  { %v3937_v4 = vsel %vm3905_vm9, %v7616_v49, 0.0  ;;  %v7618_v13 = vpop.eup %7617  ;;  %7354 = vmatprep.subr.bf16.mxu1 %v7353_v44 }
 0x5dc   :  { %6920 = vmatmul.mubr.f32.gmra.mrb[98].mxu1 %v3962_v57  ;;  %v3967_v38 = vmul.f32 %v3937_v4, %v9906_v27  ;;  %v3968_v35 = vmul.f32 %v3937_v4, %v9916_v54  ;;  %v3938_v5 = vsel %vm3906_vm10, %v7618_v13, 0.0  ;;  %v4361_v27 = vld [vmem:[%s10790_s4 + $0x328] sm:$0xff]  ;;  %v4383_v57 = vld [vmem:[%s10790_s4 + $0x3d8] sm:$0xff] }
 0x5dd   :  { %6922 = vmatprep.mubr.f32.mxu1 %v3963_v18  ;;  %v3969_v58 = vmul.f32 %v3938_v5, %v9920_v45  ;;  %v3970_v53 = vmul.f32 %v3938_v5, %v9926_v26  ;;  %v7321_v54 = vpack.c.bf16 %v4361_v27, %v4360_v46  ;;  %v4362_v45 = vld [vmem:[%s10790_s4 + $0x330] sm:$0xff]  ;;  %v4363_v26 = vld [vmem:[%s10790_s4 + $0x338] sm:$0xff]  ;;  %7356 = vmatpush3.bf16.msra.mxu1 %v7353_v44 }
 0x5de   :  { %v7325_v62 = vpack.c.bf16 %v4363_v26, %v4362_v45  ;;  %7358 = vmatprep.subr.bf16.mxu1 %v7357_v47  ;;  %v7365_v42 = vpack.c.bf16 %v4383_v57, %v4382_v41  ;;  %v7369_v18 = vpack.c.bf16 %v4385_v6, %v4384_v39 }
 0x5df   :  { %7322 = vmatprep.subr.bf16.mxu0 %v7321_v54 }
 0x5e0   :  { %6923 = vmatmul.mubr.f32.gmra.mrb[100].mxu1 %v3964_v37  ;;  %7324 = vmatpush3.bf16.msra.mxu0 %v7321_v54  ;;  %v4386_v37 = vld [vmem:[%s10790_s4 + $0x3f0] sm:$0xff] }
 0x5e1   :  { %6925 = vmatprep.mubr.f32.mxu1 %v3965_v59  ;;  %7326 = vmatprep.subr.bf16.mxu0 %v7325_v62  ;;  %v7373_v28 = vpack.c.bf16 %v4387_v0, %v4386_v37 }
 0x5e2   :  { %7360 = vmatpush3.bf16.msra.mxu1 %v7357_v47 }
 0x5e3   :  { %7362 = vmatprep.subr.bf16.mxu1 %v7361_v43 }
 0x5e4   :  { %6926 = vmatmul.mubr.f32.gmra.mrb[102].mxu1 %v3966_v24  ;;  %7328 = vmatpush3.bf16.msra.mxu0 %v7325_v62  ;;  %v11128_v24 = vld [vmem:[#allocation127_spill] sm:$0xff] }
 0x5e5   :  { %6928 = vmatprep.mubr.f32.mxu1 %v3967_v38  ;;  %7330 = vmatprep.subr.bf16.mxu0 %v7329_v32  ;;  %v11129_v38 = vld [vmem:[#allocation126_spill] sm:$0xff] }
 0x5e6   :  { %7364 = vmatpush3.bf16.msra.mxu1 %v7361_v43 }
 0x5e7   :  { %7366 = vmatprep.subr.bf16.mxu1 %v7365_v42 }
 0x5e8   :  { %6929 = vmatmul.mubr.f32.gmra.mrb[104].mxu1 %v3968_v35  ;;  %7332 = vmatpush3.bf16.msra.mxu0 %v7329_v32 }
 0x5e9   :  { %6931 = vmatprep.mubr.f32.mxu1 %v3969_v58  ;;  %7334 = vmatprep.subr.bf16.mxu0 %v7333_v11 }
 0x5ea   :  { %7368 = vmatpush3.bf16.msra.mxu1 %v7365_v42  ;;  %v10060_v42 = vld [vmem:[%s10790_s4 + $0x318] ss:$0 sm:$0xff] }
 0x5eb   :  { %7370 = vmatprep.subr.bf16.mxu1 %v7369_v18 }
 0x5ec   :  { %6932 = vmatmul.mubr.f32.gmra.mrb[106].mxu1 %v3970_v53  ;;  %7336 = vmatpush3.bf16.msra.mxu0 %v7333_v11 }
 0x5ed   :  { %7338 = vmatprep.subr.bf16.mxu0 %v7337_v23 }
 0x5ee   :  { %7372 = vmatpush3.bf16.msra.mxu1 %v7369_v18 }
 0x5ef   :  { %7374 = vmatprep.subr.bf16.mxu1 %v7373_v28 }
 0x5f0   :  { %7340 = vmatpush3.bf16.msra.mxu0 %v7337_v23 }
 0x5f1   :  { %7342 = vmatprep.subr.bf16.mxu0 %v7341_v36 }
 0x5f2   :  { %7376 = vmatpush3.bf16.msra.mxu1 %v7373_v28 }
 0x5f4   :  { %7344 = vmatpush3.bf16.msra.mxu0 %v7341_v36 }
 0x5f5   :  { %7346 = vmatprep.subr.bf16.mxu0 %v7345_v14 }
 0x5f8   :  { %7348 = vmatpush3.bf16.msra.mxu0 %v7345_v14 }
 0x5f9   :  { %7350 = vmatprep.subr.bf16.mxu0 %v7349_v10 }
 0x5fc   :  { %7352 = vmatpush3.bf16.msra.mxu0 %v7349_v10 }
 0x671   :  { %v6888_v59 = vpop.f32.mrb[76].mxu1 }
 0x672   :  { %v4197_v49 = vmul.f32 %v6888_v59, %v11128_v24  ;;  %v4037_v4 = vpop.f32.mrb[77].mxu1 }
 0x673   :  { %v4196_v35 = vmul.f32 %v4037_v4, %v11129_v38 }
 0x675   :  { %v4228_v13 = vadd.f32 %v4197_v49, %v4196_v35 }
 0x677   :  { %v4229_v5 = vrot.slane %v4228_v13, 4 }
 0x679   :  { %v4230_v53 = vadd.f32 %v4229_v5, %v4228_v13 }
 0x67b   :  { %v4231_v62 = vrot.slane %v4230_v53, 2 }
 0x67d   :  { %v4232_v50 = vadd.f32 %v4231_v62, %v4230_v53 }
 0x67f   :  { %v4233_v10 = vrot.slane %v4232_v50, 1 }
 0x681   :  { %v4234_v39 = vadd.f32 %v4233_v10, %v4232_v50 }
 0x683   :  { %v4344_v53 = vadd.f32 %v10060_v42, %v4234_v39 }
 0x687   :  { %v6891_v58 = vpop.f32.mrb[78].mxu1 }
 0x688   :  { %v4199_v46 = vmul.f32 %v6891_v58, %v11128_v24  ;;  %v4047_v27 = vpop.f32.mrb[79].mxu1 }
 0x689   :  { %v4198_v54 = vmul.f32 %v4047_v27, %v11129_v38 }
 0x68b   :  { %v4235_v45 = vadd.f32 %v4199_v46, %v4198_v54  ;;  %v6894_v26 = vpop.f32.mrb[80].mxu1 }
 0x68c   :  { %v4201_v22 = vmul.f32 %v6894_v26, %v11128_v24  ;;  %v4057_v7 = vpop.f32.mrb[81].mxu1 }
 0x68d   :  { %v4236_v32 = vrot.slane %v4235_v45, 4  ;;  %v4200_v33 = vmul.f32 %v4057_v7, %v11129_v38 }
 0x68f   :  { %v4237_v60 = vadd.f32 %v4236_v32, %v4235_v45  ;;  %v4242_v11 = vadd.f32 %v4201_v22, %v4200_v33  ;;  %v6897_v17 = vpop.f32.mrb[82].mxu1 }
 0x690   :  { %v4203_v23 = vmul.f32 %v6897_v17, %v11128_v24  ;;  %v4067_v34 = vpop.f32.mrb[83].mxu1 }
 0x691   :  { %v4238_v21 = vrot.slane %v4237_v60, 2  ;;  %v4243_v36 = vrot.slane %v4242_v11, 4  ;;  %v4202_v56 = vmul.f32 %v4067_v34, %v11129_v38 }
 0x693   :  { %v4239_v63 = vadd.f32 %v4238_v21, %v4237_v60  ;;  %v4244_v14 = vadd.f32 %v4243_v36, %v4242_v11  ;;  %v4249_v30 = vadd.f32 %v4203_v23, %v4202_v56  ;;  %v6900_v29 = vpop.f32.mrb[84].mxu1 }
 0x694   :  { %v4205_v3 = vmul.f32 %v6900_v29, %v11128_v24  ;;  %v4077_v20 = vpop.f32.mrb[85].mxu1 }
 0x695   :  { %v4240_v8 = vrot.slane %v4239_v63, 1  ;;  %v4245_v44 = vrot.slane %v4244_v14, 2  ;;  %v4250_v2 = vrot.slane %v4249_v30, 4  ;;  %v4204_v47 = vmul.f32 %v4077_v20, %v11129_v38 }
 0x697   :  { %v4241_v48 = vadd.f32 %v4240_v8, %v4239_v63  ;;  %v4246_v9 = vadd.f32 %v4245_v44, %v4244_v14  ;;  %v4251_v43 = vadd.f32 %v4250_v2, %v4249_v30  ;;  %v4256_v41 = vadd.f32 %v4205_v3, %v4204_v47  ;;  %v6903_v57 = vpop.f32.mrb[86].mxu1 }
 0x698   :  { %v4207_v6 = vmul.f32 %v6903_v57, %v11128_v24  ;;  %v4087_v18 = vpop.f32.mrb[87].mxu1 }
 0x699   :  { %v4345_v37 = vadd.f32 %v10060_v42, %v4241_v48  ;;  %v4247_v0 = vrot.slane %v4246_v9, 1  ;;  %v4252_v28 = vrot.slane %v4251_v43, 2  ;;  %v4257_v59 = vrot.slane %v4256_v41, 4 }
 0x69a   :  { %v4206_v49 = vmul.f32 %v4087_v18, %v11129_v38 }
 0x69b   :  { %v4430_v4 = vrot.slane %v4345_v37, 7  ;;  %v4248_v35 = vadd.f32 %v4247_v0, %v4246_v9  ;;  %v4253_v13 = vadd.f32 %v4252_v28, %v4251_v43  ;;  %v4258_v5 = vadd.f32 %v4257_v59, %v4256_v41  ;;  %v6906_v58 = vpop.f32.mrb[88].mxu1 }
 0x69c   :  { %v4263_v46 = vadd.f32 %v4207_v6, %v4206_v49  ;;  %v4209_v27 = vmul.f32 %v6906_v58, %v11128_v24  ;;  %v4097_v54 = vpop.f32.mrb[89].mxu1 }
 0x69d   :  { %v4346_v45 = vadd.f32 %v10060_v42, %v4248_v35  ;;  %v4254_v26 = vrot.slane %v4253_v13, 1  ;;  %v4259_v62 = vrot.slane %v4258_v5, 2  ;;  %v4208_v22 = vmul.f32 %v4097_v54, %v11129_v38 }
 0x69e   :  { %v4264_v7 = vrot.slane %v4263_v46, 4  ;;  %v4431_v32 = vsel %vm2799_vm1, %v4430_v4, %v4344_v53 }
 0x69f   :  { %v4432_v33 = vrot.slane %v4346_v45, 6  ;;  %v4255_v60 = vadd.f32 %v4254_v26, %v4253_v13  ;;  %v4260_v11 = vadd.f32 %v4259_v62, %v4258_v5  ;;  %v4270_v17 = vadd.f32 %v4209_v27, %v4208_v22  ;;  %v6909_v50 = vpop.f32.mrb[90].mxu1 }
 0x6a0   :  { %v4265_v23 = vadd.f32 %v4264_v7, %v4263_v46  ;;  %v4211_v34 = vmul.f32 %v6909_v50, %v11128_v24  ;;  %v4107_v21 = vpop.f32.mrb[91].mxu1 }
 0x6a1   :  { %v4347_v36 = vadd.f32 %v10060_v42, %v4255_v60  ;;  %v4261_v56 = vrot.slane %v4260_v11, 1  ;;  %v4271_v63 = vrot.slane %v4270_v17, 4  ;;  %v4210_v14 = vmul.f32 %v4107_v21, %v11129_v38 }
 0x6a2   :  { %v4266_v30 = vrot.slane %v4265_v23, 2  ;;  %v4433_v29 = vsel %vm2802_vm2, %v4432_v33, %v4431_v32 }
 0x6a3   :  { %v4434_v10 = vrot.slane %v4347_v36, 5  ;;  %v4262_v3 = vadd.f32 %v4261_v56, %v4260_v11  ;;  %v4272_v20 = vadd.f32 %v4271_v63, %v4270_v17  ;;  %v4277_v8 = vadd.f32 %v4211_v34, %v4210_v14  ;;  %v6912_v44 = vpop.f32.mrb[92].mxu1 }
 0x6a4   :  { %v4267_v2 = vadd.f32 %v4266_v30, %v4265_v23  ;;  %v4213_v47 = vmul.f32 %v6912_v44, %v11128_v24  ;;  %v4117_v48 = vpop.f32.mrb[93].mxu1 }
 0x6a5   :  { %v4348_v9 = vadd.f32 %v10060_v42, %v4262_v3  ;;  %v4273_v43 = vrot.slane %v4272_v20, 2  ;;  %v4278_v41 = vrot.slane %v4277_v8, 4  ;;  %v4212_v57 = vmul.f32 %v4117_v48, %v11129_v38 }
 0x6a6   :  { %v4268_v39 = vrot.slane %v4267_v2, 1  ;;  %v4435_v6 = vsel %vm2805_vm3, %v4434_v10, %v4433_v29 }
 0x6a7   :  { %v4436_v18 = vrot.slane %v4348_v9, 4  ;;  %v4274_v37 = vadd.f32 %v4273_v43, %v4272_v20  ;;  %v4279_v0 = vadd.f32 %v4278_v41, %v4277_v8  ;;  %v4284_v28 = vadd.f32 %v4213_v47, %v4212_v57  ;;  %v6915_v59 = vpop.f32.mrb[94].mxu1 }
 0x6a8   :  { %v4269_v49 = vadd.f32 %v4268_v39, %v4267_v2  ;;  %v4215_v4 = vmul.f32 %v6915_v59, %v11128_v24  ;;  %v4127_v35 = vpop.f32.mrb[95].mxu1 }
 0x6a9   :  { %v4275_v13 = vrot.slane %v4274_v37, 1  ;;  %v4280_v5 = vrot.slane %v4279_v0, 2  ;;  %v4285_v58 = vrot.slane %v4284_v28, 4  ;;  %v4214_v53 = vmul.f32 %v4127_v35, %v11129_v38 }
 0x6aa   :  { %v4349_v46 = vadd.f32 %v10060_v42, %v4269_v49  ;;  %v4437_v27 = vsel %vm2808_vm4, %v4436_v18, %v4435_v6 }
 0x6ab   :  { %v4276_v54 = vadd.f32 %v4275_v13, %v4274_v37  ;;  %v4281_v45 = vadd.f32 %v4280_v5, %v4279_v0  ;;  %v4286_v26 = vadd.f32 %v4285_v58, %v4284_v28  ;;  %v4291_v62 = vadd.f32 %v4215_v4, %v4214_v53  ;;  %v6918_v22 = vpop.f32.mrb[96].mxu1 }
 0x6ac   :  { %v4217_v7 = vmul.f32 %v6918_v22, %v11128_v24  ;;  %v4137_v32 = vpop.f32.mrb[97].mxu1  ;;  %v4438_v33 = vrot.slane %v4349_v46, 3 }
 0x6ad   :  { %v4282_v60 = vrot.slane %v4281_v45, 1  ;;  %v4287_v11 = vrot.slane %v4286_v26, 2  ;;  %v4292_v17 = vrot.slane %v4291_v62, 4  ;;  %v4216_v50 = vmul.f32 %v4137_v32, %v11129_v38 }
 0x6ae   :  { %v4350_v23 = vadd.f32 %v10060_v42, %v4276_v54  ;;  %v4439_v34 = vsel %vm2811_vm5, %v4438_v33, %v4437_v27 }
 0x6af   :  { %v4283_v21 = vadd.f32 %v4282_v60, %v4281_v45  ;;  %v4288_v36 = vadd.f32 %v4287_v11, %v4286_v26  ;;  %v4293_v56 = vadd.f32 %v4292_v17, %v4291_v62  ;;  %v4298_v63 = vadd.f32 %v4217_v7, %v4216_v50  ;;  %v6921_v14 = vpop.f32.mrb[98].mxu1 }
 0x6b0   :  { %v4219_v30 = vmul.f32 %v6921_v14, %v11128_v24  ;;  %v4147_v29 = vpop.f32.mrb[99].mxu1  ;;  %v4440_v10 = vrot.slane %v4350_v23, 2 }
 0x6b1   :  { %v4294_v3 = vrot.slane %v4293_v56, 2  ;;  %v4299_v20 = vrot.slane %v4298_v63, 4  ;;  %v4218_v8 = vmul.f32 %v4147_v29, %v11129_v38  ;;  %v4289_v44 = vrot.slane %v4288_v36, 1 }
 0x6b2   :  { %v4351_v2 = vadd.f32 %v10060_v42, %v4283_v21  ;;  %v4441_v47 = vsel %vm2814_vm6, %v4440_v10, %v4439_v34 }
 0x6b3   :  { %v4295_v48 = vadd.f32 %v4294_v3, %v4293_v56  ;;  %v4300_v9 = vadd.f32 %v4299_v20, %v4298_v63  ;;  %v4305_v43 = vadd.f32 %v4219_v30, %v4218_v8  ;;  %v6924_v41 = vpop.f32.mrb[100].mxu1  ;;  %v4290_v28 = vadd.f32 %v4289_v44, %v4288_v36 }
 0x6b4   :  { %v4221_v57 = vmul.f32 %v6924_v41, %v11128_v24  ;;  %v4157_v39 = vpop.f32.mrb[101].mxu1  ;;  %v4442_v6 = vrot.slane %v4351_v2, 1 }
 0x6b5   :  { %v4296_v18 = vrot.slane %v4295_v48, 1  ;;  %v4301_v37 = vrot.slane %v4300_v9, 2  ;;  %v4306_v0 = vrot.slane %v4305_v43, 4  ;;  %v4220_v59 = vmul.f32 %v4157_v39, %v11129_v38 }
 0x6b6   :  { %v4443_v49 = vsel %vm2817_vm7, %v4442_v6, %v4441_v47  ;;  %v4352_v62 = vadd.f32 %v10060_v42, %v4290_v28 }
 0x6b7   :  { %v4297_v4 = vadd.f32 %v4296_v18, %v4295_v48  ;;  %v4302_v35 = vadd.f32 %v4301_v37, %v4300_v9  ;;  %v4307_v13 = vadd.f32 %v4306_v0, %v4305_v43  ;;  %6966 = vmatprep.mubr.f32.mxu0 %v4443_v49  ;;  %v6927_v5 = vpop.f32.mrb[102].mxu1  ;;  %v4312_v58 = vadd.f32 %v4221_v57, %v4220_v59 }
 0x6b8   :  { %v4223_v53 = vmul.f32 %v6927_v5, %v11128_v24  ;;  %v4167_v46 = vpop.f32.mrb[103].mxu1 }
 0x6b9   :  { %v4353_v27 = vadd.f32 %v10060_v42, %v4297_v4  ;;  %v4303_v54 = vrot.slane %v4302_v35, 1  ;;  %v4308_v45 = vrot.slane %v4307_v13, 2  ;;  %v4222_v26 = vmul.f32 %v4167_v46, %v11129_v38 }
 0x6ba   :  { %v4313_v22 = vrot.slane %v4312_v58, 4 }
 0x6bb   :  { %v4444_v7 = vrot.slane %v4353_v27, 7  ;;  %v4304_v32 = vadd.f32 %v4303_v54, %v4302_v35  ;;  %v4309_v33 = vadd.f32 %v4308_v45, %v4307_v13  ;;  %v4319_v60 = vadd.f32 %v4223_v53, %v4222_v26  ;;  %v6930_v11 = vpop.f32.mrb[104].mxu1 }
 0x6bc   :  { %v4314_v17 = vadd.f32 %v4313_v22, %v4312_v58  ;;  %v4225_v50 = vmul.f32 %v6930_v11, %v11128_v24  ;;  %v4177_v23 = vpop.f32.mrb[105].mxu1 }
 0x6bd   :  { %v4445_v34 = vsel %vm2799_vm1, %v4444_v7, %v4352_v62  ;;  %v4354_v21 = vadd.f32 %v10060_v42, %v4304_v32  ;;  %v4310_v36 = vrot.slane %v4309_v33, 1  ;;  %v4320_v56 = vrot.slane %v4319_v60, 4 }
 0x6be   :  { %v4315_v63 = vrot.slane %v4314_v17, 2  ;;  %v4224_v14 = vmul.f32 %v4177_v23, %v11129_v38  ;;  %v4388_v23 = vld [vmem:[%s10790_s4 + $0x400] sm:$0xff] }
 0x6bf   :  { %v4446_v30 = vrot.slane %v4354_v21, 6  ;;  %v4311_v29 = vadd.f32 %v4310_v36, %v4309_v33  ;;  %v4321_v10 = vadd.f32 %v4320_v56, %v4319_v60  ;;  %v6933_v3 = vpop.f32.mrb[106].mxu1  ;;  %v4391_v36 = vld [vmem:[%s10790_s4 + $0x418] sm:$0xff] }
 0x6c0   :  { %v4316_v20 = vadd.f32 %v4315_v63, %v4314_v17  ;;  %v4326_v8 = vadd.f32 %v4225_v50, %v4224_v14  ;;  %v4227_v44 = vmul.f32 %v6933_v3, %v11128_v24  ;;  %v4187_v2 = vpop.f32.mrb[107].mxu1 }
 0x6c1   :  { %v4447_v47 = vsel %vm2802_vm2, %v4446_v30, %v4445_v34  ;;  %v4355_v48 = vadd.f32 %v10060_v42, %v4311_v29  ;;  %v4322_v9 = vrot.slane %v4321_v10, 2  ;;  %v4226_v43 = vmul.f32 %v4187_v2, %v11129_v38  ;;  %v4389_v34 = vld [vmem:[%s10790_s4 + $0x408] sm:$0xff]  ;;  %v6117_v30 = vld [vmem:[%s10790_s4 + $0x4a0] ss:$0 sm:$0xff] }
 0x6c2   :  { %v4317_v41 = vrot.slane %v4316_v20, 1  ;;  %v4327_v57 = vrot.slane %v4326_v8, 4  ;;  %v7377_v21 = vpack.c.bf16 %v4389_v34, %v4388_v23 }
 0x6c3   :  { %v4448_v39 = vrot.slane %v4355_v48, 5  ;;  %v4323_v6 = vadd.f32 %v4322_v9, %v4321_v10  ;;  %v4333_v18 = vadd.f32 %v4227_v44, %v4226_v43  ;;  %v11131_v10 = vld [vmem:[#allocation63_spill] sm:$0xff]  ;;  %v11132_v44 = vld [vmem:[#allocation66_spill] sm:$0xff] }
 0x6c4   :  { %v4318_v37 = vadd.f32 %v4317_v41, %v4316_v20  ;;  %v4328_v0 = vadd.f32 %v4327_v57, %v4326_v8  ;;  %7378 = vmatprep.subr.bf16.mxu1 %v7377_v21 }
 0x6c5   :  { %v4324_v28 = vrot.slane %v4323_v6, 1  ;;  %v4334_v59 = vrot.slane %v4333_v18, 4  ;;  %v4449_v49 = vsel %vm2805_vm3, %v4448_v39, %v4447_v47  ;;  %7380 = vmatpush3.bf16.msra.mxu1 %v7377_v21  ;;  %v11139_v21 = vld [vmem:[#allocation20_spill] sm:$0xff] }
 0x6c6   :  { %v4356_v24 = vadd.f32 %v10060_v42, %v4318_v37  ;;  %v4329_v4 = vrot.slane %v4328_v0, 2  ;;  %v11135_v37 = vld [vmem:[#allocation14_spill] sm:$0xff] }
 0x6c7   :  { %v4325_v35 = vadd.f32 %v4324_v28, %v4323_v6  ;;  %v4335_v13 = vadd.f32 %v4334_v59, %v4333_v18  ;;  %v11134_v6 = vld [vmem:[#allocation15_spill] sm:$0xff] }
 0x6c8   :  { %v4450_v5 = vrot.slane %v4356_v24, 4  ;;  %v4330_v58 = vadd.f32 %v4329_v4, %v4328_v0 }
 0x6c9   :  { %v4357_v38 = vadd.f32 %v10060_v42, %v4325_v35  ;;  %v4336_v53 = vrot.slane %v4335_v13, 2 }
 0x6ca   :  { %v4331_v46 = vrot.slane %v4330_v58, 1  ;;  %v4451_v27 = vsel %vm2808_vm4, %v4450_v5, %v4449_v49 }
 0x6cb   :  { %v4452_v54 = vrot.slane %v4357_v38, 3  ;;  %v4337_v45 = vadd.f32 %v4336_v53, %v4335_v13 }
 0x6cc   :  { %v4332_v26 = vadd.f32 %v4331_v46, %v4330_v58 }
 0x6cd   :  { %v4338_v62 = vrot.slane %v4337_v45, 1  ;;  %v4453_v22 = vsel %vm2811_vm5, %v4452_v54, %v4451_v27  ;;  %v11136_v54 = vld [vmem:[#allocation18_spill] sm:$0xff] }
 0x6ce   :  { %v4358_v7 = vadd.f32 %v10060_v42, %v4332_v26 }
 0x6cf   :  { %v4339_v32 = vadd.f32 %v4338_v62, %v4337_v45 }
 0x6d0   :  { %v4454_v33 = vrot.slane %v4358_v7, 2 }
 0x6d1   :  { %v4359_v60 = vadd.f32 %v10060_v42, %v4339_v32  ;;  %v4390_v42 = vld [vmem:[%s10790_s4 + $0x410] sm:$0xff] }
 0x6d2   :  { %v4455_v11 = vsel %vm2814_vm6, %v4454_v33, %v4453_v22  ;;  %v7381_v56 = vpack.c.bf16 %v4391_v36, %v4390_v42  ;;  %v11137_v22 = vld [vmem:[#allocation17_spill] sm:$0xff] }
 0x6d3   :  { %v4456_v17 = vrot.slane %v4359_v60, 1  ;;  %v11138_v60 = vld [vmem:[#allocation21_spill] sm:$0xff] }
 0x6d4   :  { %7382 = vmatprep.subr.bf16.mxu1 %v7381_v56 }
 0x6d5   :  { %v4457_v50 = vsel %vm2817_vm7, %v4456_v17, %v4455_v11  ;;  %7384 = vmatpush3.bf16.msra.mxu1 %v7381_v56 }
 0x6d6   :  { %6967 = vmatmul.mubr.f32.vlgmr.msra.gmra.mrb[120].mxu0 %v4457_v50 }
 0x7a9   :  { %v6968_v63 = vpop.f32.mrb[120].mxu0 }
 0x7aa   :  { %v4526_v14 = vpop.f32.mrb[121].mxu0  ;;  %v10135_v47 = vadd.f32 %v6968_v63, %v6117_v30  ;;  %v11140_v63 = vld [vmem:[#allocation24_spill] sm:$0xff] }
 0x7ab   :  { %v10129_v29 = vadd.f32 %v6117_v30, %v4526_v14 }
 0x7ac   :  { %11133 = vst [vmem:[#allocation19_spill] sm:$0xff] %v10135_v47 }
 0x7ad   :  { %11130 = vst [vmem:[#allocation16_spill] sm:$0xff] %v10129_v29  ;;  %v4576_v3 = vrot.slane %v10129_v29, %v11131_v10  ;;  %v4569_v41 = vcombine.high %v10129_v29, %v10129_v29 }
 0x7af   :  { %v4592_v20 = vrot.slane %v4576_v3, %v11131_v10  ;;  %v4584_v8 = vcombine.high %v4576_v3, %v4576_v3  ;;  %v4583_v28 = vrot.slane %v4569_v41, %v11131_v10  ;;  %v4625_v3 = vrot.slane %v10135_v47, %v11131_v10 }
 0x7b1   :  { %v4670_v2 = vrot.slane %v4592_v20, %v11132_v44  ;;  %v4606_v48 = vrot.slane %v4584_v8, %v11131_v10  ;;  %v4614_v57 = vcombine.high %v4592_v20, %v4592_v20  ;;  %v4585_v13 = vcombine.high %v4583_v28, %v4583_v28 }
 0x7b2   :  { %v4599_v58 = vrot.slane %v4583_v28, %v11131_v10  ;;  %v4633_v28 = vcombine.high %v4625_v3, %v4625_v3 }
 0x7b3   :  { %v4747_v9 = vadd.f32 %v4670_v2, %v10129_v29  ;;  %v4748_v43 = vadd.f32 %v4670_v2, %v10135_v47  ;;  %v4674_v39 = vrot.slane %v4606_v48, %v11132_v44  ;;  %v4616_v59 = vcombine.high %v4606_v48, %v4606_v48 }
 0x7b4   :  { %v4678_v49 = vrot.slane %v4614_v57, %v11132_v44  ;;  %v4613_v26 = vrot.slane %v4585_v13, %v11131_v10  ;;  %v4686_v32 = vrot.slane %v4599_v58, %v11132_v44  ;;  %v4615_v17 = vcombine.high %v4599_v58, %v4599_v58 }
 0x7b5   :  { %v4779_v18 = vadd.f32 %v4747_v9, %v11134_v6  ;;  %v4780_v0 = vadd.f32 %v11135_v37, %v4748_v43  ;;  %v4749_v24 = vadd.f32 %v4674_v39, %v10129_v29  ;;  %v4750_v5 = vadd.f32 %v4674_v39, %v10135_v47  ;;  %v11141_v43 = vld [vmem:[#allocation23_spill] sm:$0xff] }
 0x7b6   :  { %v4682_v38 = vrot.slane %v4616_v59, %v11132_v44  ;;  %v4751_v53 = vadd.f32 %v4678_v49, %v10129_v29  ;;  %v4752_v62 = vadd.f32 %v4678_v49, %v10135_v47  ;;  %v4690_v23 = vrot.slane %v4613_v26, %v11132_v44  ;;  %v11142_v6 = vld [vmem:[#allocation27_spill] sm:$0xff] }
 0x7b7   :  { %vm4812_vm11 = vcmp.gt.f32.partialorder %v4780_v0, 0.0  ;;  %v4843_v4 = vmul.f32 0.2, %v4779_v18  ;;  %v4844_v35 = vmul.f32 0.2, %v4780_v0  ;;  %vm4811_vm12 = vcmp.gt.f32.partialorder %v4779_v18, 0.0 }
 0x7b8   :  { %v4781_v45 = vadd.f32 %v4749_v24, %v11136_v54  ;;  %v4782_v7 = vadd.f32 %v11137_v22, %v4750_v5  ;;  %v4753_v33 = vadd.f32 %v4682_v38, %v10129_v29  ;;  %v4783_v11 = vadd.f32 %v4751_v53, %v11138_v60  ;;  %v11145_v22 = vld [vmem:[#allocation29_spill] sm:$0xff] }
 0x7b9   :  { %v4876_v46 = vsel %vm4812_vm11, %v4780_v0, %v4844_v35  ;;  %v4875_v27 = vsel %vm4811_vm12, %v4779_v18, %v4843_v4  ;;  %v4754_v34 = vadd.f32 %v4682_v38, %v10135_v47  ;;  %v4784_v42 = vadd.f32 %v11139_v21, %v4752_v62  ;;  %v11143_v35 = vld [vmem:[#allocation26_spill] sm:$0xff]  ;;  %v11146_v60 = vld [vmem:[#allocation33_spill] sm:$0xff] }
 0x7ba   :  { %7001 = vmatprep.mubr.f32.mxu1 %v4875_v27  ;;  %v4845_v50 = vmul.f32 0.2, %v4781_v45  ;;  %v4846_v36 = vmul.f32 0.2, %v4782_v7  ;;  %v4755_v56 = vadd.f32 %v4686_v32, %v10129_v29  ;;  %v4785_v14 = vadd.f32 %v4753_v33, %v11140_v63  ;;  %v11144_v38 = vld [vmem:[#allocation30_spill] sm:$0xff] }
 0x7bb   :  { %7002 = vmatmul.mubr.f32.vlgmr.msra.gmra.mrb[108].mxu1 %v4876_v46  ;;  %v4847_v30 = vmul.f32 0.2, %v4783_v11  ;;  %vm4813_vm13 = vcmp.gt.f32.partialorder %v4781_v45, 0.0  ;;  %vm4814_vm14 = vcmp.gt.f32.partialorder %v4782_v7, 0.0  ;;  %vm4815_vm15 = vcmp.gt.f32.partialorder %v4783_v11, 0.0 }
 0x7bc   :  { %v4617_v20 = vcombine.high %v4613_v26, %v4613_v26  ;;  %v4694_v8 = vrot.slane %v4615_v17, %v11132_v44  ;;  %v4756_v2 = vadd.f32 %v4686_v32, %v10135_v47  ;;  %v4877_v48 = vsel %vm4813_vm13, %v4781_v45, %v4845_v50 }
 0x7bd   :  { %v4757_v9 = vadd.f32 %v4690_v23, %v10129_v29  ;;  %v4786_v41 = vadd.f32 %v11141_v43, %v4754_v34  ;;  %v4848_v57 = vmul.f32 0.2, %v4784_v42  ;;  %7004 = vmatprep.mubr.f32.mxu1 %v4877_v48  ;;  %v4878_v39 = vsel %vm4814_vm14, %v4782_v7, %v4846_v36 }
 0x7be   :  { %v4787_v18 = vadd.f32 %v4755_v56, %v11142_v6  ;;  %v4849_v37 = vmul.f32 0.2, %v4785_v14  ;;  %v4879_v0 = vsel %vm4815_vm15, %v4783_v11, %v4847_v30  ;;  %vm4816_vm0 = vcmp.gt.f32.partialorder %v4784_v42, 0.0  ;;  %v11147_v56 = vld [vmem:[#allocation32_spill] sm:$0xff] }
 0x7bf   :  { %7005 = vmatmul.mubr.f32.gmra.mrb[110].mxu1 %v4878_v39  ;;  %vm4817_vm8 = vcmp.gt.f32.partialorder %v4785_v14, 0.0  ;;  %v4641_v59 = vrot.slane %v4625_v3, %v11131_v10  ;;  %v4698_v49 = vrot.slane %v4617_v20, %v11132_v44  ;;  %v4758_v24 = vadd.f32 %v4690_v23, %v10135_v47  ;;  %v11148_v3 = vld [vmem:[#allocation36_spill] sm:$0xff]  ;;  %v11149_v39 = vld [vmem:[#allocation35_spill] sm:$0xff] }
 0x7c0   :  { %7007 = vmatprep.mubr.f32.mxu1 %v4879_v0  ;;  %v4759_v4 = vadd.f32 %v4694_v8, %v10129_v29  ;;  %v4788_v13 = vadd.f32 %v11143_v35, %v4756_v2  ;;  %v4850_v5 = vmul.f32 0.2, %v4786_v41  ;;  %v4880_v58 = vsel %vm4816_vm0, %v4784_v42, %v4848_v57  ;;  %v11150_v0 = vld [vmem:[#allocation39_spill] sm:$0xff] }
 0x7c1   :  { %v4789_v53 = vadd.f32 %v4757_v9, %v11144_v38  ;;  %v4851_v46 = vmul.f32 0.2, %v4787_v18  ;;  %v4881_v27 = vsel %vm4817_vm8, %v4785_v14, %v4849_v37  ;;  %vm4818_vm9 = vcmp.gt.f32.partialorder %v4786_v41, 0.0 }
 0x7c2   :  { %vm4819_vm10 = vcmp.gt.f32.partialorder %v4787_v18, 0.0  ;;  %v4655_v54 = vrot.slane %v4633_v28, %v11131_v10  ;;  %v4702_v45 = vrot.slane %v4641_v59, %v11132_v44  ;;  %v4760_v26 = vadd.f32 %v4694_v8, %v10135_v47 }
 0x7c3   :  { %7008 = vmatmul.mubr.f32.gmra.mrb[112].mxu1 %v4880_v58  ;;  %v4761_v62 = vadd.f32 %v4698_v49, %v10129_v29  ;;  %v4790_v7 = vadd.f32 %v11145_v22, %v4758_v24  ;;  %v4852_v32 = vmul.f32 0.2, %v4788_v13  ;;  %v4882_v33 = vsel %vm4818_vm9, %v4786_v41, %v4850_v5  ;;  %v11151_v58 = vld [vmem:[#allocation38_spill] sm:$0xff] }
 0x7c4   :  { %7010 = vmatprep.mubr.f32.mxu1 %v4881_v27  ;;  %v4791_v11 = vadd.f32 %v4759_v4, %v11146_v60  ;;  %v4853_v17 = vmul.f32 0.2, %v4789_v53  ;;  %v4883_v50 = vsel %vm4819_vm10, %v4787_v18, %v4851_v46  ;;  %vm4820_vm11 = vcmp.gt.f32.partialorder %v4788_v13, 0.0  ;;  %v11152_v27 = vld [vmem:[#allocation42_spill] sm:$0xff] }
 0x7c5   :  { %vm4821_vm12 = vcmp.gt.f32.partialorder %v4789_v53, 0.0  ;;  %v4618_v23 = vcombine.high %v10135_v47, %v10135_v47  ;;  %v4663_v34 = vcombine.high %v4641_v59, %v4641_v59  ;;  %v4706_v21 = vrot.slane %v4655_v54, %v11132_v44 }
 0x7c6   :  { %v4762_v42 = vadd.f32 %v4698_v49, %v10135_v47  ;;  %v4763_v36 = vadd.f32 %v4702_v45, %v10129_v29  ;;  %v4792_v63 = vadd.f32 %v11147_v56, %v4760_v26  ;;  %v4854_v14 = vmul.f32 0.2, %v4790_v7 }
 0x7c7   :  { %7011 = vmatmul.mubr.f32.gmra.mrb[114].mxu1 %v4882_v33  ;;  %v4884_v30 = vsel %vm4820_vm11, %v4788_v13, %v4852_v32  ;;  %v4793_v20 = vadd.f32 %v4761_v62, %v11148_v3  ;;  %v4855_v8 = vmul.f32 0.2, %v4791_v11  ;;  %v4885_v2 = vsel %vm4821_vm12, %v4789_v53, %v4853_v17  ;;  %v11153_v33 = vld [vmem:[#allocation41_spill] sm:$0xff] }
 0x7c8   :  { %7013 = vmatprep.mubr.f32.mxu1 %v4883_v50  ;;  %vm4822_vm13 = vcmp.gt.f32.partialorder %v4790_v7, 0.0  ;;  %vm4823_vm14 = vcmp.gt.f32.partialorder %v4791_v11, 0.0  ;;  %v4632_v48 = vrot.slane %v4618_v23, %v11131_v10  ;;  %v4665_v9 = vcombine.high %v4655_v54, %v4655_v54  ;;  %v11154_v50 = vld [vmem:[#allocation45_spill] sm:$0xff] }
 0x7c9   :  { %v4710_v43 = vrot.slane %v4663_v34, %v11132_v44  ;;  %v4764_v41 = vadd.f32 %v4702_v45, %v10135_v47  ;;  %v4765_v57 = vadd.f32 %v4706_v21, %v10129_v29  ;;  %v4794_v6 = vadd.f32 %v11149_v39, %v4762_v42  ;;  %v11157_v39 = vld [vmem:[#allocation47_spill] sm:$0xff] }
 0x7ca   :  { %v4856_v18 = vmul.f32 0.2, %v4792_v63  ;;  %v4886_v37 = vsel %vm4822_vm13, %v4790_v7, %v4854_v14  ;;  %v4795_v28 = vadd.f32 %v4763_v36, %v11150_v0  ;;  %v4857_v59 = vmul.f32 0.2, %v4793_v20  ;;  %v11158_v0 = vld [vmem:[#allocation51_spill] sm:$0xff] }
 0x7cb   :  { %7014 = vmatmul.mubr.f32.gmra.mrb[116].mxu1 %v4884_v30  ;;  %v4887_v49 = vsel %vm4823_vm14, %v4791_v11, %v4855_v8  ;;  %vm4824_vm15 = vcmp.gt.f32.partialorder %v4792_v63, 0.0  ;;  %vm4825_vm0 = vcmp.gt.f32.partialorder %v4793_v20, 0.0  ;;  %v4634_v24 = vcombine.high %v4632_v48, %v4632_v48 }
 0x7cc   :  { %7016 = vmatprep.mubr.f32.mxu1 %v4885_v2  ;;  %v4648_v4 = vrot.slane %v4632_v48, %v11131_v10  ;;  %v4714_v35 = vrot.slane %v4665_v9, %v11132_v44  ;;  %v4766_v13 = vadd.f32 %v4706_v21, %v10135_v47  ;;  %v4767_v5 = vadd.f32 %v4710_v43, %v10129_v29 }
 0x7cd   :  { %v4796_v38 = vadd.f32 %v11151_v58, %v4764_v41  ;;  %v4858_v53 = vmul.f32 0.2, %v4794_v6  ;;  %v4888_v46 = vsel %vm4824_vm15, %v4792_v63, %v4856_v18  ;;  %v4797_v54 = vadd.f32 %v4765_v57, %v11152_v27  ;;  %v11155_v63 = vld [vmem:[#allocation44_spill] sm:$0xff] }
 0x7ce   :  { %v4859_v45 = vmul.f32 0.2, %v4795_v28  ;;  %v4889_v26 = vsel %vm4825_vm0, %v4793_v20, %v4857_v59  ;;  %vm4826_vm8 = vcmp.gt.f32.partialorder %v4794_v6, 0.0  ;;  %vm4827_vm9 = vcmp.gt.f32.partialorder %v4795_v28, 0.0  ;;  %v11156_v20 = vld [vmem:[#allocation48_spill] sm:$0xff] }
 0x7cf   :  { %7017 = vmatmul.mubr.f32.gmra.mrb[118].mxu1 %v4886_v37  ;;  %v4662_v62 = vrot.slane %v4634_v24, %v11131_v10  ;;  %v4718_v22 = vrot.slane %v4648_v4, %v11132_v44  ;;  %v4768_v7 = vadd.f32 %v4710_v43, %v10135_v47  ;;  %v4769_v32 = vadd.f32 %v4714_v35, %v10129_v29 }
 0x7d0   :  { %7019 = vmatprep.mubr.f32.mxu1 %v4887_v49  ;;  %v4798_v60 = vadd.f32 %v11153_v33, %v4766_v13  ;;  %v4860_v11 = vmul.f32 0.2, %v4796_v38  ;;  %v4890_v17 = vsel %vm4826_vm8, %v4794_v6, %v4858_v53  ;;  %v4799_v23 = vadd.f32 %v4767_v5, %v11154_v50  ;;  %v11159_v13 = vld [vmem:[#allocation50_spill] sm:$0xff]  ;;  %v11163_v50 = vld [vmem:[#allocation56_spill] sm:$0xff] }
 0x7d1   :  { %v4861_v34 = vmul.f32 0.2, %v4797_v54  ;;  %v4891_v21 = vsel %vm4827_vm9, %v4795_v28, %v4859_v45  ;;  %vm4828_vm10 = vcmp.gt.f32.partialorder %v4796_v38, 0.0  ;;  %vm4829_vm11 = vcmp.gt.f32.partialorder %v4797_v54, 0.0  ;;  %v11160_v53 = vld [vmem:[#allocation54_spill] sm:$0xff] }
 0x7d2   :  { %v4664_v42 = vcombine.high %v4648_v4, %v4648_v4  ;;  %v4722_v10 = vrot.slane %v4662_v62, %v11132_v44  ;;  %v4770_v36 = vadd.f32 %v4714_v35, %v10135_v47  ;;  %v4771_v56 = vadd.f32 %v4718_v22, %v10129_v29 }
 0x7d3   :  { %7020 = vmatmul.mubr.f32.gmra.mrb[120].mxu1 %v4888_v46  ;;  %v4800_v14 = vadd.f32 %v11155_v63, %v4768_v7  ;;  %v4862_v30 = vmul.f32 0.2, %v4798_v60  ;;  %v4892_v3 = vsel %vm4828_vm10, %v4796_v38, %v4860_v11  ;;  %v4801_v8 = vadd.f32 %v4769_v32, %v11156_v20  ;;  %v11162_v32 = vld [vmem:[#allocation57_spill] sm:$0xff]  ;;  %v11165_v63 = vld [vmem:[#allocation59_spill] sm:$0xff] }
 0x7d4   :  { %7022 = vmatprep.mubr.f32.mxu1 %v4889_v26  ;;  %v4863_v2 = vmul.f32 0.2, %v4799_v23  ;;  %v4893_v48 = vsel %vm4829_vm11, %v4797_v54, %v4861_v34  ;;  %vm4830_vm12 = vcmp.gt.f32.partialorder %v4798_v60, 0.0  ;;  %vm4831_vm13 = vcmp.gt.f32.partialorder %v4799_v23, 0.0  ;;  %v11161_v26 = vld [vmem:[#allocation53_spill] sm:$0xff] }
 0x7d5   :  { %v4666_v9 = vcombine.high %v4662_v62, %v4662_v62  ;;  %v4726_v43 = vrot.slane %v4664_v42, %v11132_v44  ;;  %v4772_v41 = vadd.f32 %v4718_v22, %v10135_v47  ;;  %v4773_v57 = vadd.f32 %v4722_v10, %v10129_v29  ;;  %v11164_v42 = vld [vmem:[#allocation60_spill] sm:$0xff] }
 0x7d6   :  { %v4802_v6 = vadd.f32 %v11157_v39, %v4770_v36  ;;  %v4864_v18 = vmul.f32 0.2, %v4800_v14  ;;  %v4894_v37 = vsel %vm4830_vm12, %v4798_v60, %v4862_v30  ;;  %v4803_v28 = vadd.f32 %v4771_v56, %v11158_v0  ;;  %v4396_v0 = vld [vmem:[%s10790_s4 + $0x440] sm:$0xff] }
 0x7d7   :  { %7023 = vmatmul.mubr.f32.gmra.mrb[122].mxu1 %v4890_v17  ;;  %v4865_v59 = vmul.f32 0.2, %v4801_v8  ;;  %v4895_v49 = vsel %vm4831_vm13, %v4799_v23, %v4863_v2  ;;  %vm4832_vm14 = vcmp.gt.f32.partialorder %v4800_v14, 0.0  ;;  %vm4833_vm15 = vcmp.gt.f32.partialorder %v4801_v8, 0.0 }
 0x7d8   :  { %7025 = vmatprep.mubr.f32.mxu1 %v4891_v21  ;;  %v4730_v24 = vrot.slane %v4666_v9, %v11132_v44  ;;  %v4774_v4 = vadd.f32 %v4722_v10, %v10135_v47  ;;  %v4775_v35 = vadd.f32 %v4726_v43, %v10129_v29  ;;  %v4804_v5 = vadd.f32 %v11159_v13, %v4772_v41  ;;  %v4392_v41 = vld [vmem:[%s10790_s4 + $0x420] sm:$0xff]  ;;  %v4401_v13 = vld [vmem:[%s10790_s4 + $0x468] sm:$0xff] }
 0x7d9   :  { %v4866_v58 = vmul.f32 0.2, %v4802_v6  ;;  %v4896_v38 = vsel %vm4832_vm14, %v4800_v14, %v4864_v18  ;;  %v4805_v46 = vadd.f32 %v4773_v57, %v11160_v53  ;;  %v4867_v27 = vmul.f32 0.2, %v4803_v28  ;;  %v4393_v57 = vld [vmem:[%s10790_s4 + $0x428] sm:$0xff]  ;;  %v4395_v18 = vld [vmem:[%s10790_s4 + $0x438] sm:$0xff] }
 0x7da   :  { %v4897_v54 = vsel %vm4833_vm15, %v4801_v8, %v4865_v59  ;;  %vm4834_vm0 = vcmp.gt.f32.partialorder %v4802_v6, 0.0  ;;  %vm4835_vm8 = vcmp.gt.f32.partialorder %v4803_v28, 0.0  ;;  %v4776_v45 = vadd.f32 %v4726_v43, %v10135_v47 }
 0x7db   :  { %7026 = vmatmul.mubr.f32.gmra.mrb[124].mxu1 %v4892_v3  ;;  %v4777_v44 = vadd.f32 %v4730_v24, %v10129_v29  ;;  %v4806_v62 = vadd.f32 %v11161_v26, %v4774_v4  ;;  %v4868_v22 = vmul.f32 0.2, %v4804_v5  ;;  %v4898_v7 = vsel %vm4834_vm0, %v4802_v6, %v4866_v58  ;;  %v4394_v6 = vld [vmem:[%s10790_s4 + $0x430] sm:$0xff] }
 0x7dc   :  { %7028 = vmatprep.mubr.f32.mxu1 %v4893_v48  ;;  %v4807_v33 = vadd.f32 %v4775_v35, %v11162_v32  ;;  %v4869_v60 = vmul.f32 0.2, %v4805_v46  ;;  %v4899_v11 = vsel %vm4835_vm8, %v4803_v28, %v4867_v27  ;;  %vm4836_vm9 = vcmp.gt.f32.partialorder %v4804_v5, 0.0  ;;  %v4397_v28 = vld [vmem:[%s10790_s4 + $0x448] sm:$0xff]  ;;  %v4400_v35 = vld [vmem:[%s10790_s4 + $0x460] sm:$0xff]  ;;  %v4402_v58 = vld [vmem:[%s10790_s4 + $0x470] sm:$0xff] }
 0x7dd   :  { %vm4837_vm10 = vcmp.gt.f32.partialorder %v4805_v46, 0.0  ;;  %v4778_v17 = vadd.f32 %v4730_v24, %v10135_v47  ;;  %v4808_v23 = vadd.f32 %v11163_v50, %v4776_v45  ;;  %v4870_v34 = vmul.f32 0.2, %v4806_v62  ;;  %v4399_v24 = vld [vmem:[%s10790_s4 + $0x458] sm:$0xff]  ;;  %v4405_v27 = vld [vmem:[%s10790_s4 + $0x488] sm:$0xff]  ;;  %v4406_v45 = vld [vmem:[%s10790_s4 + $0x490] sm:$0xff] }
 0x7de   :  { %v4900_v21 = vsel %vm4836_vm9, %v4804_v5, %v4868_v22  ;;  %v4809_v10 = vadd.f32 %v4777_v44, %v11164_v42  ;;  %v4871_v36 = vmul.f32 0.2, %v4807_v33  ;;  %v4901_v56 = vsel %vm4837_vm10, %v4805_v46, %v4869_v60  ;;  %v4404_v46 = vld [vmem:[%s10790_s4 + $0x480] sm:$0xff]  ;;  %v4407_v44 = vld [vmem:[%s10790_s4 + $0x498] sm:$0xff] }
 0x7df   :  { %7029 = vmatmul.mubr.f32.gmra.mrb[126].mxu1 %v4894_v37  ;;  %vm4838_vm11 = vcmp.gt.f32.partialorder %v4806_v62, 0.0  ;;  %vm4839_vm12 = vcmp.gt.f32.partialorder %v4807_v33, 0.0  ;;  %v4810_v14 = vadd.f32 %v11165_v63, %v4778_v17  ;;  %v4872_v30 = vmul.f32 0.2, %v4808_v23  ;;  %v11166_v22 = vld [vmem:[#allocation75_spill] sm:$0xff] }
 0x7e0   :  { %7031 = vmatprep.mubr.f32.mxu1 %v4895_v49  ;;  %v4902_v3 = vsel %vm4838_vm11, %v4806_v62, %v4870_v34  ;;  %v4873_v20 = vmul.f32 0.2, %v4809_v10  ;;  %v4903_v8 = vsel %vm4839_vm12, %v4807_v33, %v4871_v36  ;;  %vm4840_vm13 = vcmp.gt.f32.partialorder %v4808_v23, 0.0  ;;  %v4398_v49 = vld [vmem:[%s10790_s4 + $0x450] sm:$0xff]  ;;  %v11167_v33 = vld [vmem:[#allocation73_spill] sm:$0xff]  ;;  %v11169_v36 = vld [vmem:[#allocation72_spill] sm:$0xff] }
 0x7e1   :  { %vm4841_vm14 = vcmp.gt.f32.partialorder %v4809_v10, 0.0  ;;  %v4874_v2 = vmul.f32 0.2, %v4810_v14  ;;  %v4904_v48 = vsel %vm4840_vm13, %v4808_v23, %v4872_v30  ;;  %vm4842_vm15 = vcmp.gt.f32.partialorder %v4810_v14, 0.0 }
 0x7e2   :  { %v4905_v9 = vsel %vm4841_vm14, %v4809_v10, %v4873_v20  ;;  %v7385_v39 = vpack.c.bf16 %v4393_v57, %v4392_v41  ;;  %v7389_v37 = vpack.c.bf16 %v4395_v18, %v4394_v6  ;;  %v7393_v59 = vpack.c.bf16 %v4397_v28, %v4396_v0  ;;  %v11170_v20 = vld [vmem:[#allocation76_spill] sm:$0xff]  ;;  %v11172_v0 = vld [vmem:[#allocation78_spill] sm:$0xff] }
 0x7e3   :  { %7032 = vmatmul.mubr.f32.gmra.mrb[128].mxu1 %v4896_v38  ;;  %v4906_v43 = vsel %vm4842_vm15, %v4810_v14, %v4874_v2  ;;  %v7397_v4 = vpack.c.bf16 %v4399_v24, %v4398_v49  ;;  %v7401_v5 = vpack.c.bf16 %v4401_v13, %v4400_v35  ;;  %v4403_v38 = vld [vmem:[%s10790_s4 + $0x478] sm:$0xff]  ;;  %v7413_v26 = vpack.c.bf16 %v4407_v44, %v4406_v45 }
 0x7e4   :  { %7034 = vmatprep.mubr.f32.mxu1 %v4897_v54  ;;  %7386 = vmatprep.subr.bf16.mxu0 %v7385_v39  ;;  %v7405_v53 = vpack.c.bf16 %v4403_v38, %v4402_v58  ;;  %v7409_v54 = vpack.c.bf16 %v4405_v27, %v4404_v46  ;;  %v11174_v27 = vld [vmem:[#allocation80_spill] sm:$0xff] }
 0x7e5   :  { %7388 = vmatpush3.bf16.msra.mxu0 %v7385_v39 }
 0x7e6   :  { %7390 = vmatprep.subr.bf16.mxu0 %v7389_v37 }
 0x7e7   :  { %7035 = vmatmul.mubr.f32.gmra.mrb[130].mxu1 %v4898_v7 }
 0x7e8   :  { %7037 = vmatprep.mubr.f32.mxu1 %v4899_v11 }
 0x7e9   :  { %7392 = vmatpush3.bf16.msra.mxu0 %v7389_v37 }
 0x7ea   :  { %7394 = vmatprep.subr.bf16.mxu0 %v7393_v59 }
 0x7eb   :  { %7038 = vmatmul.mubr.f32.gmra.mrb[132].mxu1 %v4900_v21  ;;  %v11168_v21 = vld [vmem:[#allocation74_spill] sm:$0xff] }
 0x7ec   :  { %7040 = vmatprep.mubr.f32.mxu1 %v4901_v56 }
 0x7ed   :  { %7396 = vmatpush3.bf16.msra.mxu0 %v7393_v59 }
 0x7ee   :  { %7398 = vmatprep.subr.bf16.mxu0 %v7397_v4 }
 0x7ef   :  { %7041 = vmatmul.mubr.f32.gmra.mrb[134].mxu1 %v4902_v3 }
 0x7f0   :  { %7043 = vmatprep.mubr.f32.mxu1 %v4903_v8 }
 0x7f1   :  { %7400 = vmatpush3.bf16.msra.mxu0 %v7397_v4  ;;  %v11173_v4 = vld [vmem:[#allocation79_spill] sm:$0xff] }
 0x7f2   :  { %7402 = vmatprep.subr.bf16.mxu0 %v7401_v5 }
 0x7f3   :  { %7044 = vmatmul.mubr.f32.gmra.mrb[136].mxu1 %v4904_v48 }
 0x7f4   :  { %7046 = vmatprep.mubr.f32.mxu1 %v4905_v9  ;;  %v11171_v9 = vld [vmem:[#allocation77_spill] sm:$0xff] }
 0x7f5   :  { %7404 = vmatpush3.bf16.msra.mxu0 %v7401_v5 }
 0x7f6   :  { %7406 = vmatprep.subr.bf16.mxu0 %v7405_v53 }
 0x7f7   :  { %7047 = vmatmul.mubr.f32.gmra.mrb[138].mxu1 %v4906_v43 }
 0x7f9   :  { %7408 = vmatpush3.bf16.msra.mxu0 %v7405_v53 }
 0x7fa   :  { %7410 = vmatprep.subr.bf16.mxu0 %v7409_v54 }
 0x7fd   :  { %7412 = vmatpush3.bf16.msra.mxu0 %v7409_v54 }
 0x7fe   :  { %7414 = vmatprep.subr.bf16.mxu0 %v7413_v26 }
 0x801   :  { %7416 = vmatpush3.bf16.msra.mxu0 %v7413_v26 }
 0x88e   :  { %v7003_v62 = vpop.f32.mrb[108].mxu1 }
 0x88f   :  { %v5133_v7 = vadd.f32 %v7003_v62, %v11166_v22  ;;  %v4973_v32 = vpop.f32.mrb[109].mxu1  ;;  %v11175_v22 = vld [vmem:[#allocation81_spill] sm:$0xff] }
 0x890   :  { %v5132_v60 = vadd.f32 %v4973_v32, %v11167_v33 }
 0x892   :  { %v5164_v11 = vmax.f32 %v5132_v60, %v5133_v7  ;;  %v7006_v23 = vpop.f32.mrb[110].mxu1 }
 0x893   :  { %v5135_v42 = vadd.f32 %v7006_v23, %v11168_v21  ;;  %v4983_v10 = vpop.f32.mrb[111].mxu1 }
 0x894   :  { %v5165_v17 = vrot.slane %v5164_v11, 4  ;;  %v5134_v56 = vadd.f32 %v4983_v10, %v11169_v36 }
 0x896   :  { %v5166_v50 = vmax.f32 %v5164_v11, %v5165_v17  ;;  %v5171_v14 = vmax.f32 %v5134_v56, %v5135_v42  ;;  %v7009_v30 = vpop.f32.mrb[112].mxu1 }
 0x897   :  { %v5137_v8 = vadd.f32 %v7009_v30, %v11170_v20  ;;  %v4993_v2 = vpop.f32.mrb[113].mxu1  ;;  %v11177_v30 = vld [vmem:[#allocation83_spill] sm:$0xff] }
 0x898   :  { %v5167_v34 = vrot.slane %v5166_v50, 2  ;;  %v5172_v48 = vrot.slane %v5171_v14, 4  ;;  %v5136_v43 = vadd.f32 %v4993_v2, %v11171_v9 }
 0x89a   :  { %v5168_v63 = vmax.f32 %v5166_v50, %v5167_v34  ;;  %v5173_v57 = vmax.f32 %v5171_v14, %v5172_v48  ;;  %v5178_v39 = vmax.f32 %v5136_v43, %v5137_v8  ;;  %v7012_v6 = vpop.f32.mrb[114].mxu1  ;;  %v11176_v50 = vld [vmem:[#allocation82_spill] sm:$0xff] }
 0x89b   :  { %v10286_v28 = vadd.f32 %v7012_v6, %v11172_v0  ;;  %v5003_v59 = vpop.f32.mrb[115].mxu1  ;;  %v11178_v6 = vld [vmem:[#allocation84_spill] sm:$0xff] }
 0x89c   :  { %v5169_v3 = vrot.slane %v5168_v63, 1  ;;  %v5174_v49 = vrot.slane %v5173_v57, 2  ;;  %v5179_v24 = vrot.slane %v5178_v39, 4  ;;  %v10289_v35 = vadd.f32 %v5003_v59, %v11173_v4  ;;  %v11179_v4 = vld [vmem:[#allocation85_spill] sm:$0xff] }
 0x89e   :  { %v5170_v41 = vmax.f32 %v5168_v63, %v5169_v3  ;;  %v5175_v58 = vmax.f32 %v5173_v57, %v5174_v49  ;;  %v5180_v38 = vmax.f32 %v5178_v39, %v5179_v24  ;;  %v5185_v53 = vmax.f32 %v10289_v35, %v10286_v28  ;;  %v7015_v46 = vpop.f32.mrb[116].mxu1 }
 0x89f   :  { %v10294_v54 = vadd.f32 %v7015_v46, %v11174_v27  ;;  %v5013_v45 = vpop.f32.mrb[117].mxu1  ;;  %v11180_v46 = vld [vmem:[#allocation89_spill] sm:$0xff] }
 0x8a0   :  { %v5276_v18 = vsub.f32 %v5132_v60, %v5170_v41  ;;  %v5277_v37 = vsub.f32 %v5133_v7, %v5170_v41  ;;  %v5176_v44 = vrot.slane %v5175_v58, 1  ;;  %v5181_v26 = vrot.slane %v5180_v38, 2 }
 0x8a1   :  { %v5186_v62 = vrot.slane %v5185_v53, 4  ;;  %v10297_v7 = vadd.f32 %v5013_v45, %v11175_v22 }
 0x8a2   :  { %v5308_v13 = vmul.f32 1.442695, %v5276_v18  ;;  %v5310_v5 = vmul.f32 1.442695, %v5277_v37  ;;  %v5177_v32 = vmax.f32 %v5175_v58, %v5176_v44  ;;  %v5182_v33 = vmax.f32 %v5180_v38, %v5181_v26  ;;  %v7018_v11 = vpop.f32.mrb[118].mxu1 }
 0x8a3   :  { %v5187_v60 = vmax.f32 %v5185_v53, %v5186_v62  ;;  %v5192_v17 = vmax.f32 %v10297_v7, %v10294_v54  ;;  %v10302_v23 = vadd.f32 %v7018_v11, %v11176_v50  ;;  %v5023_v34 = vpop.f32.mrb[119].mxu1 }
 0x8a4   :  { %7619 = vpow2.f32 %v5308_v13  ;;  %v5278_v21 = vsub.f32 %v5134_v56, %v5177_v32  ;;  %v5279_v10 = vsub.f32 %v5135_v42, %v5177_v32  ;;  %v5183_v36 = vrot.slane %v5182_v33, 1 }
 0x8a5   :  { %7621 = vpow2.f32 %v5310_v5  ;;  %v5188_v63 = vrot.slane %v5187_v60, 2  ;;  %v5193_v14 = vrot.slane %v5192_v17, 4  ;;  %v10305_v3 = vadd.f32 %v5023_v34, %v11177_v30 }
 0x8a6   :  { %v5312_v20 = vmul.f32 1.442695, %v5278_v21  ;;  %v5314_v2 = vmul.f32 1.442695, %v5279_v10  ;;  %v5184_v48 = vmax.f32 %v5182_v33, %v5183_v36  ;;  %v7021_v41 = vpop.f32.mrb[120].mxu1 }
 0x8a7   :  { %v5189_v9 = vmax.f32 %v5187_v60, %v5188_v63  ;;  %v5194_v57 = vmax.f32 %v5192_v17, %v5193_v14  ;;  %v5199_v39 = vmax.f32 %v10305_v3, %v10302_v23  ;;  %v10310_v18 = vadd.f32 %v7021_v41, %v11178_v6  ;;  %v5033_v56 = vpop.f32.mrb[121].mxu1  ;;  %v11182_v60 = vld [vmem:[#allocation87_spill] sm:$0xff]  ;;  %v11183_v14 = vld [vmem:[#allocation88_spill] sm:$0xff] }
 0x8a8   :  { %7623 = vpow2.f32 %v5312_v20  ;;  %v5280_v42 = vsub.f32 %v5136_v43, %v5184_v48  ;;  %v5281_v37 = vsub.f32 %v5137_v8, %v5184_v48  ;;  %v10313_v13 = vadd.f32 %v5033_v56, %v11179_v4  ;;  %v11181_v43 = vld [vmem:[#allocation86_spill] sm:$0xff] }
 0x8a9   :  { %v5190_v0 = vrot.slane %v5189_v9, 1  ;;  %7625 = vpow2.f32 %v5314_v2  ;;  %v5195_v49 = vrot.slane %v5194_v57, 2  ;;  %v5200_v24 = vrot.slane %v5199_v39, 4 }
 0x8aa   :  { %v5316_v5 = vmul.f32 1.442695, %v5280_v42  ;;  %v5318_v58 = vmul.f32 1.442695, %v5281_v37  ;;  %v7024_v53 = vpop.f32.mrb[122].mxu1  ;;  %v5206_v8 = vmax.f32 %v10313_v13, %v10310_v18 }
 0x8ab   :  { %v5191_v38 = vmax.f32 %v5189_v9, %v5190_v0  ;;  %v5196_v44 = vmax.f32 %v5194_v57, %v5195_v49  ;;  %v5201_v26 = vmax.f32 %v5199_v39, %v5200_v24  ;;  %v10321_v62 = vadd.f32 %v7024_v53, %v11181_v43  ;;  %v5043_v22 = vpop.f32.mrb[123].mxu1  ;;  %v11185_v57 = vld [vmem:[#allocation91_spill] sm:$0xff] }
 0x8ac   :  { %7627 = vpow2.f32 %v5316_v5  ;;  %v10326_v11 = vadd.f32 %v5043_v22, %v11182_v60  ;;  %v5207_v34 = vrot.slane %v5206_v8, 4  ;;  %v11187_v43 = vld [vmem:[#allocation95_spill] sm:$0xff] }
 0x8ad   :  { %v5282_v32 = vsub.f32 %v10289_v35, %v5191_v38  ;;  %v5283_v33 = vsub.f32 %v10286_v28, %v5191_v38  ;;  %7629 = vpow2.f32 %v5318_v58  ;;  %v5197_v17 = vrot.slane %v5196_v44, 1  ;;  %v11184_v28 = vld [vmem:[#allocation90_spill] sm:$0xff] }
 0x8ae   :  { %v7620_v59 = vpop.eup %7619  ;;  %v5202_v50 = vrot.slane %v5201_v26, 2  ;;  %v5213_v36 = vmax.f32 %v10326_v11, %v10321_v62  ;;  %v7027_v63 = vpop.f32.mrb[124].mxu1  ;;  %v5208_v2 = vmax.f32 %v5206_v8, %v5207_v34 }
 0x8af   :  { %v10316_v27 = vmul.f32 %v7620_v59, %v11180_v46  ;;  %v7622_v45 = vpop.eup %7621  ;;  %v5320_v21 = vmul.f32 1.442695, %v5282_v32  ;;  %v5322_v10 = vmul.f32 1.442695, %v5283_v33  ;;  %v5198_v20 = vmax.f32 %v5196_v44, %v5197_v17  ;;  %v5053_v9 = vpop.f32.mrb[125].mxu1 }
 0x8b0   :  { %v10331_v30 = vmul.f32 %v7622_v45, %v11183_v14  ;;  %v5203_v35 = vmax.f32 %v5201_v26, %v5202_v50  ;;  %v10334_v48 = vadd.f32 %v7027_v63, %v11184_v28  ;;  %v5214_v41 = vrot.slane %v5213_v36, 4  ;;  %v11186_v45 = vld [vmem:[#allocation94_spill] sm:$0xff] }
 0x8b1   :  { %7631 = vpow2.f32 %v5320_v21  ;;  %v10337_v39 = vadd.f32 %v5053_v9, %v11185_v57  ;;  %v5284_v56 = vsub.f32 %v10297_v7, %v5198_v20  ;;  %v5285_v42 = vsub.f32 %v10294_v54, %v5198_v20 }
 0x8b2   :  { %v5404_v6 = vadd.f32 %v10331_v30, %v10316_v27  ;;  %7633 = vpow2.f32 %v5322_v10  ;;  %v5204_v37 = vrot.slane %v5203_v35, 1  ;;  %v10343_v0 = vpop.eup %7623  ;;  %v5209_v59 = vrot.slane %v5208_v2, 2  ;;  %v7030_v4 = vpop.f32.mrb[126].mxu1 }
 0x8b3   :  { %v5215_v49 = vmax.f32 %v5213_v36, %v5214_v41  ;;  %v5220_v24 = vmax.f32 %v10337_v39, %v10334_v48  ;;  %v10347_v58 = vpop.eup %7625  ;;  %v5324_v38 = vmul.f32 1.442695, %v5284_v56  ;;  %v5326_v53 = vmul.f32 1.442695, %v5285_v42  ;;  %v5063_v7 = vpop.f32.mrb[127].mxu1  ;;  %v11189_v41 = vld [vmem:[#allocation99_spill] sm:$0xff] }
 0x8b4   :  { %v5405_v5 = vrot.slane %v5404_v6, 4  ;;  %v5205_v46 = vmax.f32 %v5203_v35, %v5204_v37  ;;  %v10350_v44 = vadd.f32 %v7030_v4, %v11186_v45  ;;  %v5210_v54 = vmax.f32 %v5208_v2, %v5209_v59  ;;  %v11188_v35 = vld [vmem:[#allocation98_spill] sm:$0xff] }
 0x8b5   :  { %v5216_v26 = vrot.slane %v5215_v49, 2  ;;  %v5221_v8 = vrot.slane %v5220_v24, 4  ;;  %v10353_v22 = vadd.f32 %v5063_v7, %v11187_v43  ;;  %7635 = vpow2.f32 %v5324_v38 }
 0x8b6   :  { %v5286_v32 = vsub.f32 %v10305_v3, %v5205_v46  ;;  %v5287_v33 = vsub.f32 %v10302_v23, %v5205_v46  ;;  %v5406_v60 = vadd.f32 %v5405_v5, %v5404_v6  ;;  %v10357_v17 = vpop.eup %7627  ;;  %7637 = vpow2.f32 %v5326_v53  ;;  %v7033_v10 = vpop.f32.mrb[128].mxu1  ;;  %v11190_v46 = vld [vmem:[#allocation102_spill] sm:$0xff] }
 0x8b7   :  { %v5211_v50 = vrot.slane %v5210_v54, 1  ;;  %v5217_v34 = vmax.f32 %v5215_v49, %v5216_v26  ;;  %v5222_v21 = vmax.f32 %v5220_v24, %v5221_v8  ;;  %v10359_v36 = vpop.eup %7629  ;;  %v5227_v20 = vmax.f32 %v10353_v22, %v10350_v44  ;;  %v5073_v3 = vpop.f32.mrb[129].mxu1 }
 0x8b8   :  { %v5328_v63 = vmul.f32 1.442695, %v5286_v32  ;;  %v5330_v14 = vmul.f32 1.442695, %v5287_v33  ;;  %v10364_v2 = vadd.f32 %v7033_v10, %v11188_v35  ;;  %v10367_v57 = vadd.f32 %v5073_v3, %v11189_v41  ;;  %v11191_v33 = vld [vmem:[#allocation103_spill] sm:$0xff]  ;;  %v11193_v41 = vld [vmem:[#allocation106_spill] sm:$0xff] }
 0x8b9   :  { %v5212_v23 = vmax.f32 %v5210_v54, %v5211_v50  ;;  %v5218_v28 = vrot.slane %v5217_v34, 1  ;;  %v5223_v9 = vrot.slane %v5222_v21, 2  ;;  %v5228_v6 = vrot.slane %v5227_v20, 4 }
 0x8ba   :  { %7639 = vpow2.f32 %v5328_v63  ;;  %v5407_v56 = vrot.slane %v5406_v60, 2  ;;  %v7036_v24 = vpop.f32.mrb[130].mxu1  ;;  %v5234_v53 = vmax.f32 %v10367_v57, %v10364_v2  ;;  %v11192_v63 = vld [vmem:[#allocation93_spill] sm:$0xff] }
 0x8bb   :  { %v10369_v42 = vpop.eup %7631  ;;  %7641 = vpow2.f32 %v5330_v14  ;;  %v5288_v37 = vsub.f32 %v10313_v13, %v5212_v23  ;;  %v5289_v59 = vsub.f32 %v10310_v18, %v5212_v23  ;;  %v5219_v49 = vmax.f32 %v5217_v34, %v5218_v28  ;;  %v5083_v7 = vpop.f32.mrb[131].mxu1 }
 0x8bc   :  { %v10373_v4 = vpop.eup %7633  ;;  %v5224_v5 = vmax.f32 %v5222_v21, %v5223_v9  ;;  %v5229_v38 = vmax.f32 %v5227_v20, %v5228_v6  ;;  %v10378_v45 = vadd.f32 %v7036_v24, %v11190_v46  ;;  %v5235_v32 = vrot.slane %v5234_v53, 4 }
 0x8bd   :  { %v5332_v54 = vmul.f32 1.442695, %v5288_v37  ;;  %v5334_v26 = vmul.f32 1.442695, %v5289_v59  ;;  %v5290_v8 = vsub.f32 %v10326_v11, %v5219_v49  ;;  %v5291_v13 = vsub.f32 %v10321_v62, %v5219_v49  ;;  %v11194_v37 = vld [vmem:[#allocation107_spill] sm:$0xff] }
 0x8be   :  { %v5225_v18 = vrot.slane %v5224_v5, 1  ;;  %v5230_v43 = vrot.slane %v5229_v38, 2  ;;  %v10383_v50 = vadd.f32 %v5083_v7, %v11191_v33  ;;  %v7039_v10 = vpop.f32.mrb[132].mxu1  ;;  %v10387_v14 = vmul.f32 %v10343_v0, %v11192_v63 }
 0x8bf   :  { %7643 = vpow2.f32 %v5332_v54  ;;  %v5336_v34 = vmul.f32 1.442695, %v5290_v8  ;;  %v5338_v21 = vmul.f32 1.442695, %v5291_v13  ;;  %v10389_v20 = vpop.eup %7635  ;;  %v5236_v3 = vmax.f32 %v5234_v53, %v5235_v32  ;;  %v5093_v62 = vpop.f32.mrb[133].mxu1  ;;  %v11196_v32 = vld [vmem:[#allocation111_spill] sm:$0xff] }
 0x8c0   :  { %v5226_v35 = vmax.f32 %v5224_v5, %v5225_v18  ;;  %v5231_v11 = vmax.f32 %v5229_v38, %v5230_v43  ;;  %v5408_v23 = vadd.f32 %v5407_v56, %v5406_v60  ;;  %v10391_v28 = vpop.eup %7637  ;;  %7645 = vpow2.f32 %v5334_v26  ;;  %v11195_v26 = vld [vmem:[#allocation110_spill] sm:$0xff] }
 0x8c1   :  { %v5241_v9 = vmax.f32 %v10383_v50, %v10378_v45  ;;  %v10396_v6 = vadd.f32 %v7039_v10, %v11193_v41  ;;  %v10399_v59 = vadd.f32 %v5093_v62, %v11194_v37  ;;  %7647 = vpow2.f32 %v5336_v34 }
 0x8c2   :  { %v5292_v0 = vsub.f32 %v10337_v39, %v5226_v35  ;;  %v5293_v49 = vsub.f32 %v10334_v48, %v5226_v35  ;;  %v5232_v24 = vrot.slane %v5231_v11, 1  ;;  %7649 = vpow2.f32 %v5338_v21  ;;  %v7042_v38 = vpop.f32.mrb[134].mxu1 }
 0x8c3   :  { %v5237_v60 = vrot.slane %v5236_v3, 2  ;;  %v5242_v56 = vrot.slane %v5241_v9, 4  ;;  %v5248_v5 = vmax.f32 %v10399_v59, %v10396_v6  ;;  %v10408_v8 = vadd.f32 %v7042_v38, %v11195_v26  ;;  %v5103_v13 = vpop.f32.mrb[135].mxu1 }
 0x8c4   :  { %v10405_v53 = vpop.eup %7639  ;;  %v5340_v46 = vmul.f32 1.442695, %v5292_v0  ;;  %v5342_v7 = vmul.f32 1.442695, %v5293_v49  ;;  %v5233_v54 = vmax.f32 %v5231_v11, %v5232_v24  ;;  %v10413_v33 = vadd.f32 %v5103_v13, %v11196_v32 }
 0x8c5   :  { %v10410_v39 = vpop.eup %7641  ;;  %v5238_v48 = vmax.f32 %v5236_v3, %v5237_v60  ;;  %v5243_v18 = vmax.f32 %v5241_v9, %v5242_v56  ;;  %v5249_v43 = vrot.slane %v5248_v5, 4  ;;  %v5409_v10 = vrot.slane %v5408_v23, 1  ;;  %v11197_v9 = vld [vmem:[#allocation114_spill] sm:$0xff]  ;;  %v11198_v56 = vld [vmem:[#allocation115_spill] sm:$0xff] }
 0x8c6   :  { %7651 = vpow2.f32 %v5340_v46  ;;  %v5294_v34 = vsub.f32 %v10353_v22, %v5233_v54  ;;  %v5295_v21 = vsub.f32 %v10350_v44, %v5233_v54  ;;  %v7045_v62 = vpop.f32.mrb[136].mxu1  ;;  %v5255_v3 = vmax.f32 %v10413_v33, %v10408_v8 }
 0x8c7   :  { %7653 = vpow2.f32 %v5342_v7  ;;  %v5239_v63 = vrot.slane %v5238_v48, 1  ;;  %v5244_v35 = vrot.slane %v5243_v18, 2  ;;  %v5250_v11 = vmax.f32 %v5248_v5, %v5249_v43  ;;  %v5113_v49 = vpop.f32.mrb[137].mxu1  ;;  %v11199_v7 = vld [vmem:[#allocation92_spill] sm:$0xff] }
 0x8c8   :  { %v5344_v41 = vmul.f32 1.442695, %v5294_v34  ;;  %v5346_v37 = vmul.f32 1.442695, %v5295_v21  ;;  %v10420_v0 = vadd.f32 %v7045_v62, %v11197_v9  ;;  %v10425_v38 = vadd.f32 %v5113_v49, %v11198_v56 }
 0x8c9   :  { %v10422_v24 = vpop.eup %7643  ;;  %v5240_v22 = vmax.f32 %v5238_v48, %v5239_v63  ;;  %v5245_v60 = vmax.f32 %v5243_v18, %v5244_v35  ;;  %v5251_v44 = vrot.slane %v5250_v11, 2  ;;  %v5256_v5 = vrot.slane %v5255_v3, 4 }
 0x8ca   :  { %7655 = vpow2.f32 %v5344_v41  ;;  %v10427_v46 = vadd.f32 %v5409_v10, %v5408_v23  ;;  %v10431_v54 = vmul.f32 %v10347_v58, %v11199_v7  ;;  %v10433_v26 = vpop.eup %7645  ;;  %v7048_v43 = vpop.f32.mrb[138].mxu1  ;;  %v5262_v23 = vmax.f32 %v10425_v38, %v10420_v0  ;;  %v11200_v10 = vld [vmem:[#allocation118_spill] sm:$0xff] }
 0x8cb   :  { %7657 = vpow2.f32 %v5346_v37  ;;  %v5296_v13 = vsub.f32 %v10367_v57, %v5240_v22  ;;  %v5297_v48 = vsub.f32 %v10364_v2, %v5240_v22  ;;  %v5246_v18 = vrot.slane %v5245_v60, 1  ;;  %v10437_v32 = vpop.eup %7647  ;;  %v5123_v58 = vpop.f32.mrb[139].mxu1  ;;  %v11201_v37 = vld [vmem:[#allocation119_spill] sm:$0xff] }
 0x8cc   :  { %v5252_v34 = vmax.f32 %v5250_v11, %v5251_v44  ;;  %v5257_v21 = vmax.f32 %v5255_v3, %v5256_v5  ;;  %v10442_v63 = vadd.f32 %v7048_v43, %v11200_v10  ;;  %v10444_v35 = vpop.eup %7649  ;;  %v10447_v2 = vadd.f32 %v5123_v58, %v11201_v37 }
 0x8cd   :  { %v5348_v62 = vmul.f32 1.442695, %v5296_v13  ;;  %v5350_v41 = vmul.f32 1.442695, %v5297_v48  ;;  %v5247_v57 = vmax.f32 %v5245_v60, %v5246_v18  ;;  %v5263_v22 = vrot.slane %v5262_v23, 4 }
 0x8ce   :  { %v5253_v9 = vrot.slane %v5252_v34, 1  ;;  %v5258_v49 = vrot.slane %v5257_v21, 2  ;;  %7659 = vrcp.f32 %v10427_v46  ;;  %v5269_v44 = vmax.f32 %v10447_v2, %v10442_v63 }
 0x8cf   :  { %7661 = vpow2.f32 %v5348_v62  ;;  %v5298_v11 = vsub.f32 %v10383_v50, %v5247_v57  ;;  %v5299_v3 = vsub.f32 %v10378_v45, %v5247_v57  ;;  %v5264_v7 = vmax.f32 %v5262_v23, %v5263_v22  ;;  %v11202_v23 = vld [vmem:[#allocation97_spill] sm:$0xff] }
 0x8d0   :  { %v10454_v56 = vpop.eup %7651  ;;  %7663 = vpow2.f32 %v5350_v41  ;;  %v5254_v60 = vmax.f32 %v5252_v34, %v5253_v9  ;;  %v5259_v5 = vmax.f32 %v5257_v21, %v5258_v49  ;;  %vm5516_vm0 = vcmp.gt.f32.partialorder %v10427_v46, 0.0 }
 0x8d1   :  { %v10457_v13 = vpop.eup %7653  ;;  %v5352_v48 = vmul.f32 1.442695, %v5298_v11  ;;  %v5354_v18 = vmul.f32 1.442695, %v5299_v3  ;;  %v5270_v43 = vrot.slane %v5269_v44, 4  ;;  %v5411_v50 = vadd.f32 %v10431_v54, %v10387_v14  ;;  %v11203_v3 = vld [vmem:[#allocation96_spill] sm:$0xff] }
 0x8d2   :  { %v5300_v45 = vsub.f32 %v10399_v59, %v5254_v60  ;;  %v5301_v10 = vsub.f32 %v10396_v6, %v5254_v60  ;;  %v5260_v58 = vrot.slane %v5259_v5, 1  ;;  %v5265_v62 = vrot.slane %v5264_v7, 2 }
 0x8d3   :  { %7665 = vpow2.f32 %v5352_v48  ;;  %v5271_v34 = vmax.f32 %v5269_v44, %v5270_v43  ;;  %v5412_v21 = vrot.slane %v5411_v50, 4  ;;  %v10465_v41 = vmul.f32 %v10357_v17, %v11202_v23  ;;  %v11204_v48 = vld [vmem:[#allocation101_spill] sm:$0xff] }
 0x8d4   :  { %v10467_v57 = vpop.eup %7655  ;;  %7667 = vpow2.f32 %v5354_v18  ;;  %v5356_v37 = vmul.f32 1.442695, %v5300_v45  ;;  %v5358_v9 = vmul.f32 1.442695, %v5301_v10  ;;  %v5261_v49 = vmax.f32 %v5259_v5, %v5260_v58  ;;  %v11205_v58 = vld [vmem:[#allocation100_spill] sm:$0xff] }
 0x8d5   :  { %v10469_v22 = vpop.eup %7657  ;;  %v5266_v59 = vmax.f32 %v5264_v7, %v5265_v62  ;;  %v5272_v11 = vrot.slane %v5271_v34, 2  ;;  %v5413_v6 = vadd.f32 %v5412_v21, %v5411_v50  ;;  %v10473_v60 = vmul.f32 %v10359_v36, %v11203_v3 }
 0x8d6   :  { %7669 = vpow2.f32 %v5356_v37  ;;  %v5302_v44 = vsub.f32 %v10413_v33, %v5261_v49  ;;  %v5303_v17 = vsub.f32 %v10408_v8, %v5261_v49  ;;  %v10479_v18 = vmul.f32 %v10369_v42, %v11204_v48 }
 0x8d7   :  { %7671 = vpow2.f32 %v5358_v9  ;;  %v5267_v5 = vrot.slane %v5266_v59, 1  ;;  %v5273_v43 = vmax.f32 %v5271_v34, %v5272_v11  ;;  %v5414_v45 = vrot.slane %v5413_v6, 2 }
 0x8d8   :  { %v7660_v7 = vpop.eup %7659  ;;  %v5360_v10 = vmul.f32 1.442695, %v5302_v44  ;;  %v5362_v50 = vmul.f32 1.442695, %v5303_v17  ;;  %v5418_v36 = vadd.f32 %v10473_v60, %v10465_v41  ;;  %v10485_v62 = vmul.f32 %v10373_v4, %v11205_v58  ;;  %v11208_v58 = vld [vmem:[#allocation109_spill] sm:$0xff] }
 0x8d9   :  { %v10487_v33 = vpop.eup %7661  ;;  %v5268_v8 = vmax.f32 %v5266_v59, %v5267_v5  ;;  %v5274_v21 = vrot.slane %v5273_v43, 1  ;;  %v5548_v42 = vsel %vm5516_vm0, %v7660_v7, 0.0  ;;  %v5415_v23 = vadd.f32 %v5414_v45, %v5413_v6  ;;  %v11206_v6 = vld [vmem:[#allocation105_spill] sm:$0xff] }
 0x8da   :  { %v10491_v34 = vpop.eup %7663  ;;  %7673 = vpow2.f32 %v5360_v10  ;;  %v5564_v37 = vmul.f32 %v5548_v42, %v10316_v27  ;;  %v5565_v9 = vmul.f32 %v5548_v42, %v10331_v30  ;;  %v5419_v49 = vrot.slane %v5418_v36, 4  ;;  %v11207_v10 = vld [vmem:[#allocation104_spill] sm:$0xff] }
 0x8db   :  { %7675 = vpow2.f32 %v5362_v50  ;;  %v5304_v4 = vsub.f32 %v10425_v38, %v5268_v8  ;;  %v5305_v11 = vsub.f32 %v10420_v0, %v5268_v8  ;;  %v5275_v3 = vmax.f32 %v5273_v43, %v5274_v21 }
 0x8dc   :  { %7081 = vmatprep.mubr.f32.mxu0 %v5564_v37  ;;  %v5416_v59 = vrot.slane %v5415_v23, 1  ;;  %v5420_v44 = vadd.f32 %v5419_v49, %v5418_v36  ;;  %v5425_v46 = vadd.f32 %v10485_v62, %v10479_v18  ;;  %v10501_v17 = vmul.f32 %v10389_v20, %v11206_v6 }
 0x8dd   :  { %v10503_v27 = vpop.eup %7665  ;;  %v5364_v30 = vmul.f32 1.442695, %v5304_v4  ;;  %v5366_v48 = vmul.f32 1.442695, %v5305_v11  ;;  %v5306_v5 = vsub.f32 %v10447_v2, %v5275_v3  ;;  %v5307_v38 = vsub.f32 %v10442_v63, %v5275_v3  ;;  %7082 = vmatmul.mubr.f32.vlgmr.msra.gmra.mrb[122].mxu0 %v5565_v9  ;;  %v11210_v9 = vld [vmem:[#allocation113_spill] sm:$0xff]  ;;  %v11211_v11 = vld [vmem:[#allocation112_spill] sm:$0xff] }
 0x8de   :  { %v10507_v0 = vpop.eup %7667  ;;  %v10509_v43 = vadd.f32 %v5416_v59, %v5415_v23  ;;  %v5421_v45 = vrot.slane %v5420_v44, 2  ;;  %v5426_v7 = vrot.slane %v5425_v46, 4  ;;  %v10513_v50 = vmul.f32 %v10391_v28, %v11207_v10  ;;  %v11209_v28 = vld [vmem:[#allocation108_spill] sm:$0xff] }
 0x8df   :  { %7677 = vpow2.f32 %v5364_v30  ;;  %v5368_v20 = vmul.f32 1.442695, %v5306_v5  ;;  %v5370_v36 = vmul.f32 1.442695, %v5307_v38  ;;  %v10517_v8 = vmul.f32 %v10405_v53, %v11208_v58  ;;  %v11213_v5 = vld [vmem:[#allocation116_spill] sm:$0xff] }
 0x8e0   :  { %v10519_v2 = vpop.eup %7669  ;;  %7679 = vpow2.f32 %v5366_v48  ;;  %v5422_v63 = vadd.f32 %v5421_v45, %v5420_v44  ;;  %v5427_v21 = vadd.f32 %v5426_v7, %v5425_v46  ;;  %v5432_v23 = vadd.f32 %v10513_v50, %v10501_v17  ;;  %v11212_v46 = vld [vmem:[#allocation117_spill] sm:$0xff]  ;;  %v11214_v10 = vld [vmem:[#allocation120_spill] sm:$0xff] }
 0x8e1   :  { %v10521_v42 = vpop.eup %7671  ;;  %7681 = vpow2.f32 %v5368_v20  ;;  %v10527_v37 = vmul.f32 %v10410_v39, %v11209_v28  ;;  %v10531_v49 = vmul.f32 %v10422_v24, %v11210_v9  ;;  %v10535_v3 = vmul.f32 %v10433_v26, %v11211_v11  ;;  %v11220_v11 = vld [vmem:[#allocation123_spill] sm:$0xff] }
 0x8e2   :  { %7683 = vpow2.f32 %v5370_v36  ;;  %v5423_v53 = vrot.slane %v5422_v63, 1  ;;  %v5428_v4 = vrot.slane %v5427_v21, 2  ;;  %v5433_v59 = vrot.slane %v5432_v23, 4 }
 0x8e3   :  { %7685 = vrcp.f32 %v10509_v43  ;;  %v5439_v44 = vadd.f32 %v10527_v37, %v10517_v8  ;;  %v10542_v39 = vmul.f32 %v10437_v32, %v11212_v46  ;;  %v5446_v48 = vadd.f32 %v10535_v3, %v10531_v49  ;;  %v11216_v32 = vld [vmem:[#allocation121_spill] sm:$0xff] }
 0x8e4   :  { %v10544_v6 = vpop.eup %7673  ;;  %v5424_v24 = vadd.f32 %v5423_v53, %v5422_v63  ;;  %v5429_v30 = vadd.f32 %v5428_v4, %v5427_v21  ;;  %v10550_v26 = vmul.f32 %v10444_v35, %v11213_v5  ;;  %v5434_v45 = vadd.f32 %v5433_v59, %v5432_v23  ;;  %v11218_v4 = vld [vmem:[#allocation122_spill] sm:$0xff] }
 0x8e5   :  { %v10552_v38 = vpop.eup %7675  ;;  %v5440_v7 = vrot.slane %v5439_v44, 4  ;;  %v10556_v20 = vmul.f32 %v10454_v56, %v11214_v10  ;;  %v10560_v36 = vmul.f32 %v10457_v13, %v11216_v32  ;;  %v5447_v63 = vrot.slane %v5446_v48, 4 }
 0x8e6   :  { %7687 = vrcp.f32 %v5424_v24  ;;  %v5430_v58 = vrot.slane %v5429_v30, 1  ;;  %v5435_v21 = vrot.slane %v5434_v45, 2  ;;  %v5453_v35 = vadd.f32 %v10550_v26, %v10542_v39 }
 0x8e7   :  { %11215 = vst [vmem:[#allocation22_spill] sm:$0xff] %v10556_v20  ;;  %11217 = vst [vmem:[#allocation25_spill] sm:$0xff] %v10560_v36  ;;  %v5441_v28 = vadd.f32 %v5440_v7, %v5439_v44  ;;  %v5460_v23 = vadd.f32 %v10560_v36, %v10556_v20  ;;  %v5448_v53 = vadd.f32 %v5447_v63, %v5446_v48  ;;  %vm5517_vm8 = vcmp.gt.f32.partialorder %v10509_v43, 0.0 }
 0x8e8   :  { %v5431_v9 = vadd.f32 %v5430_v58, %v5429_v30  ;;  %v10568_v56 = vmul.f32 %v10467_v57, %v11218_v4  ;;  %v10572_v13 = vmul.f32 %v10469_v22, %v11220_v11  ;;  %v5436_v46 = vadd.f32 %v5435_v21, %v5434_v45 }
 0x8e9   :  { %v10574_v59 = vpop.eup %7677  ;;  %v5442_v44 = vrot.slane %v5441_v28, 2  ;;  %v5454_v5 = vrot.slane %v5453_v35, 4  ;;  %v5461_v7 = vrot.slane %v5460_v23, 4  ;;  %v5449_v30 = vrot.slane %v5448_v53, 2 }
 0x8ea   :  { %11219 = vst [vmem:[#allocation28_spill] sm:$0xff] %v10568_v56  ;;  %11221 = vst [vmem:[#allocation31_spill] sm:$0xff] %v10572_v13  ;;  %v10576_v10 = vpop.eup %7679  ;;  %7689 = vrcp.f32 %v5431_v9  ;;  %v5467_v57 = vadd.f32 %v10572_v13, %v10568_v56  ;;  %v5437_v32 = vrot.slane %v5436_v46, 1  ;;  %v10587_v11 = vmul.f32 %v10487_v33, %v11122_v52 }
 0x8eb   :  { %v10581_v48 = vpop.eup %7681  ;;  %v5443_v22 = vadd.f32 %v5442_v44, %v5441_v28  ;;  %v5455_v58 = vadd.f32 %v5454_v5, %v5453_v35  ;;  %v5462_v63 = vadd.f32 %v5461_v7, %v5460_v23  ;;  %v5450_v45 = vadd.f32 %v5449_v30, %v5448_v53 }
 0x8ec   :  { %v10583_v4 = vpop.eup %7683  ;;  %v5468_v21 = vrot.slane %v5467_v57, 4  ;;  %v10591_v29 = vmul.f32 %v10491_v34, %v11123_v15  ;;  %v5438_v13 = vadd.f32 %v5437_v32, %v5436_v46  ;;  %vm5518_vm9 = vcmp.gt.f32.partialorder %v5424_v24, 0.0 }
 0x8ed   :  { %v7686_v47 = vpop.eup %7685  ;;  %v5444_v56 = vrot.slane %v5443_v22, 1  ;;  %v5456_v36 = vrot.slane %v5455_v58, 2  ;;  %v5463_v20 = vrot.slane %v5462_v63, 2  ;;  %v5451_v35 = vrot.slane %v5450_v45, 1 }
 0x8ee   :  { %v5549_v28 = vsel %vm5517_vm8, %v7686_v47, 0.0  ;;  %v5469_v23 = vadd.f32 %v5468_v21, %v5467_v57  ;;  %v5474_v53 = vadd.f32 %v10591_v29, %v10587_v11  ;;  %7691 = vrcp.f32 %v5438_v13 }
 0x8ef   :  { %v5566_v52 = vmul.f32 %v5549_v28, %v10387_v14  ;;  %v5567_v33 = vmul.f32 %v5549_v28, %v10431_v54  ;;  %v10599_v34 = vadd.f32 %v5444_v56, %v5443_v22  ;;  %v10601_v46 = vadd.f32 %v5451_v35, %v5450_v45 }
 0x8f0   :  { %v7688_v15 = vpop.eup %7687  ;;  %v5457_v44 = vadd.f32 %v5456_v36, %v5455_v58  ;;  %v5464_v5 = vadd.f32 %v5463_v20, %v5462_v63  ;;  %v5470_v43 = vrot.slane %v5469_v23, 2  ;;  %v5475_v7 = vrot.slane %v5474_v53, 4 }
 0x8f1   :  { %7084 = vmatprep.mubr.f32.mxu0 %v5566_v52  ;;  %v5550_v47 = vsel %vm5518_vm9, %v7688_v15, 0.0  ;;  %vm5519_vm10 = vcmp.gt.f32.partialorder %v5431_v9, 0.0  ;;  %7693 = vrcp.f32 %v10599_v34  ;;  %v10609_v36 = vmul.f32 %v10503_v27, %v9037_v40 }
 0x8f2   :  { %7085 = vmatmul.mubr.f32.gmra.mrb[124].mxu0 %v5567_v33  ;;  %v5568_v30 = vmul.f32 %v5550_v47, %v10465_v41  ;;  %v5569_v14 = vmul.f32 %v5550_v47, %v10473_v60  ;;  %7695 = vrcp.f32 %v10601_v46  ;;  %v5458_v54 = vrot.slane %v5457_v44, 1 }
 0x8f3   :  { %v5465_v24 = vrot.slane %v5464_v5, 1  ;;  %v5471_v56 = vadd.f32 %v5470_v43, %v5469_v23  ;;  %v5476_v57 = vadd.f32 %v5475_v7, %v5474_v53  ;;  %v10613_v41 = vmul.f32 %v10507_v0, %v9054_v25 }
 0x8f4   :  { %v7690_v20 = vpop.eup %7689  ;;  %7087 = vmatprep.mubr.f32.mxu0 %v5568_v30  ;;  %v10617_v60 = vmul.f32 %v10519_v2, %v9084_v16  ;;  %v10619_v32 = vadd.f32 %v5458_v54, %v5457_v44  ;;  %v10625_v40 = vmul.f32 %v10521_v42, %v9094_v12  ;;  %vm5520_vm11 = vcmp.gt.f32.partialorder %v5438_v13, 0.0 }
 0x8f5   :  { %v5551_v9 = vsel %vm5519_vm10, %v7690_v20, 0.0  ;;  %v10621_v22 = vadd.f32 %v5465_v24, %v5464_v5  ;;  %v5472_v25 = vrot.slane %v5471_v56, 1  ;;  %v5477_v0 = vrot.slane %v5476_v57, 2 }
 0x8f6   :  { %7088 = vmatmul.mubr.f32.gmra.mrb[126].mxu0 %v5569_v14  ;;  %v5570_v27 = vmul.f32 %v5551_v9, %v10479_v18  ;;  %v5571_v58 = vmul.f32 %v5551_v9, %v10485_v62  ;;  %vm5521_vm12 = vcmp.gt.f32.partialorder %v10599_v34, 0.0  ;;  %7697 = vrcp.f32 %v10619_v32  ;;  %v11223_v9 = vld [vmem:[#allocation25_spill] sm:$0xff] }
 0x8f7   :  { %v5481_v16 = vadd.f32 %v10613_v41, %v10609_v36  ;;  %7699 = vrcp.f32 %v10621_v22  ;;  %v10634_v12 = vadd.f32 %v5472_v25, %v5471_v56  ;;  %v5478_v2 = vadd.f32 %v5477_v0, %v5476_v57  ;;  %v11222_v56 = vld [vmem:[#allocation22_spill] sm:$0xff]  ;;  %v11224_v0 = vld [vmem:[#allocation28_spill] sm:$0xff] }
 0x8f8   :  { %7090 = vmatprep.mubr.f32.mxu0 %v5570_v27  ;;  %v5488_v18 = vadd.f32 %v10625_v40, %v10617_v60  ;;  %v7692_v62 = vpop.eup %7691  ;;  %vm5522_vm13 = vcmp.gt.f32.partialorder %v10601_v46, 0.0  ;;  %v10641_v13 = vmul.f32 %v10544_v6, %v9112_v55  ;;  %v10645_v63 = vmul.f32 %v10552_v38, %v9124_v1 }
 0x8f9   :  { %v5482_v42 = vrot.slane %v5481_v16, 4  ;;  %v5552_v45 = vsel %vm5520_vm11, %v7692_v62, 0.0  ;;  %7701 = vrcp.f32 %v10634_v12  ;;  %v5479_v21 = vrot.slane %v5478_v2, 1 }
 0x8fa   :  { %7091 = vmatmul.mubr.f32.gmra.mrb[128].mxu0 %v5571_v58  ;;  %v10650_v28 = vmul.f32 %v10574_v59, %v9148_v51  ;;  %v5572_v35 = vmul.f32 %v5552_v45, %v10501_v17  ;;  %v5573_v23 = vmul.f32 %v5552_v45, %v10513_v50  ;;  %v5489_v55 = vrot.slane %v5488_v18, 4 }
 0x8fb   :  { %v5483_v53 = vadd.f32 %v5482_v42, %v5481_v16  ;;  %v7694_v6 = vpop.eup %7693  ;;  %v10654_v52 = vadd.f32 %v5479_v21, %v5478_v2  ;;  %v5495_v1 = vadd.f32 %v10645_v63, %v10641_v13  ;;  %v10660_v38 = vmul.f32 %v10576_v10, %v9159_v31 }
 0x8fc   :  { %v10664_v51 = vmul.f32 %v10581_v48, %v9171_v19  ;;  %v7696_v59 = vpop.eup %7695  ;;  %7093 = vmatprep.mubr.f32.mxu0 %v5572_v35  ;;  %v5553_v17 = vsel %vm5521_vm12, %v7694_v6, 0.0  ;;  %v5490_v33 = vadd.f32 %v5489_v55, %v5488_v18  ;;  %v10670_v15 = vmul.f32 %v10583_v4, %v9187_v61 }
 0x8fd   :  { %v5484_v50 = vrot.slane %v5483_v53, 2  ;;  %v5574_v44 = vmul.f32 %v5553_v17, %v10517_v8  ;;  %v5575_v31 = vmul.f32 %v5553_v17, %v10527_v37  ;;  %v5554_v19 = vsel %vm5522_vm13, %v7696_v59, 0.0 }
 0x8fe   :  { %7094 = vmatmul.mubr.f32.gmra.mrb[130].mxu0 %v5573_v23  ;;  %v5576_v10 = vmul.f32 %v5554_v19, %v10531_v49  ;;  %v5577_v48 = vmul.f32 %v5554_v19, %v10535_v3  ;;  %7703 = vrcp.f32 %v10654_v52  ;;  %v5491_v5 = vrot.slane %v5490_v33, 2 }
 0x8ff   :  { %v5485_v34 = vadd.f32 %v5484_v50, %v5483_v53  ;;  %7096 = vmatprep.mubr.f32.mxu0 %v5574_v44  ;;  %v5496_v47 = vrot.slane %v5495_v1, 4  ;;  %v5502_v61 = vadd.f32 %v10660_v38, %v10650_v28  ;;  %v5509_v8 = vadd.f32 %v10670_v15, %v10664_v51 }
 0x900   :  { %v7698_v37 = vpop.eup %7697  ;;  %vm5523_vm14 = vcmp.gt.f32.partialorder %v10619_v32, 0.0  ;;  %vm5524_vm15 = vcmp.gt.f32.partialorder %v10621_v22, 0.0  ;;  %vm5525_vm0 = vcmp.gt.f32.partialorder %v10634_v12, 0.0  ;;  %v5492_v46 = vadd.f32 %v5491_v5, %v5490_v33 }
 0x901   :  { %v5486_v49 = vrot.slane %v5485_v34, 1  ;;  %v7700_v3 = vpop.eup %7699  ;;  %v5555_v4 = vsel %vm5523_vm14, %v7698_v37, 0.0  ;;  %v5497_v43 = vadd.f32 %v5496_v47, %v5495_v1  ;;  %v5503_v7 = vrot.slane %v5502_v61, 4 }
 0x902   :  { %7097 = vmatmul.mubr.f32.gmra.mrb[132].mxu0 %v5575_v31  ;;  %v5578_v30 = vmul.f32 %v5555_v4, %v10542_v39  ;;  %v5579_v14 = vmul.f32 %v5555_v4, %v10550_v26  ;;  %v5556_v54 = vsel %vm5524_vm15, %v7700_v3, 0.0  ;;  %v5493_v22 = vrot.slane %v5492_v46, 1  ;;  %v11225_v39 = vld [vmem:[#allocation31_spill] sm:$0xff] }
 0x903   :  { %7099 = vmatprep.mubr.f32.mxu0 %v5576_v10  ;;  %v5487_v24 = vadd.f32 %v5486_v49, %v5485_v34  ;;  %v7702_v20 = vpop.eup %7701  ;;  %v5580_v57 = vmul.f32 %v5556_v54, %v11222_v56  ;;  %v5581_v32 = vmul.f32 %v5556_v54, %v11223_v9  ;;  %v5498_v27 = vrot.slane %v5497_v43, 2  ;;  %v11226_v4 = vld [vmem:[#allocation19_spill] sm:$0xff] }
 0x904   :  { %v5557_v58 = vsel %vm5525_vm0, %v7702_v20, 0.0  ;;  %v5504_v25 = vadd.f32 %v5503_v7, %v5502_v61  ;;  %v5494_v26 = vadd.f32 %v5493_v22, %v5492_v46  ;;  %v5510_v42 = vrot.slane %v5509_v8, 4 }
 0x905   :  { %7705 = vrcp.f32 %v5487_v24  ;;  %v5582_v16 = vmul.f32 %v5557_v58, %v11224_v0  ;;  %v5583_v2 = vmul.f32 %v5557_v58, %v11225_v39  ;;  %v5499_v18 = vadd.f32 %v5498_v27, %v5497_v43  ;;  %v11227_v43 = vld [vmem:[#allocation16_spill] sm:$0xff] }
 0x906   :  { %7100 = vmatmul.mubr.f32.gmra.mrb[134].mxu0 %v5577_v48  ;;  %v5505_v62 = vrot.slane %v5504_v25, 2  ;;  %7707 = vrcp.f32 %v5494_v26  ;;  %vm5526_vm8 = vcmp.gt.f32.partialorder %v10654_v52, 0.0  ;;  %v5511_v12 = vadd.f32 %v5510_v42, %v5509_v8 }
 0x907   :  { %7102 = vmatprep.mubr.f32.mxu0 %v5578_v30  ;;  %v5500_v45 = vrot.slane %v5499_v18, 1  ;;  %vm5527_vm9 = vcmp.gt.f32.partialorder %v5487_v24, 0.0  ;;  %vm5528_vm10 = vcmp.gt.f32.partialorder %v5494_v26, 0.0 }
 0x908   :  { %v7704_v21 = vpop.eup %7703  ;;  %v5506_v35 = vadd.f32 %v5505_v62, %v5504_v25  ;;  %v5512_v59 = vrot.slane %v5511_v12, 2 }
 0x909   :  { %v5558_v23 = vsel %vm5526_vm8, %v7704_v21, 0.0  ;;  %v5501_v53 = vadd.f32 %v5500_v45, %v5499_v18 }
 0x90a   :  { %7103 = vmatmul.mubr.f32.gmra.mrb[136].mxu0 %v5579_v14  ;;  %v5584_v55 = vmul.f32 %v5558_v23, %v10587_v11  ;;  %v5585_v6 = vmul.f32 %v5558_v23, %v10591_v29  ;;  %v5507_v1 = vrot.slane %v5506_v35, 1  ;;  %v5513_v50 = vadd.f32 %v5512_v59, %v5511_v12 }
 0x90b   :  { %7105 = vmatprep.mubr.f32.mxu0 %v5580_v57  ;;  %7709 = vrcp.f32 %v5501_v53  ;;  %vm5529_vm11 = vcmp.gt.f32.partialorder %v5501_v53, 0.0 }
 0x90c   :  { %v5508_v17 = vadd.f32 %v5507_v1, %v5506_v35  ;;  %v5514_v52 = vrot.slane %v5513_v50, 1 }
 0x90e   :  { %7106 = vmatmul.mubr.f32.gmra.mrb[138].mxu0 %v5581_v32  ;;  %7711 = vrcp.f32 %v5508_v17  ;;  %v5515_v10 = vadd.f32 %v5514_v52, %v5513_v50  ;;  %vm5530_vm12 = vcmp.gt.f32.partialorder %v5508_v17, 0.0  ;;  %v10720_v50 = vld [vmem:[%s10790_s4 + $0x4a8] ss:$0 sm:$0xff]  ;;  %s7742_s4 = smov [#allocation3]  }
 0x90f   :  { %v7706_v33 = vpop.eup %7705  ;;  %7108 = vmatprep.mubr.f32.mxu0 %v5582_v16  ;;  %s6038_s7 = sshll.u32 %s7742_s4, 4  ;;  %s6039_s7 = int_to_ptr.vmem [resolvable:$true] %s6038_s7 }
 0x910   :  { %v5559_v44 = vsel %vm5527_vm9, %v7706_v33, 0.0  ;;  %v7708_v11 = vpop.eup %7707  ;;  %7713 = vrcp.f32 %v5515_v10  ;;  %vm5531_vm13 = vcmp.gt.f32.partialorder %v5515_v10, 0.0  ;;  %s7715_s8 = scalar_lea.vmem %s6039_s7, 256  ;;  %p7720_p1 = scmp.lt.s32.totalorder %s6039_s7, %s6039_s7 }
 0x911   :  { %v5586_v31 = vmul.f32 %v5559_v44, %v10609_v36  ;;  %v5587_v19 = vmul.f32 %v5559_v44, %v10613_v41  ;;  %v5560_v29 = vsel %vm5528_vm10, %v7708_v11, 0.0  ;;  %p7716_p0 = scmp.ne.s32.totalorder %s6039_s7, %s7715_s8  ;;  %p7721_p2 = scmp.lt.s32.totalorder %s7715_s8, %s7715_s8 }
 0x912   :  { %7109 = vmatmul.mubr.f32.gmra.mrb[140].mxu0 %v5583_v2  ;;  %v5588_v48 = vmul.f32 %v5560_v29, %v10617_v60  ;;  %v5589_v34 = vmul.f32 %v5560_v29, %v10625_v40 }
 0x913   :  { %7111 = vmatprep.mubr.f32.mxu0 %v5584_v55  ;;  %p7722_p3 = por %p7721_p2, %p7720_p1 }
 0x915   :  { %v7710_v5 = vpop.eup %7709  ;;  %p7723_p4 = pnand %p7722_p3, %p7716_p0 }
 0x916   :  { %7112 = vmatmul.mubr.f32.gmra.mrb[142].mxu0 %v5585_v6  ;;  %v5561_v47 = vsel %vm5529_vm11, %v7710_v5, 0.0 }
 0x917   :  { %7114 = vmatprep.mubr.f32.mxu0 %v5586_v31  ;;  %v5590_v36 = vmul.f32 %v5561_v47, %v10641_v13  ;;  %v5591_v41 = vmul.f32 %v5561_v47, %v10645_v63 }
 0x918   :  { %v7712_v61 = vpop.eup %7711 }
 0x919   :  { %v5562_v8 = vsel %vm5530_vm12, %v7712_v61, 0.0 }
 0x91a   :  { %7115 = vmatmul.mubr.f32.gmra.mrb[144].mxu0 %v5587_v19  ;;  %v5592_v37 = vmul.f32 %v5562_v8, %v10650_v28  ;;  %v5593_v60 = vmul.f32 %v5562_v8, %v10660_v38  ;;  %v7714_v49 = vpop.eup %7713 }
 0x91b   :  { %7117 = vmatprep.mubr.f32.mxu0 %v5588_v48  ;;  %v5563_v40 = vsel %vm5531_vm13, %v7714_v49, 0.0 }
 0x91c   :  { %v5594_v3 = vmul.f32 %v5563_v40, %v10664_v51  ;;  %v5595_v13 = vmul.f32 %v5563_v40, %v10670_v15 }
 0x91e   :  { %7118 = vmatmul.mubr.f32.gmra.mrb[146].mxu0 %v5589_v34 }
 0x91f   :  { %7120 = vmatprep.mubr.f32.mxu0 %v5590_v36 }
 0x922   :  { %7121 = vmatmul.mubr.f32.gmra.mrb[148].mxu0 %v5591_v41 }
 0x923   :  { %7123 = vmatprep.mubr.f32.mxu0 %v5592_v37 }
 0x926   :  { %7124 = vmatmul.mubr.f32.gmra.mrb[150].mxu0 %v5593_v60 }
 0x927   :  { %7126 = vmatprep.mubr.f32.mxu0 %v5594_v3 }
 0x92a   :  { %7127 = vmatmul.mubr.f32.gmra.mrb[152].mxu0 %v5595_v13 }
 0x9b0   :  { %v7083_v63 = vpop.f32.mrb[122].mxu0 }
 0x9b1   :  { %v5822_v46 = vmul.f32 %v7083_v63, %v11226_v4  ;;  %v5662_v28 = vpop.f32.mrb[123].mxu0 }
 0x9b2   :  { %v5821_v38 = vmul.f32 %v5662_v28, %v11227_v43 }
 0x9b4   :  { %v5853_v7 = vadd.f32 %v5822_v46, %v5821_v38 }
 0x9b6   :  { %v5854_v30 = vrot.slane %v5853_v7, 4 }
 0x9b8   :  { %v5855_v14 = vadd.f32 %v5854_v30, %v5853_v7 }
 0x9ba   :  { %v5856_v20 = vrot.slane %v5855_v14, 2 }
 0x9bc   :  { %v5857_v58 = vadd.f32 %v5856_v20, %v5855_v14 }
 0x9be   :  { %v5858_v42 = vrot.slane %v5857_v58, 1 }
 0x9c0   :  { %v5859_v17 = vadd.f32 %v5858_v42, %v5857_v58 }
 0x9c2   :  { %v5969_v47 = vadd.f32 %v10720_v50, %v5859_v17 }
 0x9c5   :  { %v7086_v54 = vpop.f32.mrb[124].mxu0 }
 0x9c6   :  { %v5824_v24 = vmul.f32 %v7086_v54, %v11226_v4  ;;  %v5672_v51 = vpop.f32.mrb[125].mxu0 }
 0x9c7   :  { %v5823_v15 = vmul.f32 %v5672_v51, %v11227_v43 }
 0x9c9   :  { %v5860_v56 = vadd.f32 %v5824_v24, %v5823_v15  ;;  %v7089_v57 = vpop.f32.mrb[126].mxu0 }
 0x9ca   :  { %v5826_v9 = vmul.f32 %v7089_v57, %v11226_v4  ;;  %v5682_v32 = vpop.f32.mrb[127].mxu0 }
 0x9cb   :  { %v5861_v22 = vrot.slane %v5860_v56, 4  ;;  %v5825_v27 = vmul.f32 %v5682_v32, %v11227_v43 }
 0x9cd   :  { %v5862_v25 = vadd.f32 %v5861_v22, %v5860_v56  ;;  %v5867_v0 = vadd.f32 %v5826_v9, %v5825_v27  ;;  %v7092_v16 = vpop.f32.mrb[128].mxu0 }
 0x9ce   :  { %v5828_v39 = vmul.f32 %v7092_v16, %v11226_v4  ;;  %v5692_v2 = vpop.f32.mrb[129].mxu0 }
 0x9cf   :  { %v5863_v26 = vrot.slane %v5862_v25, 2  ;;  %v5868_v18 = vrot.slane %v5867_v0, 4  ;;  %v5827_v62 = vmul.f32 %v5692_v2, %v11227_v43 }
 0x9d1   :  { %v5864_v45 = vadd.f32 %v5863_v26, %v5862_v25  ;;  %v5869_v21 = vadd.f32 %v5868_v18, %v5867_v0  ;;  %v5874_v35 = vadd.f32 %v5828_v39, %v5827_v62  ;;  %v7095_v12 = vpop.f32.mrb[130].mxu0 }
 0x9d2   :  { %v5830_v23 = vmul.f32 %v7095_v12, %v11226_v4  ;;  %v5702_v53 = vpop.f32.mrb[131].mxu0 }
 0x9d3   :  { %v5865_v55 = vrot.slane %v5864_v45, 1  ;;  %v5870_v6 = vrot.slane %v5869_v21, 2  ;;  %v5875_v1 = vrot.slane %v5874_v35, 4  ;;  %v5829_v59 = vmul.f32 %v5702_v53, %v11227_v43 }
 0x9d5   :  { %v5866_v33 = vadd.f32 %v5865_v55, %v5864_v45  ;;  %v5871_v52 = vadd.f32 %v5870_v6, %v5869_v21  ;;  %v5876_v44 = vadd.f32 %v5875_v1, %v5874_v35  ;;  %v5881_v31 = vadd.f32 %v5830_v23, %v5829_v59  ;;  %v7098_v19 = vpop.f32.mrb[132].mxu0 }
 0x9d6   :  { %v5832_v10 = vmul.f32 %v7098_v19, %v11226_v4  ;;  %v5712_v11 = vpop.f32.mrb[133].mxu0 }
 0x9d7   :  { %v5970_v29 = vadd.f32 %v10720_v50, %v5866_v33  ;;  %v5872_v48 = vrot.slane %v5871_v52, 1  ;;  %v5877_v34 = vrot.slane %v5876_v44, 2  ;;  %v5882_v5 = vrot.slane %v5881_v31, 4 }
 0x9d8   :  { %v5831_v36 = vmul.f32 %v5712_v11, %v11227_v43 }
 0x9d9   :  { %v6001_v41 = vrot.slane %v5970_v29, 7  ;;  %v5873_v61 = vadd.f32 %v5872_v48, %v5871_v52  ;;  %v5878_v8 = vadd.f32 %v5877_v34, %v5876_v44  ;;  %v5883_v37 = vadd.f32 %v5882_v5, %v5881_v31  ;;  %v7101_v60 = vpop.f32.mrb[134].mxu0 }
 0x9da   :  { %v5888_v49 = vadd.f32 %v5832_v10, %v5831_v36  ;;  %v5834_v40 = vmul.f32 %v7101_v60, %v11226_v4  ;;  %v5722_v3 = vpop.f32.mrb[135].mxu0 }
 0x9db   :  { %v6002_v13 = vsel %vm2799_vm1, %v6001_v41, %v5969_v47  ;;  %v5971_v63 = vadd.f32 %v10720_v50, %v5873_v61  ;;  %v5879_v46 = vrot.slane %v5878_v8, 1  ;;  %v5884_v28 = vrot.slane %v5883_v37, 2 }
 0x9dc   :  { %v5889_v38 = vrot.slane %v5888_v49, 4  ;;  %v5833_v7 = vmul.f32 %v5722_v3, %v11227_v43 }
 0x9dd   :  { %v6003_v30 = vrot.slane %v5971_v63, 6  ;;  %v5880_v14 = vadd.f32 %v5879_v46, %v5878_v8  ;;  %v5885_v54 = vadd.f32 %v5884_v28, %v5883_v37  ;;  %v7104_v24 = vpop.f32.mrb[136].mxu0 }
 0x9de   :  { %v5890_v51 = vadd.f32 %v5889_v38, %v5888_v49  ;;  %v5895_v15 = vadd.f32 %v5834_v40, %v5833_v7  ;;  %v5836_v20 = vmul.f32 %v7104_v24, %v11226_v4  ;;  %v5732_v56 = vpop.f32.mrb[137].mxu0 }
 0x9df   :  { %v6004_v57 = vsel %vm2802_vm2, %v6003_v30, %v6002_v13  ;;  %v5972_v9 = vadd.f32 %v10720_v50, %v5880_v14  ;;  %v5886_v32 = vrot.slane %v5885_v54, 1  ;;  %v5835_v22 = vmul.f32 %v5732_v56, %v11227_v43 }
 0x9e0   :  { %v5891_v27 = vrot.slane %v5890_v51, 2  ;;  %v5896_v58 = vrot.slane %v5895_v15, 4 }
 0x9e1   :  { %v6005_v25 = vrot.slane %v5972_v9, 5  ;;  %v5887_v0 = vadd.f32 %v5886_v32, %v5885_v54  ;;  %v5902_v16 = vadd.f32 %v5836_v20, %v5835_v22  ;;  %v7107_v39 = vpop.f32.mrb[138].mxu0 }
 0x9e2   :  { %v5892_v2 = vadd.f32 %v5891_v27, %v5890_v51  ;;  %v5897_v26 = vadd.f32 %v5896_v58, %v5895_v15  ;;  %v5838_v18 = vmul.f32 %v7107_v39, %v11226_v4  ;;  %v5742_v62 = vpop.f32.mrb[139].mxu0 }
 0x9e3   :  { %v6006_v42 = vsel %vm2805_vm3, %v6005_v25, %v6004_v57  ;;  %v5973_v45 = vadd.f32 %v10720_v50, %v5887_v0  ;;  %v5903_v21 = vrot.slane %v5902_v16, 4  ;;  %v5837_v35 = vmul.f32 %v5742_v62, %v11227_v43 }
 0x9e4   :  { %v5893_v12 = vrot.slane %v5892_v2, 1  ;;  %v5898_v23 = vrot.slane %v5897_v26, 2 }
 0x9e5   :  { %v6007_v53 = vrot.slane %v5973_v45, 4  ;;  %v5904_v55 = vadd.f32 %v5903_v21, %v5902_v16  ;;  %v5909_v6 = vadd.f32 %v5838_v18, %v5837_v35  ;;  %v7110_v1 = vpop.f32.mrb[140].mxu0 }
 0x9e6   :  { %v5894_v59 = vadd.f32 %v5893_v12, %v5892_v2  ;;  %v5899_v17 = vadd.f32 %v5898_v23, %v5897_v26  ;;  %v5840_v33 = vmul.f32 %v7110_v1, %v11226_v4  ;;  %v5752_v52 = vpop.f32.mrb[141].mxu0 }
 0x9e7   :  { %v5905_v44 = vrot.slane %v5904_v55, 2  ;;  %v5910_v31 = vrot.slane %v5909_v6, 4  ;;  %v5839_v19 = vmul.f32 %v5752_v52, %v11227_v43  ;;  %v6008_v10 = vsel %vm2808_vm4, %v6007_v53, %v6006_v42 }
 0x9e8   :  { %v5974_v11 = vadd.f32 %v10720_v50, %v5894_v59  ;;  %v5900_v29 = vrot.slane %v5899_v17, 1 }
 0x9e9   :  { %v5906_v48 = vadd.f32 %v5905_v44, %v5904_v55  ;;  %v5911_v34 = vadd.f32 %v5910_v31, %v5909_v6  ;;  %v5916_v5 = vadd.f32 %v5840_v33, %v5839_v19  ;;  %v7113_v47 = vpop.f32.mrb[142].mxu0 }
 0x9ea   :  { %v6009_v36 = vrot.slane %v5974_v11, 3  ;;  %v5901_v41 = vadd.f32 %v5900_v29, %v5899_v17  ;;  %v5842_v61 = vmul.f32 %v7113_v47, %v11226_v4  ;;  %v5762_v8 = vpop.f32.mrb[143].mxu0 }
 0x9eb   :  { %v5907_v37 = vrot.slane %v5906_v48, 1  ;;  %v5912_v60 = vrot.slane %v5911_v34, 2  ;;  %v5917_v49 = vrot.slane %v5916_v5, 4  ;;  %v5841_v40 = vmul.f32 %v5762_v8, %v11227_v43 }
 0x9ec   :  { %v5975_v3 = vadd.f32 %v10720_v50, %v5901_v41  ;;  %v6010_v13 = vsel %vm2811_vm5, %v6009_v36, %v6008_v10 }
 0x9ed   :  { %v5908_v63 = vadd.f32 %v5907_v37, %v5906_v48  ;;  %v5913_v46 = vadd.f32 %v5912_v60, %v5911_v34  ;;  %v5918_v28 = vadd.f32 %v5917_v49, %v5916_v5  ;;  %v5923_v38 = vadd.f32 %v5842_v61, %v5841_v40  ;;  %v7116_v7 = vpop.f32.mrb[144].mxu0 }
 0x9ee   :  { %v6011_v30 = vrot.slane %v5975_v3, 2  ;;  %v5844_v14 = vmul.f32 %v7116_v7, %v11226_v4  ;;  %v5772_v54 = vpop.f32.mrb[145].mxu0 }
 0x9ef   :  { %v5976_v24 = vadd.f32 %v10720_v50, %v5908_v63  ;;  %v5919_v51 = vrot.slane %v5918_v28, 2  ;;  %v5924_v15 = vrot.slane %v5923_v38, 4  ;;  %v5914_v20 = vrot.slane %v5913_v46, 1 }
 0x9f0   :  { %v5843_v56 = vmul.f32 %v5772_v54, %v11227_v43  ;;  %v6012_v57 = vsel %vm2814_vm6, %v6011_v30, %v6010_v13 }
 0x9f1   :  { %v6013_v9 = vrot.slane %v5976_v24, 1  ;;  %v5920_v32 = vadd.f32 %v5919_v51, %v5918_v28  ;;  %v5925_v22 = vadd.f32 %v5924_v15, %v5923_v38  ;;  %v7119_v27 = vpop.f32.mrb[146].mxu0  ;;  %v5915_v26 = vadd.f32 %v5914_v20, %v5913_v46 }
 0x9f2   :  { %v5930_v58 = vadd.f32 %v5844_v14, %v5843_v56  ;;  %v5846_v25 = vmul.f32 %v7119_v27, %v11226_v4  ;;  %v5782_v0 = vpop.f32.mrb[147].mxu0 }
 0x9f3   :  { %v5921_v16 = vrot.slane %v5920_v32, 1  ;;  %v5926_v39 = vrot.slane %v5925_v22, 2  ;;  %v5845_v2 = vmul.f32 %v5782_v0, %v11227_v43  ;;  %v6014_v62 = vsel %vm2817_vm7, %v6013_v9, %v6012_v57 }
 0x9f4   :  { %v5931_v18 = vrot.slane %v5930_v58, 4  ;;  %6031 = vst [vmem:[#allocation3] sm:$0xff] %v6014_v62  ;;  %v5977_v17 = vadd.f32 %v10720_v50, %v5915_v26 }
 0x9f5   :  { %v5922_v42 = vadd.f32 %v5921_v16, %v5920_v32  ;;  %v5927_v45 = vadd.f32 %v5926_v39, %v5925_v22  ;;  %v5937_v21 = vadd.f32 %v5846_v25, %v5845_v2  ;;  %v7122_v35 = vpop.f32.mrb[148].mxu0 }
 0x9f6   :  { %v5932_v12 = vadd.f32 %v5931_v18, %v5930_v58  ;;  %v5848_v23 = vmul.f32 %v7122_v35, %v11226_v4  ;;  %v5792_v53 = vpop.f32.mrb[149].mxu0 }
 0x9f7   :  { %v5978_v55 = vadd.f32 %v10720_v50, %v5922_v42  ;;  %v5928_v6 = vrot.slane %v5927_v45, 1  ;;  %v5938_v1 = vrot.slane %v5937_v21, 4  ;;  %v5847_v59 = vmul.f32 %v5792_v53, %v11227_v43 }
 0x9f8   :  { %v5933_v33 = vrot.slane %v5932_v12, 2 }
 0x9f9   :  { %v6015_v52 = vrot.slane %v5978_v55, 7  ;;  %v5929_v44 = vadd.f32 %v5928_v6, %v5927_v45  ;;  %v5939_v31 = vadd.f32 %v5938_v1, %v5937_v21  ;;  %v5944_v19 = vadd.f32 %v5848_v23, %v5847_v59  ;;  %v7125_v10 = vpop.f32.mrb[150].mxu0 }
 0x9fa   :  { %v5934_v11 = vadd.f32 %v5933_v33, %v5932_v12  ;;  %v5850_v29 = vmul.f32 %v7125_v10, %v11226_v4  ;;  %v5802_v48 = vpop.f32.mrb[151].mxu0 }
 0x9fb   :  { %v6016_v34 = vsel %vm2799_vm1, %v6015_v52, %v5977_v17  ;;  %v5979_v5 = vadd.f32 %v10720_v50, %v5929_v44  ;;  %v5940_v47 = vrot.slane %v5939_v31, 2  ;;  %v5945_v36 = vrot.slane %v5944_v19, 4 }
 0x9fc   :  { %v5935_v41 = vrot.slane %v5934_v11, 1  ;;  %v5849_v61 = vmul.f32 %v5802_v48, %v11227_v43 }
 0x9fd   :  { %v6017_v8 = vrot.slane %v5979_v5, 6  ;;  %v5941_v37 = vadd.f32 %v5940_v47, %v5939_v31  ;;  %v5946_v60 = vadd.f32 %v5945_v36, %v5944_v19  ;;  %v7128_v49 = vpop.f32.mrb[152].mxu0 }
 0x9fe   :  { %v5936_v40 = vadd.f32 %v5935_v41, %v5934_v11  ;;  %v5951_v3 = vadd.f32 %v5850_v29, %v5849_v61  ;;  %v5852_v13 = vmul.f32 %v7128_v49, %v11226_v4  ;;  %v5812_v63 = vpop.f32.mrb[153].mxu0 }
 0x9ff   :  { %v6018_v46 = vsel %vm2802_vm2, %v6017_v8, %v6016_v34  ;;  %v5942_v28 = vrot.slane %v5941_v37, 1  ;;  %v5947_v38 = vrot.slane %v5946_v60, 2  ;;  %v5851_v7 = vmul.f32 %v5812_v63, %v11227_v43 }
 0xa00   :  { %v5980_v30 = vadd.f32 %v10720_v50, %v5936_v40  ;;  %v5952_v14 = vrot.slane %v5951_v3, 4 }
 0xa01   :  { %v5943_v54 = vadd.f32 %v5942_v28, %v5941_v37  ;;  %v5948_v24 = vadd.f32 %v5947_v38, %v5946_v60  ;;  %v5958_v51 = vadd.f32 %v5852_v13, %v5851_v7 }
 0xa02   :  { %v6019_v15 = vrot.slane %v5980_v30, 5  ;;  %v5953_v20 = vadd.f32 %v5952_v14, %v5951_v3 }
 0xa03   :  { %v5981_v56 = vadd.f32 %v10720_v50, %v5943_v54  ;;  %v5949_v57 = vrot.slane %v5948_v24, 1  ;;  %v5959_v9 = vrot.slane %v5958_v51, 4 }
 0xa04   :  { %v6020_v4 = vsel %vm2805_vm3, %v6019_v15, %v6018_v46  ;;  %v5954_v32 = vrot.slane %v5953_v20, 2 }
 0xa05   :  { %v6021_v22 = vrot.slane %v5981_v56, 4  ;;  %v5950_v27 = vadd.f32 %v5949_v57, %v5948_v24  ;;  %v5960_v58 = vadd.f32 %v5959_v9, %v5958_v51 }
 0xa06   :  { %v5955_v25 = vadd.f32 %v5954_v32, %v5953_v20 }
 0xa07   :  { %v5982_v43 = vadd.f32 %v10720_v50, %v5950_v27  ;;  %v5961_v0 = vrot.slane %v5960_v58, 2  ;;  %v6022_v16 = vsel %vm2808_vm4, %v6021_v22, %v6020_v4 }
 0xa08   :  { %v5956_v39 = vrot.slane %v5955_v25, 1 }
 0xa09   :  { %v6023_v2 = vrot.slane %v5982_v43, 3  ;;  %v5962_v26 = vadd.f32 %v5961_v0, %v5960_v58 }
 0xa0a   :  { %v5957_v18 = vadd.f32 %v5956_v39, %v5955_v25 }
 0xa0b   :  { %v5963_v62 = vrot.slane %v5962_v26, 1  ;;  %v6024_v42 = vsel %vm2811_vm5, %v6023_v2, %v6022_v16 }
 0xa0c   :  { %v5983_v45 = vadd.f32 %v10720_v50, %v5957_v18 }
 0xa0d   :  { %v5964_v21 = vadd.f32 %v5963_v62, %v5962_v26 }
 0xa0e   :  { %v6025_v35 = vrot.slane %v5983_v45, 2 }
 0xa0f   :  { %v5984_v12 = vadd.f32 %v10720_v50, %v5964_v21 }
 0xa10   :  { %v6026_v23 = vsel %vm2814_vm6, %v6025_v35, %v6024_v42 }
 0xa11   :  { %v6027_v53 = vrot.slane %v5984_v12, 1 }
 0xa13   :  { %v6028_v55 = vsel %vm2817_vm7, %v6027_v53, %v6026_v23 }
 0xa14   :  { %6032 = vst [vmem:[#allocation3 + $0x8] sm:$0xff] %v6028_v55 }
 0xa15   :  { %7726 = shalt.err (!%p7723_p4)
}
 0xa16   :  { %s7727_s11 = scalar_lea.hbm %s10791_s5, 256 }
 0xa17   :  { %p7728_p5 = scmp.ne.s32.totalorder %s10791_s5, %s7727_s11  ;;  %p7731_p6 = scmp.lt.u32.totalorder %s7727_s11, %s10791_s5 }
 0xa19   :  { %p7733_p7 = pnand %p7731_p6, %p7728_p5 }
 0xa1b   :  { %7736 = shalt.err (!%p7733_p7)
}
 0xa1c   :  { %s7743_s2 = smov 128   ;;  %s7744_s16 = smov 8  }
 0xa1d   :  { %6044 = dma.vmem_to_hbm [thread:$0]  %s6039_s7, 256, %s10791_s5, [#allocation4], %s7743_s2, %s7743_s2, %s7744_s16  }
 0xa1e   :  { %7737 = dma.done.wait [#allocation4], 256  }
 0xa1f   :  { %7738 = vsyncadd [#allocation4], 4294967040 }
 0xa20   :  { %6048 = vsyncpa [#allocation4], 1 }

</bundles_post_ra>
